<compile_context>
chip_gen: v7x
topology: tpu7x:2x2x1
jax: 0.10.0
libtpu: 0.0.40
codegen_flags: <defaults>
</compile_context>

<pallas_src>
import jax
import jax.numpy as jnp
from jax.experimental import pallas as pl
from jax.experimental.pallas import tpu as pltpu


# ---------------------------------------------------------------------------
# Fused kernel: composed 5x5/s2 conv -> fc1 (bf16 weights) -> ReLU -> fc2
# ---------------------------------------------------------------------------

def _cnn_fused_kernel(v_ref, w_ref, b_ref, w1_ref, b1_ref, w2_ref, b2_ref,
                      o_ref):
    # v_ref:  (25, B, 900) f32 VMEM   -- im2col of the composed conv,
    #                                    tap t = u*5 + v, 900 = 30*30 on lanes
    # w_ref:  (8, 25) f32 SMEM        -- composed 5x5 weights per out-channel
    # b_ref:  (8,)    f32 SMEM        -- composed conv bias
    # w1_ref: (8, 900, 128) bf16 VMEM -- fc1 weight, channel-major flatten order
    # b1_ref: (1, 128) f32 | w2_ref: (128, 7) f32 | b2_ref: (1, 7) f32
    # o_ref:  (B, 7) f32
    n_c, n_tap = w_ref.shape
    nb = v_ref.shape[1]
    nh = w1_ref.shape[2]

    h = jnp.zeros((nb, nh), jnp.float32)
    for c in range(n_c):
        # Conv channel c on the VPU: 25 lane-dense (B, 900) multiply-adds,
        # window tile loaded just-in-time (small live set, no spills).
        acc = v_ref[0] * w_ref[c, 0]
        for t in range(1, n_tap):
            acc = acc + v_ref[t] * w_ref[c, t]
        acc = acc + b_ref[c]                       # scalar bias, no broadcast op
        # fc1 partial for channel c on the MXU (bf16 weights, f32 accumulate);
        # overlaps with the next channel's VPU taps.
        h = h + jnp.dot(acc.astype(jnp.bfloat16), w1_ref[c],
                        preferred_element_type=jnp.float32)
    h = jnp.maximum(h + b1_ref[...], 0.0)
    o_ref[...] = (jnp.dot(h, w2_ref[...], preferred_element_type=jnp.float32)
                  + b2_ref[...])


def cnn_fused(v, w_eff, b_eff, w1r, b1_row, w2t, b2_row):
    """v: (25, B, 900) f32 -> logits (B, 7) f32, one pallas_call, no grid."""
    B = v.shape[1]
    O = w2t.shape[1]
    # NOTE: at B beyond a few dozen, switch to a batch-blocked grid over B
    # (marked "parallel"); at B=2 a single un-gridded call minimizes the fixed
    # launch / pipeline costs that dominate here.
    return pl.pallas_call(
        _cnn_fused_kernel,
        out_shape=jax.ShapeDtypeStruct((B, O), jnp.float32),
        in_specs=[
            pl.BlockSpec(memory_space=pltpu.MemorySpace.VMEM),   # windows
            pl.BlockSpec(memory_space=pltpu.MemorySpace.SMEM),   # conv weights
            pl.BlockSpec(memory_space=pltpu.MemorySpace.SMEM),   # conv bias
            pl.BlockSpec(memory_space=pltpu.MemorySpace.VMEM),   # fc1 weight
            pl.BlockSpec(memory_space=pltpu.MemorySpace.VMEM),   # fc1 bias
            pl.BlockSpec(memory_space=pltpu.MemorySpace.VMEM),   # fc2 weight
            pl.BlockSpec(memory_space=pltpu.MemorySpace.VMEM),   # fc2 bias
        ],
        out_specs=pl.BlockSpec(memory_space=pltpu.MemorySpace.VMEM),
        compiler_params=pltpu.CompilerParams(
            # Real footprint ~3 MB (padded windows ~0.8 MB + 1.9 MB bf16 fc1
            # weight + small tensors); 16 MiB leaves relayout headroom and is
            # safe on every generation (v7x: 64 MiB physical).
            vmem_limit_bytes=16 * 1024 * 1024,
        ),
    )(v, w_eff, b_eff, w1r, b1_row, w2t, b2_row)


# ---------------------------------------------------------------------------
# One-time weight packing (inference-time "module init")
# ---------------------------------------------------------------------------

def prepare_params(params):
    w1, b1, w2, b2, fw1, fb1, fw2, fb2 = params
    # conv2 ∘ conv1 (no activation between) == one 5x5, stride-2, 1->8 conv.
    # W_eff[o,u,v] = sum_{c, ei+di=u, ej+dj=v} w2[o,c,ei,ej] * w1[c,0,di,dj]
    w_eff = jnp.zeros((8, 5, 5), jnp.float32)
    for di in range(3):
        for dj in range(3):
            w_eff = w_eff.at[:, di:di + 3, dj:dj + 3].add(
                jnp.einsum('ocij,c->oij', w2, w1[:, 0, di, dj]))
    b_eff = b2 + jnp.einsum('ocij,c->o', w2, b1)
    # fc1 weight: (128, 7200) -> (8, 900, 128), matching the channel-major
    # PyTorch flatten of (B, 8, 30, 30); bf16 halves the dominant HBM load.
    w1r = fw1.reshape(128, 8, 900).transpose(1, 2, 0).astype(jnp.bfloat16)
    return (w_eff.reshape(8, 25), b_eff, w1r,
            fb1.reshape(1, 128), fw2.T, fb2.reshape(1, 7))


@jax.jit
def cnn_forward(x, prep):
    w_eff, b_eff, w1r, b1_row, w2t, b2_row = prep
    B = x.shape[0]
    xs = x[:, 0]                                  # (B, 64, 64), Cin == 1
    # im2col of the composed 5x5 stride-2 conv: one small fused XLA gather
    # (25 * B * 900 f32 ≈ 180 KB at B=2).  Row-major (i, j) flatten puts the
    # 900 output positions on the lane dim for the kernel.
    wins = [xs[:, u:u + 60:2, v:v + 60:2].reshape(B, 900)
            for u in range(5) for v in range(5)]
    v = jnp.stack(wins, axis=0)                   # (25, B, 900), tap = u*5 + v
    return cnn_fused(v, w_eff, b_eff, w1r, b1_row, w2t, b2_row)   # (B, 7)


# ---------------------------------------------------------------------------
# Pure-JAX reference (literal conv1 -> conv2 -> flatten -> fc1 -> relu -> fc2)
# ---------------------------------------------------------------------------

def reference_forward(x, params):
    w1, b1, w2, b2, fw1, fb1, fw2, fb2 = params
    dn = ('NCHW', 'OIHW', 'NCHW')
    y1 = jax.lax.conv_general_dilated(x, w1, (1, 1), 'VALID',
                                      dimension_numbers=dn) + b1[None, :, None, None]
    y2 = jax.lax.conv_general_dilated(y1, w2, (2, 2), 'VALID',
                                      dimension_numbers=dn) + b2[None, :, None, None]
    flat = y2.reshape(x.shape[0], -1)
    h = jnp.maximum(flat @ fw1.T + fb1, 0.0)
    return h @ fw2.T + fb2


if __name__ == "__main__":
    key = jax.random.PRNGKey(0)
    ks = jax.random.split(key, 9)

    # Deterministic synthetic parameters (shapes from CNN.__init__).
    w1 = 0.2 * jax.random.normal(ks[0], (4, 1, 3, 3), jnp.float32)
    b1 = 0.1 * jax.random.normal(ks[1], (4,), jnp.float32)
    w2 = 0.1 * jax.random.normal(ks[2], (8, 4, 3, 3), jnp.float32)
    b2 = 0.1 * jax.random.normal(ks[3], (8,), jnp.float32)
    fw1 = 0.02 * jax.random.normal(ks[4], (128, 7200), jnp.float32)
    fb1 = 0.1 * jax.random.normal(ks[5], (128,), jnp.float32)
    fw2 = 0.1 * jax.random.normal(ks[6], (7, 128), jnp.float32)
    fb2 = 0.1 * jax.random.normal(ks[7], (7,), jnp.float32)
    params = (w1, b1, w2, b2, fw1, fb1, fw2, fb2)

    # fc1 expects 7200 = 8*30*30 features => 64x64 single-channel input.
    x = jax.random.normal(ks[8], (2, 1, 64, 64), jnp.float32)

    prep = prepare_params(params)                 # one-time weight packing
    out = jax.block_until_ready(cnn_forward(x, prep))
    ref = jax.block_until_ready(reference_forward(x, params))
    assert out.shape == (2, 7), out.shape
    if not jnp.allclose(out, ref, atol=2e-2, rtol=2e-2):
        raise AssertionError("Pallas CNN output mismatch vs JAX reference")
    print("KERNEL_OK")
</pallas_src>

<mosaic_0001>
module attributes {stable_mosaic.version = 11 : i64} {
  func.func @_cnn_fused_kernel(%arg0: memref<25x2x900xf32, #tpu.memory_space<vmem>>, %arg1: memref<8x25xf32, #tpu.memory_space<smem>>, %arg2: memref<8xf32, #tpu.memory_space<smem>>, %arg3: memref<8x900x128xbf16, #tpu.memory_space<vmem>>, %arg4: memref<1x128xf32, #tpu.memory_space<vmem>>, %arg5: memref<128x7xf32, #tpu.memory_space<vmem>>, %arg6: memref<1x7xf32, #tpu.memory_space<vmem>>, %arg7: memref<2x7xf32, #tpu.memory_space<vmem>>) attributes {dimension_semantics = [], scalar_prefetch = 0 : i64, scratch_operands = 0 : i64, tpu.core_type = #tpu.core_type<tc>} {
    %cst = arith.constant 0.000000e+00 : f32
    %0 = vector.broadcast %cst : f32 to vector<2x128xf32>
    %c0 = arith.constant 0 : index
    %c0_0 = arith.constant 0 : index
    %c0_1 = arith.constant 0 : index
    %1 = vector.load %arg0[%c0, %c0_0, %c0_1] : memref<25x2x900xf32, #tpu.memory_space<vmem>>, vector<1x2x900xf32>
    %2 = vector.shape_cast %1 : vector<1x2x900xf32> to vector<2x900xf32>
    %c0_2 = arith.constant 0 : index
    %c0_3 = arith.constant 0 : index
    %3 = memref.load %arg1[%c0_2, %c0_3] : memref<8x25xf32, #tpu.memory_space<smem>>
    %4 = vector.broadcast %3 : f32 to vector<2x900xf32>
    %5 = arith.mulf %2, %4 : vector<2x900xf32>
    %c1 = arith.constant 1 : index
    %c0_4 = arith.constant 0 : index
    %c0_5 = arith.constant 0 : index
    %6 = vector.load %arg0[%c1, %c0_4, %c0_5] : memref<25x2x900xf32, #tpu.memory_space<vmem>>, vector<1x2x900xf32>
    %7 = vector.shape_cast %6 : vector<1x2x900xf32> to vector<2x900xf32>
    %c0_6 = arith.constant 0 : index
    %c1_7 = arith.constant 1 : index
    %8 = memref.load %arg1[%c0_6, %c1_7] : memref<8x25xf32, #tpu.memory_space<smem>>
    %9 = vector.broadcast %8 : f32 to vector<2x900xf32>
    %10 = arith.mulf %7, %9 : vector<2x900xf32>
    %11 = arith.addf %5, %10 : vector<2x900xf32>
    %c2 = arith.constant 2 : index
    %c0_8 = arith.constant 0 : index
    %c0_9 = arith.constant 0 : index
    %12 = vector.load %arg0[%c2, %c0_8, %c0_9] : memref<25x2x900xf32, #tpu.memory_space<vmem>>, vector<1x2x900xf32>
    %13 = vector.shape_cast %12 : vector<1x2x900xf32> to vector<2x900xf32>
    %c0_10 = arith.constant 0 : index
    %c2_11 = arith.constant 2 : index
    %14 = memref.load %arg1[%c0_10, %c2_11] : memref<8x25xf32, #tpu.memory_space<smem>>
    %15 = vector.broadcast %14 : f32 to vector<2x900xf32>
    %16 = arith.mulf %13, %15 : vector<2x900xf32>
    %17 = arith.addf %11, %16 : vector<2x900xf32>
    %c3 = arith.constant 3 : index
    %c0_12 = arith.constant 0 : index
    %c0_13 = arith.constant 0 : index
    %18 = vector.load %arg0[%c3, %c0_12, %c0_13] : memref<25x2x900xf32, #tpu.memory_space<vmem>>, vector<1x2x900xf32>
    %19 = vector.shape_cast %18 : vector<1x2x900xf32> to vector<2x900xf32>
    %c0_14 = arith.constant 0 : index
    %c3_15 = arith.constant 3 : index
    %20 = memref.load %arg1[%c0_14, %c3_15] : memref<8x25xf32, #tpu.memory_space<smem>>
    %21 = vector.broadcast %20 : f32 to vector<2x900xf32>
    %22 = arith.mulf %19, %21 : vector<2x900xf32>
    %23 = arith.addf %17, %22 : vector<2x900xf32>
    %c4 = arith.constant 4 : index
    %c0_16 = arith.constant 0 : index
    %c0_17 = arith.constant 0 : index
    %24 = vector.load %arg0[%c4, %c0_16, %c0_17] : memref<25x2x900xf32, #tpu.memory_space<vmem>>, vector<1x2x900xf32>
    %25 = vector.shape_cast %24 : vector<1x2x900xf32> to vector<2x900xf32>
    %c0_18 = arith.constant 0 : index
    %c4_19 = arith.constant 4 : index
    %26 = memref.load %arg1[%c0_18, %c4_19] : memref<8x25xf32, #tpu.memory_space<smem>>
    %27 = vector.broadcast %26 : f32 to vector<2x900xf32>
    %28 = arith.mulf %25, %27 : vector<2x900xf32>
    %29 = arith.addf %23, %28 : vector<2x900xf32>
    %c5 = arith.constant 5 : index
    %c0_20 = arith.constant 0 : index
    %c0_21 = arith.constant 0 : index
    %30 = vector.load %arg0[%c5, %c0_20, %c0_21] : memref<25x2x900xf32, #tpu.memory_space<vmem>>, vector<1x2x900xf32>
    %31 = vector.shape_cast %30 : vector<1x2x900xf32> to vector<2x900xf32>
    %c0_22 = arith.constant 0 : index
    %c5_23 = arith.constant 5 : index
    %32 = memref.load %arg1[%c0_22, %c5_23] : memref<8x25xf32, #tpu.memory_space<smem>>
    %33 = vector.broadcast %32 : f32 to vector<2x900xf32>
    %34 = arith.mulf %31, %33 : vector<2x900xf32>
    %35 = arith.addf %29, %34 : vector<2x900xf32>
    %c6 = arith.constant 6 : index
    %c0_24 = arith.constant 0 : index
    %c0_25 = arith.constant 0 : index
    %36 = vector.load %arg0[%c6, %c0_24, %c0_25] : memref<25x2x900xf32, #tpu.memory_space<vmem>>, vector<1x2x900xf32>
    %37 = vector.shape_cast %36 : vector<1x2x900xf32> to vector<2x900xf32>
    %c0_26 = arith.constant 0 : index
    %c6_27 = arith.constant 6 : index
    %38 = memref.load %arg1[%c0_26, %c6_27] : memref<8x25xf32, #tpu.memory_space<smem>>
    %39 = vector.broadcast %38 : f32 to vector<2x900xf32>
    %40 = arith.mulf %37, %39 : vector<2x900xf32>
    %41 = arith.addf %35, %40 : vector<2x900xf32>
    %c7 = arith.constant 7 : index
    %c0_28 = arith.constant 0 : index
    %c0_29 = arith.constant 0 : index
    %42 = vector.load %arg0[%c7, %c0_28, %c0_29] : memref<25x2x900xf32, #tpu.memory_space<vmem>>, vector<1x2x900xf32>
    %43 = vector.shape_cast %42 : vector<1x2x900xf32> to vector<2x900xf32>
    %c0_30 = arith.constant 0 : index
    %c7_31 = arith.constant 7 : index
    %44 = memref.load %arg1[%c0_30, %c7_31] : memref<8x25xf32, #tpu.memory_space<smem>>
    %45 = vector.broadcast %44 : f32 to vector<2x900xf32>
    %46 = arith.mulf %43, %45 : vector<2x900xf32>
    %47 = arith.addf %41, %46 : vector<2x900xf32>
    %c8 = arith.constant 8 : index
    %c0_32 = arith.constant 0 : index
    %c0_33 = arith.constant 0 : index
    %48 = vector.load %arg0[%c8, %c0_32, %c0_33] : memref<25x2x900xf32, #tpu.memory_space<vmem>>, vector<1x2x900xf32>
    %49 = vector.shape_cast %48 : vector<1x2x900xf32> to vector<2x900xf32>
    %c0_34 = arith.constant 0 : index
    %c8_35 = arith.constant 8 : index
    %50 = memref.load %arg1[%c0_34, %c8_35] : memref<8x25xf32, #tpu.memory_space<smem>>
    %51 = vector.broadcast %50 : f32 to vector<2x900xf32>
    %52 = arith.mulf %49, %51 : vector<2x900xf32>
    %53 = arith.addf %47, %52 : vector<2x900xf32>
    %c9 = arith.constant 9 : index
    %c0_36 = arith.constant 0 : index
    %c0_37 = arith.constant 0 : index
    %54 = vector.load %arg0[%c9, %c0_36, %c0_37] : memref<25x2x900xf32, #tpu.memory_space<vmem>>, vector<1x2x900xf32>
    %55 = vector.shape_cast %54 : vector<1x2x900xf32> to vector<2x900xf32>
    %c0_38 = arith.constant 0 : index
    %c9_39 = arith.constant 9 : index
    %56 = memref.load %arg1[%c0_38, %c9_39] : memref<8x25xf32, #tpu.memory_space<smem>>
    %57 = vector.broadcast %56 : f32 to vector<2x900xf32>
    %58 = arith.mulf %55, %57 : vector<2x900xf32>
    %59 = arith.addf %53, %58 : vector<2x900xf32>
    %c10 = arith.constant 10 : index
    %c0_40 = arith.constant 0 : index
    %c0_41 = arith.constant 0 : index
    %60 = vector.load %arg0[%c10, %c0_40, %c0_41] : memref<25x2x900xf32, #tpu.memory_space<vmem>>, vector<1x2x900xf32>
    %61 = vector.shape_cast %60 : vector<1x2x900xf32> to vector<2x900xf32>
    %c0_42 = arith.constant 0 : index
    %c10_43 = arith.constant 10 : index
    %62 = memref.load %arg1[%c0_42, %c10_43] : memref<8x25xf32, #tpu.memory_space<smem>>
    %63 = vector.broadcast %62 : f32 to vector<2x900xf32>
    %64 = arith.mulf %61, %63 : vector<2x900xf32>
    %65 = arith.addf %59, %64 : vector<2x900xf32>
    %c11 = arith.constant 11 : index
    %c0_44 = arith.constant 0 : index
    %c0_45 = arith.constant 0 : index
    %66 = vector.load %arg0[%c11, %c0_44, %c0_45] : memref<25x2x900xf32, #tpu.memory_space<vmem>>, vector<1x2x900xf32>
    %67 = vector.shape_cast %66 : vector<1x2x900xf32> to vector<2x900xf32>
    %c0_46 = arith.constant 0 : index
    %c11_47 = arith.constant 11 : index
    %68 = memref.load %arg1[%c0_46, %c11_47] : memref<8x25xf32, #tpu.memory_space<smem>>
    %69 = vector.broadcast %68 : f32 to vector<2x900xf32>
    %70 = arith.mulf %67, %69 : vector<2x900xf32>
    %71 = arith.addf %65, %70 : vector<2x900xf32>
    %c12 = arith.constant 12 : index
    %c0_48 = arith.constant 0 : index
    %c0_49 = arith.constant 0 : index
    %72 = vector.load %arg0[%c12, %c0_48, %c0_49] : memref<25x2x900xf32, #tpu.memory_space<vmem>>, vector<1x2x900xf32>
    %73 = vector.shape_cast %72 : vector<1x2x900xf32> to vector<2x900xf32>
    %c0_50 = arith.constant 0 : index
    %c12_51 = arith.constant 12 : index
    %74 = memref.load %arg1[%c0_50, %c12_51] : memref<8x25xf32, #tpu.memory_space<smem>>
    %75 = vector.broadcast %74 : f32 to vector<2x900xf32>
    %76 = arith.mulf %73, %75 : vector<2x900xf32>
    %77 = arith.addf %71, %76 : vector<2x900xf32>
    %c13 = arith.constant 13 : index
    %c0_52 = arith.constant 0 : index
    %c0_53 = arith.constant 0 : index
    %78 = vector.load %arg0[%c13, %c0_52, %c0_53] : memref<25x2x900xf32, #tpu.memory_space<vmem>>, vector<1x2x900xf32>
    %79 = vector.shape_cast %78 : vector<1x2x900xf32> to vector<2x900xf32>
    %c0_54 = arith.constant 0 : index
    %c13_55 = arith.constant 13 : index
    %80 = memref.load %arg1[%c0_54, %c13_55] : memref<8x25xf32, #tpu.memory_space<smem>>
    %81 = vector.broadcast %80 : f32 to vector<2x900xf32>
    %82 = arith.mulf %79, %81 : vector<2x900xf32>
    %83 = arith.addf %77, %82 : vector<2x900xf32>
    %c14 = arith.constant 14 : index
    %c0_56 = arith.constant 0 : index
    %c0_57 = arith.constant 0 : index
    %84 = vector.load %arg0[%c14, %c0_56, %c0_57] : memref<25x2x900xf32, #tpu.memory_space<vmem>>, vector<1x2x900xf32>
    %85 = vector.shape_cast %84 : vector<1x2x900xf32> to vector<2x900xf32>
    %c0_58 = arith.constant 0 : index
    %c14_59 = arith.constant 14 : index
    %86 = memref.load %arg1[%c0_58, %c14_59] : memref<8x25xf32, #tpu.memory_space<smem>>
    %87 = vector.broadcast %86 : f32 to vector<2x900xf32>
    %88 = arith.mulf %85, %87 : vector<2x900xf32>
    %89 = arith.addf %83, %88 : vector<2x900xf32>
    %c15 = arith.constant 15 : index
    %c0_60 = arith.constant 0 : index
    %c0_61 = arith.constant 0 : index
    %90 = vector.load %arg0[%c15, %c0_60, %c0_61] : memref<25x2x900xf32, #tpu.memory_space<vmem>>, vector<1x2x900xf32>
    %91 = vector.shape_cast %90 : vector<1x2x900xf32> to vector<2x900xf32>
    %c0_62 = arith.constant 0 : index
    %c15_63 = arith.constant 15 : index
    %92 = memref.load %arg1[%c0_62, %c15_63] : memref<8x25xf32, #tpu.memory_space<smem>>
    %93 = vector.broadcast %92 : f32 to vector<2x900xf32>
    %94 = arith.mulf %91, %93 : vector<2x900xf32>
    %95 = arith.addf %89, %94 : vector<2x900xf32>
    %c16 = arith.constant 16 : index
    %c0_64 = arith.constant 0 : index
    %c0_65 = arith.constant 0 : index
    %96 = vector.load %arg0[%c16, %c0_64, %c0_65] : memref<25x2x900xf32, #tpu.memory_space<vmem>>, vector<1x2x900xf32>
    %97 = vector.shape_cast %96 : vector<1x2x900xf32> to vector<2x900xf32>
    %c0_66 = arith.constant 0 : index
    %c16_67 = arith.constant 16 : index
    %98 = memref.load %arg1[%c0_66, %c16_67] : memref<8x25xf32, #tpu.memory_space<smem>>
    %99 = vector.broadcast %98 : f32 to vector<2x900xf32>
    %100 = arith.mulf %97, %99 : vector<2x900xf32>
    %101 = arith.addf %95, %100 : vector<2x900xf32>
    %c17 = arith.constant 17 : index
    %c0_68 = arith.constant 0 : index
    %c0_69 = arith.constant 0 : index
    %102 = vector.load %arg0[%c17, %c0_68, %c0_69] : memref<25x2x900xf32, #tpu.memory_space<vmem>>, vector<1x2x900xf32>
    %103 = vector.shape_cast %102 : vector<1x2x900xf32> to vector<2x900xf32>
    %c0_70 = arith.constant 0 : index
    %c17_71 = arith.constant 17 : index
    %104 = memref.load %arg1[%c0_70, %c17_71] : memref<8x25xf32, #tpu.memory_space<smem>>
    %105 = vector.broadcast %104 : f32 to vector<2x900xf32>
    %106 = arith.mulf %103, %105 : vector<2x900xf32>
    %107 = arith.addf %101, %106 : vector<2x900xf32>
    %c18 = arith.constant 18 : index
    %c0_72 = arith.constant 0 : index
    %c0_73 = arith.constant 0 : index
    %108 = vector.load %arg0[%c18, %c0_72, %c0_73] : memref<25x2x900xf32, #tpu.memory_space<vmem>>, vector<1x2x900xf32>
    %109 = vector.shape_cast %108 : vector<1x2x900xf32> to vector<2x900xf32>
    %c0_74 = arith.constant 0 : index
    %c18_75 = arith.constant 18 : index
    %110 = memref.load %arg1[%c0_74, %c18_75] : memref<8x25xf32, #tpu.memory_space<smem>>
    %111 = vector.broadcast %110 : f32 to vector<2x900xf32>
    %112 = arith.mulf %109, %111 : vector<2x900xf32>
    %113 = arith.addf %107, %112 : vector<2x900xf32>
    %c19 = arith.constant 19 : index
    %c0_76 = arith.constant 0 : index
    %c0_77 = arith.constant 0 : index
    %114 = vector.load %arg0[%c19, %c0_76, %c0_77] : memref<25x2x900xf32, #tpu.memory_space<vmem>>, vector<1x2x900xf32>
    %115 = vector.shape_cast %114 : vector<1x2x900xf32> to vector<2x900xf32>
    %c0_78 = arith.constant 0 : index
    %c19_79 = arith.constant 19 : index
    %116 = memref.load %arg1[%c0_78, %c19_79] : memref<8x25xf32, #tpu.memory_space<smem>>
    %117 = vector.broadcast %116 : f32 to vector<2x900xf32>
    %118 = arith.mulf %115, %117 : vector<2x900xf32>
    %119 = arith.addf %113, %118 : vector<2x900xf32>
    %c20 = arith.constant 20 : index
    %c0_80 = arith.constant 0 : index
    %c0_81 = arith.constant 0 : index
    %120 = vector.load %arg0[%c20, %c0_80, %c0_81] : memref<25x2x900xf32, #tpu.memory_space<vmem>>, vector<1x2x900xf32>
    %121 = vector.shape_cast %120 : vector<1x2x900xf32> to vector<2x900xf32>
    %c0_82 = arith.constant 0 : index
    %c20_83 = arith.constant 20 : index
    %122 = memref.load %arg1[%c0_82, %c20_83] : memref<8x25xf32, #tpu.memory_space<smem>>
    %123 = vector.broadcast %122 : f32 to vector<2x900xf32>
    %124 = arith.mulf %121, %123 : vector<2x900xf32>
    %125 = arith.addf %119, %124 : vector<2x900xf32>
    %c21 = arith.constant 21 : index
    %c0_84 = arith.constant 0 : index
    %c0_85 = arith.constant 0 : index
    %126 = vector.load %arg0[%c21, %c0_84, %c0_85] : memref<25x2x900xf32, #tpu.memory_space<vmem>>, vector<1x2x900xf32>
    %127 = vector.shape_cast %126 : vector<1x2x900xf32> to vector<2x900xf32>
    %c0_86 = arith.constant 0 : index
    %c21_87 = arith.constant 21 : index
    %128 = memref.load %arg1[%c0_86, %c21_87] : memref<8x25xf32, #tpu.memory_space<smem>>
    %129 = vector.broadcast %128 : f32 to vector<2x900xf32>
    %130 = arith.mulf %127, %129 : vector<2x900xf32>
    %131 = arith.addf %125, %130 : vector<2x900xf32>
    %c22 = arith.constant 22 : index
    %c0_88 = arith.constant 0 : index
    %c0_89 = arith.constant 0 : index
    %132 = vector.load %arg0[%c22, %c0_88, %c0_89] : memref<25x2x900xf32, #tpu.memory_space<vmem>>, vector<1x2x900xf32>
    %133 = vector.shape_cast %132 : vector<1x2x900xf32> to vector<2x900xf32>
    %c0_90 = arith.constant 0 : index
    %c22_91 = arith.constant 22 : index
    %134 = memref.load %arg1[%c0_90, %c22_91] : memref<8x25xf32, #tpu.memory_space<smem>>
    %135 = vector.broadcast %134 : f32 to vector<2x900xf32>
    %136 = arith.mulf %133, %135 : vector<2x900xf32>
    %137 = arith.addf %131, %136 : vector<2x900xf32>
    %c23 = arith.constant 23 : index
    %c0_92 = arith.constant 0 : index
    %c0_93 = arith.constant 0 : index
    %138 = vector.load %arg0[%c23, %c0_92, %c0_93] : memref<25x2x900xf32, #tpu.memory_space<vmem>>, vector<1x2x900xf32>
    %139 = vector.shape_cast %138 : vector<1x2x900xf32> to vector<2x900xf32>
    %c0_94 = arith.constant 0 : index
    %c23_95 = arith.constant 23 : index
    %140 = memref.load %arg1[%c0_94, %c23_95] : memref<8x25xf32, #tpu.memory_space<smem>>
    %141 = vector.broadcast %140 : f32 to vector<2x900xf32>
    %142 = arith.mulf %139, %141 : vector<2x900xf32>
    %143 = arith.addf %137, %142 : vector<2x900xf32>
    %c24 = arith.constant 24 : index
    %c0_96 = arith.constant 0 : index
    %c0_97 = arith.constant 0 : index
    %144 = vector.load %arg0[%c24, %c0_96, %c0_97] : memref<25x2x900xf32, #tpu.memory_space<vmem>>, vector<1x2x900xf32>
    %145 = vector.shape_cast %144 : vector<1x2x900xf32> to vector<2x900xf32>
    %c0_98 = arith.constant 0 : index
    %c24_99 = arith.constant 24 : index
    %146 = memref.load %arg1[%c0_98, %c24_99] : memref<8x25xf32, #tpu.memory_space<smem>>
    %147 = vector.broadcast %146 : f32 to vector<2x900xf32>
    %148 = arith.mulf %145, %147 : vector<2x900xf32>
    %149 = arith.addf %143, %148 : vector<2x900xf32>
    %c0_100 = arith.constant 0 : index
    %150 = memref.load %arg2[%c0_100] : memref<8xf32, #tpu.memory_space<smem>>
    %151 = vector.broadcast %150 : f32 to vector<2x900xf32>
    %152 = arith.addf %149, %151 : vector<2x900xf32>
    %153 = arith.truncf %152 : vector<2x900xf32> to vector<2x900xbf16>
    %c0_101 = arith.constant 0 : index
    %c0_102 = arith.constant 0 : index
    %c0_103 = arith.constant 0 : index
    %154 = vector.load %arg3[%c0_101, %c0_102, %c0_103] : memref<8x900x128xbf16, #tpu.memory_space<vmem>>, vector<1x900x128xbf16>
    %155 = vector.shape_cast %154 : vector<1x900x128xbf16> to vector<900x128xbf16>
    %cst_104 = arith.constant dense<0.000000e+00> : vector<2x128xf32>
    %156 = tpu.matmul %153, %155, %cst_104 {dimension_numbers = #tpu.dot_dimension_numbers<[1], [0], [0], [1], [0, 0, 1, 1], [], []>} : vector<2x900xbf16>, vector<900x128xbf16>, vector<2x128xf32> -> vector<2x128xf32>
    %157 = arith.addf %0, %156 : vector<2x128xf32>
    %c0_105 = arith.constant 0 : index
    %c0_106 = arith.constant 0 : index
    %c0_107 = arith.constant 0 : index
    %158 = vector.load %arg0[%c0_105, %c0_106, %c0_107] : memref<25x2x900xf32, #tpu.memory_space<vmem>>, vector<1x2x900xf32>
    %159 = vector.shape_cast %158 : vector<1x2x900xf32> to vector<2x900xf32>
    %c1_108 = arith.constant 1 : index
    %c0_109 = arith.constant 0 : index
    %160 = memref.load %arg1[%c1_108, %c0_109] : memref<8x25xf32, #tpu.memory_space<smem>>
    %161 = vector.broadcast %160 : f32 to vector<2x900xf32>
    %162 = arith.mulf %159, %161 : vector<2x900xf32>
    %c1_110 = arith.constant 1 : index
    %c0_111 = arith.constant 0 : index
    %c0_112 = arith.constant 0 : index
    %163 = vector.load %arg0[%c1_110, %c0_111, %c0_112] : memref<25x2x900xf32, #tpu.memory_space<vmem>>, vector<1x2x900xf32>
    %164 = vector.shape_cast %163 : vector<1x2x900xf32> to vector<2x900xf32>
    %c1_113 = arith.constant 1 : index
    %c1_114 = arith.constant 1 : index
    %165 = memref.load %arg1[%c1_113, %c1_114] : memref<8x25xf32, #tpu.memory_space<smem>>
    %166 = vector.broadcast %165 : f32 to vector<2x900xf32>
    %167 = arith.mulf %164, %166 : vector<2x900xf32>
    %168 = arith.addf %162, %167 : vector<2x900xf32>
    %c2_115 = arith.constant 2 : index
    %c0_116 = arith.constant 0 : index
    %c0_117 = arith.constant 0 : index
    %169 = vector.load %arg0[%c2_115, %c0_116, %c0_117] : memref<25x2x900xf32, #tpu.memory_space<vmem>>, vector<1x2x900xf32>
    %170 = vector.shape_cast %169 : vector<1x2x900xf32> to vector<2x900xf32>
    %c1_118 = arith.constant 1 : index
    %c2_119 = arith.constant 2 : index
    %171 = memref.load %arg1[%c1_118, %c2_119] : memref<8x25xf32, #tpu.memory_space<smem>>
    %172 = vector.broadcast %171 : f32 to vector<2x900xf32>
    %173 = arith.mulf %170, %172 : vector<2x900xf32>
    %174 = arith.addf %168, %173 : vector<2x900xf32>
    %c3_120 = arith.constant 3 : index
    %c0_121 = arith.constant 0 : index
    %c0_122 = arith.constant 0 : index
    %175 = vector.load %arg0[%c3_120, %c0_121, %c0_122] : memref<25x2x900xf32, #tpu.memory_space<vmem>>, vector<1x2x900xf32>
    %176 = vector.shape_cast %175 : vector<1x2x900xf32> to vector<2x900xf32>
    %c1_123 = arith.constant 1 : index
    %c3_124 = arith.constant 3 : index
    %177 = memref.load %arg1[%c1_123, %c3_124] : memref<8x25xf32, #tpu.memory_space<smem>>
    %178 = vector.broadcast %177 : f32 to vector<2x900xf32>
    %179 = arith.mulf %176, %178 : vector<2x900xf32>
    %180 = arith.addf %174, %179 : vector<2x900xf32>
    %c4_125 = arith.constant 4 : index
    %c0_126 = arith.constant 0 : index
    %c0_127 = arith.constant 0 : index
    %181 = vector.load %arg0[%c4_125, %c0_126, %c0_127] : memref<25x2x900xf32, #tpu.memory_space<vmem>>, vector<1x2x900xf32>
    %182 = vector.shape_cast %181 : vector<1x2x900xf32> to vector<2x900xf32>
    %c1_128 = arith.constant 1 : index
    %c4_129 = arith.constant 4 : index
    %183 = memref.load %arg1[%c1_128, %c4_129] : memref<8x25xf32, #tpu.memory_space<smem>>
    %184 = vector.broadcast %183 : f32 to vector<2x900xf32>
    %185 = arith.mulf %182, %184 : vector<2x900xf32>
    %186 = arith.addf %180, %185 : vector<2x900xf32>
    %c5_130 = arith.constant 5 : index
    %c0_131 = arith.constant 0 : index
    %c0_132 = arith.constant 0 : index
    %187 = vector.load %arg0[%c5_130, %c0_131, %c0_132] : memref<25x2x900xf32, #tpu.memory_space<vmem>>, vector<1x2x900xf32>
    %188 = vector.shape_cast %187 : vector<1x2x900xf32> to vector<2x900xf32>
    %c1_133 = arith.constant 1 : index
    %c5_134 = arith.constant 5 : index
    %189 = memref.load %arg1[%c1_133, %c5_134] : memref<8x25xf32, #tpu.memory_space<smem>>
    %190 = vector.broadcast %189 : f32 to vector<2x900xf32>
    %191 = arith.mulf %188, %190 : vector<2x900xf32>
    %192 = arith.addf %186, %191 : vector<2x900xf32>
    %c6_135 = arith.constant 6 : index
    %c0_136 = arith.constant 0 : index
    %c0_137 = arith.constant 0 : index
    %193 = vector.load %arg0[%c6_135, %c0_136, %c0_137] : memref<25x2x900xf32, #tpu.memory_space<vmem>>, vector<1x2x900xf32>
    %194 = vector.shape_cast %193 : vector<1x2x900xf32> to vector<2x900xf32>
    %c1_138 = arith.constant 1 : index
    %c6_139 = arith.constant 6 : index
    %195 = memref.load %arg1[%c1_138, %c6_139] : memref<8x25xf32, #tpu.memory_space<smem>>
    %196 = vector.broadcast %195 : f32 to vector<2x900xf32>
    %197 = arith.mulf %194, %196 : vector<2x900xf32>
    %198 = arith.addf %192, %197 : vector<2x900xf32>
    %c7_140 = arith.constant 7 : index
    %c0_141 = arith.constant 0 : index
    %c0_142 = arith.constant 0 : index
    %199 = vector.load %arg0[%c7_140, %c0_141, %c0_142] : memref<25x2x900xf32, #tpu.memory_space<vmem>>, vector<1x2x900xf32>
    %200 = vector.shape_cast %199 : vector<1x2x900xf32> to vector<2x900xf32>
    %c1_143 = arith.constant 1 : index
    %c7_144 = arith.constant 7 : index
    %201 = memref.load %arg1[%c1_143, %c7_144] : memref<8x25xf32, #tpu.memory_space<smem>>
    %202 = vector.broadcast %201 : f32 to vector<2x900xf32>
    %203 = arith.mulf %200, %202 : vector<2x900xf32>
    %204 = arith.addf %198, %203 : vector<2x900xf32>
    %c8_145 = arith.constant 8 : index
    %c0_146 = arith.constant 0 : index
    %c0_147 = arith.constant 0 : index
    %205 = vector.load %arg0[%c8_145, %c0_146, %c0_147] : memref<25x2x900xf32, #tpu.memory_space<vmem>>, vector<1x2x900xf32>
    %206 = vector.shape_cast %205 : vector<1x2x900xf32> to vector<2x900xf32>
    %c1_148 = arith.constant 1 : index
    %c8_149 = arith.constant 8 : index
    %207 = memref.load %arg1[%c1_148, %c8_149] : memref<8x25xf32, #tpu.memory_space<smem>>
    %208 = vector.broadcast %207 : f32 to vector<2x900xf32>
    %209 = arith.mulf %206, %208 : vector<2x900xf32>
    %210 = arith.addf %204, %209 : vector<2x900xf32>
    %c9_150 = arith.constant 9 : index
    %c0_151 = arith.constant 0 : index
    %c0_152 = arith.constant 0 : index
    %211 = vector.load %arg0[%c9_150, %c0_151, %c0_152] : memref<25x2x900xf32, #tpu.memory_space<vmem>>, vector<1x2x900xf32>
    %212 = vector.shape_cast %211 : vector<1x2x900xf32> to vector<2x900xf32>
    %c1_153 = arith.constant 1 : index
    %c9_154 = arith.constant 9 : index
    %213 = memref.load %arg1[%c1_153, %c9_154] : memref<8x25xf32, #tpu.memory_space<smem>>
    %214 = vector.broadcast %213 : f32 to vector<2x900xf32>
    %215 = arith.mulf %212, %214 : vector<2x900xf32>
    %216 = arith.addf %210, %215 : vector<2x900xf32>
    %c10_155 = arith.constant 10 : index
    %c0_156 = arith.constant 0 : index
    %c0_157 = arith.constant 0 : index
    %217 = vector.load %arg0[%c10_155, %c0_156, %c0_157] : memref<25x2x900xf32, #tpu.memory_space<vmem>>, vector<1x2x900xf32>
    %218 = vector.shape_cast %217 : vector<1x2x900xf32> to vector<2x900xf32>
    %c1_158 = arith.constant 1 : index
    %c10_159 = arith.constant 10 : index
    %219 = memref.load %arg1[%c1_158, %c10_159] : memref<8x25xf32, #tpu.memory_space<smem>>
    %220 = vector.broadcast %219 : f32 to vector<2x900xf32>
    %221 = arith.mulf %218, %220 : vector<2x900xf32>
    %222 = arith.addf %216, %221 : vector<2x900xf32>
    %c11_160 = arith.constant 11 : index
    %c0_161 = arith.constant 0 : index
    %c0_162 = arith.constant 0 : index
    %223 = vector.load %arg0[%c11_160, %c0_161, %c0_162] : memref<25x2x900xf32, #tpu.memory_space<vmem>>, vector<1x2x900xf32>
    %224 = vector.shape_cast %223 : vector<1x2x900xf32> to vector<2x900xf32>
    %c1_163 = arith.constant 1 : index
    %c11_164 = arith.constant 11 : index
    %225 = memref.load %arg1[%c1_163, %c11_164] : memref<8x25xf32, #tpu.memory_space<smem>>
    %226 = vector.broadcast %225 : f32 to vector<2x900xf32>
    %227 = arith.mulf %224, %226 : vector<2x900xf32>
    %228 = arith.addf %222, %227 : vector<2x900xf32>
    %c12_165 = arith.constant 12 : index
    %c0_166 = arith.constant 0 : index
    %c0_167 = arith.constant 0 : index
    %229 = vector.load %arg0[%c12_165, %c0_166, %c0_167] : memref<25x2x900xf32, #tpu.memory_space<vmem>>, vector<1x2x900xf32>
    %230 = vector.shape_cast %229 : vector<1x2x900xf32> to vector<2x900xf32>
    %c1_168 = arith.constant 1 : index
    %c12_169 = arith.constant 12 : index
    %231 = memref.load %arg1[%c1_168, %c12_169] : memref<8x25xf32, #tpu.memory_space<smem>>
    %232 = vector.broadcast %231 : f32 to vector<2x900xf32>
    %233 = arith.mulf %230, %232 : vector<2x900xf32>
    %234 = arith.addf %228, %233 : vector<2x900xf32>
    %c13_170 = arith.constant 13 : index
    %c0_171 = arith.constant 0 : index
    %c0_172 = arith.constant 0 : index
    %235 = vector.load %arg0[%c13_170, %c0_171, %c0_172] : memref<25x2x900xf32, #tpu.memory_space<vmem>>, vector<1x2x900xf32>
    %236 = vector.shape_cast %235 : vector<1x2x900xf32> to vector<2x900xf32>
    %c1_173 = arith.constant 1 : index
    %c13_174 = arith.constant 13 : index
    %237 = memref.load %arg1[%c1_173, %c13_174] : memref<8x25xf32, #tpu.memory_space<smem>>
    %238 = vector.broadcast %237 : f32 to vector<2x900xf32>
    %239 = arith.mulf %236, %238 : vector<2x900xf32>
    %240 = arith.addf %234, %239 : vector<2x900xf32>
    %c14_175 = arith.constant 14 : index
    %c0_176 = arith.constant 0 : index
    %c0_177 = arith.constant 0 : index
    %241 = vector.load %arg0[%c14_175, %c0_176, %c0_177] : memref<25x2x900xf32, #tpu.memory_space<vmem>>, vector<1x2x900xf32>
    %242 = vector.shape_cast %241 : vector<1x2x900xf32> to vector<2x900xf32>
    %c1_178 = arith.constant 1 : index
    %c14_179 = arith.constant 14 : index
    %243 = memref.load %arg1[%c1_178, %c14_179] : memref<8x25xf32, #tpu.memory_space<smem>>
    %244 = vector.broadcast %243 : f32 to vector<2x900xf32>
    %245 = arith.mulf %242, %244 : vector<2x900xf32>
    %246 = arith.addf %240, %245 : vector<2x900xf32>
    %c15_180 = arith.constant 15 : index
    %c0_181 = arith.constant 0 : index
    %c0_182 = arith.constant 0 : index
    %247 = vector.load %arg0[%c15_180, %c0_181, %c0_182] : memref<25x2x900xf32, #tpu.memory_space<vmem>>, vector<1x2x900xf32>
    %248 = vector.shape_cast %247 : vector<1x2x900xf32> to vector<2x900xf32>
    %c1_183 = arith.constant 1 : index
    %c15_184 = arith.constant 15 : index
    %249 = memref.load %arg1[%c1_183, %c15_184] : memref<8x25xf32, #tpu.memory_space<smem>>
    %250 = vector.broadcast %249 : f32 to vector<2x900xf32>
    %251 = arith.mulf %248, %250 : vector<2x900xf32>
    %252 = arith.addf %246, %251 : vector<2x900xf32>
    %c16_185 = arith.constant 16 : index
    %c0_186 = arith.constant 0 : index
    %c0_187 = arith.constant 0 : index
    %253 = vector.load %arg0[%c16_185, %c0_186, %c0_187] : memref<25x2x900xf32, #tpu.memory_space<vmem>>, vector<1x2x900xf32>
    %254 = vector.shape_cast %253 : vector<1x2x900xf32> to vector<2x900xf32>
    %c1_188 = arith.constant 1 : index
    %c16_189 = arith.constant 16 : index
    %255 = memref.load %arg1[%c1_188, %c16_189] : memref<8x25xf32, #tpu.memory_space<smem>>
    %256 = vector.broadcast %255 : f32 to vector<2x900xf32>
    %257 = arith.mulf %254, %256 : vector<2x900xf32>
    %258 = arith.addf %252, %257 : vector<2x900xf32>
    %c17_190 = arith.constant 17 : index
    %c0_191 = arith.constant 0 : index
    %c0_192 = arith.constant 0 : index
    %259 = vector.load %arg0[%c17_190, %c0_191, %c0_192] : memref<25x2x900xf32, #tpu.memory_space<vmem>>, vector<1x2x900xf32>
    %260 = vector.shape_cast %259 : vector<1x2x900xf32> to vector<2x900xf32>
    %c1_193 = arith.constant 1 : index
    %c17_194 = arith.constant 17 : index
    %261 = memref.load %arg1[%c1_193, %c17_194] : memref<8x25xf32, #tpu.memory_space<smem>>
    %262 = vector.broadcast %261 : f32 to vector<2x900xf32>
    %263 = arith.mulf %260, %262 : vector<2x900xf32>
    %264 = arith.addf %258, %263 : vector<2x900xf32>
    %c18_195 = arith.constant 18 : index
    %c0_196 = arith.constant 0 : index
    %c0_197 = arith.constant 0 : index
    %265 = vector.load %arg0[%c18_195, %c0_196, %c0_197] : memref<25x2x900xf32, #tpu.memory_space<vmem>>, vector<1x2x900xf32>
    %266 = vector.shape_cast %265 : vector<1x2x900xf32> to vector<2x900xf32>
    %c1_198 = arith.constant 1 : index
    %c18_199 = arith.constant 18 : index
    %267 = memref.load %arg1[%c1_198, %c18_199] : memref<8x25xf32, #tpu.memory_space<smem>>
    %268 = vector.broadcast %267 : f32 to vector<2x900xf32>
    %269 = arith.mulf %266, %268 : vector<2x900xf32>
    %270 = arith.addf %264, %269 : vector<2x900xf32>
    %c19_200 = arith.constant 19 : index
    %c0_201 = arith.constant 0 : index
    %c0_202 = arith.constant 0 : index
    %271 = vector.load %arg0[%c19_200, %c0_201, %c0_202] : memref<25x2x900xf32, #tpu.memory_space<vmem>>, vector<1x2x900xf32>
    %272 = vector.shape_cast %271 : vector<1x2x900xf32> to vector<2x900xf32>
    %c1_203 = arith.constant 1 : index
    %c19_204 = arith.constant 19 : index
    %273 = memref.load %arg1[%c1_203, %c19_204] : memref<8x25xf32, #tpu.memory_space<smem>>
    %274 = vector.broadcast %273 : f32 to vector<2x900xf32>
    %275 = arith.mulf %272, %274 : vector<2x900xf32>
    %276 = arith.addf %270, %275 : vector<2x900xf32>
    %c20_205 = arith.constant 20 : index
    %c0_206 = arith.constant 0 : index
    %c0_207 = arith.constant 0 : index
    %277 = vector.load %arg0[%c20_205, %c0_206, %c0_207] : memref<25x2x900xf32, #tpu.memory_space<vmem>>, vector<1x2x900xf32>
    %278 = vector.shape_cast %277 : vector<1x2x900xf32> to vector<2x900xf32>
    %c1_208 = arith.constant 1 : index
    %c20_209 = arith.constant 20 : index
    %279 = memref.load %arg1[%c1_208, %c20_209] : memref<8x25xf32, #tpu.memory_space<smem>>
    %280 = vector.broadcast %279 : f32 to vector<2x900xf32>
    %281 = arith.mulf %278, %280 : vector<2x900xf32>
    %282 = arith.addf %276, %281 : vector<2x900xf32>
    %c21_210 = arith.constant 21 : index
    %c0_211 = arith.constant 0 : index
    %c0_212 = arith.constant 0 : index
    %283 = vector.load %arg0[%c21_210, %c0_211, %c0_212] : memref<25x2x900xf32, #tpu.memory_space<vmem>>, vector<1x2x900xf32>
    %284 = vector.shape_cast %283 : vector<1x2x900xf32> to vector<2x900xf32>
    %c1_213 = arith.constant 1 : index
    %c21_214 = arith.constant 21 : index
    %285 = memref.load %arg1[%c1_213, %c21_214] : memref<8x25xf32, #tpu.memory_space<smem>>
    %286 = vector.broadcast %285 : f32 to vector<2x900xf32>
    %287 = arith.mulf %284, %286 : vector<2x900xf32>
    %288 = arith.addf %282, %287 : vector<2x900xf32>
    %c22_215 = arith.constant 22 : index
    %c0_216 = arith.constant 0 : index
    %c0_217 = arith.constant 0 : index
    %289 = vector.load %arg0[%c22_215, %c0_216, %c0_217] : memref<25x2x900xf32, #tpu.memory_space<vmem>>, vector<1x2x900xf32>
    %290 = vector.shape_cast %289 : vector<1x2x900xf32> to vector<2x900xf32>
    %c1_218 = arith.constant 1 : index
    %c22_219 = arith.constant 22 : index
    %291 = memref.load %arg1[%c1_218, %c22_219] : memref<8x25xf32, #tpu.memory_space<smem>>
    %292 = vector.broadcast %291 : f32 to vector<2x900xf32>
    %293 = arith.mulf %290, %292 : vector<2x900xf32>
    %294 = arith.addf %288, %293 : vector<2x900xf32>
    %c23_220 = arith.constant 23 : index
    %c0_221 = arith.constant 0 : index
    %c0_222 = arith.constant 0 : index
    %295 = vector.load %arg0[%c23_220, %c0_221, %c0_222] : memref<25x2x900xf32, #tpu.memory_space<vmem>>, vector<1x2x900xf32>
    %296 = vector.shape_cast %295 : vector<1x2x900xf32> to vector<2x900xf32>
    %c1_223 = arith.constant 1 : index
    %c23_224 = arith.constant 23 : index
    %297 = memref.load %arg1[%c1_223, %c23_224] : memref<8x25xf32, #tpu.memory_space<smem>>
    %298 = vector.broadcast %297 : f32 to vector<2x900xf32>
    %299 = arith.mulf %296, %298 : vector<2x900xf32>
    %300 = arith.addf %294, %299 : vector<2x900xf32>
    %c24_225 = arith.constant 24 : index
    %c0_226 = arith.constant 0 : index
    %c0_227 = arith.constant 0 : index
    %301 = vector.load %arg0[%c24_225, %c0_226, %c0_227] : memref<25x2x900xf32, #tpu.memory_space<vmem>>, vector<1x2x900xf32>
    %302 = vector.shape_cast %301 : vector<1x2x900xf32> to vector<2x900xf32>
    %c1_228 = arith.constant 1 : index
    %c24_229 = arith.constant 24 : index
    %303 = memref.load %arg1[%c1_228, %c24_229] : memref<8x25xf32, #tpu.memory_space<smem>>
    %304 = vector.broadcast %303 : f32 to vector<2x900xf32>
    %305 = arith.mulf %302, %304 : vector<2x900xf32>
    %306 = arith.addf %300, %305 : vector<2x900xf32>
    %c1_230 = arith.constant 1 : index
    %307 = memref.load %arg2[%c1_230] : memref<8xf32, #tpu.memory_space<smem>>
    %308 = vector.broadcast %307 : f32 to vector<2x900xf32>
    %309 = arith.addf %306, %308 : vector<2x900xf32>
    %310 = arith.truncf %309 : vector<2x900xf32> to vector<2x900xbf16>
    %c1_231 = arith.constant 1 : index
    %c0_232 = arith.constant 0 : index
    %c0_233 = arith.constant 0 : index
    %311 = vector.load %arg3[%c1_231, %c0_232, %c0_233] : memref<8x900x128xbf16, #tpu.memory_space<vmem>>, vector<1x900x128xbf16>
    %312 = vector.shape_cast %311 : vector<1x900x128xbf16> to vector<900x128xbf16>
    %cst_234 = arith.constant dense<0.000000e+00> : vector<2x128xf32>
    %313 = tpu.matmul %310, %312, %cst_234 {dimension_numbers = #tpu.dot_dimension_numbers<[1], [0], [0], [1], [0, 0, 1, 1], [], []>} : vector<2x900xbf16>, vector<900x128xbf16>, vector<2x128xf32> -> vector<2x128xf32>
    %314 = arith.addf %157, %313 : vector<2x128xf32>
    %c0_235 = arith.constant 0 : index
    %c0_236 = arith.constant 0 : index
    %c0_237 = arith.constant 0 : index
    %315 = vector.load %arg0[%c0_235, %c0_236, %c0_237] : memref<25x2x900xf32, #tpu.memory_space<vmem>>, vector<1x2x900xf32>
    %316 = vector.shape_cast %315 : vector<1x2x900xf32> to vector<2x900xf32>
    %c2_238 = arith.constant 2 : index
    %c0_239 = arith.constant 0 : index
    %317 = memref.load %arg1[%c2_238, %c0_239] : memref<8x25xf32, #tpu.memory_space<smem>>
    %318 = vector.broadcast %317 : f32 to vector<2x900xf32>
    %319 = arith.mulf %316, %318 : vector<2x900xf32>
    %c1_240 = arith.constant 1 : index
    %c0_241 = arith.constant 0 : index
    %c0_242 = arith.constant 0 : index
    %320 = vector.load %arg0[%c1_240, %c0_241, %c0_242] : memref<25x2x900xf32, #tpu.memory_space<vmem>>, vector<1x2x900xf32>
    %321 = vector.shape_cast %320 : vector<1x2x900xf32> to vector<2x900xf32>
    %c2_243 = arith.constant 2 : index
    %c1_244 = arith.constant 1 : index
    %322 = memref.load %arg1[%c2_243, %c1_244] : memref<8x25xf32, #tpu.memory_space<smem>>
    %323 = vector.broadcast %322 : f32 to vector<2x900xf32>
    %324 = arith.mulf %321, %323 : vector<2x900xf32>
    %325 = arith.addf %319, %324 : vector<2x900xf32>
    %c2_245 = arith.constant 2 : index
    %c0_246 = arith.constant 0 : index
    %c0_247 = arith.constant 0 : index
    %326 = vector.load %arg0[%c2_245, %c0_246, %c0_247] : memref<25x2x900xf32, #tpu.memory_space<vmem>>, vector<1x2x900xf32>
    %327 = vector.shape_cast %326 : vector<1x2x900xf32> to vector<2x900xf32>
    %c2_248 = arith.constant 2 : index
    %c2_249 = arith.constant 2 : index
    %328 = memref.load %arg1[%c2_248, %c2_249] : memref<8x25xf32, #tpu.memory_space<smem>>
    %329 = vector.broadcast %328 : f32 to vector<2x900xf32>
    %330 = arith.mulf %327, %329 : vector<2x900xf32>
    %331 = arith.addf %325, %330 : vector<2x900xf32>
    %c3_250 = arith.constant 3 : index
    %c0_251 = arith.constant 0 : index
    %c0_252 = arith.constant 0 : index
    %332 = vector.load %arg0[%c3_250, %c0_251, %c0_252] : memref<25x2x900xf32, #tpu.memory_space<vmem>>, vector<1x2x900xf32>
    %333 = vector.shape_cast %332 : vector<1x2x900xf32> to vector<2x900xf32>
    %c2_253 = arith.constant 2 : index
    %c3_254 = arith.constant 3 : index
    %334 = memref.load %arg1[%c2_253, %c3_254] : memref<8x25xf32, #tpu.memory_space<smem>>
    %335 = vector.broadcast %334 : f32 to vector<2x900xf32>
    %336 = arith.mulf %333, %335 : vector<2x900xf32>
    %337 = arith.addf %331, %336 : vector<2x900xf32>
    %c4_255 = arith.constant 4 : index
    %c0_256 = arith.constant 0 : index
    %c0_257 = arith.constant 0 : index
    %338 = vector.load %arg0[%c4_255, %c0_256, %c0_257] : memref<25x2x900xf32, #tpu.memory_space<vmem>>, vector<1x2x900xf32>
    %339 = vector.shape_cast %338 : vector<1x2x900xf32> to vector<2x900xf32>
    %c2_258 = arith.constant 2 : index
    %c4_259 = arith.constant 4 : index
    %340 = memref.load %arg1[%c2_258, %c4_259] : memref<8x25xf32, #tpu.memory_space<smem>>
    %341 = vector.broadcast %340 : f32 to vector<2x900xf32>
    %342 = arith.mulf %339, %341 : vector<2x900xf32>
    %343 = arith.addf %337, %342 : vector<2x900xf32>
    %c5_260 = arith.constant 5 : index
    %c0_261 = arith.constant 0 : index
    %c0_262 = arith.constant 0 : index
    %344 = vector.load %arg0[%c5_260, %c0_261, %c0_262] : memref<25x2x900xf32, #tpu.memory_space<vmem>>, vector<1x2x900xf32>
    %345 = vector.shape_cast %344 : vector<1x2x900xf32> to vector<2x900xf32>
    %c2_263 = arith.constant 2 : index
    %c5_264 = arith.constant 5 : index
    %346 = memref.load %arg1[%c2_263, %c5_264] : memref<8x25xf32, #tpu.memory_space<smem>>
    %347 = vector.broadcast %346 : f32 to vector<2x900xf32>
    %348 = arith.mulf %345, %347 : vector<2x900xf32>
    %349 = arith.addf %343, %348 : vector<2x900xf32>
    %c6_265 = arith.constant 6 : index
    %c0_266 = arith.constant 0 : index
    %c0_267 = arith.constant 0 : index
    %350 = vector.load %arg0[%c6_265, %c0_266, %c0_267] : memref<25x2x900xf32, #tpu.memory_space<vmem>>, vector<1x2x900xf32>
    %351 = vector.shape_cast %350 : vector<1x2x900xf32> to vector<2x900xf32>
    %c2_268 = arith.constant 2 : index
    %c6_269 = arith.constant 6 : index
    %352 = memref.load %arg1[%c2_268, %c6_269] : memref<8x25xf32, #tpu.memory_space<smem>>
    %353 = vector.broadcast %352 : f32 to vector<2x900xf32>
    %354 = arith.mulf %351, %353 : vector<2x900xf32>
    %355 = arith.addf %349, %354 : vector<2x900xf32>
    %c7_270 = arith.constant 7 : index
    %c0_271 = arith.constant 0 : index
    %c0_272 = arith.constant 0 : index
    %356 = vector.load %arg0[%c7_270, %c0_271, %c0_272] : memref<25x2x900xf32, #tpu.memory_space<vmem>>, vector<1x2x900xf32>
    %357 = vector.shape_cast %356 : vector<1x2x900xf32> to vector<2x900xf32>
    %c2_273 = arith.constant 2 : index
    %c7_274 = arith.constant 7 : index
    %358 = memref.load %arg1[%c2_273, %c7_274] : memref<8x25xf32, #tpu.memory_space<smem>>
    %359 = vector.broadcast %358 : f32 to vector<2x900xf32>
    %360 = arith.mulf %357, %359 : vector<2x900xf32>
    %361 = arith.addf %355, %360 : vector<2x900xf32>
    %c8_275 = arith.constant 8 : index
    %c0_276 = arith.constant 0 : index
    %c0_277 = arith.constant 0 : index
    %362 = vector.load %arg0[%c8_275, %c0_276, %c0_277] : memref<25x2x900xf32, #tpu.memory_space<vmem>>, vector<1x2x900xf32>
    %363 = vector.shape_cast %362 : vector<1x2x900xf32> to vector<2x900xf32>
    %c2_278 = arith.constant 2 : index
    %c8_279 = arith.constant 8 : index
    %364 = memref.load %arg1[%c2_278, %c8_279] : memref<8x25xf32, #tpu.memory_space<smem>>
    %365 = vector.broadcast %364 : f32 to vector<2x900xf32>
    %366 = arith.mulf %363, %365 : vector<2x900xf32>
    %367 = arith.addf %361, %366 : vector<2x900xf32>
    %c9_280 = arith.constant 9 : index
    %c0_281 = arith.constant 0 : index
    %c0_282 = arith.constant 0 : index
    %368 = vector.load %arg0[%c9_280, %c0_281, %c0_282] : memref<25x2x900xf32, #tpu.memory_space<vmem>>, vector<1x2x900xf32>
    %369 = vector.shape_cast %368 : vector<1x2x900xf32> to vector<2x900xf32>
    %c2_283 = arith.constant 2 : index
    %c9_284 = arith.constant 9 : index
    %370 = memref.load %arg1[%c2_283, %c9_284] : memref<8x25xf32, #tpu.memory_space<smem>>
    %371 = vector.broadcast %370 : f32 to vector<2x900xf32>
    %372 = arith.mulf %369, %371 : vector<2x900xf32>
    %373 = arith.addf %367, %372 : vector<2x900xf32>
    %c10_285 = arith.constant 10 : index
    %c0_286 = arith.constant 0 : index
    %c0_287 = arith.constant 0 : index
    %374 = vector.load %arg0[%c10_285, %c0_286, %c0_287] : memref<25x2x900xf32, #tpu.memory_space<vmem>>, vector<1x2x900xf32>
    %375 = vector.shape_cast %374 : vector<1x2x900xf32> to vector<2x900xf32>
    %c2_288 = arith.constant 2 : index
    %c10_289 = arith.constant 10 : index
    %376 = memref.load %arg1[%c2_288, %c10_289] : memref<8x25xf32, #tpu.memory_space<smem>>
    %377 = vector.broadcast %376 : f32 to vector<2x900xf32>
    %378 = arith.mulf %375, %377 : vector<2x900xf32>
    %379 = arith.addf %373, %378 : vector<2x900xf32>
    %c11_290 = arith.constant 11 : index
    %c0_291 = arith.constant 0 : index
    %c0_292 = arith.constant 0 : index
    %380 = vector.load %arg0[%c11_290, %c0_291, %c0_292] : memref<25x2x900xf32, #tpu.memory_space<vmem>>, vector<1x2x900xf32>
    %381 = vector.shape_cast %380 : vector<1x2x900xf32> to vector<2x900xf32>
    %c2_293 = arith.constant 2 : index
    %c11_294 = arith.constant 11 : index
    %382 = memref.load %arg1[%c2_293, %c11_294] : memref<8x25xf32, #tpu.memory_space<smem>>
    %383 = vector.broadcast %382 : f32 to vector<2x900xf32>
    %384 = arith.mulf %381, %383 : vector<2x900xf32>
    %385 = arith.addf %379, %384 : vector<2x900xf32>
    %c12_295 = arith.constant 12 : index
    %c0_296 = arith.constant 0 : index
    %c0_297 = arith.constant 0 : index
    %386 = vector.load %arg0[%c12_295, %c0_296, %c0_297] : memref<25x2x900xf32, #tpu.memory_space<vmem>>, vector<1x2x900xf32>
    %387 = vector.shape_cast %386 : vector<1x2x900xf32> to vector<2x900xf32>
    %c2_298 = arith.constant 2 : index
    %c12_299 = arith.constant 12 : index
    %388 = memref.load %arg1[%c2_298, %c12_299] : memref<8x25xf32, #tpu.memory_space<smem>>
    %389 = vector.broadcast %388 : f32 to vector<2x900xf32>
    %390 = arith.mulf %387, %389 : vector<2x900xf32>
    %391 = arith.addf %385, %390 : vector<2x900xf32>
    %c13_300 = arith.constant 13 : index
    %c0_301 = arith.constant 0 : index
    %c0_302 = arith.constant 0 : index
    %392 = vector.load %arg0[%c13_300, %c0_301, %c0_302] : memref<25x2x900xf32, #tpu.memory_space<vmem>>, vector<1x2x900xf32>
    %393 = vector.shape_cast %392 : vector<1x2x900xf32> to vector<2x900xf32>
    %c2_303 = arith.constant 2 : index
    %c13_304 = arith.constant 13 : index
    %394 = memref.load %arg1[%c2_303, %c13_304] : memref<8x25xf32, #tpu.memory_space<smem>>
    %395 = vector.broadcast %394 : f32 to vector<2x900xf32>
    %396 = arith.mulf %393, %395 : vector<2x900xf32>
    %397 = arith.addf %391, %396 : vector<2x900xf32>
    %c14_305 = arith.constant 14 : index
    %c0_306 = arith.constant 0 : index
    %c0_307 = arith.constant 0 : index
    %398 = vector.load %arg0[%c14_305, %c0_306, %c0_307] : memref<25x2x900xf32, #tpu.memory_space<vmem>>, vector<1x2x900xf32>
    %399 = vector.shape_cast %398 : vector<1x2x900xf32> to vector<2x900xf32>
    %c2_308 = arith.constant 2 : index
    %c14_309 = arith.constant 14 : index
    %400 = memref.load %arg1[%c2_308, %c14_309] : memref<8x25xf32, #tpu.memory_space<smem>>
    %401 = vector.broadcast %400 : f32 to vector<2x900xf32>
    %402 = arith.mulf %399, %401 : vector<2x900xf32>
    %403 = arith.addf %397, %402 : vector<2x900xf32>
    %c15_310 = arith.constant 15 : index
    %c0_311 = arith.constant 0 : index
    %c0_312 = arith.constant 0 : index
    %404 = vector.load %arg0[%c15_310, %c0_311, %c0_312] : memref<25x2x900xf32, #tpu.memory_space<vmem>>, vector<1x2x900xf32>
    %405 = vector.shape_cast %404 : vector<1x2x900xf32> to vector<2x900xf32>
    %c2_313 = arith.constant 2 : index
    %c15_314 = arith.constant 15 : index
    %406 = memref.load %arg1[%c2_313, %c15_314] : memref<8x25xf32, #tpu.memory_space<smem>>
    %407 = vector.broadcast %406 : f32 to vector<2x900xf32>
    %408 = arith.mulf %405, %407 : vector<2x900xf32>
    %409 = arith.addf %403, %408 : vector<2x900xf32>
    %c16_315 = arith.constant 16 : index
    %c0_316 = arith.constant 0 : index
    %c0_317 = arith.constant 0 : index
    %410 = vector.load %arg0[%c16_315, %c0_316, %c0_317] : memref<25x2x900xf32, #tpu.memory_space<vmem>>, vector<1x2x900xf32>
    %411 = vector.shape_cast %410 : vector<1x2x900xf32> to vector<2x900xf32>
    %c2_318 = arith.constant 2 : index
    %c16_319 = arith.constant 16 : index
    %412 = memref.load %arg1[%c2_318, %c16_319] : memref<8x25xf32, #tpu.memory_space<smem>>
    %413 = vector.broadcast %412 : f32 to vector<2x900xf32>
    %414 = arith.mulf %411, %413 : vector<2x900xf32>
    %415 = arith.addf %409, %414 : vector<2x900xf32>
    %c17_320 = arith.constant 17 : index
    %c0_321 = arith.constant 0 : index
    %c0_322 = arith.constant 0 : index
    %416 = vector.load %arg0[%c17_320, %c0_321, %c0_322] : memref<25x2x900xf32, #tpu.memory_space<vmem>>, vector<1x2x900xf32>
    %417 = vector.shape_cast %416 : vector<1x2x900xf32> to vector<2x900xf32>
    %c2_323 = arith.constant 2 : index
    %c17_324 = arith.constant 17 : index
    %418 = memref.load %arg1[%c2_323, %c17_324] : memref<8x25xf32, #tpu.memory_space<smem>>
    %419 = vector.broadcast %418 : f32 to vector<2x900xf32>
    %420 = arith.mulf %417, %419 : vector<2x900xf32>
    %421 = arith.addf %415, %420 : vector<2x900xf32>
    %c18_325 = arith.constant 18 : index
    %c0_326 = arith.constant 0 : index
    %c0_327 = arith.constant 0 : index
    %422 = vector.load %arg0[%c18_325, %c0_326, %c0_327] : memref<25x2x900xf32, #tpu.memory_space<vmem>>, vector<1x2x900xf32>
    %423 = vector.shape_cast %422 : vector<1x2x900xf32> to vector<2x900xf32>
    %c2_328 = arith.constant 2 : index
    %c18_329 = arith.constant 18 : index
    %424 = memref.load %arg1[%c2_328, %c18_329] : memref<8x25xf32, #tpu.memory_space<smem>>
    %425 = vector.broadcast %424 : f32 to vector<2x900xf32>
    %426 = arith.mulf %423, %425 : vector<2x900xf32>
    %427 = arith.addf %421, %426 : vector<2x900xf32>
    %c19_330 = arith.constant 19 : index
    %c0_331 = arith.constant 0 : index
    %c0_332 = arith.constant 0 : index
    %428 = vector.load %arg0[%c19_330, %c0_331, %c0_332] : memref<25x2x900xf32, #tpu.memory_space<vmem>>, vector<1x2x900xf32>
    %429 = vector.shape_cast %428 : vector<1x2x900xf32> to vector<2x900xf32>
    %c2_333 = arith.constant 2 : index
    %c19_334 = arith.constant 19 : index
    %430 = memref.load %arg1[%c2_333, %c19_334] : memref<8x25xf32, #tpu.memory_space<smem>>
    %431 = vector.broadcast %430 : f32 to vector<2x900xf32>
    %432 = arith.mulf %429, %431 : vector<2x900xf32>
    %433 = arith.addf %427, %432 : vector<2x900xf32>
    %c20_335 = arith.constant 20 : index
    %c0_336 = arith.constant 0 : index
    %c0_337 = arith.constant 0 : index
    %434 = vector.load %arg0[%c20_335, %c0_336, %c0_337] : memref<25x2x900xf32, #tpu.memory_space<vmem>>, vector<1x2x900xf32>
    %435 = vector.shape_cast %434 : vector<1x2x900xf32> to vector<2x900xf32>
    %c2_338 = arith.constant 2 : index
    %c20_339 = arith.constant 20 : index
    %436 = memref.load %arg1[%c2_338, %c20_339] : memref<8x25xf32, #tpu.memory_space<smem>>
    %437 = vector.broadcast %436 : f32 to vector<2x900xf32>
    %438 = arith.mulf %435, %437 : vector<2x900xf32>
    %439 = arith.addf %433, %438 : vector<2x900xf32>
    %c21_340 = arith.constant 21 : index
    %c0_341 = arith.constant 0 : index
    %c0_342 = arith.constant 0 : index
    %440 = vector.load %arg0[%c21_340, %c0_341, %c0_342] : memref<25x2x900xf32, #tpu.memory_space<vmem>>, vector<1x2x900xf32>
    %441 = vector.shape_cast %440 : vector<1x2x900xf32> to vector<2x900xf32>
    %c2_343 = arith.constant 2 : index
    %c21_344 = arith.constant 21 : index
    %442 = memref.load %arg1[%c2_343, %c21_344] : memref<8x25xf32, #tpu.memory_space<smem>>
    %443 = vector.broadcast %442 : f32 to vector<2x900xf32>
    %444 = arith.mulf %441, %443 : vector<2x900xf32>
    %445 = arith.addf %439, %444 : vector<2x900xf32>
    %c22_345 = arith.constant 22 : index
    %c0_346 = arith.constant 0 : index
    %c0_347 = arith.constant 0 : index
    %446 = vector.load %arg0[%c22_345, %c0_346, %c0_347] : memref<25x2x900xf32, #tpu.memory_space<vmem>>, vector<1x2x900xf32>
    %447 = vector.shape_cast %446 : vector<1x2x900xf32> to vector<2x900xf32>
    %c2_348 = arith.constant 2 : index
    %c22_349 = arith.constant 22 : index
    %448 = memref.load %arg1[%c2_348, %c22_349] : memref<8x25xf32, #tpu.memory_space<smem>>
    %449 = vector.broadcast %448 : f32 to vector<2x900xf32>
    %450 = arith.mulf %447, %449 : vector<2x900xf32>
    %451 = arith.addf %445, %450 : vector<2x900xf32>
    %c23_350 = arith.constant 23 : index
    %c0_351 = arith.constant 0 : index
    %c0_352 = arith.constant 0 : index
    %452 = vector.load %arg0[%c23_350, %c0_351, %c0_352] : memref<25x2x900xf32, #tpu.memory_space<vmem>>, vector<1x2x900xf32>
    %453 = vector.shape_cast %452 : vector<1x2x900xf32> to vector<2x900xf32>
    %c2_353 = arith.constant 2 : index
    %c23_354 = arith.constant 23 : index
    %454 = memref.load %arg1[%c2_353, %c23_354] : memref<8x25xf32, #tpu.memory_space<smem>>
    %455 = vector.broadcast %454 : f32 to vector<2x900xf32>
    %456 = arith.mulf %453, %455 : vector<2x900xf32>
    %457 = arith.addf %451, %456 : vector<2x900xf32>
    %c24_355 = arith.constant 24 : index
    %c0_356 = arith.constant 0 : index
    %c0_357 = arith.constant 0 : index
    %458 = vector.load %arg0[%c24_355, %c0_356, %c0_357] : memref<25x2x900xf32, #tpu.memory_space<vmem>>, vector<1x2x900xf32>
    %459 = vector.shape_cast %458 : vector<1x2x900xf32> to vector<2x900xf32>
    %c2_358 = arith.constant 2 : index
    %c24_359 = arith.constant 24 : index
    %460 = memref.load %arg1[%c2_358, %c24_359] : memref<8x25xf32, #tpu.memory_space<smem>>
    %461 = vector.broadcast %460 : f32 to vector<2x900xf32>
    %462 = arith.mulf %459, %461 : vector<2x900xf32>
    %463 = arith.addf %457, %462 : vector<2x900xf32>
    %c2_360 = arith.constant 2 : index
    %464 = memref.load %arg2[%c2_360] : memref<8xf32, #tpu.memory_space<smem>>
    %465 = vector.broadcast %464 : f32 to vector<2x900xf32>
    %466 = arith.addf %463, %465 : vector<2x900xf32>
    %467 = arith.truncf %466 : vector<2x900xf32> to vector<2x900xbf16>
    %c2_361 = arith.constant 2 : index
    %c0_362 = arith.constant 0 : index
    %c0_363 = arith.constant 0 : index
    %468 = vector.load %arg3[%c2_361, %c0_362, %c0_363] : memref<8x900x128xbf16, #tpu.memory_space<vmem>>, vector<1x900x128xbf16>
    %469 = vector.shape_cast %468 : vector<1x900x128xbf16> to vector<900x128xbf16>
    %cst_364 = arith.constant dense<0.000000e+00> : vector<2x128xf32>
    %470 = tpu.matmul %467, %469, %cst_364 {dimension_numbers = #tpu.dot_dimension_numbers<[1], [0], [0], [1], [0, 0, 1, 1], [], []>} : vector<2x900xbf16>, vector<900x128xbf16>, vector<2x128xf32> -> vector<2x128xf32>
    %471 = arith.addf %314, %470 : vector<2x128xf32>
    %c0_365 = arith.constant 0 : index
    %c0_366 = arith.constant 0 : index
    %c0_367 = arith.constant 0 : index
    %472 = vector.load %arg0[%c0_365, %c0_366, %c0_367] : memref<25x2x900xf32, #tpu.memory_space<vmem>>, vector<1x2x900xf32>
    %473 = vector.shape_cast %472 : vector<1x2x900xf32> to vector<2x900xf32>
    %c3_368 = arith.constant 3 : index
    %c0_369 = arith.constant 0 : index
    %474 = memref.load %arg1[%c3_368, %c0_369] : memref<8x25xf32, #tpu.memory_space<smem>>
    %475 = vector.broadcast %474 : f32 to vector<2x900xf32>
    %476 = arith.mulf %473, %475 : vector<2x900xf32>
    %c1_370 = arith.constant 1 : index
    %c0_371 = arith.constant 0 : index
    %c0_372 = arith.constant 0 : index
    %477 = vector.load %arg0[%c1_370, %c0_371, %c0_372] : memref<25x2x900xf32, #tpu.memory_space<vmem>>, vector<1x2x900xf32>
    %478 = vector.shape_cast %477 : vector<1x2x900xf32> to vector<2x900xf32>
    %c3_373 = arith.constant 3 : index
    %c1_374 = arith.constant 1 : index
    %479 = memref.load %arg1[%c3_373, %c1_374] : memref<8x25xf32, #tpu.memory_space<smem>>
    %480 = vector.broadcast %479 : f32 to vector<2x900xf32>
    %481 = arith.mulf %478, %480 : vector<2x900xf32>
    %482 = arith.addf %476, %481 : vector<2x900xf32>
    %c2_375 = arith.constant 2 : index
    %c0_376 = arith.constant 0 : index
    %c0_377 = arith.constant 0 : index
    %483 = vector.load %arg0[%c2_375, %c0_376, %c0_377] : memref<25x2x900xf32, #tpu.memory_space<vmem>>, vector<1x2x900xf32>
    %484 = vector.shape_cast %483 : vector<1x2x900xf32> to vector<2x900xf32>
    %c3_378 = arith.constant 3 : index
    %c2_379 = arith.constant 2 : index
    %485 = memref.load %arg1[%c3_378, %c2_379] : memref<8x25xf32, #tpu.memory_space<smem>>
    %486 = vector.broadcast %485 : f32 to vector<2x900xf32>
    %487 = arith.mulf %484, %486 : vector<2x900xf32>
    %488 = arith.addf %482, %487 : vector<2x900xf32>
    %c3_380 = arith.constant 3 : index
    %c0_381 = arith.constant 0 : index
    %c0_382 = arith.constant 0 : index
    %489 = vector.load %arg0[%c3_380, %c0_381, %c0_382] : memref<25x2x900xf32, #tpu.memory_space<vmem>>, vector<1x2x900xf32>
    %490 = vector.shape_cast %489 : vector<1x2x900xf32> to vector<2x900xf32>
    %c3_383 = arith.constant 3 : index
    %c3_384 = arith.constant 3 : index
    %491 = memref.load %arg1[%c3_383, %c3_384] : memref<8x25xf32, #tpu.memory_space<smem>>
    %492 = vector.broadcast %491 : f32 to vector<2x900xf32>
    %493 = arith.mulf %490, %492 : vector<2x900xf32>
    %494 = arith.addf %488, %493 : vector<2x900xf32>
    %c4_385 = arith.constant 4 : index
    %c0_386 = arith.constant 0 : index
    %c0_387 = arith.constant 0 : index
    %495 = vector.load %arg0[%c4_385, %c0_386, %c0_387] : memref<25x2x900xf32, #tpu.memory_space<vmem>>, vector<1x2x900xf32>
    %496 = vector.shape_cast %495 : vector<1x2x900xf32> to vector<2x900xf32>
    %c3_388 = arith.constant 3 : index
    %c4_389 = arith.constant 4 : index
    %497 = memref.load %arg1[%c3_388, %c4_389] : memref<8x25xf32, #tpu.memory_space<smem>>
    %498 = vector.broadcast %497 : f32 to vector<2x900xf32>
    %499 = arith.mulf %496, %498 : vector<2x900xf32>
    %500 = arith.addf %494, %499 : vector<2x900xf32>
    %c5_390 = arith.constant 5 : index
    %c0_391 = arith.constant 0 : index
    %c0_392 = arith.constant 0 : index
    %501 = vector.load %arg0[%c5_390, %c0_391, %c0_392] : memref<25x2x900xf32, #tpu.memory_space<vmem>>, vector<1x2x900xf32>
    %502 = vector.shape_cast %501 : vector<1x2x900xf32> to vector<2x900xf32>
    %c3_393 = arith.constant 3 : index
    %c5_394 = arith.constant 5 : index
    %503 = memref.load %arg1[%c3_393, %c5_394] : memref<8x25xf32, #tpu.memory_space<smem>>
    %504 = vector.broadcast %503 : f32 to vector<2x900xf32>
    %505 = arith.mulf %502, %504 : vector<2x900xf32>
    %506 = arith.addf %500, %505 : vector<2x900xf32>
    %c6_395 = arith.constant 6 : index
    %c0_396 = arith.constant 0 : index
    %c0_397 = arith.constant 0 : index
    %507 = vector.load %arg0[%c6_395, %c0_396, %c0_397] : memref<25x2x900xf32, #tpu.memory_space<vmem>>, vector<1x2x900xf32>
    %508 = vector.shape_cast %507 : vector<1x2x900xf32> to vector<2x900xf32>
    %c3_398 = arith.constant 3 : index
    %c6_399 = arith.constant 6 : index
    %509 = memref.load %arg1[%c3_398, %c6_399] : memref<8x25xf32, #tpu.memory_space<smem>>
    %510 = vector.broadcast %509 : f32 to vector<2x900xf32>
    %511 = arith.mulf %508, %510 : vector<2x900xf32>
    %512 = arith.addf %506, %511 : vector<2x900xf32>
    %c7_400 = arith.constant 7 : index
    %c0_401 = arith.constant 0 : index
    %c0_402 = arith.constant 0 : index
    %513 = vector.load %arg0[%c7_400, %c0_401, %c0_402] : memref<25x2x900xf32, #tpu.memory_space<vmem>>, vector<1x2x900xf32>
    %514 = vector.shape_cast %513 : vector<1x2x900xf32> to vector<2x900xf32>
    %c3_403 = arith.constant 3 : index
    %c7_404 = arith.constant 7 : index
    %515 = memref.load %arg1[%c3_403, %c7_404] : memref<8x25xf32, #tpu.memory_space<smem>>
    %516 = vector.broadcast %515 : f32 to vector<2x900xf32>
    %517 = arith.mulf %514, %516 : vector<2x900xf32>
    %518 = arith.addf %512, %517 : vector<2x900xf32>
    %c8_405 = arith.constant 8 : index
    %c0_406 = arith.constant 0 : index
    %c0_407 = arith.constant 0 : index
    %519 = vector.load %arg0[%c8_405, %c0_406, %c0_407] : memref<25x2x900xf32, #tpu.memory_space<vmem>>, vector<1x2x900xf32>
    %520 = vector.shape_cast %519 : vector<1x2x900xf32> to vector<2x900xf32>
    %c3_408 = arith.constant 3 : index
    %c8_409 = arith.constant 8 : index
    %521 = memref.load %arg1[%c3_408, %c8_409] : memref<8x25xf32, #tpu.memory_space<smem>>
    %522 = vector.broadcast %521 : f32 to vector<2x900xf32>
    %523 = arith.mulf %520, %522 : vector<2x900xf32>
    %524 = arith.addf %518, %523 : vector<2x900xf32>
    %c9_410 = arith.constant 9 : index
    %c0_411 = arith.constant 0 : index
    %c0_412 = arith.constant 0 : index
    %525 = vector.load %arg0[%c9_410, %c0_411, %c0_412] : memref<25x2x900xf32, #tpu.memory_space<vmem>>, vector<1x2x900xf32>
    %526 = vector.shape_cast %525 : vector<1x2x900xf32> to vector<2x900xf32>
    %c3_413 = arith.constant 3 : index
    %c9_414 = arith.constant 9 : index
    %527 = memref.load %arg1[%c3_413, %c9_414] : memref<8x25xf32, #tpu.memory_space<smem>>
    %528 = vector.broadcast %527 : f32 to vector<2x900xf32>
    %529 = arith.mulf %526, %528 : vector<2x900xf32>
    %530 = arith.addf %524, %529 : vector<2x900xf32>
    %c10_415 = arith.constant 10 : index
    %c0_416 = arith.constant 0 : index
    %c0_417 = arith.constant 0 : index
    %531 = vector.load %arg0[%c10_415, %c0_416, %c0_417] : memref<25x2x900xf32, #tpu.memory_space<vmem>>, vector<1x2x900xf32>
    %532 = vector.shape_cast %531 : vector<1x2x900xf32> to vector<2x900xf32>
    %c3_418 = arith.constant 3 : index
    %c10_419 = arith.constant 10 : index
    %533 = memref.load %arg1[%c3_418, %c10_419] : memref<8x25xf32, #tpu.memory_space<smem>>
    %534 = vector.broadcast %533 : f32 to vector<2x900xf32>
    %535 = arith.mulf %532, %534 : vector<2x900xf32>
    %536 = arith.addf %530, %535 : vector<2x900xf32>
    %c11_420 = arith.constant 11 : index
    %c0_421 = arith.constant 0 : index
    %c0_422 = arith.constant 0 : index
    %537 = vector.load %arg0[%c11_420, %c0_421, %c0_422] : memref<25x2x900xf32, #tpu.memory_space<vmem>>, vector<1x2x900xf32>
    %538 = vector.shape_cast %537 : vector<1x2x900xf32> to vector<2x900xf32>
    %c3_423 = arith.constant 3 : index
    %c11_424 = arith.constant 11 : index
    %539 = memref.load %arg1[%c3_423, %c11_424] : memref<8x25xf32, #tpu.memory_space<smem>>
    %540 = vector.broadcast %539 : f32 to vector<2x900xf32>
    %541 = arith.mulf %538, %540 : vector<2x900xf32>
    %542 = arith.addf %536, %541 : vector<2x900xf32>
    %c12_425 = arith.constant 12 : index
    %c0_426 = arith.constant 0 : index
    %c0_427 = arith.constant 0 : index
    %543 = vector.load %arg0[%c12_425, %c0_426, %c0_427] : memref<25x2x900xf32, #tpu.memory_space<vmem>>, vector<1x2x900xf32>
    %544 = vector.shape_cast %543 : vector<1x2x900xf32> to vector<2x900xf32>
    %c3_428 = arith.constant 3 : index
    %c12_429 = arith.constant 12 : index
    %545 = memref.load %arg1[%c3_428, %c12_429] : memref<8x25xf32, #tpu.memory_space<smem>>
    %546 = vector.broadcast %545 : f32 to vector<2x900xf32>
    %547 = arith.mulf %544, %546 : vector<2x900xf32>
    %548 = arith.addf %542, %547 : vector<2x900xf32>
    %c13_430 = arith.constant 13 : index
    %c0_431 = arith.constant 0 : index
    %c0_432 = arith.constant 0 : index
    %549 = vector.load %arg0[%c13_430, %c0_431, %c0_432] : memref<25x2x900xf32, #tpu.memory_space<vmem>>, vector<1x2x900xf32>
    %550 = vector.shape_cast %549 : vector<1x2x900xf32> to vector<2x900xf32>
    %c3_433 = arith.constant 3 : index
    %c13_434 = arith.constant 13 : index
    %551 = memref.load %arg1[%c3_433, %c13_434] : memref<8x25xf32, #tpu.memory_space<smem>>
    %552 = vector.broadcast %551 : f32 to vector<2x900xf32>
    %553 = arith.mulf %550, %552 : vector<2x900xf32>
    %554 = arith.addf %548, %553 : vector<2x900xf32>
    %c14_435 = arith.constant 14 : index
    %c0_436 = arith.constant 0 : index
    %c0_437 = arith.constant 0 : index
    %555 = vector.load %arg0[%c14_435, %c0_436, %c0_437] : memref<25x2x900xf32, #tpu.memory_space<vmem>>, vector<1x2x900xf32>
    %556 = vector.shape_cast %555 : vector<1x2x900xf32> to vector<2x900xf32>
    %c3_438 = arith.constant 3 : index
    %c14_439 = arith.constant 14 : index
    %557 = memref.load %arg1[%c3_438, %c14_439] : memref<8x25xf32, #tpu.memory_space<smem>>
    %558 = vector.broadcast %557 : f32 to vector<2x900xf32>
    %559 = arith.mulf %556, %558 : vector<2x900xf32>
    %560 = arith.addf %554, %559 : vector<2x900xf32>
    %c15_440 = arith.constant 15 : index
    %c0_441 = arith.constant 0 : index
    %c0_442 = arith.constant 0 : index
    %561 = vector.load %arg0[%c15_440, %c0_441, %c0_442] : memref<25x2x900xf32, #tpu.memory_space<vmem>>, vector<1x2x900xf32>
    %562 = vector.shape_cast %561 : vector<1x2x900xf32> to vector<2x900xf32>
    %c3_443 = arith.constant 3 : index
    %c15_444 = arith.constant 15 : index
    %563 = memref.load %arg1[%c3_443, %c15_444] : memref<8x25xf32, #tpu.memory_space<smem>>
    %564 = vector.broadcast %563 : f32 to vector<2x900xf32>
    %565 = arith.mulf %562, %564 : vector<2x900xf32>
    %566 = arith.addf %560, %565 : vector<2x900xf32>
    %c16_445 = arith.constant 16 : index
    %c0_446 = arith.constant 0 : index
    %c0_447 = arith.constant 0 : index
    %567 = vector.load %arg0[%c16_445, %c0_446, %c0_447] : memref<25x2x900xf32, #tpu.memory_space<vmem>>, vector<1x2x900xf32>
    %568 = vector.shape_cast %567 : vector<1x2x900xf32> to vector<2x900xf32>
    %c3_448 = arith.constant 3 : index
    %c16_449 = arith.constant 16 : index
    %569 = memref.load %arg1[%c3_448, %c16_449] : memref<8x25xf32, #tpu.memory_space<smem>>
    %570 = vector.broadcast %569 : f32 to vector<2x900xf32>
    %571 = arith.mulf %568, %570 : vector<2x900xf32>
    %572 = arith.addf %566, %571 : vector<2x900xf32>
    %c17_450 = arith.constant 17 : index
    %c0_451 = arith.constant 0 : index
    %c0_452 = arith.constant 0 : index
    %573 = vector.load %arg0[%c17_450, %c0_451, %c0_452] : memref<25x2x900xf32, #tpu.memory_space<vmem>>, vector<1x2x900xf32>
    %574 = vector.shape_cast %573 : vector<1x2x900xf32> to vector<2x900xf32>
    %c3_453 = arith.constant 3 : index
    %c17_454 = arith.constant 17 : index
    %575 = memref.load %arg1[%c3_453, %c17_454] : memref<8x25xf32, #tpu.memory_space<smem>>
    %576 = vector.broadcast %575 : f32 to vector<2x900xf32>
    %577 = arith.mulf %574, %576 : vector<2x900xf32>
    %578 = arith.addf %572, %577 : vector<2x900xf32>
    %c18_455 = arith.constant 18 : index
    %c0_456 = arith.constant 0 : index
    %c0_457 = arith.constant 0 : index
    %579 = vector.load %arg0[%c18_455, %c0_456, %c0_457] : memref<25x2x900xf32, #tpu.memory_space<vmem>>, vector<1x2x900xf32>
    %580 = vector.shape_cast %579 : vector<1x2x900xf32> to vector<2x900xf32>
    %c3_458 = arith.constant 3 : index
    %c18_459 = arith.constant 18 : index
    %581 = memref.load %arg1[%c3_458, %c18_459] : memref<8x25xf32, #tpu.memory_space<smem>>
    %582 = vector.broadcast %581 : f32 to vector<2x900xf32>
    %583 = arith.mulf %580, %582 : vector<2x900xf32>
    %584 = arith.addf %578, %583 : vector<2x900xf32>
    %c19_460 = arith.constant 19 : index
    %c0_461 = arith.constant 0 : index
    %c0_462 = arith.constant 0 : index
    %585 = vector.load %arg0[%c19_460, %c0_461, %c0_462] : memref<25x2x900xf32, #tpu.memory_space<vmem>>, vector<1x2x900xf32>
    %586 = vector.shape_cast %585 : vector<1x2x900xf32> to vector<2x900xf32>
    %c3_463 = arith.constant 3 : index
    %c19_464 = arith.constant 19 : index
    %587 = memref.load %arg1[%c3_463, %c19_464] : memref<8x25xf32, #tpu.memory_space<smem>>
    %588 = vector.broadcast %587 : f32 to vector<2x900xf32>
    %589 = arith.mulf %586, %588 : vector<2x900xf32>
    %590 = arith.addf %584, %589 : vector<2x900xf32>
    %c20_465 = arith.constant 20 : index
    %c0_466 = arith.constant 0 : index
    %c0_467 = arith.constant 0 : index
    %591 = vector.load %arg0[%c20_465, %c0_466, %c0_467] : memref<25x2x900xf32, #tpu.memory_space<vmem>>, vector<1x2x900xf32>
    %592 = vector.shape_cast %591 : vector<1x2x900xf32> to vector<2x900xf32>
    %c3_468 = arith.constant 3 : index
    %c20_469 = arith.constant 20 : index
    %593 = memref.load %arg1[%c3_468, %c20_469] : memref<8x25xf32, #tpu.memory_space<smem>>
    %594 = vector.broadcast %593 : f32 to vector<2x900xf32>
    %595 = arith.mulf %592, %594 : vector<2x900xf32>
    %596 = arith.addf %590, %595 : vector<2x900xf32>
    %c21_470 = arith.constant 21 : index
    %c0_471 = arith.constant 0 : index
    %c0_472 = arith.constant 0 : index
    %597 = vector.load %arg0[%c21_470, %c0_471, %c0_472] : memref<25x2x900xf32, #tpu.memory_space<vmem>>, vector<1x2x900xf32>
    %598 = vector.shape_cast %597 : vector<1x2x900xf32> to vector<2x900xf32>
    %c3_473 = arith.constant 3 : index
    %c21_474 = arith.constant 21 : index
    %599 = memref.load %arg1[%c3_473, %c21_474] : memref<8x25xf32, #tpu.memory_space<smem>>
    %600 = vector.broadcast %599 : f32 to vector<2x900xf32>
    %601 = arith.mulf %598, %600 : vector<2x900xf32>
    %602 = arith.addf %596, %601 : vector<2x900xf32>
    %c22_475 = arith.constant 22 : index
    %c0_476 = arith.constant 0 : index
    %c0_477 = arith.constant 0 : index
    %603 = vector.load %arg0[%c22_475, %c0_476, %c0_477] : memref<25x2x900xf32, #tpu.memory_space<vmem>>, vector<1x2x900xf32>
    %604 = vector.shape_cast %603 : vector<1x2x900xf32> to vector<2x900xf32>
    %c3_478 = arith.constant 3 : index
    %c22_479 = arith.constant 22 : index
    %605 = memref.load %arg1[%c3_478, %c22_479] : memref<8x25xf32, #tpu.memory_space<smem>>
    %606 = vector.broadcast %605 : f32 to vector<2x900xf32>
    %607 = arith.mulf %604, %606 : vector<2x900xf32>
    %608 = arith.addf %602, %607 : vector<2x900xf32>
    %c23_480 = arith.constant 23 : index
    %c0_481 = arith.constant 0 : index
    %c0_482 = arith.constant 0 : index
    %609 = vector.load %arg0[%c23_480, %c0_481, %c0_482] : memref<25x2x900xf32, #tpu.memory_space<vmem>>, vector<1x2x900xf32>
    %610 = vector.shape_cast %609 : vector<1x2x900xf32> to vector<2x900xf32>
    %c3_483 = arith.constant 3 : index
    %c23_484 = arith.constant 23 : index
    %611 = memref.load %arg1[%c3_483, %c23_484] : memref<8x25xf32, #tpu.memory_space<smem>>
    %612 = vector.broadcast %611 : f32 to vector<2x900xf32>
    %613 = arith.mulf %610, %612 : vector<2x900xf32>
    %614 = arith.addf %608, %613 : vector<2x900xf32>
    %c24_485 = arith.constant 24 : index
    %c0_486 = arith.constant 0 : index
    %c0_487 = arith.constant 0 : index
    %615 = vector.load %arg0[%c24_485, %c0_486, %c0_487] : memref<25x2x900xf32, #tpu.memory_space<vmem>>, vector<1x2x900xf32>
    %616 = vector.shape_cast %615 : vector<1x2x900xf32> to vector<2x900xf32>
    %c3_488 = arith.constant 3 : index
    %c24_489 = arith.constant 24 : index
    %617 = memref.load %arg1[%c3_488, %c24_489] : memref<8x25xf32, #tpu.memory_space<smem>>
    %618 = vector.broadcast %617 : f32 to vector<2x900xf32>
    %619 = arith.mulf %616, %618 : vector<2x900xf32>
    %620 = arith.addf %614, %619 : vector<2x900xf32>
    %c3_490 = arith.constant 3 : index
    %621 = memref.load %arg2[%c3_490] : memref<8xf32, #tpu.memory_space<smem>>
    %622 = vector.broadcast %621 : f32 to vector<2x900xf32>
    %623 = arith.addf %620, %622 : vector<2x900xf32>
    %624 = arith.truncf %623 : vector<2x900xf32> to vector<2x900xbf16>
    %c3_491 = arith.constant 3 : index
    %c0_492 = arith.constant 0 : index
    %c0_493 = arith.constant 0 : index
    %625 = vector.load %arg3[%c3_491, %c0_492, %c0_493] : memref<8x900x128xbf16, #tpu.memory_space<vmem>>, vector<1x900x128xbf16>
    %626 = vector.shape_cast %625 : vector<1x900x128xbf16> to vector<900x128xbf16>
    %cst_494 = arith.constant dense<0.000000e+00> : vector<2x128xf32>
    %627 = tpu.matmul %624, %626, %cst_494 {dimension_numbers = #tpu.dot_dimension_numbers<[1], [0], [0], [1], [0, 0, 1, 1], [], []>} : vector<2x900xbf16>, vector<900x128xbf16>, vector<2x128xf32> -> vector<2x128xf32>
    %628 = arith.addf %471, %627 : vector<2x128xf32>
    %c0_495 = arith.constant 0 : index
    %c0_496 = arith.constant 0 : index
    %c0_497 = arith.constant 0 : index
    %629 = vector.load %arg0[%c0_495, %c0_496, %c0_497] : memref<25x2x900xf32, #tpu.memory_space<vmem>>, vector<1x2x900xf32>
    %630 = vector.shape_cast %629 : vector<1x2x900xf32> to vector<2x900xf32>
    %c4_498 = arith.constant 4 : index
    %c0_499 = arith.constant 0 : index
    %631 = memref.load %arg1[%c4_498, %c0_499] : memref<8x25xf32, #tpu.memory_space<smem>>
    %632 = vector.broadcast %631 : f32 to vector<2x900xf32>
    %633 = arith.mulf %630, %632 : vector<2x900xf32>
    %c1_500 = arith.constant 1 : index
    %c0_501 = arith.constant 0 : index
    %c0_502 = arith.constant 0 : index
    %634 = vector.load %arg0[%c1_500, %c0_501, %c0_502] : memref<25x2x900xf32, #tpu.memory_space<vmem>>, vector<1x2x900xf32>
    %635 = vector.shape_cast %634 : vector<1x2x900xf32> to vector<2x900xf32>
    %c4_503 = arith.constant 4 : index
    %c1_504 = arith.constant 1 : index
    %636 = memref.load %arg1[%c4_503, %c1_504] : memref<8x25xf32, #tpu.memory_space<smem>>
    %637 = vector.broadcast %636 : f32 to vector<2x900xf32>
    %638 = arith.mulf %635, %637 : vector<2x900xf32>
    %639 = arith.addf %633, %638 : vector<2x900xf32>
    %c2_505 = arith.constant 2 : index
    %c0_506 = arith.constant 0 : index
    %c0_507 = arith.constant 0 : index
    %640 = vector.load %arg0[%c2_505, %c0_506, %c0_507] : memref<25x2x900xf32, #tpu.memory_space<vmem>>, vector<1x2x900xf32>
    %641 = vector.shape_cast %640 : vector<1x2x900xf32> to vector<2x900xf32>
    %c4_508 = arith.constant 4 : index
    %c2_509 = arith.constant 2 : index
    %642 = memref.load %arg1[%c4_508, %c2_509] : memref<8x25xf32, #tpu.memory_space<smem>>
    %643 = vector.broadcast %642 : f32 to vector<2x900xf32>
    %644 = arith.mulf %641, %643 : vector<2x900xf32>
    %645 = arith.addf %639, %644 : vector<2x900xf32>
    %c3_510 = arith.constant 3 : index
    %c0_511 = arith.constant 0 : index
    %c0_512 = arith.constant 0 : index
    %646 = vector.load %arg0[%c3_510, %c0_511, %c0_512] : memref<25x2x900xf32, #tpu.memory_space<vmem>>, vector<1x2x900xf32>
    %647 = vector.shape_cast %646 : vector<1x2x900xf32> to vector<2x900xf32>
    %c4_513 = arith.constant 4 : index
    %c3_514 = arith.constant 3 : index
    %648 = memref.load %arg1[%c4_513, %c3_514] : memref<8x25xf32, #tpu.memory_space<smem>>
    %649 = vector.broadcast %648 : f32 to vector<2x900xf32>
    %650 = arith.mulf %647, %649 : vector<2x900xf32>
    %651 = arith.addf %645, %650 : vector<2x900xf32>
    %c4_515 = arith.constant 4 : index
    %c0_516 = arith.constant 0 : index
    %c0_517 = arith.constant 0 : index
    %652 = vector.load %arg0[%c4_515, %c0_516, %c0_517] : memref<25x2x900xf32, #tpu.memory_space<vmem>>, vector<1x2x900xf32>
    %653 = vector.shape_cast %652 : vector<1x2x900xf32> to vector<2x900xf32>
    %c4_518 = arith.constant 4 : index
    %c4_519 = arith.constant 4 : index
    %654 = memref.load %arg1[%c4_518, %c4_519] : memref<8x25xf32, #tpu.memory_space<smem>>
    %655 = vector.broadcast %654 : f32 to vector<2x900xf32>
    %656 = arith.mulf %653, %655 : vector<2x900xf32>
    %657 = arith.addf %651, %656 : vector<2x900xf32>
    %c5_520 = arith.constant 5 : index
    %c0_521 = arith.constant 0 : index
    %c0_522 = arith.constant 0 : index
    %658 = vector.load %arg0[%c5_520, %c0_521, %c0_522] : memref<25x2x900xf32, #tpu.memory_space<vmem>>, vector<1x2x900xf32>
    %659 = vector.shape_cast %658 : vector<1x2x900xf32> to vector<2x900xf32>
    %c4_523 = arith.constant 4 : index
    %c5_524 = arith.constant 5 : index
    %660 = memref.load %arg1[%c4_523, %c5_524] : memref<8x25xf32, #tpu.memory_space<smem>>
    %661 = vector.broadcast %660 : f32 to vector<2x900xf32>
    %662 = arith.mulf %659, %661 : vector<2x900xf32>
    %663 = arith.addf %657, %662 : vector<2x900xf32>
    %c6_525 = arith.constant 6 : index
    %c0_526 = arith.constant 0 : index
    %c0_527 = arith.constant 0 : index
    %664 = vector.load %arg0[%c6_525, %c0_526, %c0_527] : memref<25x2x900xf32, #tpu.memory_space<vmem>>, vector<1x2x900xf32>
    %665 = vector.shape_cast %664 : vector<1x2x900xf32> to vector<2x900xf32>
    %c4_528 = arith.constant 4 : index
    %c6_529 = arith.constant 6 : index
    %666 = memref.load %arg1[%c4_528, %c6_529] : memref<8x25xf32, #tpu.memory_space<smem>>
    %667 = vector.broadcast %666 : f32 to vector<2x900xf32>
    %668 = arith.mulf %665, %667 : vector<2x900xf32>
    %669 = arith.addf %663, %668 : vector<2x900xf32>
    %c7_530 = arith.constant 7 : index
    %c0_531 = arith.constant 0 : index
    %c0_532 = arith.constant 0 : index
    %670 = vector.load %arg0[%c7_530, %c0_531, %c0_532] : memref<25x2x900xf32, #tpu.memory_space<vmem>>, vector<1x2x900xf32>
    %671 = vector.shape_cast %670 : vector<1x2x900xf32> to vector<2x900xf32>
    %c4_533 = arith.constant 4 : index
    %c7_534 = arith.constant 7 : index
    %672 = memref.load %arg1[%c4_533, %c7_534] : memref<8x25xf32, #tpu.memory_space<smem>>
    %673 = vector.broadcast %672 : f32 to vector<2x900xf32>
    %674 = arith.mulf %671, %673 : vector<2x900xf32>
    %675 = arith.addf %669, %674 : vector<2x900xf32>
    %c8_535 = arith.constant 8 : index
    %c0_536 = arith.constant 0 : index
    %c0_537 = arith.constant 0 : index
    %676 = vector.load %arg0[%c8_535, %c0_536, %c0_537] : memref<25x2x900xf32, #tpu.memory_space<vmem>>, vector<1x2x900xf32>
    %677 = vector.shape_cast %676 : vector<1x2x900xf32> to vector<2x900xf32>
    %c4_538 = arith.constant 4 : index
    %c8_539 = arith.constant 8 : index
    %678 = memref.load %arg1[%c4_538, %c8_539] : memref<8x25xf32, #tpu.memory_space<smem>>
    %679 = vector.broadcast %678 : f32 to vector<2x900xf32>
    %680 = arith.mulf %677, %679 : vector<2x900xf32>
    %681 = arith.addf %675, %680 : vector<2x900xf32>
    %c9_540 = arith.constant 9 : index
    %c0_541 = arith.constant 0 : index
    %c0_542 = arith.constant 0 : index
    %682 = vector.load %arg0[%c9_540, %c0_541, %c0_542] : memref<25x2x900xf32, #tpu.memory_space<vmem>>, vector<1x2x900xf32>
    %683 = vector.shape_cast %682 : vector<1x2x900xf32> to vector<2x900xf32>
    %c4_543 = arith.constant 4 : index
    %c9_544 = arith.constant 9 : index
    %684 = memref.load %arg1[%c4_543, %c9_544] : memref<8x25xf32, #tpu.memory_space<smem>>
    %685 = vector.broadcast %684 : f32 to vector<2x900xf32>
    %686 = arith.mulf %683, %685 : vector<2x900xf32>
    %687 = arith.addf %681, %686 : vector<2x900xf32>
    %c10_545 = arith.constant 10 : index
    %c0_546 = arith.constant 0 : index
    %c0_547 = arith.constant 0 : index
    %688 = vector.load %arg0[%c10_545, %c0_546, %c0_547] : memref<25x2x900xf32, #tpu.memory_space<vmem>>, vector<1x2x900xf32>
    %689 = vector.shape_cast %688 : vector<1x2x900xf32> to vector<2x900xf32>
    %c4_548 = arith.constant 4 : index
    %c10_549 = arith.constant 10 : index
    %690 = memref.load %arg1[%c4_548, %c10_549] : memref<8x25xf32, #tpu.memory_space<smem>>
    %691 = vector.broadcast %690 : f32 to vector<2x900xf32>
    %692 = arith.mulf %689, %691 : vector<2x900xf32>
    %693 = arith.addf %687, %692 : vector<2x900xf32>
    %c11_550 = arith.constant 11 : index
    %c0_551 = arith.constant 0 : index
    %c0_552 = arith.constant 0 : index
    %694 = vector.load %arg0[%c11_550, %c0_551, %c0_552] : memref<25x2x900xf32, #tpu.memory_space<vmem>>, vector<1x2x900xf32>
    %695 = vector.shape_cast %694 : vector<1x2x900xf32> to vector<2x900xf32>
    %c4_553 = arith.constant 4 : index
    %c11_554 = arith.constant 11 : index
    %696 = memref.load %arg1[%c4_553, %c11_554] : memref<8x25xf32, #tpu.memory_space<smem>>
    %697 = vector.broadcast %696 : f32 to vector<2x900xf32>
    %698 = arith.mulf %695, %697 : vector<2x900xf32>
    %699 = arith.addf %693, %698 : vector<2x900xf32>
    %c12_555 = arith.constant 12 : index
    %c0_556 = arith.constant 0 : index
    %c0_557 = arith.constant 0 : index
    %700 = vector.load %arg0[%c12_555, %c0_556, %c0_557] : memref<25x2x900xf32, #tpu.memory_space<vmem>>, vector<1x2x900xf32>
    %701 = vector.shape_cast %700 : vector<1x2x900xf32> to vector<2x900xf32>
    %c4_558 = arith.constant 4 : index
    %c12_559 = arith.constant 12 : index
    %702 = memref.load %arg1[%c4_558, %c12_559] : memref<8x25xf32, #tpu.memory_space<smem>>
    %703 = vector.broadcast %702 : f32 to vector<2x900xf32>
    %704 = arith.mulf %701, %703 : vector<2x900xf32>
    %705 = arith.addf %699, %704 : vector<2x900xf32>
    %c13_560 = arith.constant 13 : index
    %c0_561 = arith.constant 0 : index
    %c0_562 = arith.constant 0 : index
    %706 = vector.load %arg0[%c13_560, %c0_561, %c0_562] : memref<25x2x900xf32, #tpu.memory_space<vmem>>, vector<1x2x900xf32>
    %707 = vector.shape_cast %706 : vector<1x2x900xf32> to vector<2x900xf32>
    %c4_563 = arith.constant 4 : index
    %c13_564 = arith.constant 13 : index
    %708 = memref.load %arg1[%c4_563, %c13_564] : memref<8x25xf32, #tpu.memory_space<smem>>
    %709 = vector.broadcast %708 : f32 to vector<2x900xf32>
    %710 = arith.mulf %707, %709 : vector<2x900xf32>
    %711 = arith.addf %705, %710 : vector<2x900xf32>
    %c14_565 = arith.constant 14 : index
    %c0_566 = arith.constant 0 : index
    %c0_567 = arith.constant 0 : index
    %712 = vector.load %arg0[%c14_565, %c0_566, %c0_567] : memref<25x2x900xf32, #tpu.memory_space<vmem>>, vector<1x2x900xf32>
    %713 = vector.shape_cast %712 : vector<1x2x900xf32> to vector<2x900xf32>
    %c4_568 = arith.constant 4 : index
    %c14_569 = arith.constant 14 : index
    %714 = memref.load %arg1[%c4_568, %c14_569] : memref<8x25xf32, #tpu.memory_space<smem>>
    %715 = vector.broadcast %714 : f32 to vector<2x900xf32>
    %716 = arith.mulf %713, %715 : vector<2x900xf32>
    %717 = arith.addf %711, %716 : vector<2x900xf32>
    %c15_570 = arith.constant 15 : index
    %c0_571 = arith.constant 0 : index
    %c0_572 = arith.constant 0 : index
    %718 = vector.load %arg0[%c15_570, %c0_571, %c0_572] : memref<25x2x900xf32, #tpu.memory_space<vmem>>, vector<1x2x900xf32>
    %719 = vector.shape_cast %718 : vector<1x2x900xf32> to vector<2x900xf32>
    %c4_573 = arith.constant 4 : index
    %c15_574 = arith.constant 15 : index
    %720 = memref.load %arg1[%c4_573, %c15_574] : memref<8x25xf32, #tpu.memory_space<smem>>
    %721 = vector.broadcast %720 : f32 to vector<2x900xf32>
    %722 = arith.mulf %719, %721 : vector<2x900xf32>
    %723 = arith.addf %717, %722 : vector<2x900xf32>
    %c16_575 = arith.constant 16 : index
    %c0_576 = arith.constant 0 : index
    %c0_577 = arith.constant 0 : index
    %724 = vector.load %arg0[%c16_575, %c0_576, %c0_577] : memref<25x2x900xf32, #tpu.memory_space<vmem>>, vector<1x2x900xf32>
    %725 = vector.shape_cast %724 : vector<1x2x900xf32> to vector<2x900xf32>
    %c4_578 = arith.constant 4 : index
    %c16_579 = arith.constant 16 : index
    %726 = memref.load %arg1[%c4_578, %c16_579] : memref<8x25xf32, #tpu.memory_space<smem>>
    %727 = vector.broadcast %726 : f32 to vector<2x900xf32>
    %728 = arith.mulf %725, %727 : vector<2x900xf32>
    %729 = arith.addf %723, %728 : vector<2x900xf32>
    %c17_580 = arith.constant 17 : index
    %c0_581 = arith.constant 0 : index
    %c0_582 = arith.constant 0 : index
    %730 = vector.load %arg0[%c17_580, %c0_581, %c0_582] : memref<25x2x900xf32, #tpu.memory_space<vmem>>, vector<1x2x900xf32>
    %731 = vector.shape_cast %730 : vector<1x2x900xf32> to vector<2x900xf32>
    %c4_583 = arith.constant 4 : index
    %c17_584 = arith.constant 17 : index
    %732 = memref.load %arg1[%c4_583, %c17_584] : memref<8x25xf32, #tpu.memory_space<smem>>
    %733 = vector.broadcast %732 : f32 to vector<2x900xf32>
    %734 = arith.mulf %731, %733 : vector<2x900xf32>
    %735 = arith.addf %729, %734 : vector<2x900xf32>
    %c18_585 = arith.constant 18 : index
    %c0_586 = arith.constant 0 : index
    %c0_587 = arith.constant 0 : index
    %736 = vector.load %arg0[%c18_585, %c0_586, %c0_587] : memref<25x2x900xf32, #tpu.memory_space<vmem>>, vector<1x2x900xf32>
    %737 = vector.shape_cast %736 : vector<1x2x900xf32> to vector<2x900xf32>
    %c4_588 = arith.constant 4 : index
    %c18_589 = arith.constant 18 : index
    %738 = memref.load %arg1[%c4_588, %c18_589] : memref<8x25xf32, #tpu.memory_space<smem>>
    %739 = vector.broadcast %738 : f32 to vector<2x900xf32>
    %740 = arith.mulf %737, %739 : vector<2x900xf32>
    %741 = arith.addf %735, %740 : vector<2x900xf32>
    %c19_590 = arith.constant 19 : index
    %c0_591 = arith.constant 0 : index
    %c0_592 = arith.constant 0 : index
    %742 = vector.load %arg0[%c19_590, %c0_591, %c0_592] : memref<25x2x900xf32, #tpu.memory_space<vmem>>, vector<1x2x900xf32>
    %743 = vector.shape_cast %742 : vector<1x2x900xf32> to vector<2x900xf32>
    %c4_593 = arith.constant 4 : index
    %c19_594 = arith.constant 19 : index
    %744 = memref.load %arg1[%c4_593, %c19_594] : memref<8x25xf32, #tpu.memory_space<smem>>
    %745 = vector.broadcast %744 : f32 to vector<2x900xf32>
    %746 = arith.mulf %743, %745 : vector<2x900xf32>
    %747 = arith.addf %741, %746 : vector<2x900xf32>
    %c20_595 = arith.constant 20 : index
    %c0_596 = arith.constant 0 : index
    %c0_597 = arith.constant 0 : index
    %748 = vector.load %arg0[%c20_595, %c0_596, %c0_597] : memref<25x2x900xf32, #tpu.memory_space<vmem>>, vector<1x2x900xf32>
    %749 = vector.shape_cast %748 : vector<1x2x900xf32> to vector<2x900xf32>
    %c4_598 = arith.constant 4 : index
    %c20_599 = arith.constant 20 : index
    %750 = memref.load %arg1[%c4_598, %c20_599] : memref<8x25xf32, #tpu.memory_space<smem>>
    %751 = vector.broadcast %750 : f32 to vector<2x900xf32>
    %752 = arith.mulf %749, %751 : vector<2x900xf32>
    %753 = arith.addf %747, %752 : vector<2x900xf32>
    %c21_600 = arith.constant 21 : index
    %c0_601 = arith.constant 0 : index
    %c0_602 = arith.constant 0 : index
    %754 = vector.load %arg0[%c21_600, %c0_601, %c0_602] : memref<25x2x900xf32, #tpu.memory_space<vmem>>, vector<1x2x900xf32>
    %755 = vector.shape_cast %754 : vector<1x2x900xf32> to vector<2x900xf32>
    %c4_603 = arith.constant 4 : index
    %c21_604 = arith.constant 21 : index
    %756 = memref.load %arg1[%c4_603, %c21_604] : memref<8x25xf32, #tpu.memory_space<smem>>
    %757 = vector.broadcast %756 : f32 to vector<2x900xf32>
    %758 = arith.mulf %755, %757 : vector<2x900xf32>
    %759 = arith.addf %753, %758 : vector<2x900xf32>
    %c22_605 = arith.constant 22 : index
    %c0_606 = arith.constant 0 : index
    %c0_607 = arith.constant 0 : index
    %760 = vector.load %arg0[%c22_605, %c0_606, %c0_607] : memref<25x2x900xf32, #tpu.memory_space<vmem>>, vector<1x2x900xf32>
    %761 = vector.shape_cast %760 : vector<1x2x900xf32> to vector<2x900xf32>
    %c4_608 = arith.constant 4 : index
    %c22_609 = arith.constant 22 : index
    %762 = memref.load %arg1[%c4_608, %c22_609] : memref<8x25xf32, #tpu.memory_space<smem>>
    %763 = vector.broadcast %762 : f32 to vector<2x900xf32>
    %764 = arith.mulf %761, %763 : vector<2x900xf32>
    %765 = arith.addf %759, %764 : vector<2x900xf32>
    %c23_610 = arith.constant 23 : index
    %c0_611 = arith.constant 0 : index
    %c0_612 = arith.constant 0 : index
    %766 = vector.load %arg0[%c23_610, %c0_611, %c0_612] : memref<25x2x900xf32, #tpu.memory_space<vmem>>, vector<1x2x900xf32>
    %767 = vector.shape_cast %766 : vector<1x2x900xf32> to vector<2x900xf32>
    %c4_613 = arith.constant 4 : index
    %c23_614 = arith.constant 23 : index
    %768 = memref.load %arg1[%c4_613, %c23_614] : memref<8x25xf32, #tpu.memory_space<smem>>
    %769 = vector.broadcast %768 : f32 to vector<2x900xf32>
    %770 = arith.mulf %767, %769 : vector<2x900xf32>
    %771 = arith.addf %765, %770 : vector<2x900xf32>
    %c24_615 = arith.constant 24 : index
    %c0_616 = arith.constant 0 : index
    %c0_617 = arith.constant 0 : index
    %772 = vector.load %arg0[%c24_615, %c0_616, %c0_617] : memref<25x2x900xf32, #tpu.memory_space<vmem>>, vector<1x2x900xf32>
    %773 = vector.shape_cast %772 : vector<1x2x900xf32> to vector<2x900xf32>
    %c4_618 = arith.constant 4 : index
    %c24_619 = arith.constant 24 : index
    %774 = memref.load %arg1[%c4_618, %c24_619] : memref<8x25xf32, #tpu.memory_space<smem>>
    %775 = vector.broadcast %774 : f32 to vector<2x900xf32>
    %776 = arith.mulf %773, %775 : vector<2x900xf32>
    %777 = arith.addf %771, %776 : vector<2x900xf32>
    %c4_620 = arith.constant 4 : index
    %778 = memref.load %arg2[%c4_620] : memref<8xf32, #tpu.memory_space<smem>>
    %779 = vector.broadcast %778 : f32 to vector<2x900xf32>
    %780 = arith.addf %777, %779 : vector<2x900xf32>
    %781 = arith.truncf %780 : vector<2x900xf32> to vector<2x900xbf16>
    %c4_621 = arith.constant 4 : index
    %c0_622 = arith.constant 0 : index
    %c0_623 = arith.constant 0 : index
    %782 = vector.load %arg3[%c4_621, %c0_622, %c0_623] : memref<8x900x128xbf16, #tpu.memory_space<vmem>>, vector<1x900x128xbf16>
    %783 = vector.shape_cast %782 : vector<1x900x128xbf16> to vector<900x128xbf16>
    %cst_624 = arith.constant dense<0.000000e+00> : vector<2x128xf32>
    %784 = tpu.matmul %781, %783, %cst_624 {dimension_numbers = #tpu.dot_dimension_numbers<[1], [0], [0], [1], [0, 0, 1, 1], [], []>} : vector<2x900xbf16>, vector<900x128xbf16>, vector<2x128xf32> -> vector<2x128xf32>
    %785 = arith.addf %628, %784 : vector<2x128xf32>
    %c0_625 = arith.constant 0 : index
    %c0_626 = arith.constant 0 : index
    %c0_627 = arith.constant 0 : index
    %786 = vector.load %arg0[%c0_625, %c0_626, %c0_627] : memref<25x2x900xf32, #tpu.memory_space<vmem>>, vector<1x2x900xf32>
    %787 = vector.shape_cast %786 : vector<1x2x900xf32> to vector<2x900xf32>
    %c5_628 = arith.constant 5 : index
    %c0_629 = arith.constant 0 : index
    %788 = memref.load %arg1[%c5_628, %c0_629] : memref<8x25xf32, #tpu.memory_space<smem>>
    %789 = vector.broadcast %788 : f32 to vector<2x900xf32>
    %790 = arith.mulf %787, %789 : vector<2x900xf32>
    %c1_630 = arith.constant 1 : index
    %c0_631 = arith.constant 0 : index
    %c0_632 = arith.constant 0 : index
    %791 = vector.load %arg0[%c1_630, %c0_631, %c0_632] : memref<25x2x900xf32, #tpu.memory_space<vmem>>, vector<1x2x900xf32>
    %792 = vector.shape_cast %791 : vector<1x2x900xf32> to vector<2x900xf32>
    %c5_633 = arith.constant 5 : index
    %c1_634 = arith.constant 1 : index
    %793 = memref.load %arg1[%c5_633, %c1_634] : memref<8x25xf32, #tpu.memory_space<smem>>
    %794 = vector.broadcast %793 : f32 to vector<2x900xf32>
    %795 = arith.mulf %792, %794 : vector<2x900xf32>
    %796 = arith.addf %790, %795 : vector<2x900xf32>
    %c2_635 = arith.constant 2 : index
    %c0_636 = arith.constant 0 : index
    %c0_637 = arith.constant 0 : index
    %797 = vector.load %arg0[%c2_635, %c0_636, %c0_637] : memref<25x2x900xf32, #tpu.memory_space<vmem>>, vector<1x2x900xf32>
    %798 = vector.shape_cast %797 : vector<1x2x900xf32> to vector<2x900xf32>
    %c5_638 = arith.constant 5 : index
    %c2_639 = arith.constant 2 : index
    %799 = memref.load %arg1[%c5_638, %c2_639] : memref<8x25xf32, #tpu.memory_space<smem>>
    %800 = vector.broadcast %799 : f32 to vector<2x900xf32>
    %801 = arith.mulf %798, %800 : vector<2x900xf32>
    %802 = arith.addf %796, %801 : vector<2x900xf32>
    %c3_640 = arith.constant 3 : index
    %c0_641 = arith.constant 0 : index
    %c0_642 = arith.constant 0 : index
    %803 = vector.load %arg0[%c3_640, %c0_641, %c0_642] : memref<25x2x900xf32, #tpu.memory_space<vmem>>, vector<1x2x900xf32>
    %804 = vector.shape_cast %803 : vector<1x2x900xf32> to vector<2x900xf32>
    %c5_643 = arith.constant 5 : index
    %c3_644 = arith.constant 3 : index
    %805 = memref.load %arg1[%c5_643, %c3_644] : memref<8x25xf32, #tpu.memory_space<smem>>
    %806 = vector.broadcast %805 : f32 to vector<2x900xf32>
    %807 = arith.mulf %804, %806 : vector<2x900xf32>
    %808 = arith.addf %802, %807 : vector<2x900xf32>
    %c4_645 = arith.constant 4 : index
    %c0_646 = arith.constant 0 : index
    %c0_647 = arith.constant 0 : index
    %809 = vector.load %arg0[%c4_645, %c0_646, %c0_647] : memref<25x2x900xf32, #tpu.memory_space<vmem>>, vector<1x2x900xf32>
    %810 = vector.shape_cast %809 : vector<1x2x900xf32> to vector<2x900xf32>
    %c5_648 = arith.constant 5 : index
    %c4_649 = arith.constant 4 : index
    %811 = memref.load %arg1[%c5_648, %c4_649] : memref<8x25xf32, #tpu.memory_space<smem>>
    %812 = vector.broadcast %811 : f32 to vector<2x900xf32>
    %813 = arith.mulf %810, %812 : vector<2x900xf32>
    %814 = arith.addf %808, %813 : vector<2x900xf32>
    %c5_650 = arith.constant 5 : index
    %c0_651 = arith.constant 0 : index
    %c0_652 = arith.constant 0 : index
    %815 = vector.load %arg0[%c5_650, %c0_651, %c0_652] : memref<25x2x900xf32, #tpu.memory_space<vmem>>, vector<1x2x900xf32>
    %816 = vector.shape_cast %815 : vector<1x2x900xf32> to vector<2x900xf32>
    %c5_653 = arith.constant 5 : index
    %c5_654 = arith.constant 5 : index
    %817 = memref.load %arg1[%c5_653, %c5_654] : memref<8x25xf32, #tpu.memory_space<smem>>
    %818 = vector.broadcast %817 : f32 to vector<2x900xf32>
    %819 = arith.mulf %816, %818 : vector<2x900xf32>
    %820 = arith.addf %814, %819 : vector<2x900xf32>
    %c6_655 = arith.constant 6 : index
    %c0_656 = arith.constant 0 : index
    %c0_657 = arith.constant 0 : index
    %821 = vector.load %arg0[%c6_655, %c0_656, %c0_657] : memref<25x2x900xf32, #tpu.memory_space<vmem>>, vector<1x2x900xf32>
    %822 = vector.shape_cast %821 : vector<1x2x900xf32> to vector<2x900xf32>
    %c5_658 = arith.constant 5 : index
    %c6_659 = arith.constant 6 : index
    %823 = memref.load %arg1[%c5_658, %c6_659] : memref<8x25xf32, #tpu.memory_space<smem>>
    %824 = vector.broadcast %823 : f32 to vector<2x900xf32>
    %825 = arith.mulf %822, %824 : vector<2x900xf32>
    %826 = arith.addf %820, %825 : vector<2x900xf32>
    %c7_660 = arith.constant 7 : index
    %c0_661 = arith.constant 0 : index
    %c0_662 = arith.constant 0 : index
    %827 = vector.load %arg0[%c7_660, %c0_661, %c0_662] : memref<25x2x900xf32, #tpu.memory_space<vmem>>, vector<1x2x900xf32>
    %828 = vector.shape_cast %827 : vector<1x2x900xf32> to vector<2x900xf32>
    %c5_663 = arith.constant 5 : index
    %c7_664 = arith.constant 7 : index
    %829 = memref.load %arg1[%c5_663, %c7_664] : memref<8x25xf32, #tpu.memory_space<smem>>
    %830 = vector.broadcast %829 : f32 to vector<2x900xf32>
    %831 = arith.mulf %828, %830 : vector<2x900xf32>
    %832 = arith.addf %826, %831 : vector<2x900xf32>
    %c8_665 = arith.constant 8 : index
    %c0_666 = arith.constant 0 : index
    %c0_667 = arith.constant 0 : index
    %833 = vector.load %arg0[%c8_665, %c0_666, %c0_667] : memref<25x2x900xf32, #tpu.memory_space<vmem>>, vector<1x2x900xf32>
    %834 = vector.shape_cast %833 : vector<1x2x900xf32> to vector<2x900xf32>
    %c5_668 = arith.constant 5 : index
    %c8_669 = arith.constant 8 : index
    %835 = memref.load %arg1[%c5_668, %c8_669] : memref<8x25xf32, #tpu.memory_space<smem>>
    %836 = vector.broadcast %835 : f32 to vector<2x900xf32>
    %837 = arith.mulf %834, %836 : vector<2x900xf32>
    %838 = arith.addf %832, %837 : vector<2x900xf32>
    %c9_670 = arith.constant 9 : index
    %c0_671 = arith.constant 0 : index
    %c0_672 = arith.constant 0 : index
    %839 = vector.load %arg0[%c9_670, %c0_671, %c0_672] : memref<25x2x900xf32, #tpu.memory_space<vmem>>, vector<1x2x900xf32>
    %840 = vector.shape_cast %839 : vector<1x2x900xf32> to vector<2x900xf32>
    %c5_673 = arith.constant 5 : index
    %c9_674 = arith.constant 9 : index
    %841 = memref.load %arg1[%c5_673, %c9_674] : memref<8x25xf32, #tpu.memory_space<smem>>
    %842 = vector.broadcast %841 : f32 to vector<2x900xf32>
    %843 = arith.mulf %840, %842 : vector<2x900xf32>
    %844 = arith.addf %838, %843 : vector<2x900xf32>
    %c10_675 = arith.constant 10 : index
    %c0_676 = arith.constant 0 : index
    %c0_677 = arith.constant 0 : index
    %845 = vector.load %arg0[%c10_675, %c0_676, %c0_677] : memref<25x2x900xf32, #tpu.memory_space<vmem>>, vector<1x2x900xf32>
    %846 = vector.shape_cast %845 : vector<1x2x900xf32> to vector<2x900xf32>
    %c5_678 = arith.constant 5 : index
    %c10_679 = arith.constant 10 : index
    %847 = memref.load %arg1[%c5_678, %c10_679] : memref<8x25xf32, #tpu.memory_space<smem>>
    %848 = vector.broadcast %847 : f32 to vector<2x900xf32>
    %849 = arith.mulf %846, %848 : vector<2x900xf32>
    %850 = arith.addf %844, %849 : vector<2x900xf32>
    %c11_680 = arith.constant 11 : index
    %c0_681 = arith.constant 0 : index
    %c0_682 = arith.constant 0 : index
    %851 = vector.load %arg0[%c11_680, %c0_681, %c0_682] : memref<25x2x900xf32, #tpu.memory_space<vmem>>, vector<1x2x900xf32>
    %852 = vector.shape_cast %851 : vector<1x2x900xf32> to vector<2x900xf32>
    %c5_683 = arith.constant 5 : index
    %c11_684 = arith.constant 11 : index
    %853 = memref.load %arg1[%c5_683, %c11_684] : memref<8x25xf32, #tpu.memory_space<smem>>
    %854 = vector.broadcast %853 : f32 to vector<2x900xf32>
    %855 = arith.mulf %852, %854 : vector<2x900xf32>
    %856 = arith.addf %850, %855 : vector<2x900xf32>
    %c12_685 = arith.constant 12 : index
    %c0_686 = arith.constant 0 : index
    %c0_687 = arith.constant 0 : index
    %857 = vector.load %arg0[%c12_685, %c0_686, %c0_687] : memref<25x2x900xf32, #tpu.memory_space<vmem>>, vector<1x2x900xf32>
    %858 = vector.shape_cast %857 : vector<1x2x900xf32> to vector<2x900xf32>
    %c5_688 = arith.constant 5 : index
    %c12_689 = arith.constant 12 : index
    %859 = memref.load %arg1[%c5_688, %c12_689] : memref<8x25xf32, #tpu.memory_space<smem>>
    %860 = vector.broadcast %859 : f32 to vector<2x900xf32>
    %861 = arith.mulf %858, %860 : vector<2x900xf32>
    %862 = arith.addf %856, %861 : vector<2x900xf32>
    %c13_690 = arith.constant 13 : index
    %c0_691 = arith.constant 0 : index
    %c0_692 = arith.constant 0 : index
    %863 = vector.load %arg0[%c13_690, %c0_691, %c0_692] : memref<25x2x900xf32, #tpu.memory_space<vmem>>, vector<1x2x900xf32>
    %864 = vector.shape_cast %863 : vector<1x2x900xf32> to vector<2x900xf32>
    %c5_693 = arith.constant 5 : index
    %c13_694 = arith.constant 13 : index
    %865 = memref.load %arg1[%c5_693, %c13_694] : memref<8x25xf32, #tpu.memory_space<smem>>
    %866 = vector.broadcast %865 : f32 to vector<2x900xf32>
    %867 = arith.mulf %864, %866 : vector<2x900xf32>
    %868 = arith.addf %862, %867 : vector<2x900xf32>
    %c14_695 = arith.constant 14 : index
    %c0_696 = arith.constant 0 : index
    %c0_697 = arith.constant 0 : index
    %869 = vector.load %arg0[%c14_695, %c0_696, %c0_697] : memref<25x2x900xf32, #tpu.memory_space<vmem>>, vector<1x2x900xf32>
    %870 = vector.shape_cast %869 : vector<1x2x900xf32> to vector<2x900xf32>
    %c5_698 = arith.constant 5 : index
    %c14_699 = arith.constant 14 : index
    %871 = memref.load %arg1[%c5_698, %c14_699] : memref<8x25xf32, #tpu.memory_space<smem>>
    %872 = vector.broadcast %871 : f32 to vector<2x900xf32>
    %873 = arith.mulf %870, %872 : vector<2x900xf32>
    %874 = arith.addf %868, %873 : vector<2x900xf32>
    %c15_700 = arith.constant 15 : index
    %c0_701 = arith.constant 0 : index
    %c0_702 = arith.constant 0 : index
    %875 = vector.load %arg0[%c15_700, %c0_701, %c0_702] : memref<25x2x900xf32, #tpu.memory_space<vmem>>, vector<1x2x900xf32>
    %876 = vector.shape_cast %875 : vector<1x2x900xf32> to vector<2x900xf32>
    %c5_703 = arith.constant 5 : index
    %c15_704 = arith.constant 15 : index
    %877 = memref.load %arg1[%c5_703, %c15_704] : memref<8x25xf32, #tpu.memory_space<smem>>
    %878 = vector.broadcast %877 : f32 to vector<2x900xf32>
    %879 = arith.mulf %876, %878 : vector<2x900xf32>
    %880 = arith.addf %874, %879 : vector<2x900xf32>
    %c16_705 = arith.constant 16 : index
    %c0_706 = arith.constant 0 : index
    %c0_707 = arith.constant 0 : index
    %881 = vector.load %arg0[%c16_705, %c0_706, %c0_707] : memref<25x2x900xf32, #tpu.memory_space<vmem>>, vector<1x2x900xf32>
    %882 = vector.shape_cast %881 : vector<1x2x900xf32> to vector<2x900xf32>
    %c5_708 = arith.constant 5 : index
    %c16_709 = arith.constant 16 : index
    %883 = memref.load %arg1[%c5_708, %c16_709] : memref<8x25xf32, #tpu.memory_space<smem>>
    %884 = vector.broadcast %883 : f32 to vector<2x900xf32>
    %885 = arith.mulf %882, %884 : vector<2x900xf32>
    %886 = arith.addf %880, %885 : vector<2x900xf32>
    %c17_710 = arith.constant 17 : index
    %c0_711 = arith.constant 0 : index
    %c0_712 = arith.constant 0 : index
    %887 = vector.load %arg0[%c17_710, %c0_711, %c0_712] : memref<25x2x900xf32, #tpu.memory_space<vmem>>, vector<1x2x900xf32>
    %888 = vector.shape_cast %887 : vector<1x2x900xf32> to vector<2x900xf32>
    %c5_713 = arith.constant 5 : index
    %c17_714 = arith.constant 17 : index
    %889 = memref.load %arg1[%c5_713, %c17_714] : memref<8x25xf32, #tpu.memory_space<smem>>
    %890 = vector.broadcast %889 : f32 to vector<2x900xf32>
    %891 = arith.mulf %888, %890 : vector<2x900xf32>
    %892 = arith.addf %886, %891 : vector<2x900xf32>
    %c18_715 = arith.constant 18 : index
    %c0_716 = arith.constant 0 : index
    %c0_717 = arith.constant 0 : index
    %893 = vector.load %arg0[%c18_715, %c0_716, %c0_717] : memref<25x2x900xf32, #tpu.memory_space<vmem>>, vector<1x2x900xf32>
    %894 = vector.shape_cast %893 : vector<1x2x900xf32> to vector<2x900xf32>
    %c5_718 = arith.constant 5 : index
    %c18_719 = arith.constant 18 : index
    %895 = memref.load %arg1[%c5_718, %c18_719] : memref<8x25xf32, #tpu.memory_space<smem>>
    %896 = vector.broadcast %895 : f32 to vector<2x900xf32>
    %897 = arith.mulf %894, %896 : vector<2x900xf32>
    %898 = arith.addf %892, %897 : vector<2x900xf32>
    %c19_720 = arith.constant 19 : index
    %c0_721 = arith.constant 0 : index
    %c0_722 = arith.constant 0 : index
    %899 = vector.load %arg0[%c19_720, %c0_721, %c0_722] : memref<25x2x900xf32, #tpu.memory_space<vmem>>, vector<1x2x900xf32>
    %900 = vector.shape_cast %899 : vector<1x2x900xf32> to vector<2x900xf32>
    %c5_723 = arith.constant 5 : index
    %c19_724 = arith.constant 19 : index
    %901 = memref.load %arg1[%c5_723, %c19_724] : memref<8x25xf32, #tpu.memory_space<smem>>
    %902 = vector.broadcast %901 : f32 to vector<2x900xf32>
    %903 = arith.mulf %900, %902 : vector<2x900xf32>
    %904 = arith.addf %898, %903 : vector<2x900xf32>
    %c20_725 = arith.constant 20 : index
    %c0_726 = arith.constant 0 : index
    %c0_727 = arith.constant 0 : index
    %905 = vector.load %arg0[%c20_725, %c0_726, %c0_727] : memref<25x2x900xf32, #tpu.memory_space<vmem>>, vector<1x2x900xf32>
    %906 = vector.shape_cast %905 : vector<1x2x900xf32> to vector<2x900xf32>
    %c5_728 = arith.constant 5 : index
    %c20_729 = arith.constant 20 : index
    %907 = memref.load %arg1[%c5_728, %c20_729] : memref<8x25xf32, #tpu.memory_space<smem>>
    %908 = vector.broadcast %907 : f32 to vector<2x900xf32>
    %909 = arith.mulf %906, %908 : vector<2x900xf32>
    %910 = arith.addf %904, %909 : vector<2x900xf32>
    %c21_730 = arith.constant 21 : index
    %c0_731 = arith.constant 0 : index
    %c0_732 = arith.constant 0 : index
    %911 = vector.load %arg0[%c21_730, %c0_731, %c0_732] : memref<25x2x900xf32, #tpu.memory_space<vmem>>, vector<1x2x900xf32>
    %912 = vector.shape_cast %911 : vector<1x2x900xf32> to vector<2x900xf32>
    %c5_733 = arith.constant 5 : index
    %c21_734 = arith.constant 21 : index
    %913 = memref.load %arg1[%c5_733, %c21_734] : memref<8x25xf32, #tpu.memory_space<smem>>
    %914 = vector.broadcast %913 : f32 to vector<2x900xf32>
    %915 = arith.mulf %912, %914 : vector<2x900xf32>
    %916 = arith.addf %910, %915 : vector<2x900xf32>
    %c22_735 = arith.constant 22 : index
    %c0_736 = arith.constant 0 : index
    %c0_737 = arith.constant 0 : index
    %917 = vector.load %arg0[%c22_735, %c0_736, %c0_737] : memref<25x2x900xf32, #tpu.memory_space<vmem>>, vector<1x2x900xf32>
    %918 = vector.shape_cast %917 : vector<1x2x900xf32> to vector<2x900xf32>
    %c5_738 = arith.constant 5 : index
    %c22_739 = arith.constant 22 : index
    %919 = memref.load %arg1[%c5_738, %c22_739] : memref<8x25xf32, #tpu.memory_space<smem>>
    %920 = vector.broadcast %919 : f32 to vector<2x900xf32>
    %921 = arith.mulf %918, %920 : vector<2x900xf32>
    %922 = arith.addf %916, %921 : vector<2x900xf32>
    %c23_740 = arith.constant 23 : index
    %c0_741 = arith.constant 0 : index
    %c0_742 = arith.constant 0 : index
    %923 = vector.load %arg0[%c23_740, %c0_741, %c0_742] : memref<25x2x900xf32, #tpu.memory_space<vmem>>, vector<1x2x900xf32>
    %924 = vector.shape_cast %923 : vector<1x2x900xf32> to vector<2x900xf32>
    %c5_743 = arith.constant 5 : index
    %c23_744 = arith.constant 23 : index
    %925 = memref.load %arg1[%c5_743, %c23_744] : memref<8x25xf32, #tpu.memory_space<smem>>
    %926 = vector.broadcast %925 : f32 to vector<2x900xf32>
    %927 = arith.mulf %924, %926 : vector<2x900xf32>
    %928 = arith.addf %922, %927 : vector<2x900xf32>
    %c24_745 = arith.constant 24 : index
    %c0_746 = arith.constant 0 : index
    %c0_747 = arith.constant 0 : index
    %929 = vector.load %arg0[%c24_745, %c0_746, %c0_747] : memref<25x2x900xf32, #tpu.memory_space<vmem>>, vector<1x2x900xf32>
    %930 = vector.shape_cast %929 : vector<1x2x900xf32> to vector<2x900xf32>
    %c5_748 = arith.constant 5 : index
    %c24_749 = arith.constant 24 : index
    %931 = memref.load %arg1[%c5_748, %c24_749] : memref<8x25xf32, #tpu.memory_space<smem>>
    %932 = vector.broadcast %931 : f32 to vector<2x900xf32>
    %933 = arith.mulf %930, %932 : vector<2x900xf32>
    %934 = arith.addf %928, %933 : vector<2x900xf32>
    %c5_750 = arith.constant 5 : index
    %935 = memref.load %arg2[%c5_750] : memref<8xf32, #tpu.memory_space<smem>>
    %936 = vector.broadcast %935 : f32 to vector<2x900xf32>
    %937 = arith.addf %934, %936 : vector<2x900xf32>
    %938 = arith.truncf %937 : vector<2x900xf32> to vector<2x900xbf16>
    %c5_751 = arith.constant 5 : index
    %c0_752 = arith.constant 0 : index
    %c0_753 = arith.constant 0 : index
    %939 = vector.load %arg3[%c5_751, %c0_752, %c0_753] : memref<8x900x128xbf16, #tpu.memory_space<vmem>>, vector<1x900x128xbf16>
    %940 = vector.shape_cast %939 : vector<1x900x128xbf16> to vector<900x128xbf16>
    %cst_754 = arith.constant dense<0.000000e+00> : vector<2x128xf32>
    %941 = tpu.matmul %938, %940, %cst_754 {dimension_numbers = #tpu.dot_dimension_numbers<[1], [0], [0], [1], [0, 0, 1, 1], [], []>} : vector<2x900xbf16>, vector<900x128xbf16>, vector<2x128xf32> -> vector<2x128xf32>
    %942 = arith.addf %785, %941 : vector<2x128xf32>
    %c0_755 = arith.constant 0 : index
    %c0_756 = arith.constant 0 : index
    %c0_757 = arith.constant 0 : index
    %943 = vector.load %arg0[%c0_755, %c0_756, %c0_757] : memref<25x2x900xf32, #tpu.memory_space<vmem>>, vector<1x2x900xf32>
    %944 = vector.shape_cast %943 : vector<1x2x900xf32> to vector<2x900xf32>
    %c6_758 = arith.constant 6 : index
    %c0_759 = arith.constant 0 : index
    %945 = memref.load %arg1[%c6_758, %c0_759] : memref<8x25xf32, #tpu.memory_space<smem>>
    %946 = vector.broadcast %945 : f32 to vector<2x900xf32>
    %947 = arith.mulf %944, %946 : vector<2x900xf32>
    %c1_760 = arith.constant 1 : index
    %c0_761 = arith.constant 0 : index
    %c0_762 = arith.constant 0 : index
    %948 = vector.load %arg0[%c1_760, %c0_761, %c0_762] : memref<25x2x900xf32, #tpu.memory_space<vmem>>, vector<1x2x900xf32>
    %949 = vector.shape_cast %948 : vector<1x2x900xf32> to vector<2x900xf32>
    %c6_763 = arith.constant 6 : index
    %c1_764 = arith.constant 1 : index
    %950 = memref.load %arg1[%c6_763, %c1_764] : memref<8x25xf32, #tpu.memory_space<smem>>
    %951 = vector.broadcast %950 : f32 to vector<2x900xf32>
    %952 = arith.mulf %949, %951 : vector<2x900xf32>
    %953 = arith.addf %947, %952 : vector<2x900xf32>
    %c2_765 = arith.constant 2 : index
    %c0_766 = arith.constant 0 : index
    %c0_767 = arith.constant 0 : index
    %954 = vector.load %arg0[%c2_765, %c0_766, %c0_767] : memref<25x2x900xf32, #tpu.memory_space<vmem>>, vector<1x2x900xf32>
    %955 = vector.shape_cast %954 : vector<1x2x900xf32> to vector<2x900xf32>
    %c6_768 = arith.constant 6 : index
    %c2_769 = arith.constant 2 : index
    %956 = memref.load %arg1[%c6_768, %c2_769] : memref<8x25xf32, #tpu.memory_space<smem>>
    %957 = vector.broadcast %956 : f32 to vector<2x900xf32>
    %958 = arith.mulf %955, %957 : vector<2x900xf32>
    %959 = arith.addf %953, %958 : vector<2x900xf32>
    %c3_770 = arith.constant 3 : index
    %c0_771 = arith.constant 0 : index
    %c0_772 = arith.constant 0 : index
    %960 = vector.load %arg0[%c3_770, %c0_771, %c0_772] : memref<25x2x900xf32, #tpu.memory_space<vmem>>, vector<1x2x900xf32>
    %961 = vector.shape_cast %960 : vector<1x2x900xf32> to vector<2x900xf32>
    %c6_773 = arith.constant 6 : index
    %c3_774 = arith.constant 3 : index
    %962 = memref.load %arg1[%c6_773, %c3_774] : memref<8x25xf32, #tpu.memory_space<smem>>
    %963 = vector.broadcast %962 : f32 to vector<2x900xf32>
    %964 = arith.mulf %961, %963 : vector<2x900xf32>
    %965 = arith.addf %959, %964 : vector<2x900xf32>
    %c4_775 = arith.constant 4 : index
    %c0_776 = arith.constant 0 : index
    %c0_777 = arith.constant 0 : index
    %966 = vector.load %arg0[%c4_775, %c0_776, %c0_777] : memref<25x2x900xf32, #tpu.memory_space<vmem>>, vector<1x2x900xf32>
    %967 = vector.shape_cast %966 : vector<1x2x900xf32> to vector<2x900xf32>
    %c6_778 = arith.constant 6 : index
    %c4_779 = arith.constant 4 : index
    %968 = memref.load %arg1[%c6_778, %c4_779] : memref<8x25xf32, #tpu.memory_space<smem>>
    %969 = vector.broadcast %968 : f32 to vector<2x900xf32>
    %970 = arith.mulf %967, %969 : vector<2x900xf32>
    %971 = arith.addf %965, %970 : vector<2x900xf32>
    %c5_780 = arith.constant 5 : index
    %c0_781 = arith.constant 0 : index
    %c0_782 = arith.constant 0 : index
    %972 = vector.load %arg0[%c5_780, %c0_781, %c0_782] : memref<25x2x900xf32, #tpu.memory_space<vmem>>, vector<1x2x900xf32>
    %973 = vector.shape_cast %972 : vector<1x2x900xf32> to vector<2x900xf32>
    %c6_783 = arith.constant 6 : index
    %c5_784 = arith.constant 5 : index
    %974 = memref.load %arg1[%c6_783, %c5_784] : memref<8x25xf32, #tpu.memory_space<smem>>
    %975 = vector.broadcast %974 : f32 to vector<2x900xf32>
    %976 = arith.mulf %973, %975 : vector<2x900xf32>
    %977 = arith.addf %971, %976 : vector<2x900xf32>
    %c6_785 = arith.constant 6 : index
    %c0_786 = arith.constant 0 : index
    %c0_787 = arith.constant 0 : index
    %978 = vector.load %arg0[%c6_785, %c0_786, %c0_787] : memref<25x2x900xf32, #tpu.memory_space<vmem>>, vector<1x2x900xf32>
    %979 = vector.shape_cast %978 : vector<1x2x900xf32> to vector<2x900xf32>
    %c6_788 = arith.constant 6 : index
    %c6_789 = arith.constant 6 : index
    %980 = memref.load %arg1[%c6_788, %c6_789] : memref<8x25xf32, #tpu.memory_space<smem>>
    %981 = vector.broadcast %980 : f32 to vector<2x900xf32>
    %982 = arith.mulf %979, %981 : vector<2x900xf32>
    %983 = arith.addf %977, %982 : vector<2x900xf32>
    %c7_790 = arith.constant 7 : index
    %c0_791 = arith.constant 0 : index
    %c0_792 = arith.constant 0 : index
    %984 = vector.load %arg0[%c7_790, %c0_791, %c0_792] : memref<25x2x900xf32, #tpu.memory_space<vmem>>, vector<1x2x900xf32>
    %985 = vector.shape_cast %984 : vector<1x2x900xf32> to vector<2x900xf32>
    %c6_793 = arith.constant 6 : index
    %c7_794 = arith.constant 7 : index
    %986 = memref.load %arg1[%c6_793, %c7_794] : memref<8x25xf32, #tpu.memory_space<smem>>
    %987 = vector.broadcast %986 : f32 to vector<2x900xf32>
    %988 = arith.mulf %985, %987 : vector<2x900xf32>
    %989 = arith.addf %983, %988 : vector<2x900xf32>
    %c8_795 = arith.constant 8 : index
    %c0_796 = arith.constant 0 : index
    %c0_797 = arith.constant 0 : index
    %990 = vector.load %arg0[%c8_795, %c0_796, %c0_797] : memref<25x2x900xf32, #tpu.memory_space<vmem>>, vector<1x2x900xf32>
    %991 = vector.shape_cast %990 : vector<1x2x900xf32> to vector<2x900xf32>
    %c6_798 = arith.constant 6 : index
    %c8_799 = arith.constant 8 : index
    %992 = memref.load %arg1[%c6_798, %c8_799] : memref<8x25xf32, #tpu.memory_space<smem>>
    %993 = vector.broadcast %992 : f32 to vector<2x900xf32>
    %994 = arith.mulf %991, %993 : vector<2x900xf32>
    %995 = arith.addf %989, %994 : vector<2x900xf32>
    %c9_800 = arith.constant 9 : index
    %c0_801 = arith.constant 0 : index
    %c0_802 = arith.constant 0 : index
    %996 = vector.load %arg0[%c9_800, %c0_801, %c0_802] : memref<25x2x900xf32, #tpu.memory_space<vmem>>, vector<1x2x900xf32>
    %997 = vector.shape_cast %996 : vector<1x2x900xf32> to vector<2x900xf32>
    %c6_803 = arith.constant 6 : index
    %c9_804 = arith.constant 9 : index
    %998 = memref.load %arg1[%c6_803, %c9_804] : memref<8x25xf32, #tpu.memory_space<smem>>
    %999 = vector.broadcast %998 : f32 to vector<2x900xf32>
    %1000 = arith.mulf %997, %999 : vector<2x900xf32>
    %1001 = arith.addf %995, %1000 : vector<2x900xf32>
    %c10_805 = arith.constant 10 : index
    %c0_806 = arith.constant 0 : index
    %c0_807 = arith.constant 0 : index
    %1002 = vector.load %arg0[%c10_805, %c0_806, %c0_807] : memref<25x2x900xf32, #tpu.memory_space<vmem>>, vector<1x2x900xf32>
    %1003 = vector.shape_cast %1002 : vector<1x2x900xf32> to vector<2x900xf32>
    %c6_808 = arith.constant 6 : index
    %c10_809 = arith.constant 10 : index
    %1004 = memref.load %arg1[%c6_808, %c10_809] : memref<8x25xf32, #tpu.memory_space<smem>>
    %1005 = vector.broadcast %1004 : f32 to vector<2x900xf32>
    %1006 = arith.mulf %1003, %1005 : vector<2x900xf32>
    %1007 = arith.addf %1001, %1006 : vector<2x900xf32>
    %c11_810 = arith.constant 11 : index
    %c0_811 = arith.constant 0 : index
    %c0_812 = arith.constant 0 : index
    %1008 = vector.load %arg0[%c11_810, %c0_811, %c0_812] : memref<25x2x900xf32, #tpu.memory_space<vmem>>, vector<1x2x900xf32>
    %1009 = vector.shape_cast %1008 : vector<1x2x900xf32> to vector<2x900xf32>
    %c6_813 = arith.constant 6 : index
    %c11_814 = arith.constant 11 : index
    %1010 = memref.load %arg1[%c6_813, %c11_814] : memref<8x25xf32, #tpu.memory_space<smem>>
    %1011 = vector.broadcast %1010 : f32 to vector<2x900xf32>
    %1012 = arith.mulf %1009, %1011 : vector<2x900xf32>
    %1013 = arith.addf %1007, %1012 : vector<2x900xf32>
    %c12_815 = arith.constant 12 : index
    %c0_816 = arith.constant 0 : index
    %c0_817 = arith.constant 0 : index
    %1014 = vector.load %arg0[%c12_815, %c0_816, %c0_817] : memref<25x2x900xf32, #tpu.memory_space<vmem>>, vector<1x2x900xf32>
    %1015 = vector.shape_cast %1014 : vector<1x2x900xf32> to vector<2x900xf32>
    %c6_818 = arith.constant 6 : index
    %c12_819 = arith.constant 12 : index
    %1016 = memref.load %arg1[%c6_818, %c12_819] : memref<8x25xf32, #tpu.memory_space<smem>>
    %1017 = vector.broadcast %1016 : f32 to vector<2x900xf32>
    %1018 = arith.mulf %1015, %1017 : vector<2x900xf32>
    %1019 = arith.addf %1013, %1018 : vector<2x900xf32>
    %c13_820 = arith.constant 13 : index
    %c0_821 = arith.constant 0 : index
    %c0_822 = arith.constant 0 : index
    %1020 = vector.load %arg0[%c13_820, %c0_821, %c0_822] : memref<25x2x900xf32, #tpu.memory_space<vmem>>, vector<1x2x900xf32>
    %1021 = vector.shape_cast %1020 : vector<1x2x900xf32> to vector<2x900xf32>
    %c6_823 = arith.constant 6 : index
    %c13_824 = arith.constant 13 : index
    %1022 = memref.load %arg1[%c6_823, %c13_824] : memref<8x25xf32, #tpu.memory_space<smem>>
    %1023 = vector.broadcast %1022 : f32 to vector<2x900xf32>
    %1024 = arith.mulf %1021, %1023 : vector<2x900xf32>
    %1025 = arith.addf %1019, %1024 : vector<2x900xf32>
    %c14_825 = arith.constant 14 : index
    %c0_826 = arith.constant 0 : index
    %c0_827 = arith.constant 0 : index
    %1026 = vector.load %arg0[%c14_825, %c0_826, %c0_827] : memref<25x2x900xf32, #tpu.memory_space<vmem>>, vector<1x2x900xf32>
    %1027 = vector.shape_cast %1026 : vector<1x2x900xf32> to vector<2x900xf32>
    %c6_828 = arith.constant 6 : index
    %c14_829 = arith.constant 14 : index
    %1028 = memref.load %arg1[%c6_828, %c14_829] : memref<8x25xf32, #tpu.memory_space<smem>>
    %1029 = vector.broadcast %1028 : f32 to vector<2x900xf32>
    %1030 = arith.mulf %1027, %1029 : vector<2x900xf32>
    %1031 = arith.addf %1025, %1030 : vector<2x900xf32>
    %c15_830 = arith.constant 15 : index
    %c0_831 = arith.constant 0 : index
    %c0_832 = arith.constant 0 : index
    %1032 = vector.load %arg0[%c15_830, %c0_831, %c0_832] : memref<25x2x900xf32, #tpu.memory_space<vmem>>, vector<1x2x900xf32>
    %1033 = vector.shape_cast %1032 : vector<1x2x900xf32> to vector<2x900xf32>
    %c6_833 = arith.constant 6 : index
    %c15_834 = arith.constant 15 : index
    %1034 = memref.load %arg1[%c6_833, %c15_834] : memref<8x25xf32, #tpu.memory_space<smem>>
    %1035 = vector.broadcast %1034 : f32 to vector<2x900xf32>
    %1036 = arith.mulf %1033, %1035 : vector<2x900xf32>
    %1037 = arith.addf %1031, %1036 : vector<2x900xf32>
    %c16_835 = arith.constant 16 : index
    %c0_836 = arith.constant 0 : index
    %c0_837 = arith.constant 0 : index
    %1038 = vector.load %arg0[%c16_835, %c0_836, %c0_837] : memref<25x2x900xf32, #tpu.memory_space<vmem>>, vector<1x2x900xf32>
    %1039 = vector.shape_cast %1038 : vector<1x2x900xf32> to vector<2x900xf32>
    %c6_838 = arith.constant 6 : index
    %c16_839 = arith.constant 16 : index
    %1040 = memref.load %arg1[%c6_838, %c16_839] : memref<8x25xf32, #tpu.memory_space<smem>>
    %1041 = vector.broadcast %1040 : f32 to vector<2x900xf32>
    %1042 = arith.mulf %1039, %1041 : vector<2x900xf32>
    %1043 = arith.addf %1037, %1042 : vector<2x900xf32>
    %c17_840 = arith.constant 17 : index
    %c0_841 = arith.constant 0 : index
    %c0_842 = arith.constant 0 : index
    %1044 = vector.load %arg0[%c17_840, %c0_841, %c0_842] : memref<25x2x900xf32, #tpu.memory_space<vmem>>, vector<1x2x900xf32>
    %1045 = vector.shape_cast %1044 : vector<1x2x900xf32> to vector<2x900xf32>
    %c6_843 = arith.constant 6 : index
    %c17_844 = arith.constant 17 : index
    %1046 = memref.load %arg1[%c6_843, %c17_844] : memref<8x25xf32, #tpu.memory_space<smem>>
    %1047 = vector.broadcast %1046 : f32 to vector<2x900xf32>
    %1048 = arith.mulf %1045, %1047 : vector<2x900xf32>
    %1049 = arith.addf %1043, %1048 : vector<2x900xf32>
    %c18_845 = arith.constant 18 : index
    %c0_846 = arith.constant 0 : index
    %c0_847 = arith.constant 0 : index
    %1050 = vector.load %arg0[%c18_845, %c0_846, %c0_847] : memref<25x2x900xf32, #tpu.memory_space<vmem>>, vector<1x2x900xf32>
    %1051 = vector.shape_cast %1050 : vector<1x2x900xf32> to vector<2x900xf32>
    %c6_848 = arith.constant 6 : index
    %c18_849 = arith.constant 18 : index
    %1052 = memref.load %arg1[%c6_848, %c18_849] : memref<8x25xf32, #tpu.memory_space<smem>>
    %1053 = vector.broadcast %1052 : f32 to vector<2x900xf32>
    %1054 = arith.mulf %1051, %1053 : vector<2x900xf32>
    %1055 = arith.addf %1049, %1054 : vector<2x900xf32>
    %c19_850 = arith.constant 19 : index
    %c0_851 = arith.constant 0 : index
    %c0_852 = arith.constant 0 : index
    %1056 = vector.load %arg0[%c19_850, %c0_851, %c0_852] : memref<25x2x900xf32, #tpu.memory_space<vmem>>, vector<1x2x900xf32>
    %1057 = vector.shape_cast %1056 : vector<1x2x900xf32> to vector<2x900xf32>
    %c6_853 = arith.constant 6 : index
    %c19_854 = arith.constant 19 : index
    %1058 = memref.load %arg1[%c6_853, %c19_854] : memref<8x25xf32, #tpu.memory_space<smem>>
    %1059 = vector.broadcast %1058 : f32 to vector<2x900xf32>
    %1060 = arith.mulf %1057, %1059 : vector<2x900xf32>
    %1061 = arith.addf %1055, %1060 : vector<2x900xf32>
    %c20_855 = arith.constant 20 : index
    %c0_856 = arith.constant 0 : index
    %c0_857 = arith.constant 0 : index
    %1062 = vector.load %arg0[%c20_855, %c0_856, %c0_857] : memref<25x2x900xf32, #tpu.memory_space<vmem>>, vector<1x2x900xf32>
    %1063 = vector.shape_cast %1062 : vector<1x2x900xf32> to vector<2x900xf32>
    %c6_858 = arith.constant 6 : index
    %c20_859 = arith.constant 20 : index
    %1064 = memref.load %arg1[%c6_858, %c20_859] : memref<8x25xf32, #tpu.memory_space<smem>>
    %1065 = vector.broadcast %1064 : f32 to vector<2x900xf32>
    %1066 = arith.mulf %1063, %1065 : vector<2x900xf32>
    %1067 = arith.addf %1061, %1066 : vector<2x900xf32>
    %c21_860 = arith.constant 21 : index
    %c0_861 = arith.constant 0 : index
    %c0_862 = arith.constant 0 : index
    %1068 = vector.load %arg0[%c21_860, %c0_861, %c0_862] : memref<25x2x900xf32, #tpu.memory_space<vmem>>, vector<1x2x900xf32>
    %1069 = vector.shape_cast %1068 : vector<1x2x900xf32> to vector<2x900xf32>
    %c6_863 = arith.constant 6 : index
    %c21_864 = arith.constant 21 : index
    %1070 = memref.load %arg1[%c6_863, %c21_864] : memref<8x25xf32, #tpu.memory_space<smem>>
    %1071 = vector.broadcast %1070 : f32 to vector<2x900xf32>
    %1072 = arith.mulf %1069, %1071 : vector<2x900xf32>
    %1073 = arith.addf %1067, %1072 : vector<2x900xf32>
    %c22_865 = arith.constant 22 : index
    %c0_866 = arith.constant 0 : index
    %c0_867 = arith.constant 0 : index
    %1074 = vector.load %arg0[%c22_865, %c0_866, %c0_867] : memref<25x2x900xf32, #tpu.memory_space<vmem>>, vector<1x2x900xf32>
    %1075 = vector.shape_cast %1074 : vector<1x2x900xf32> to vector<2x900xf32>
    %c6_868 = arith.constant 6 : index
    %c22_869 = arith.constant 22 : index
    %1076 = memref.load %arg1[%c6_868, %c22_869] : memref<8x25xf32, #tpu.memory_space<smem>>
    %1077 = vector.broadcast %1076 : f32 to vector<2x900xf32>
    %1078 = arith.mulf %1075, %1077 : vector<2x900xf32>
    %1079 = arith.addf %1073, %1078 : vector<2x900xf32>
    %c23_870 = arith.constant 23 : index
    %c0_871 = arith.constant 0 : index
    %c0_872 = arith.constant 0 : index
    %1080 = vector.load %arg0[%c23_870, %c0_871, %c0_872] : memref<25x2x900xf32, #tpu.memory_space<vmem>>, vector<1x2x900xf32>
    %1081 = vector.shape_cast %1080 : vector<1x2x900xf32> to vector<2x900xf32>
    %c6_873 = arith.constant 6 : index
    %c23_874 = arith.constant 23 : index
    %1082 = memref.load %arg1[%c6_873, %c23_874] : memref<8x25xf32, #tpu.memory_space<smem>>
    %1083 = vector.broadcast %1082 : f32 to vector<2x900xf32>
    %1084 = arith.mulf %1081, %1083 : vector<2x900xf32>
    %1085 = arith.addf %1079, %1084 : vector<2x900xf32>
    %c24_875 = arith.constant 24 : index
    %c0_876 = arith.constant 0 : index
    %c0_877 = arith.constant 0 : index
    %1086 = vector.load %arg0[%c24_875, %c0_876, %c0_877] : memref<25x2x900xf32, #tpu.memory_space<vmem>>, vector<1x2x900xf32>
    %1087 = vector.shape_cast %1086 : vector<1x2x900xf32> to vector<2x900xf32>
    %c6_878 = arith.constant 6 : index
    %c24_879 = arith.constant 24 : index
    %1088 = memref.load %arg1[%c6_878, %c24_879] : memref<8x25xf32, #tpu.memory_space<smem>>
    %1089 = vector.broadcast %1088 : f32 to vector<2x900xf32>
    %1090 = arith.mulf %1087, %1089 : vector<2x900xf32>
    %1091 = arith.addf %1085, %1090 : vector<2x900xf32>
    %c6_880 = arith.constant 6 : index
    %1092 = memref.load %arg2[%c6_880] : memref<8xf32, #tpu.memory_space<smem>>
    %1093 = vector.broadcast %1092 : f32 to vector<2x900xf32>
    %1094 = arith.addf %1091, %1093 : vector<2x900xf32>
    %1095 = arith.truncf %1094 : vector<2x900xf32> to vector<2x900xbf16>
    %c6_881 = arith.constant 6 : index
    %c0_882 = arith.constant 0 : index
    %c0_883 = arith.constant 0 : index
    %1096 = vector.load %arg3[%c6_881, %c0_882, %c0_883] : memref<8x900x128xbf16, #tpu.memory_space<vmem>>, vector<1x900x128xbf16>
    %1097 = vector.shape_cast %1096 : vector<1x900x128xbf16> to vector<900x128xbf16>
    %cst_884 = arith.constant dense<0.000000e+00> : vector<2x128xf32>
    %1098 = tpu.matmul %1095, %1097, %cst_884 {dimension_numbers = #tpu.dot_dimension_numbers<[1], [0], [0], [1], [0, 0, 1, 1], [], []>} : vector<2x900xbf16>, vector<900x128xbf16>, vector<2x128xf32> -> vector<2x128xf32>
    %1099 = arith.addf %942, %1098 : vector<2x128xf32>
    %c0_885 = arith.constant 0 : index
    %c0_886 = arith.constant 0 : index
    %c0_887 = arith.constant 0 : index
    %1100 = vector.load %arg0[%c0_885, %c0_886, %c0_887] : memref<25x2x900xf32, #tpu.memory_space<vmem>>, vector<1x2x900xf32>
    %1101 = vector.shape_cast %1100 : vector<1x2x900xf32> to vector<2x900xf32>
    %c7_888 = arith.constant 7 : index
    %c0_889 = arith.constant 0 : index
    %1102 = memref.load %arg1[%c7_888, %c0_889] : memref<8x25xf32, #tpu.memory_space<smem>>
    %1103 = vector.broadcast %1102 : f32 to vector<2x900xf32>
    %1104 = arith.mulf %1101, %1103 : vector<2x900xf32>
    %c1_890 = arith.constant 1 : index
    %c0_891 = arith.constant 0 : index
    %c0_892 = arith.constant 0 : index
    %1105 = vector.load %arg0[%c1_890, %c0_891, %c0_892] : memref<25x2x900xf32, #tpu.memory_space<vmem>>, vector<1x2x900xf32>
    %1106 = vector.shape_cast %1105 : vector<1x2x900xf32> to vector<2x900xf32>
    %c7_893 = arith.constant 7 : index
    %c1_894 = arith.constant 1 : index
    %1107 = memref.load %arg1[%c7_893, %c1_894] : memref<8x25xf32, #tpu.memory_space<smem>>
    %1108 = vector.broadcast %1107 : f32 to vector<2x900xf32>
    %1109 = arith.mulf %1106, %1108 : vector<2x900xf32>
    %1110 = arith.addf %1104, %1109 : vector<2x900xf32>
    %c2_895 = arith.constant 2 : index
    %c0_896 = arith.constant 0 : index
    %c0_897 = arith.constant 0 : index
    %1111 = vector.load %arg0[%c2_895, %c0_896, %c0_897] : memref<25x2x900xf32, #tpu.memory_space<vmem>>, vector<1x2x900xf32>
    %1112 = vector.shape_cast %1111 : vector<1x2x900xf32> to vector<2x900xf32>
    %c7_898 = arith.constant 7 : index
    %c2_899 = arith.constant 2 : index
    %1113 = memref.load %arg1[%c7_898, %c2_899] : memref<8x25xf32, #tpu.memory_space<smem>>
    %1114 = vector.broadcast %1113 : f32 to vector<2x900xf32>
    %1115 = arith.mulf %1112, %1114 : vector<2x900xf32>
    %1116 = arith.addf %1110, %1115 : vector<2x900xf32>
    %c3_900 = arith.constant 3 : index
    %c0_901 = arith.constant 0 : index
    %c0_902 = arith.constant 0 : index
    %1117 = vector.load %arg0[%c3_900, %c0_901, %c0_902] : memref<25x2x900xf32, #tpu.memory_space<vmem>>, vector<1x2x900xf32>
    %1118 = vector.shape_cast %1117 : vector<1x2x900xf32> to vector<2x900xf32>
    %c7_903 = arith.constant 7 : index
    %c3_904 = arith.constant 3 : index
    %1119 = memref.load %arg1[%c7_903, %c3_904] : memref<8x25xf32, #tpu.memory_space<smem>>
    %1120 = vector.broadcast %1119 : f32 to vector<2x900xf32>
    %1121 = arith.mulf %1118, %1120 : vector<2x900xf32>
    %1122 = arith.addf %1116, %1121 : vector<2x900xf32>
    %c4_905 = arith.constant 4 : index
    %c0_906 = arith.constant 0 : index
    %c0_907 = arith.constant 0 : index
    %1123 = vector.load %arg0[%c4_905, %c0_906, %c0_907] : memref<25x2x900xf32, #tpu.memory_space<vmem>>, vector<1x2x900xf32>
    %1124 = vector.shape_cast %1123 : vector<1x2x900xf32> to vector<2x900xf32>
    %c7_908 = arith.constant 7 : index
    %c4_909 = arith.constant 4 : index
    %1125 = memref.load %arg1[%c7_908, %c4_909] : memref<8x25xf32, #tpu.memory_space<smem>>
    %1126 = vector.broadcast %1125 : f32 to vector<2x900xf32>
    %1127 = arith.mulf %1124, %1126 : vector<2x900xf32>
    %1128 = arith.addf %1122, %1127 : vector<2x900xf32>
    %c5_910 = arith.constant 5 : index
    %c0_911 = arith.constant 0 : index
    %c0_912 = arith.constant 0 : index
    %1129 = vector.load %arg0[%c5_910, %c0_911, %c0_912] : memref<25x2x900xf32, #tpu.memory_space<vmem>>, vector<1x2x900xf32>
    %1130 = vector.shape_cast %1129 : vector<1x2x900xf32> to vector<2x900xf32>
    %c7_913 = arith.constant 7 : index
    %c5_914 = arith.constant 5 : index
    %1131 = memref.load %arg1[%c7_913, %c5_914] : memref<8x25xf32, #tpu.memory_space<smem>>
    %1132 = vector.broadcast %1131 : f32 to vector<2x900xf32>
    %1133 = arith.mulf %1130, %1132 : vector<2x900xf32>
    %1134 = arith.addf %1128, %1133 : vector<2x900xf32>
    %c6_915 = arith.constant 6 : index
    %c0_916 = arith.constant 0 : index
    %c0_917 = arith.constant 0 : index
    %1135 = vector.load %arg0[%c6_915, %c0_916, %c0_917] : memref<25x2x900xf32, #tpu.memory_space<vmem>>, vector<1x2x900xf32>
    %1136 = vector.shape_cast %1135 : vector<1x2x900xf32> to vector<2x900xf32>
    %c7_918 = arith.constant 7 : index
    %c6_919 = arith.constant 6 : index
    %1137 = memref.load %arg1[%c7_918, %c6_919] : memref<8x25xf32, #tpu.memory_space<smem>>
    %1138 = vector.broadcast %1137 : f32 to vector<2x900xf32>
    %1139 = arith.mulf %1136, %1138 : vector<2x900xf32>
    %1140 = arith.addf %1134, %1139 : vector<2x900xf32>
    %c7_920 = arith.constant 7 : index
    %c0_921 = arith.constant 0 : index
    %c0_922 = arith.constant 0 : index
    %1141 = vector.load %arg0[%c7_920, %c0_921, %c0_922] : memref<25x2x900xf32, #tpu.memory_space<vmem>>, vector<1x2x900xf32>
    %1142 = vector.shape_cast %1141 : vector<1x2x900xf32> to vector<2x900xf32>
    %c7_923 = arith.constant 7 : index
    %c7_924 = arith.constant 7 : index
    %1143 = memref.load %arg1[%c7_923, %c7_924] : memref<8x25xf32, #tpu.memory_space<smem>>
    %1144 = vector.broadcast %1143 : f32 to vector<2x900xf32>
    %1145 = arith.mulf %1142, %1144 : vector<2x900xf32>
    %1146 = arith.addf %1140, %1145 : vector<2x900xf32>
    %c8_925 = arith.constant 8 : index
    %c0_926 = arith.constant 0 : index
    %c0_927 = arith.constant 0 : index
    %1147 = vector.load %arg0[%c8_925, %c0_926, %c0_927] : memref<25x2x900xf32, #tpu.memory_space<vmem>>, vector<1x2x900xf32>
    %1148 = vector.shape_cast %1147 : vector<1x2x900xf32> to vector<2x900xf32>
    %c7_928 = arith.constant 7 : index
    %c8_929 = arith.constant 8 : index
    %1149 = memref.load %arg1[%c7_928, %c8_929] : memref<8x25xf32, #tpu.memory_space<smem>>
    %1150 = vector.broadcast %1149 : f32 to vector<2x900xf32>
    %1151 = arith.mulf %1148, %1150 : vector<2x900xf32>
    %1152 = arith.addf %1146, %1151 : vector<2x900xf32>
    %c9_930 = arith.constant 9 : index
    %c0_931 = arith.constant 0 : index
    %c0_932 = arith.constant 0 : index
    %1153 = vector.load %arg0[%c9_930, %c0_931, %c0_932] : memref<25x2x900xf32, #tpu.memory_space<vmem>>, vector<1x2x900xf32>
    %1154 = vector.shape_cast %1153 : vector<1x2x900xf32> to vector<2x900xf32>
    %c7_933 = arith.constant 7 : index
    %c9_934 = arith.constant 9 : index
    %1155 = memref.load %arg1[%c7_933, %c9_934] : memref<8x25xf32, #tpu.memory_space<smem>>
    %1156 = vector.broadcast %1155 : f32 to vector<2x900xf32>
    %1157 = arith.mulf %1154, %1156 : vector<2x900xf32>
    %1158 = arith.addf %1152, %1157 : vector<2x900xf32>
    %c10_935 = arith.constant 10 : index
    %c0_936 = arith.constant 0 : index
    %c0_937 = arith.constant 0 : index
    %1159 = vector.load %arg0[%c10_935, %c0_936, %c0_937] : memref<25x2x900xf32, #tpu.memory_space<vmem>>, vector<1x2x900xf32>
    %1160 = vector.shape_cast %1159 : vector<1x2x900xf32> to vector<2x900xf32>
    %c7_938 = arith.constant 7 : index
    %c10_939 = arith.constant 10 : index
    %1161 = memref.load %arg1[%c7_938, %c10_939] : memref<8x25xf32, #tpu.memory_space<smem>>
    %1162 = vector.broadcast %1161 : f32 to vector<2x900xf32>
    %1163 = arith.mulf %1160, %1162 : vector<2x900xf32>
    %1164 = arith.addf %1158, %1163 : vector<2x900xf32>
    %c11_940 = arith.constant 11 : index
    %c0_941 = arith.constant 0 : index
    %c0_942 = arith.constant 0 : index
    %1165 = vector.load %arg0[%c11_940, %c0_941, %c0_942] : memref<25x2x900xf32, #tpu.memory_space<vmem>>, vector<1x2x900xf32>
    %1166 = vector.shape_cast %1165 : vector<1x2x900xf32> to vector<2x900xf32>
    %c7_943 = arith.constant 7 : index
    %c11_944 = arith.constant 11 : index
    %1167 = memref.load %arg1[%c7_943, %c11_944] : memref<8x25xf32, #tpu.memory_space<smem>>
    %1168 = vector.broadcast %1167 : f32 to vector<2x900xf32>
    %1169 = arith.mulf %1166, %1168 : vector<2x900xf32>
    %1170 = arith.addf %1164, %1169 : vector<2x900xf32>
    %c12_945 = arith.constant 12 : index
    %c0_946 = arith.constant 0 : index
    %c0_947 = arith.constant 0 : index
    %1171 = vector.load %arg0[%c12_945, %c0_946, %c0_947] : memref<25x2x900xf32, #tpu.memory_space<vmem>>, vector<1x2x900xf32>
    %1172 = vector.shape_cast %1171 : vector<1x2x900xf32> to vector<2x900xf32>
    %c7_948 = arith.constant 7 : index
    %c12_949 = arith.constant 12 : index
    %1173 = memref.load %arg1[%c7_948, %c12_949] : memref<8x25xf32, #tpu.memory_space<smem>>
    %1174 = vector.broadcast %1173 : f32 to vector<2x900xf32>
    %1175 = arith.mulf %1172, %1174 : vector<2x900xf32>
    %1176 = arith.addf %1170, %1175 : vector<2x900xf32>
    %c13_950 = arith.constant 13 : index
    %c0_951 = arith.constant 0 : index
    %c0_952 = arith.constant 0 : index
    %1177 = vector.load %arg0[%c13_950, %c0_951, %c0_952] : memref<25x2x900xf32, #tpu.memory_space<vmem>>, vector<1x2x900xf32>
    %1178 = vector.shape_cast %1177 : vector<1x2x900xf32> to vector<2x900xf32>
    %c7_953 = arith.constant 7 : index
    %c13_954 = arith.constant 13 : index
    %1179 = memref.load %arg1[%c7_953, %c13_954] : memref<8x25xf32, #tpu.memory_space<smem>>
    %1180 = vector.broadcast %1179 : f32 to vector<2x900xf32>
    %1181 = arith.mulf %1178, %1180 : vector<2x900xf32>
    %1182 = arith.addf %1176, %1181 : vector<2x900xf32>
    %c14_955 = arith.constant 14 : index
    %c0_956 = arith.constant 0 : index
    %c0_957 = arith.constant 0 : index
    %1183 = vector.load %arg0[%c14_955, %c0_956, %c0_957] : memref<25x2x900xf32, #tpu.memory_space<vmem>>, vector<1x2x900xf32>
    %1184 = vector.shape_cast %1183 : vector<1x2x900xf32> to vector<2x900xf32>
    %c7_958 = arith.constant 7 : index
    %c14_959 = arith.constant 14 : index
    %1185 = memref.load %arg1[%c7_958, %c14_959] : memref<8x25xf32, #tpu.memory_space<smem>>
    %1186 = vector.broadcast %1185 : f32 to vector<2x900xf32>
    %1187 = arith.mulf %1184, %1186 : vector<2x900xf32>
    %1188 = arith.addf %1182, %1187 : vector<2x900xf32>
    %c15_960 = arith.constant 15 : index
    %c0_961 = arith.constant 0 : index
    %c0_962 = arith.constant 0 : index
    %1189 = vector.load %arg0[%c15_960, %c0_961, %c0_962] : memref<25x2x900xf32, #tpu.memory_space<vmem>>, vector<1x2x900xf32>
    %1190 = vector.shape_cast %1189 : vector<1x2x900xf32> to vector<2x900xf32>
    %c7_963 = arith.constant 7 : index
    %c15_964 = arith.constant 15 : index
    %1191 = memref.load %arg1[%c7_963, %c15_964] : memref<8x25xf32, #tpu.memory_space<smem>>
    %1192 = vector.broadcast %1191 : f32 to vector<2x900xf32>
    %1193 = arith.mulf %1190, %1192 : vector<2x900xf32>
    %1194 = arith.addf %1188, %1193 : vector<2x900xf32>
    %c16_965 = arith.constant 16 : index
    %c0_966 = arith.constant 0 : index
    %c0_967 = arith.constant 0 : index
    %1195 = vector.load %arg0[%c16_965, %c0_966, %c0_967] : memref<25x2x900xf32, #tpu.memory_space<vmem>>, vector<1x2x900xf32>
    %1196 = vector.shape_cast %1195 : vector<1x2x900xf32> to vector<2x900xf32>
    %c7_968 = arith.constant 7 : index
    %c16_969 = arith.constant 16 : index
    %1197 = memref.load %arg1[%c7_968, %c16_969] : memref<8x25xf32, #tpu.memory_space<smem>>
    %1198 = vector.broadcast %1197 : f32 to vector<2x900xf32>
    %1199 = arith.mulf %1196, %1198 : vector<2x900xf32>
    %1200 = arith.addf %1194, %1199 : vector<2x900xf32>
    %c17_970 = arith.constant 17 : index
    %c0_971 = arith.constant 0 : index
    %c0_972 = arith.constant 0 : index
    %1201 = vector.load %arg0[%c17_970, %c0_971, %c0_972] : memref<25x2x900xf32, #tpu.memory_space<vmem>>, vector<1x2x900xf32>
    %1202 = vector.shape_cast %1201 : vector<1x2x900xf32> to vector<2x900xf32>
    %c7_973 = arith.constant 7 : index
    %c17_974 = arith.constant 17 : index
    %1203 = memref.load %arg1[%c7_973, %c17_974] : memref<8x25xf32, #tpu.memory_space<smem>>
    %1204 = vector.broadcast %1203 : f32 to vector<2x900xf32>
    %1205 = arith.mulf %1202, %1204 : vector<2x900xf32>
    %1206 = arith.addf %1200, %1205 : vector<2x900xf32>
    %c18_975 = arith.constant 18 : index
    %c0_976 = arith.constant 0 : index
    %c0_977 = arith.constant 0 : index
    %1207 = vector.load %arg0[%c18_975, %c0_976, %c0_977] : memref<25x2x900xf32, #tpu.memory_space<vmem>>, vector<1x2x900xf32>
    %1208 = vector.shape_cast %1207 : vector<1x2x900xf32> to vector<2x900xf32>
    %c7_978 = arith.constant 7 : index
    %c18_979 = arith.constant 18 : index
    %1209 = memref.load %arg1[%c7_978, %c18_979] : memref<8x25xf32, #tpu.memory_space<smem>>
    %1210 = vector.broadcast %1209 : f32 to vector<2x900xf32>
    %1211 = arith.mulf %1208, %1210 : vector<2x900xf32>
    %1212 = arith.addf %1206, %1211 : vector<2x900xf32>
    %c19_980 = arith.constant 19 : index
    %c0_981 = arith.constant 0 : index
    %c0_982 = arith.constant 0 : index
    %1213 = vector.load %arg0[%c19_980, %c0_981, %c0_982] : memref<25x2x900xf32, #tpu.memory_space<vmem>>, vector<1x2x900xf32>
    %1214 = vector.shape_cast %1213 : vector<1x2x900xf32> to vector<2x900xf32>
    %c7_983 = arith.constant 7 : index
    %c19_984 = arith.constant 19 : index
    %1215 = memref.load %arg1[%c7_983, %c19_984] : memref<8x25xf32, #tpu.memory_space<smem>>
    %1216 = vector.broadcast %1215 : f32 to vector<2x900xf32>
    %1217 = arith.mulf %1214, %1216 : vector<2x900xf32>
    %1218 = arith.addf %1212, %1217 : vector<2x900xf32>
    %c20_985 = arith.constant 20 : index
    %c0_986 = arith.constant 0 : index
    %c0_987 = arith.constant 0 : index
    %1219 = vector.load %arg0[%c20_985, %c0_986, %c0_987] : memref<25x2x900xf32, #tpu.memory_space<vmem>>, vector<1x2x900xf32>
    %1220 = vector.shape_cast %1219 : vector<1x2x900xf32> to vector<2x900xf32>
    %c7_988 = arith.constant 7 : index
    %c20_989 = arith.constant 20 : index
    %1221 = memref.load %arg1[%c7_988, %c20_989] : memref<8x25xf32, #tpu.memory_space<smem>>
    %1222 = vector.broadcast %1221 : f32 to vector<2x900xf32>
    %1223 = arith.mulf %1220, %1222 : vector<2x900xf32>
    %1224 = arith.addf %1218, %1223 : vector<2x900xf32>
    %c21_990 = arith.constant 21 : index
    %c0_991 = arith.constant 0 : index
    %c0_992 = arith.constant 0 : index
    %1225 = vector.load %arg0[%c21_990, %c0_991, %c0_992] : memref<25x2x900xf32, #tpu.memory_space<vmem>>, vector<1x2x900xf32>
    %1226 = vector.shape_cast %1225 : vector<1x2x900xf32> to vector<2x900xf32>
    %c7_993 = arith.constant 7 : index
    %c21_994 = arith.constant 21 : index
    %1227 = memref.load %arg1[%c7_993, %c21_994] : memref<8x25xf32, #tpu.memory_space<smem>>
    %1228 = vector.broadcast %1227 : f32 to vector<2x900xf32>
    %1229 = arith.mulf %1226, %1228 : vector<2x900xf32>
    %1230 = arith.addf %1224, %1229 : vector<2x900xf32>
    %c22_995 = arith.constant 22 : index
    %c0_996 = arith.constant 0 : index
    %c0_997 = arith.constant 0 : index
    %1231 = vector.load %arg0[%c22_995, %c0_996, %c0_997] : memref<25x2x900xf32, #tpu.memory_space<vmem>>, vector<1x2x900xf32>
    %1232 = vector.shape_cast %1231 : vector<1x2x900xf32> to vector<2x900xf32>
    %c7_998 = arith.constant 7 : index
    %c22_999 = arith.constant 22 : index
    %1233 = memref.load %arg1[%c7_998, %c22_999] : memref<8x25xf32, #tpu.memory_space<smem>>
    %1234 = vector.broadcast %1233 : f32 to vector<2x900xf32>
    %1235 = arith.mulf %1232, %1234 : vector<2x900xf32>
    %1236 = arith.addf %1230, %1235 : vector<2x900xf32>
    %c23_1000 = arith.constant 23 : index
    %c0_1001 = arith.constant 0 : index
    %c0_1002 = arith.constant 0 : index
    %1237 = vector.load %arg0[%c23_1000, %c0_1001, %c0_1002] : memref<25x2x900xf32, #tpu.memory_space<vmem>>, vector<1x2x900xf32>
    %1238 = vector.shape_cast %1237 : vector<1x2x900xf32> to vector<2x900xf32>
    %c7_1003 = arith.constant 7 : index
    %c23_1004 = arith.constant 23 : index
    %1239 = memref.load %arg1[%c7_1003, %c23_1004] : memref<8x25xf32, #tpu.memory_space<smem>>
    %1240 = vector.broadcast %1239 : f32 to vector<2x900xf32>
    %1241 = arith.mulf %1238, %1240 : vector<2x900xf32>
    %1242 = arith.addf %1236, %1241 : vector<2x900xf32>
    %c24_1005 = arith.constant 24 : index
    %c0_1006 = arith.constant 0 : index
    %c0_1007 = arith.constant 0 : index
    %1243 = vector.load %arg0[%c24_1005, %c0_1006, %c0_1007] : memref<25x2x900xf32, #tpu.memory_space<vmem>>, vector<1x2x900xf32>
    %1244 = vector.shape_cast %1243 : vector<1x2x900xf32> to vector<2x900xf32>
    %c7_1008 = arith.constant 7 : index
    %c24_1009 = arith.constant 24 : index
    %1245 = memref.load %arg1[%c7_1008, %c24_1009] : memref<8x25xf32, #tpu.memory_space<smem>>
    %1246 = vector.broadcast %1245 : f32 to vector<2x900xf32>
    %1247 = arith.mulf %1244, %1246 : vector<2x900xf32>
    %1248 = arith.addf %1242, %1247 : vector<2x900xf32>
    %c7_1010 = arith.constant 7 : index
    %1249 = memref.load %arg2[%c7_1010] : memref<8xf32, #tpu.memory_space<smem>>
    %1250 = vector.broadcast %1249 : f32 to vector<2x900xf32>
    %1251 = arith.addf %1248, %1250 : vector<2x900xf32>
    %1252 = arith.truncf %1251 : vector<2x900xf32> to vector<2x900xbf16>
    %c7_1011 = arith.constant 7 : index
    %c0_1012 = arith.constant 0 : index
    %c0_1013 = arith.constant 0 : index
    %1253 = vector.load %arg3[%c7_1011, %c0_1012, %c0_1013] : memref<8x900x128xbf16, #tpu.memory_space<vmem>>, vector<1x900x128xbf16>
    %1254 = vector.shape_cast %1253 : vector<1x900x128xbf16> to vector<900x128xbf16>
    %cst_1014 = arith.constant dense<0.000000e+00> : vector<2x128xf32>
    %1255 = tpu.matmul %1252, %1254, %cst_1014 {dimension_numbers = #tpu.dot_dimension_numbers<[1], [0], [0], [1], [0, 0, 1, 1], [], []>} : vector<2x900xbf16>, vector<900x128xbf16>, vector<2x128xf32> -> vector<2x128xf32>
    %1256 = arith.addf %1099, %1255 : vector<2x128xf32>
    %c0_1015 = arith.constant 0 : index
    %c0_1016 = arith.constant 0 : index
    %1257 = vector.load %arg4[%c0_1015, %c0_1016] : memref<1x128xf32, #tpu.memory_space<vmem>>, vector<1x128xf32>
    %1258 = vector.broadcast %1257 : vector<1x128xf32> to vector<2x128xf32>
    %1259 = arith.addf %1256, %1258 : vector<2x128xf32>
    %cst_1017 = arith.constant 0.000000e+00 : f32
    %1260 = vector.broadcast %cst_1017 : f32 to vector<2x128xf32>
    %1261 = arith.maximumf %1259, %1260 : vector<2x128xf32>
    %c0_1018 = arith.constant 0 : index
    %c0_1019 = arith.constant 0 : index
    %1262 = vector.load %arg5[%c0_1018, %c0_1019] : memref<128x7xf32, #tpu.memory_space<vmem>>, vector<128x7xf32>
    %cst_1020 = arith.constant dense<0.000000e+00> : vector<2x7xf32>
    %1263 = tpu.matmul %1261, %1262, %cst_1020 {dimension_numbers = #tpu.dot_dimension_numbers<[1], [0], [0], [1], [0, 0, 1, 1], [], []>} : vector<2x128xf32>, vector<128x7xf32>, vector<2x7xf32> -> vector<2x7xf32>
    %c0_1021 = arith.constant 0 : index
    %c0_1022 = arith.constant 0 : index
    %1264 = vector.load %arg6[%c0_1021, %c0_1022] : memref<1x7xf32, #tpu.memory_space<vmem>>, vector<1x7xf32>
    %1265 = vector.broadcast %1264 : vector<1x7xf32> to vector<2x7xf32>
    %1266 = arith.addf %1263, %1265 : vector<2x7xf32>
    %c0_1023 = arith.constant 0 : index
    %c0_1024 = arith.constant 0 : index
    %1267 = vector.load %arg7[%c0_1023, %c0_1024] : memref<2x7xf32, #tpu.memory_space<vmem>>, vector<2x7xf32>
    tpu.vector_store %arg7[%c0_1023, %c0_1024], %1266 {strides = array<i32>} : memref<2x7xf32, #tpu.memory_space<vmem>>, vector<2x7xf32>,
    return
  }
}

</mosaic_0001>

<bundles_post_ra>
// kernel: cnn_forward.1
= control target key start
LH: loop header
LB: loop body
LE: loop exit
PB: predicated region body
PF: predicated region fallthrough
CT: control target
= control target key end

     0   :  { %12 = vsyncpa [#allocation4], 0  ;;  %s13868_s0 = inlined_call_operand.vmem [shape: f32[25,2,900], index: 0, kind: input, shape index: {}]   ;;  %s13869_s1 = inlined_call_operand.vmem [shape: f32[8,25], index: 1, kind: input, shape index: {}]   ;;  %s13870_s2 = inlined_call_operand.vmem [shape: f32[8], index: 2, kind: input, shape index: {}]   ;;  %s13871_s3 = inlined_call_operand.vmem [shape: bf16[8,900,128], index: 3, kind: input, shape index: {}]   ;;  %s13872_s4 = inlined_call_operand.vmem [shape: f32[1,128], index: 4, kind: input, shape index: {}]   ;;  %s13873_s5 = inlined_call_operand.vmem [shape: f32[128,7], index: 5, kind: input, shape index: {}]   ;;  %s13874_s6 = inlined_call_operand.vmem [shape: f32[1,7], index: 6, kind: input, shape index: {}]   ;;  %s13875_s7 = inlined_call_operand.hbm [shape: f32[2,7], index: 7, kind: output, shape index: {}]  }
   0x1   :  { %13 = vsyncpa [#allocation6], 0 }
   0x2   :  { %14 = vsyncpa [#allocation3], 0  ;;  %s23_s26 = sshll.u32 %s13869_s1, 4  ;;  %s33_s29 = sshll.u32 %s13870_s2, 4  ;;  %s24_s26 = int_to_ptr.vmem [resolvable:$true] %s23_s26  ;;  %s34_s29 = int_to_ptr.vmem [resolvable:$true] %s33_s29 }
   0x3   :  { %s9569_s30 = scalar_lea.vmem %s24_s26, 128  ;;  %p9574_p1 = scmp.lt.s32.totalorder %s24_s26, %s24_s26 }
   0x4   :  { %p9570_p0 = scmp.ne.s32.totalorder %s24_s26, %s9569_s30  ;;  %p9575_p2 = scmp.lt.s32.totalorder %s9569_s30, %s9569_s30 }
   0x6   :  { %p9576_p3 = por %p9575_p2, %p9574_p1 }
   0x8   :  { %p9577_p4 = pnand %p9576_p3, %p9570_p0 }
   0xa   :  { %9580 = shalt.err (!%p9577_p4)
}
   0xb   :  { %s9621_s8 = smov [#allocation2]   ;;  %s9581_s9 = scalar_lea.vmem %s34_s29, 16 }
   0xc   :  { %26 = dma.vmem_to_smem %s24_s26, 128, %s9621_s8, [#allocation4]  }
   0xd   :  { %p9582_p5 = scmp.ne.s32.totalorder %s34_s29, %s9581_s9  ;;  %p9586_p6 = scmp.lt.s32.totalorder %s34_s29, %s34_s29 }
   0xe   :  { %p9587_p7 = scmp.lt.s32.totalorder %s9581_s9, %s9581_s9 }
  0x10   :  { %p9588_p8 = por %p9587_p7, %p9586_p6 }
  0x12   :  { %p9589_p9 = pnand %p9588_p8, %p9582_p5 }
  0x14   :  { %9592 = shalt.err (!%p9589_p9)
}
  0x15   :  { %s9622_s1 = smov [#allocation5]  }
  0x16   :  { %36 = dma.vmem_to_smem %s34_s29, 16, %s9622_s1, [#allocation6]  }
  0x17   :  { %9615 = dma.done.wait [#allocation4], 128  }
  0x18   :  { %9616 = vsyncadd [#allocation4], 4294967168 }
  0x19   :  { %9617 = dma.done.wait [#allocation6], 16  }
  0x1a   :  { %9618 = vsyncadd [#allocation6], 4294967280 }
  0x1b   :  { %51 = sfence }
  0x1c   :  { %v8961_v0 = vld [vmem:[%s13871_s3 + $0x204] sm:$0xff]   ;;  %v8965_v4 = vld [vmem:[%s13871_s3 + $0x20c] sm:$0xff]   ;;  %v8969_v8 = vld [vmem:[%s13871_s3 + $0x214] sm:$0xff]   ;;  %s6910_s23 = sld [smem:[#allocation2 + $0x80]]  ;;  %s6911_s24 = sld [smem:[#allocation2 + $0x81]]  ;;  %v13876_v32 = vmov 0  }
  0x1d   :  { %v8962_v1 = vld [vmem:[%s13871_s3 + $0x1c4] sm:$0xff]   ;;  %8349 = vmatprep.subr.bf16.mxu0 %v8961_v0  ;;  %v8966_v5 = vld [vmem:[%s13871_s3 + $0x1cc] sm:$0xff]   ;;  %v8970_v9 = vld [vmem:[%s13871_s3 + $0x1d4] sm:$0xff]   ;;  %s6912_s25 = sld [smem:[#allocation2 + $0x82]]  ;;  %s6913_s26 = sld [smem:[#allocation2 + $0x83]]  ;;  %vm1101_vm0 = vcmask 31744  }
  0x1e   :  { %v8963_v2 = vld [vmem:[%s13871_s3 + $0x284] sm:$0xff]   ;;  %8350 = vmatpush3.bf16.msra.mxu0 %v8962_v1  ;;  %v8967_v6 = vld [vmem:[%s13871_s3 + $0x28c] sm:$0xff]   ;;  %v8971_v10 = vld [vmem:[%s13871_s3 + $0x294] sm:$0xff]   ;;  %s9782_s8 = sld [smem:[#allocation2 + $0x84]]  ;;  %s9794_s11 = sld [smem:[#allocation2 + $0x85]]  ;;  %vm1105_vm1 = vcmask 1041408  }
  0x1f   :  { %v8964_v3 = vld [vmem:[%s13871_s3 + $0x244] sm:$0xff]   ;;  %8371 = vmatprep.subr.bf16.mxu1 %v8963_v2  ;;  %8351 = vmatprep.subr.bf16.mxu0 %v8965_v4  ;;  %v8968_v7 = vld [vmem:[%s13871_s3 + $0x24c] sm:$0xff]   ;;  %v8972_v11 = vld [vmem:[%s13871_s3 + $0x254] sm:$0xff]   ;;  %s9818_s20 = sld [smem:[#allocation2 + $0x86]]  ;;  %s9820_s21 = sld [smem:[#allocation2 + $0x87]]  ;;  %vm9626_vm2 = vmmov 0  }
  0x20   :  { %8372 = vmatpush3.bf16.msra.mxu1 %v8964_v3  ;;  %v8973_v12 = vld [vmem:[%s13871_s3 + $0x21c] sm:$0xff]   ;;  %v8977_v16 = vld [vmem:[%s13871_s3 + $0x224] sm:$0xff]   ;;  %v8981_v20 = vld [vmem:[%s13871_s3 + $0x22c] sm:$0xff]   ;;  %s9855_s1 = sld [smem:[#allocation2 + $0x8a]]  ;;  %s9891_s19 = sld [smem:[#allocation2 + $0x8c]]  ;;  %vm6820_vm3 = vcmask 50176  }
  0x21   :  { %8373 = vmatprep.subr.bf16.mxu1 %v8967_v6  ;;  %v8974_v13 = vld [vmem:[%s13871_s3 + $0x1dc] sm:$0xff]   ;;  %v8978_v17 = vld [vmem:[%s13871_s3 + $0x1e4] sm:$0xff]   ;;  %v8982_v21 = vld [vmem:[%s13871_s3 + $0x1ec] sm:$0xff]   ;;  %s9926_s10 = sld [smem:[#allocation2 + $0x8d]]  ;;  %s9930_s12 = sld [smem:[#allocation2 + $0x8e]] }
  0x22   :  { %8352 = vmatpush3.bf16.msra.mxu0 %v8966_v5  ;;  %v8975_v14 = vld [vmem:[%s13871_s3 + $0x29c] sm:$0xff]   ;;  %v8979_v18 = vld [vmem:[%s13871_s3 + $0x2a4] sm:$0xff]   ;;  %v8983_v22 = vld [vmem:[%s13871_s3 + $0x2ac] sm:$0xff]   ;;  %v445_v39 = vstv %s6910_s23  ;;  %s9955_s17 = sld [smem:[#allocation2 + $0x90]]  ;;  %s9986_s29 = sld [smem:[#allocation2 + $0x91]] }
  0x23   :  { %8353 = vmatprep.subr.bf16.mxu0 %v8969_v8  ;;  %v8976_v15 = vld [vmem:[%s13871_s3 + $0x25c] sm:$0xff]   ;;  %v8980_v19 = vld [vmem:[%s13871_s3 + $0x264] sm:$0xff]   ;;  %v8984_v23 = vld [vmem:[%s13871_s3 + $0x26c] sm:$0xff]   ;;  %v449_v44 = vstv %s6911_s24  ;;  %s9836_s24 = sld [smem:[#allocation2 + $0x88]]  ;;  %s10016_s15 = sld [smem:[#allocation2 + $0x93]] }
  0x24   :  { %8374 = vmatpush3.bf16.msra.mxu1 %v8968_v7  ;;  %v8985_v24 = vld [vmem:[%s13871_s3 + $0x234] sm:$0xff]   ;;  %v8989_v28 = vld [vmem:[%s13871_s3 + $0x23c] sm:$0xff]   ;;  %v9780_v34 = vld [vmem:[%s13868_s0 + $0x8] sm:$0xff]  ;;  %v455_v47 = vstv %s6912_s25  ;;  %s10076_s13 = sld [smem:[#allocation2 + $0x97]]  ;;  %s10106_s23 = sld [smem:[#allocation2]] }
  0x25   :  { %8375 = vmatprep.subr.bf16.mxu1 %v8971_v10  ;;  %v8986_v25 = vld [vmem:[%s13871_s3 + $0x1f4] sm:$0xff]   ;;  %v8990_v29 = vld [vmem:[%s13871_s3 + $0x1fc] sm:$0xff]   ;;  %v9804_v38 = vld [vmem:[%s13868_s0 + $0x28] sm:$0xff]  ;;  %v447_v43 = vmul.f32 %v445_v39, %v9780_v34  ;;  %v461_v52 = vstv %s6913_s26  ;;  %s9851_s26 = sld [smem:[#allocation2 + $0x89]]  ;;  %s10144_s9 = sld [smem:[#allocation2 + $0x3]] }
  0x26   :  { %8354 = vmatpush3.bf16.msra.mxu0 %v8970_v9  ;;  %v8987_v26 = vld [vmem:[%s13871_s3 + $0x2b4] sm:$0xff]   ;;  %v8991_v30 = vld [vmem:[%s13871_s3 + $0x2bc] sm:$0xff]   ;;  %v9832_v49 = vld [vmem:[%s13868_s0 + $0x48] sm:$0xff]  ;;  %v457_v51 = vmul.f32 %v9804_v38, %v455_v47  ;;  %v467_v59 = vstv %s9782_s8  ;;  %s6935_s30 = sld [smem:[#allocation5 + $0x1]]  ;;  %s10161_s2 = sld [smem:[#allocation2 + $0x5]] }
  0x27   :  { %8355 = vmatprep.subr.bf16.mxu0 %v8973_v12  ;;  %v8988_v27 = vld [vmem:[%s13871_s3 + $0x274] sm:$0xff]   ;;  %v8992_v31 = vld [vmem:[%s13871_s3 + $0x27c] sm:$0xff]   ;;  %v469_v63 = vmul.f32 %v9832_v49, %v467_v59  ;;  %v9865_v1 = vld [vmem:[%s13868_s0 + $0x68] sm:$0xff]  ;;  %v473_v2 = vstv %s9794_s11  ;;  %s9882_s11 = sld [smem:[#allocation2 + $0x8b]]  ;;  %s10234_s16 = sld [smem:[#allocation2 + $0xc]] }
  0x28   :  { %8376 = vmatpush3.bf16.msra.mxu1 %v8972_v11  ;;  %v9775_v33 = vld [vmem:[%s13868_s0] sm:$0xff]  ;;  %v9787_v35 = vld [vmem:[%s13868_s0 + $0x10] sm:$0xff]  ;;  %v9792_v36 = vld [vmem:[%s13868_s0 + $0x18] sm:$0xff]  ;;  %v479_v9 = vstv %s9818_s20  ;;  %s10315_s27 = sld [smem:[#allocation2 + $0x14]]  ;;  %s10364_s18 = sld [smem:[#allocation2 + $0x17]] }
  0x29   :  { %8377 = vmatprep.subr.bf16.mxu1 %v8975_v14  ;;  %v9799_v37 = vld [vmem:[%s13868_s0 + $0x20] sm:$0xff]  ;;  %v9809_v40 = vld [vmem:[%s13868_s0 + $0x30] sm:$0xff]  ;;  %v9814_v41 = vld [vmem:[%s13868_s0 + $0x38] sm:$0xff]  ;;  %v446_v42 = vmul.f32 %v445_v39, %v9775_v33  ;;  %v450_v45 = vmul.f32 %v9787_v35, %v449_v44  ;;  %v451_v46 = vmul.f32 %v9792_v36, %v449_v44  ;;  %v485_v10 = vstv %s9820_s21  ;;  %s10046_s21 = sld [smem:[#allocation2 + $0x95]]  ;;  %s10412_s14 = sld [smem:[#allocation5]] }
  0x2a   :  { %8356 = vmatpush3.bf16.msra.mxu0 %v8974_v13  ;;  %v9827_v48 = vld [vmem:[%s13868_s0 + $0x40] sm:$0xff]  ;;  %v456_v50 = vmul.f32 %v9799_v37, %v455_v47  ;;  %v462_v55 = vmul.f32 %v9809_v40, %v461_v52  ;;  %v463_v56 = vmul.f32 %v9814_v41, %v461_v52  ;;  %v9843_v57 = vld [vmem:[%s13868_s0 + $0x50] sm:$0xff]  ;;  %v9848_v58 = vld [vmem:[%s13868_s0 + $0x58] sm:$0xff]  ;;  %v503_v39 = vstv %s9855_s1  ;;  %s9951_s1 = sld [smem:[#allocation2 + $0x8f]]  ;;  %s10650_s8 = sld [smem:[#allocation2 + $0x10d]] }
  0x2b   :  { %8357 = vmatprep.subr.bf16.mxu0 %v8977_v16  ;;  %v452_v53 = vadd.f32 %v450_v45, %v446_v42  ;;  %v453_v54 = vadd.f32 %v451_v46, %v447_v43  ;;  %v468_v62 = vmul.f32 %v9827_v48, %v467_v59  ;;  %v9860_v0 = vld [vmem:[%s13868_s0 + $0x60] sm:$0xff]  ;;  %v474_v5 = vmul.f32 %v9843_v57, %v473_v2  ;;  %v9873_v7 = vld [vmem:[%s13868_s0 + $0x70] sm:$0xff]  ;;  %v9878_v8 = vld [vmem:[%s13868_s0 + $0x78] sm:$0xff]  ;;  %s10742_s25 = sld [smem:[#allocation2 + $0x112]]  ;;  %s10786_s28 = sld [smem:[#allocation2 + $0x114]] }
  0x2c   :  { %8378 = vmatpush3.bf16.msra.mxu1 %v8976_v15  ;;  %v475_v6 = vmul.f32 %v9848_v58, %v473_v2  ;;  %v9887_v11 = vld [vmem:[%s13868_s0 + $0x80] sm:$0xff]  ;;  %v480_v14 = vmul.f32 %v9860_v0, %v479_v9  ;;  %v481_v15 = vmul.f32 %v9865_v1, %v479_v9  ;;  %v9896_v16 = vld [vmem:[%s13868_s0 + $0x88] sm:$0xff]  ;;  %v9935_v42 = vld [vmem:[%s13868_s0 + $0xb0] sm:$0xff]  ;;  %v521_v9 = vstv %s9926_s10  ;;  %s10080_s10 = sld [smem:[#allocation2 + $0x98]]  ;;  %s11014_s22 = sld [smem:[#allocation2 + $0x181]] }
  0x2d   :  { %8379 = vmatprep.subr.bf16.mxu1 %v8979_v18  ;;  %v458_v60 = vadd.f32 %v456_v50, %v452_v53  ;;  %v459_v61 = vadd.f32 %v457_v51, %v453_v54  ;;  %v9902_v18 = vld [vmem:[%s13868_s0 + $0x90] sm:$0xff]  ;;  %v9940_v43 = vld [vmem:[%s13868_s0 + $0xb8] sm:$0xff]  ;;  %v9945_v44 = vld [vmem:[%s13868_s0 + $0xc0] sm:$0xff]  ;;  %v509_v52 = vstv %s9882_s11  ;;  %s10260_s11 = sld [smem:[#allocation2 + $0xf]]  ;;  %s12228_s20 = sld [smem:[#allocation2 + $0x288]] }
  0x2e   :  { %8358 = vmatpush3.bf16.msra.mxu0 %v8978_v17  ;;  %v491_v17 = vstv %s9836_s24  ;;  %v9960_v59 = vld [vmem:[%s13868_s0 + $0xc8] sm:$0xff]  ;;  %v510_v2 = vmul.f32 %v9935_v42, %v509_v52  ;;  %s9990_s24 = sld [smem:[#allocation2 + $0x92]] }
  0x2f   :  { %8359 = vmatprep.subr.bf16.mxu0 %v8981_v20  ;;  %v464_v3 = vadd.f32 %v462_v55, %v458_v60  ;;  %v465_v4 = vadd.f32 %v463_v56, %v459_v61  ;;  %v515_v56 = vstv %s9891_s19  ;;  %v9965_v60 = vld [vmem:[%s13868_s0 + $0xd0] sm:$0xff]  ;;  %v9970_v61 = vld [vmem:[%s13868_s0 + $0xd8] sm:$0xff]  ;;  %s10050_s19 = sld [smem:[#allocation2 + $0x96]] }
  0x30   :  { %8380 = vmatpush3.bf16.msra.mxu1 %v8980_v19  ;;  %v9907_v19 = vld [vmem:[%s13868_s0 + $0x98] sm:$0xff] }
  0x31   :  { %8381 = vmatprep.subr.bf16.mxu1 %v8983_v22  ;;  %v470_v12 = vadd.f32 %v468_v62, %v464_v3  ;;  %v471_v13 = vadd.f32 %v469_v63, %v465_v4  ;;  %v486_v22 = vmul.f32 %v9873_v7, %v485_v10  ;;  %v511_v3 = vmul.f32 %v9940_v43, %v509_v52  ;;  %v9977_v4 = vld [vmem:[%s13868_s0 + $0xe0] sm:$0xff] }
  0x32   :  { %8360 = vmatpush3.bf16.msra.mxu0 %v8982_v21 }
  0x33   :  { %8361 = vmatprep.subr.bf16.mxu0 %v8985_v24  ;;  %v476_v20 = vadd.f32 %v474_v5, %v470_v12  ;;  %v477_v21 = vadd.f32 %v475_v6, %v471_v13  ;;  %v8993_v24 = vld [vmem:[%s13871_s3 + $0x304] sm:$0xff]   ;;  %v516_v6 = vmul.f32 %v9945_v44, %v515_v56  ;;  %v517_v13 = vmul.f32 %v9960_v59, %v515_v56 }
  0x34   :  { %8382 = vmatpush3.bf16.msra.mxu1 %v8984_v23  ;;  %v487_v23 = vmul.f32 %v9878_v8, %v485_v10  ;;  %v9982_v5 = vld [vmem:[%s13868_s0 + $0xe8] sm:$0xff] }
  0x35   :  { %8383 = vmatprep.subr.bf16.mxu1 %v8987_v26  ;;  %v9922_v26 = vld [vmem:[%s13868_s0 + $0xa8] sm:$0xff] }
  0x36   :  { %8362 = vmatpush3.bf16.msra.mxu0 %v8986_v25  ;;  %v9917_v25 = vld [vmem:[%s13868_s0 + $0xa0] sm:$0xff]  ;;  %v505_v55 = vmul.f32 %v9922_v26, %v503_v39 }
  0x37   :  { %8363 = vmatprep.subr.bf16.mxu0 %v8989_v28  ;;  %v497_v28 = vstv %s9851_s26  ;;  %v504_v51 = vmul.f32 %v9917_v25, %v503_v39  ;;  %s10020_s26 = sld [smem:[#allocation2 + $0x94]] }
  0x38   :  { %8384 = vmatpush3.bf16.msra.mxu1 %v8988_v27  ;;  %v492_v27 = vmul.f32 %v9887_v11, %v491_v17  ;;  %v498_v47 = vmul.f32 %v9902_v18, %v497_v28  ;;  %v499_v50 = vmul.f32 %v9907_v19, %v497_v28 }
  0x39   :  { %8385 = vmatprep.subr.bf16.mxu1 %v8991_v30  ;;  %v483_v30 = vadd.f32 %v481_v15, %v477_v21  ;;  %v9995_v15 = vld [vmem:[%s13868_s0 + $0xf0] sm:$0xff] }
  0x3a   :  { %8364 = vmatpush3.bf16.msra.mxu0 %v8990_v29  ;;  %v482_v29 = vadd.f32 %v480_v14, %v476_v20  ;;  %v527_v14 = vstv %s9930_s12  ;;  %s10176_s12 = sld [smem:[#allocation2 + $0x6]] }
  0x3b   :  { %8393 = vmatprep.subr.bf16.mxu0 %v8993_v24  ;;  %v489_v46 = vadd.f32 %v487_v23, %v483_v30  ;;  %v523_v23 = vmul.f32 %v9970_v61, %v521_v9  ;;  %v10007_v24 = vld [vmem:[%s13868_s0 + $0x100] sm:$0xff]  ;;  %v528_v28 = vmul.f32 %v9977_v4, %v527_v14  ;;  %v529_v39 = vmul.f32 %v9982_v5, %v527_v14 }
  0x3c   :  { %8386 = vmatpush3.bf16.msra.mxu1 %v8992_v31  ;;  %v493_v31 = vmul.f32 %v9896_v16, %v491_v17  ;;  %v488_v45 = vadd.f32 %v486_v22, %v482_v29  ;;  %v10000_v17 = vld [vmem:[%s13868_s0 + $0xf8] sm:$0xff]  ;;  %v522_v22 = vmul.f32 %v9965_v60, %v521_v9  ;;  %v533_v29 = vstv %s9951_s1  ;;  %v10055_v9 = vld [vmem:[%s13868_s0 + $0x130] sm:$0xff]  ;;  %s10110_s1 = sld [smem:[#allocation2 + $0x1]] }
  0x3d   :  { %1229 = vmatprep.subr.bf16.mxu1 %v13876_v32  ;;  %v9624_v32 = vmov 1983009808  }
  0x3e   :  { %v494_v53 = vadd.f32 %v492_v27, %v488_v45  ;;  %v495_v54 = vadd.f32 %v493_v31, %v489_v46  ;;  %v10012_v27 = vld [vmem:[%s13868_s0 + $0x108] sm:$0xff]  ;;  %v539_v45 = vstv %s9955_s17  ;;  %v10025_v46 = vld [vmem:[%s13868_s0 + $0x110] sm:$0xff]  ;;  %s10255_s17 = sld [smem:[#allocation2 + $0xe]] }
  0x3f   :  { %13935 = vst [vmem:[#allocation11_spill] sm:$0xff] %v10012_v27  ;;  %v540_v56 = vmul.f32 %v10007_v24, %v539_v45 }
  0x40   :  { %v500_v62 = vadd.f32 %v498_v47, %v494_v53  ;;  %v501_v63 = vadd.f32 %v499_v50, %v495_v54  ;;  %v10030_v47 = vld [vmem:[%s13868_s0 + $0x118] sm:$0xff]  ;;  %v10035_v50 = vld [vmem:[%s13868_s0 + $0x120] sm:$0xff]  ;;  %v534_v53 = vmul.f32 %v9995_v15, %v533_v29  ;;  %v535_v54 = vmul.f32 %v10000_v17, %v533_v29 }
  0x41   :  { %13936 = vst [vmem:[#allocation12_spill] sm:$0xff] %v10030_v47 }
  0x42   :  { %v506_v10 = vadd.f32 %v504_v51, %v500_v62  ;;  %v507_v12 = vadd.f32 %v505_v55, %v501_v63  ;;  %v10042_v55 = vld [vmem:[%s13868_s0 + $0x128] sm:$0xff]  ;;  %v545_v62 = vstv %s9986_s29  ;;  %s10136_s29 = sld [smem:[#allocation2 + $0x2]] }
  0x43   :  { %13937 = vst [vmem:[#allocation13_spill] sm:$0xff] %v10042_v55 }
  0x44   :  { %v512_v20 = vadd.f32 %v510_v2, %v506_v10  ;;  %v513_v21 = vadd.f32 %v511_v3, %v507_v12  ;;  %v541_v3 = vmul.f32 %v10012_v27, %v539_v45  ;;  %v10060_v10 = vld [vmem:[%s13868_s0 + $0x138] sm:$0xff]  ;;  %v10065_v12 = vld [vmem:[%s13868_s0 + $0x140] sm:$0xff]  ;;  %v10085_v45 = vld [vmem:[%s13868_s0 + $0x150] sm:$0xff] }
  0x45   :  { %13938 = vst [vmem:[#allocation14_spill] sm:$0xff] %v10060_v10  ;;  %13939 = vst [vmem:[#allocation15_spill] sm:$0xff] %v10065_v12 }
  0x46   :  { %v518_v30 = vadd.f32 %v516_v6, %v512_v20  ;;  %v519_v31 = vadd.f32 %v517_v13, %v513_v21  ;;  %v551_v6 = vstv %s9990_s24  ;;  %v546_v20 = vmul.f32 %v10025_v46, %v545_v62  ;;  %13941 = vst [vmem:[#allocation17_spill] sm:$0xff] %v10085_v45  ;;  %s10153_s24 = sld [smem:[#allocation2 + $0x4]] }
  0x47   :  { %v547_v21 = vmul.f32 %v10030_v47, %v545_v62 }
  0x48   :  { %v524_v51 = vadd.f32 %v522_v22, %v518_v30  ;;  %v525_v52 = vadd.f32 %v523_v23, %v519_v31  ;;  %v10072_v22 = vld [vmem:[%s13868_s0 + $0x148] sm:$0xff]  ;;  %v552_v23 = vmul.f32 %v10035_v50, %v551_v6  ;;  %v553_v31 = vmul.f32 %v10042_v55, %v551_v6 }
  0x49   :  { %13940 = vst [vmem:[#allocation16_spill] sm:$0xff] %v10072_v22  ;;  %v581_v55 = vstv %s10076_s13  ;;  %s10226_s13 = sld [smem:[#allocation2 + $0xb]] }
  0x4a   :  { %v530_v63 = vadd.f32 %v528_v28, %v524_v51  ;;  %v531_v2 = vadd.f32 %v529_v39, %v525_v52  ;;  %v557_v28 = vstv %s10016_s15  ;;  %v563_v39 = vstv %s10020_s26  ;;  %v10090_v51 = vld [vmem:[%s13868_s0 + $0x158] sm:$0xff]  ;;  %v10095_v52 = vld [vmem:[%s13868_s0 + $0x160] sm:$0xff]  ;;  %s10242_s26 = sld [smem:[#allocation2 + $0xd]]  ;;  %s11347_s15 = sld [smem:[#allocation2 + $0x200]] }
  0x4b   :  { %13942 = vst [vmem:[#allocation18_spill] sm:$0xff] %v10090_v51  ;;  %13943 = vst [vmem:[#allocation19_spill] sm:$0xff] %v10095_v52  ;;  %v559_v62 = vmul.f32 %v10060_v10, %v557_v28 }
  0x4c   :  { %v536_v13 = vadd.f32 %v534_v53, %v530_v63  ;;  %v537_v14 = vadd.f32 %v535_v54, %v531_v2  ;;  %v10102_v63 = vld [vmem:[%s13868_s0 + $0x168] sm:$0xff]  ;;  %v564_v2 = vmul.f32 %v10065_v12, %v563_v39 }
  0x4e   :  { %v542_v29 = vadd.f32 %v540_v56, %v536_v13  ;;  %v543_v30 = vadd.f32 %v541_v3, %v537_v14  ;;  %v558_v56 = vmul.f32 %v10055_v9, %v557_v28  ;;  %v569_v3 = vstv %s10046_s21  ;;  %v10120_v28 = vld [vmem:[%s13868_s0 + $0x178] sm:$0xff]  ;;  %s10557_s21 = sld [smem:[#allocation2 + $0x107]] }
  0x4f   :  { %v565_v14 = vmul.f32 %v10072_v22, %v563_v39  ;;  %13944 = vst [vmem:[#allocation20_spill] sm:$0xff] %v10120_v28  ;;  %v283_v22 = vunpack.c.l.s4 %v9624_v32  ;;  %v583_v32 = vmul.f32 %v10120_v28, %v581_v55  ;;  %v72_v28 = vstv %s10136_s29  ;;  %s10215_s29 = sld [smem:[#allocation2 + $0x7]] }
  0x50   :  { %v548_v53 = vadd.f32 %v546_v20, %v542_v29  ;;  %v549_v54 = vadd.f32 %v547_v21, %v543_v30  ;;  %v575_v20 = vstv %s10050_s19  ;;  %v10115_v21 = vld [vmem:[%s13868_s0 + $0x170] sm:$0xff]  ;;  %v285_v29 = vlaneseq  ;;  %v10130_v30 = vld [vmem:[%s13868_s0 + $0x188] sm:$0xff]  ;;  %s10388_s19 = sld [smem:[#allocation2 + $0x100]] }
  0x51   :  { %v576_v10 = vmul.f32 %v10095_v52, %v575_v20  ;;  %v577_v12 = vmul.f32 %v10102_v63, %v575_v20  ;;  %v63_v20 = vstv %s10110_s1  ;;  %s10308_s1 = sld [smem:[#allocation2 + $0x13]] }
  0x52   :  { %v554_v6 = vadd.f32 %v552_v23, %v548_v53  ;;  %v555_v13 = vadd.f32 %v553_v31, %v549_v54  ;;  %v10125_v23 = vld [vmem:[%s13868_s0 + $0x180] sm:$0xff]  ;;  %v570_v53 = vmul.f32 %v10085_v45, %v569_v3  ;;  %v571_v54 = vmul.f32 %v10090_v51, %v569_v3 }
  0x53   :  { %v582_v3 = vmul.f32 %v10115_v21, %v581_v55  ;;  %v284_v51 = vunpack.c.0.s8 %v283_v22  ;;  %v64_v55 = vmul.f32 %v9787_v35, %v63_v20 }
  0x54   :  { %v560_v31 = vadd.f32 %v558_v56, %v554_v6  ;;  %v561_v39 = vadd.f32 %v559_v62, %v555_v13  ;;  %v587_v56 = vstv %s10080_s10  ;;  %v286_v62 = vshrl.u32 %v285_v29, 7  ;;  %s10701_s10 = sld [smem:[#allocation2 + $0x110]] }
  0x55   :  { %v588_v52 = vmul.f32 %v10125_v23, %v587_v56  ;;  %v589_v45 = vmul.f32 %v10130_v30, %v587_v56 }
  0x56   :  { %v566_v47 = vadd.f32 %v564_v2, %v560_v31  ;;  %v567_v27 = vadd.f32 %v565_v14, %v561_v39  ;;  %v56_v31 = vstv %s10106_s23  ;;  %v10150_v22 = vsub.s32 %v284_v51, %v286_v62  ;;  %s10435_s23 = sld [smem:[#allocation2 + $0x103]] }
  0x57   :  { %v57_v39 = vmul.f32 %v56_v31, %v9775_v33 }
  0x58   :  { %v572_v6 = vadd.f32 %v570_v53, %v566_v47  ;;  %v573_v13 = vadd.f32 %v571_v54, %v567_v27  ;;  %v593_v27 = vstv %s6935_s30  ;;  %s10334_s30 = sld [smem:[#allocation2 + $0x15]] }
  0x5a   :  { %v578_v2 = vadd.f32 %v576_v10, %v572_v6  ;;  %v579_v14 = vadd.f32 %v577_v12, %v573_v13  ;;  %v66_v12 = vadd.f32 %v64_v55, %v57_v39  ;;  %v73_v6 = vmul.f32 %v9799_v37, %v72_v28 }
  0x5b   :  { %v81_v13 = vstv %s10144_s9  ;;  %v65_v37 = vmul.f32 %v9792_v36, %v63_v20  ;;  %v90_v39 = vstv %s10153_s24  ;;  %v8996_v36 = vld [vmem:[%s13871_s3 + $0x30c] sm:$0xff]   ;;  %s10220_s9 = sld [smem:[#allocation2 + $0x8]]  ;;  %s10222_s24 = sld [smem:[#allocation2 + $0x9]] }
  0x5c   :  { %v584_v29 = vadd.f32 %v582_v3, %v578_v2  ;;  %v585_v47 = vadd.f32 %v583_v32, %v579_v14  ;;  %v8994_v14 = vld [vmem:[%s13871_s3 + $0x2c4] sm:$0xff]  }
  0x5e   :  { %v590_v53 = vadd.f32 %v588_v52, %v584_v29  ;;  %v591_v54 = vadd.f32 %v589_v45, %v585_v47  ;;  %v58_v45 = vmul.f32 %v56_v31, %v9780_v34  ;;  %v75_v47 = vadd.f32 %v73_v6, %v66_v12 }
  0x60   :  { %v594_v56 = vadd.f32 %v593_v27, %v590_v53  ;;  %v595_v10 = vadd.f32 %v593_v27, %v591_v54  ;;  %v82_v27 = vmul.f32 %v9809_v40, %v81_v13  ;;  %v8995_v40 = vld [vmem:[%s13871_s3 + $0x344] sm:$0xff]  }
  0x62   :  { %v605_v3 = vrot.slane %v594_v56, %v10150_v22  ;;  %v615_v32 = vcombine.high %v595_v10, %v595_v10  ;;  %v598_v33 = vcombine.high %v594_v56, %v594_v56  ;;  %v10159_v35 = vrot.slane %v595_v10, %v10150_v22 }
  0x63   :  { %v67_v56 = vadd.f32 %v65_v37, %v58_v45  ;;  %v74_v10 = vmul.f32 %v9804_v38, %v72_v28  ;;  %v84_v6 = vadd.f32 %v82_v27, %v75_v47  ;;  %v8999_v38 = vld [vmem:[%s13871_s3 + $0x314] sm:$0xff]   ;;  %v83_v45 = vmul.f32 %v9814_v41, %v81_v13 }
  0x64   :  { %v613_v51 = vcombine.high %v605_v3, %v605_v3  ;;  %v612_v52 = vrot.slane %v598_v33, %v10150_v22  ;;  %v630_v62 = vcombine.high %v10159_v35, %v10159_v35  ;;  %v640_v2 = vpack.c.bf16 %v605_v3, %v605_v3  ;;  %v9000_v37 = vld [vmem:[%s13871_s3 + $0x2d4] sm:$0xff]  }
  0x65   :  { %v10172_v29 = vrot.slane %v615_v32, %v10150_v22  ;;  %v91_v3 = vmul.f32 %v9827_v48, %v90_v39  ;;  %v8997_v32 = vld [vmem:[%s13871_s3 + $0x2cc] sm:$0xff]   ;;  %v99_v33 = vstv %s10161_s2  ;;  %v76_v28 = vadd.f32 %v74_v10, %v67_v56  ;;  %v9001_v41 = vld [vmem:[%s13871_s3 + $0x354] sm:$0xff]   ;;  %s10224_s2 = sld [smem:[#allocation2 + $0xa]]  ;;  %v9007_v56 = vld [vmem:[%s13871_s3 + $0x364] sm:$0xff]  }
  0x66   :  { %v641_v34 = vpack.c.bf16 %v613_v51, %v613_v51  ;;  %v614_v31 = vcombine.high %v612_v52, %v612_v52  ;;  %v642_v55 = vpack.c.bf16 %v612_v52, %v612_v52  ;;  %v645_v54 = vpack.c.bf16 %v630_v62, %v630_v62  ;;  %v8998_v48 = vld [vmem:[%s13871_s3 + $0x34c] sm:$0xff]  }
  0x67   :  { %v631_v20 = vcombine.high %v10172_v29, %v10172_v29  ;;  %v13945_v51 = vmov 0   ;;  %v93_v52 = vadd.f32 %v91_v3, %v84_v6  ;;  %v100_v62 = vmul.f32 %v9843_v57, %v99_v33  ;;  %v9003_v57 = vld [vmem:[%s13871_s3 + $0x2dc] sm:$0xff]  }
  0x68   :  { %1141 = vmatprep.mubr.bf16.mxu0 %v641_v34  ;;  %v643_v53 = vpack.c.bf16 %v614_v31, %v614_v31  ;;  %v85_v13 = vadd.f32 %v83_v45, %v76_v28  ;;  %v92_v47 = vmul.f32 %v9832_v49, %v90_v39  ;;  %v9005_v49 = vld [vmem:[%s13871_s3 + $0x324] sm:$0xff]   ;;  %v101_v39 = vmul.f32 %v9848_v58, %v99_v33  ;;  %v9009_v33 = vld [vmem:[%s13871_s3 + $0x2ec] sm:$0xff]  }
  0x69   :  { %1142 = vmatmul.mubr.bf16.vlgmr.msra.gmra.mrb[0].mxu0 %v640_v2  ;;  %v647_v12 = vpack.c.bf16 %v631_v20, %v631_v20  ;;  %v108_v2 = vstv %s10176_s12  ;;  %v102_v27 = vadd.f32 %v100_v62, %v93_v52  ;;  %v117_v20 = vstv %s10215_s29  ;;  %s10274_s29 = sld [smem:[#allocation2 + $0x10]]  ;;  %s10468_s12 = sld [smem:[#allocation2 + $0x104]] }
  0x6a   :  { %8394 = vmatpush3.bf16.msra.mxu0 %v8994_v14  ;;  %1181 = vmatprep.mubr.bf16.mxu1 %v643_v53  ;;  %v9002_v14 = vld [vmem:[%s13871_s3 + $0x31c] sm:$0xff]   ;;  %v109_v34 = vmul.f32 %v9860_v0, %v108_v2  ;;  %v94_v31 = vadd.f32 %v92_v47, %v85_v13  ;;  %v9008_v53 = vld [vmem:[%s13871_s3 + $0x32c] sm:$0xff]   ;;  %v126_v58 = vstv %s10220_s9  ;;  %v110_v3 = vmul.f32 %v9865_v1, %v108_v2  ;;  %s10279_s9 = sld [smem:[#allocation2 + $0x11]] }
  0x6b   :  { %1182 = vmatmul.mubr.bf16.vlgmr.msra.gmra.mrb[0].mxu1 %v642_v55  ;;  %8395 = vmatprep.subr.bf16.mxu0 %v8996_v36  ;;  %v9004_v0 = vld [vmem:[%s13871_s3 + $0x35c] sm:$0xff]   ;;  %v9006_v36 = vld [vmem:[%s13871_s3 + $0x2e4] sm:$0xff]   ;;  %v127_v10 = vmul.f32 %v9887_v11, %v126_v58  ;;  %v153_v11 = vstv %s10226_s13  ;;  %v162_v28 = vstv %s10234_s16  ;;  %v119_v52 = vmul.f32 %v9878_v8, %v117_v20  ;;  %s10285_s13 = sld [smem:[#allocation2 + $0x12]]  ;;  %s10757_s16 = sld [smem:[#allocation2 + $0x113]] }
  0x6c   :  { %1230 = vmatpush1.bf16.msra.mxu1 %v8995_v40  ;;  %1221 = vmatprep.mubr.bf16.mxu0 %v645_v54  ;;  %v111_v55 = vadd.f32 %v109_v34, %v102_v27  ;;  %v118_v40 = vmul.f32 %v9873_v7, %v117_v20  ;;  %v135_v54 = vstv %s10222_s24  ;;  %v103_v6 = vadd.f32 %v101_v39, %v94_v31  ;;  %v9014_v8 = vld [vmem:[%s13871_s3 + $0x33c] sm:$0xff]   ;;  %s10638_s24 = sld [smem:[#allocation2 + $0x10c]] }
  0x6d   :  { %1231 = vmatprep.subr.bf16.mxu1 %v13945_v51  ;;  %7106 = vmatprep.mubr.msk.bf16.mxu1 %vm1101_vm0, %v647_v12  ;;  %v144_v12 = vstv %s10224_s2  ;;  %v171_v2 = vstv %s10242_s26  ;;  %v180_v13 = vstv %s10255_s17  ;;  %v9017_v27 = vld [vmem:[%s13871_s3 + $0x40] sm:$0xff]   ;;  %v137_v39 = vmul.f32 %v9907_v19, %v135_v54  ;;  %s10367_s26 = sld [smem:[#allocation2 + $0x18]]  ;;  %s10492_s17 = sld [smem:[#allocation2 + $0x105]] }
  0x6e   :  { %8396 = vmatpush3.bf16.msra.mxu0 %v8997_v32  ;;  %v120_v7 = vadd.f32 %v118_v40, %v111_v55  ;;  %v136_v32 = vmul.f32 %v9902_v18, %v135_v54  ;;  %v9010_v18 = vld [vmem:[%s13871_s3 + $0x36c] sm:$0xff]   ;;  %v112_v45 = vadd.f32 %v110_v3, %v103_v6  ;;  %v9016_v31 = vld [vmem:[%s13871_s3 + $0x37c] sm:$0xff]   ;;  %v146_v20 = vmul.f32 %v9922_v26, %v144_v12  ;;  %s11282_s2 = sld [smem:[#allocation2 + $0x193]] }
  0x6f   :  { %8397 = vmatprep.subr.bf16.mxu0 %v8999_v38  ;;  %v9011_v38 = vld [vmem:[%s13871_s3 + $0x334] sm:$0xff]   ;;  %v9018_v19 = vld [vmem:[%s13871_s3] sm:$0xff]   ;;  %v164_v3 = vmul.f32 %v9960_v59, %v162_v28 }
  0x70   :  { %1232 = vmatpush1.bf16.msra.mxu1 %v8998_v48  ;;  %v129_v1 = vadd.f32 %v127_v10, %v120_v7  ;;  %v145_v48 = vmul.f32 %v9917_v25, %v144_v12  ;;  %v9012_v25 = vld [vmem:[%s13871_s3 + $0x2f4] sm:$0xff]   ;;  %v121_v47 = vadd.f32 %v119_v52, %v112_v45  ;;  %v207_v54 = vstv %s10279_s9  ;;  %v9022_v7 = vld [vmem:[%s13871_s3 + $0xc0] sm:$0xff]   ;;  %s10418_s9 = sld [smem:[#allocation2 + $0x102]] }
  0x71   :  { %1233 = vmatprep.subr.bf16.mxu1 %v13945_v51  ;;  %v216_v10 = vstv %s10285_s13  ;;  %v9024_v59 = vld [vmem:[%s13871_s3 + $0x50] sm:$0xff]   ;;  %v234_v45 = vstv %s10315_s27  ;;  %s10621_s27 = sld [smem:[#allocation2 + $0x108]]  ;;  %s11413_s13 = sld [smem:[#allocation2 + $0x203]] }
  0x72   :  { %8398 = vmatpush3.bf16.msra.mxu0 %v9000_v37  ;;  %v138_v62 = vadd.f32 %v136_v32, %v129_v1  ;;  %v154_v37 = vmul.f32 %v9935_v42, %v153_v11  ;;  %v9013_v42 = vld [vmem:[%s13871_s3 + $0x374] sm:$0xff]   ;;  %v208_v32 = vmul.f32 %v10025_v46, %v207_v54  ;;  %v646_v1 = vpack.c.bf16 %v10172_v29, %v10172_v29  ;;  %v9023_v46 = vld [vmem:[%s13871_s3 + $0x80] sm:$0xff]  }
  0x73   :  { %8399 = vmatprep.subr.bf16.mxu0 %v9002_v14  ;;  %v182_v29 = vmul.f32 %v9982_v5, %v180_v13  ;;  %v9025_v52 = vld [vmem:[%s13871_s3 + $0x10] sm:$0xff]  }
  0x74   :  { %1234 = vmatpush1.bf16.msra.mxu1 %v9001_v41  ;;  %v147_v14 = vadd.f32 %v145_v48, %v138_v62  ;;  %v163_v41 = vmul.f32 %v9945_v44, %v162_v28  ;;  %v172_v44 = vmul.f32 %v9965_v60, %v171_v2  ;;  %v9019_v60 = vld [vmem:[%s13871_s3 + $0x384] ss:$0 sps:$4 sm:$0x33]   ;;  %v217_v48 = vmul.f32 %v10035_v50, %v216_v10  ;;  %v9026_v50 = vld [vmem:[%s13871_s3 + $0xc8] sm:$0xff]   ;;  %v9028_v62 = vld [vmem:[%s13871_s3 + $0x58] sm:$0xff]  }
  0x75   :  { %1235 = vmatprep.subr.bf16.mxu1 %v13945_v51 }
  0x76   :  { %8400 = vmatpush3.bf16.msra.mxu0 %v9003_v57  ;;  %v9015_v57 = vld [vmem:[%s13871_s3 + $0x2fc] sm:$0xff]   ;;  %v156_v34 = vadd.f32 %v154_v37, %v147_v14 }
  0x77   :  { %8401 = vmatprep.subr.bf16.mxu0 %v9005_v49  ;;  %v189_v49 = vstv %s10260_s11  ;;  %v13946_v14 = vld [vmem:[#allocation15_spill] sm:$0xff]  ;;  %s10392_s11 = sld [smem:[#allocation2 + $0x101]] }
  0x78   :  { %1236 = vmatpush1.bf16.msra.mxu1 %v9004_v0  ;;  %v128_v0 = vmul.f32 %v9896_v16, %v126_v58  ;;  %v165_v55 = vadd.f32 %v163_v41, %v156_v34  ;;  %v181_v16 = vmul.f32 %v9977_v4, %v180_v13  ;;  %v190_v40 = vmul.f32 %v9995_v15, %v189_v49  ;;  %v9020_v4 = vld [vmem:[%s13871_s3 + $0x48] sm:$0xff]   ;;  %v9030_v34 = vld [vmem:[%s13871_s3 + $0xd0] sm:$0xff]  }
  0x79   :  { %1237 = vmatprep.subr.bf16.mxu1 %v13945_v51  ;;  %v198_v58 = vstv %s10274_s29  ;;  %s10337_s29 = sld [smem:[#allocation2 + $0x16]]  ;;  %v191_v5 = vmul.f32 %v10000_v17, %v189_v49  ;;  %v235_v41 = vmul.f32 %v13946_v14, %v234_v45  ;;  %v9029_v17 = vld [vmem:[%s13871_s3 + $0x18] sm:$0xff]   ;;  %v9042_v14 = vld [vmem:[%s13871_s3 + $0xe8] sm:$0xff]  }
  0x7a   :  { %8402 = vmatpush3.bf16.msra.mxu0 %v9006_v36  ;;  %v130_v36 = vadd.f32 %v128_v0, %v121_v47  ;;  %v174_v26 = vadd.f32 %v172_v44, %v165_v55  ;;  %v199_v15 = vmul.f32 %v10007_v24, %v198_v58  ;;  %v1107_v24 = vsel %vm1105_vm1, %v9019_v60, 0  ;;  %v13947_v47 = vld [vmem:[#allocation11_spill] sm:$0xff]  ;;  %v13948_v0 = vld [vmem:[#allocation17_spill] sm:$0xff]  ;;  %v13949_v60 = vld [vmem:[#allocation12_spill] sm:$0xff] }
  0x7b   :  { %8403 = vmatprep.subr.bf16.mxu0 %v9008_v53  ;;  %v644_v53 = vpack.c.bf16 %v10159_v35, %v10159_v35  ;;  %v155_v35 = vmul.f32 %v9940_v43, %v153_v11  ;;  %v9021_v43 = vld [vmem:[%s13871_s3 + $0x8] sm:$0xff]   ;;  %v9032_v44 = vld [vmem:[%s13871_s3 + $0x60] sm:$0xff]   ;;  %v209_v55 = vmul.f32 %v13949_v60, %v207_v54 }
  0x7c   :  { %1238 = vmatpush1.bf16.msra.mxu1 %v9007_v56  ;;  %v139_v56 = vadd.f32 %v137_v39, %v130_v36  ;;  %v183_v12 = vadd.f32 %v181_v16, %v174_v26  ;;  %v9031_v16 = vld [vmem:[%s13871_s3 + $0x90] sm:$0xff]   ;;  %v13950_v36 = vld [vmem:[#allocation19_spill] sm:$0xff] }
  0x7d   :  { %1239 = vmatprep.subr.bf16.mxu1 %v13945_v51  ;;  %v9033_v54 = vld [vmem:[%s13871_s3 + $0x20] sm:$0xff]  }
  0x7e   :  { %8404 = vmatpush3.bf16.msra.mxu0 %v9009_v33  ;;  %v148_v6 = vadd.f32 %v146_v20, %v139_v56  ;;  %v192_v33 = vadd.f32 %v190_v40, %v183_v12  ;;  %v270_v40 = vstv %s10367_s26  ;;  %v9034_v56 = vld [vmem:[%s13871_s3 + $0xd8] sm:$0xff]   ;;  %s11308_s26 = sld [smem:[#allocation2 + $0x195]] }
  0x7f   :  { %8405 = vmatprep.subr.bf16.mxu0 %v9011_v38  ;;  %v173_v38 = vmul.f32 %v9970_v61, %v171_v2  ;;  %v252_v13 = vstv %s10337_s29  ;;  %s11110_s29 = sld [smem:[#allocation2 + $0x184]] }
  0x80   :  { %1240 = vmatpush1.bf16.msra.mxu1 %v9010_v18  ;;  %v157_v11 = vadd.f32 %v155_v35, %v148_v6  ;;  %v225_v18 = vstv %s10308_s1  ;;  %v201_v28 = vadd.f32 %v199_v15, %v192_v33  ;;  %v253_v20 = vmul.f32 %v13950_v36, %v252_v13  ;;  %v13952_v6 = vld [vmem:[#allocation14_spill] sm:$0xff]  ;;  %v9047_v36 = vld [vmem:[%s13871_s3 + $0xb0] sm:$0xff]   ;;  %s11763_s1 = sld [smem:[#allocation2 + $0x213]] }
  0x81   :  { %1241 = vmatprep.subr.bf16.mxu1 %v13945_v51  ;;  %v1775_v33 = vstv %s10388_s19  ;;  %s10631_s19 = sld [smem:[#allocation2 + $0x10a]] }
  0x82   :  { %8406 = vmatpush3.bf16.msra.mxu0 %v9012_v25  ;;  %v166_v61 = vadd.f32 %v164_v3, %v157_v11  ;;  %v210_v37 = vadd.f32 %v208_v32, %v201_v28  ;;  %v226_v25 = vmul.f32 %v10055_v9, %v225_v18  ;;  %v9036_v3 = vld [vmem:[%s13871_s3 + $0x68] sm:$0xff]   ;;  %v1779_v11 = vstv %s10392_s11  ;;  %v9039_v28 = vld [vmem:[%s13871_s3 + $0xa0] sm:$0xff]   ;;  %s10689_s11 = sld [smem:[#allocation2 + $0x10f]] }
  0x83   :  { %8407 = vmatprep.subr.bf16.mxu0 %v9014_v8  ;;  %v9027_v8 = vld [vmem:[%s13871_s3 + $0x88] sm:$0xff]  }
  0x84   :  { %1242 = vmatpush1.bf16.msra.mxu1 %v9013_v42  ;;  %v175_v2 = vadd.f32 %v173_v38, %v166_v61  ;;  %v243_v42 = vstv %s10334_s30  ;;  %v9037_v38 = vld [vmem:[%s13871_s3 + $0x28] sm:$0xff]   ;;  %v276_v61 = vstv %s10412_s14  ;;  %s10530_s14 = sld [smem:[#allocation2 + $0x106]] }
  0x85   :  { %1243 = vmatprep.subr.bf16.mxu1 %v13945_v51  ;;  %s10837_s30 = sld [smem:[#allocation2 + $0x116]] }
  0x86   :  { %8408 = vmatpush3.bf16.msra.mxu0 %v9015_v57  ;;  %v219_v57 = vadd.f32 %v217_v48, %v210_v37  ;;  %v184_v9 = vadd.f32 %v182_v29, %v175_v2  ;;  %v13954_v48 = vld [vmem:[#allocation18_spill] sm:$0xff]  ;;  %v254_v2 = vmul.f32 %v10102_v63, %v252_v13  ;;  %v9043_v63 = vld [vmem:[%s13871_s3 + $0xa8] sm:$0xff]  }
  0x87   :  { %8415 = vmatprep.subr.bf16.mxu0 %v9017_v27  ;;  %v200_v27 = vmul.f32 %v13947_v47, %v198_v58  ;;  %v10457_v29 = vld [vmem:[%s13868_s0] sm:$0xff]  ;;  %v9044_v13 = vld [vmem:[%s13871_s3 + $0x78] sm:$0xff]   ;;  %v272_v47 = vmul.f32 %v10130_v30, %v270_v40 }
  0x88   :  { %1244 = vmatpush1.bf16.msra.mxu1 %v9016_v31  ;;  %v228_v49 = vadd.f32 %v226_v25, %v219_v57  ;;  %v244_v31 = vmul.f32 %v13948_v0, %v243_v42  ;;  %v193_v39 = vadd.f32 %v191_v5, %v184_v9  ;;  %v1785_v5 = vstv %s10418_s9  ;;  %v13955_v57 = vld [vmem:[#allocation20_spill] sm:$0xff]  ;;  %v9045_v30 = vld [vmem:[%s13871_s3 + $0x38] sm:$0xff]   ;;  %s10660_s9 = sld [smem:[#allocation2 + $0x10e]] }
  0x89   :  { %1222 = vmatmul.mubr.bf16.vlgmr.msra.gmra.mrb[4].mxu0 %v644_v53  ;;  %1245 = vmatprep.subr.bf16.mxu1 %v13945_v51  ;;  %v261_v53 = vstv %s10364_s18  ;;  %s10809_s18 = sld [smem:[#allocation2 + $0x115]] }
  0x8a   :  { %8416 = vmatpush3.bf16.msra.mxu0 %v9018_v19  ;;  %v237_v19 = vadd.f32 %v235_v41, %v228_v49  ;;  %v202_v58 = vadd.f32 %v200_v27, %v193_v39  ;;  %v262_v12 = vmul.f32 %v10115_v21, %v261_v53  ;;  %v9035_v21 = vld [vmem:[%s13871_s3 + $0x98] sm:$0xff]   ;;  %v263_v9 = vmul.f32 %v13955_v57, %v261_v53  ;;  %v9046_v39 = vld [vmem:[%s13871_s3 + $0xf0] sm:$0xff]   ;;  %v9054_v57 = vld [vmem:[%s13871_s3 + $0x180] sm:$0xff]  }
  0x8b   :  { %8417 = vmatprep.subr.bf16.mxu0 %v9020_v4  ;;  %v13951_v4 = vld [vmem:[#allocation13_spill] sm:$0xff] }
  0x8c   :  { %1246 = vmatpush1.bf16.msra.mxu1 %v1107_v24  ;;  %v218_v26 = vmul.f32 %v13951_v4, %v216_v10  ;;  %v246_v35 = vadd.f32 %v244_v31, %v237_v19  ;;  %v211_v15 = vadd.f32 %v209_v55, %v202_v58  ;;  %v227_v10 = vmul.f32 %v13952_v6, %v225_v18  ;;  %v10512_v19 = vld [vmem:[%s13868_s0 + $0x30] sm:$0xff]  ;;  %v10518_v58 = vld [vmem:[%s13868_s0 + $0x8] sm:$0xff]  ;;  %v9049_v6 = vld [vmem:[%s13871_s3 + $0x100] sm:$0xff]  }
  0x8d   :  { %8437 = vmatprep.subr.bf16.mxu1 %v9022_v7  ;;  %v13953_v7 = vld [vmem:[#allocation16_spill] sm:$0xff]  ;;  %v245_v18 = vmul.f32 %v13954_v48, %v243_v42  ;;  %v1791_v31 = vstv %s10435_s23  ;;  %v1777_v4 = vmul.f32 %v10518_v58, %v1775_v33  ;;  %v9051_v48 = vld [vmem:[%s13871_s3 + $0xb8] sm:$0xff]   ;;  %s11627_s23 = sld [smem:[#allocation2 + $0x209]] }
  0x8e   :  { %8418 = vmatpush3.bf16.msra.mxu0 %v9021_v43  ;;  %v271_v43 = vmul.f32 %v10125_v23, %v270_v40  ;;  %v236_v32 = vmul.f32 %v13953_v7, %v234_v45  ;;  %v255_v24 = vadd.f32 %v253_v20, %v246_v35  ;;  %v9038_v23 = vld [vmem:[%s13871_s3 + $0xe0] sm:$0xff]   ;;  %v9040_v45 = vld [vmem:[%s13871_s3 + $0x70] sm:$0xff]   ;;  %v1792_v40 = vmul.f32 %v10512_v19, %v1791_v31 }
  0x8f   :  { %1262 = vmatmul.mubr.bf16.vlgmr.msra.gmra.mrb[4].mxu1 %v646_v1  ;;  %8419 = vmatprep.subr.bf16.mxu0 %v9024_v59  ;;  %v220_v59 = vadd.f32 %v218_v26, %v211_v15  ;;  %v9048_v20 = vld [vmem:[%s13871_s3 + $0x140] sm:$0xff]   ;;  %v10524_v26 = vld [vmem:[%s13868_s0 + $0x18] sm:$0xff]  ;;  %v1797_v15 = vstv %s10468_s12  ;;  %s10722_s12 = sld [smem:[#allocation2 + $0x111]] }
  0x90   :  { %8438 = vmatpush3.bf16.msra.mxu1 %v9023_v46  ;;  %v264_v1 = vadd.f32 %v262_v12, %v255_v24 }
  0x91   :  { %8439 = vmatprep.subr.bf16.mxu1 %v9026_v50  ;;  %v229_v46 = vadd.f32 %v227_v10, %v220_v59  ;;  %v10463_v50 = vld [vmem:[%s13868_s0 + $0x10] sm:$0xff]  ;;  %v10544_v59 = vld [vmem:[%s13868_s0 + $0x40] sm:$0xff] }
  0x92   :  { %8420 = vmatpush3.bf16.msra.mxu0 %v9025_v52  ;;  %v1776_v52 = vmul.f32 %v10457_v29, %v1775_v33  ;;  %v273_v37 = vadd.f32 %v271_v43, %v264_v1  ;;  %v1798_v33 = vmul.f32 %v10544_v59, %v1797_v15 }
  0x93   :  { %8421 = vmatprep.subr.bf16.mxu0 %v9028_v62  ;;  %v1780_v62 = vmul.f32 %v10463_v50, %v1779_v11  ;;  %v238_v25 = vadd.f32 %v236_v32, %v229_v46  ;;  %v9052_v32 = vld [vmem:[%s13871_s3 + $0x148] sm:$0xff]   ;;  %v1803_v46 = vstv %s10492_s17  ;;  %s10633_s17 = sld [smem:[#allocation2 + $0x10b]] }
  0x94   :  { %8440 = vmatpush3.bf16.msra.mxu1 %v9027_v8  ;;  %v9041_v8 = vld [vmem:[%s13871_s3 + $0x30] sm:$0xff]   ;;  %v277_v41 = vadd.f32 %v276_v61, %v273_v37 }
  0x95   :  { %8441 = vmatprep.subr.bf16.mxu1 %v9030_v34  ;;  %v247_v42 = vadd.f32 %v245_v18, %v238_v25  ;;  %v1782_v27 = vadd.f32 %v1780_v62, %v1776_v52  ;;  %v10573_v52 = vld [vmem:[%s13868_s0 + $0x50] sm:$0xff]  ;;  %v10579_v25 = vld [vmem:[%s13868_s0 + $0x38] sm:$0xff] }
  0x96   :  { %8422 = vmatpush3.bf16.msra.mxu0 %v9029_v17  ;;  %v10487_v17 = vld [vmem:[%s13868_s0 + $0x20] sm:$0xff]  ;;  %v281_v49 = vcombine.high %v277_v41, %v277_v41  ;;  %v1804_v62 = vmul.f32 %v10573_v52, %v1803_v46 }
  0x97   :  { %8423 = vmatprep.subr.bf16.mxu0 %v9032_v44  ;;  %v1786_v34 = vmul.f32 %v10487_v17, %v1785_v5  ;;  %v288_v44 = vrot.slane %v277_v41, %v10150_v22  ;;  %v256_v0 = vadd.f32 %v254_v2, %v247_v42  ;;  %v1793_v2 = vmul.f32 %v10579_v25, %v1791_v31  ;;  %v10613_v31 = vld [vmem:[%s13868_s0 + $0x48] sm:$0xff] }
  0x98   :  { %8442 = vmatpush3.bf16.msra.mxu1 %v9031_v16  ;;  %v10501_v55 = vrot.slane %v281_v49, %v10150_v22  ;;  %v1809_v42 = vstv %s10530_s14  ;;  %v1815_v49 = vstv %s10557_s21  ;;  %s10623_s21 = sld [smem:[#allocation2 + $0x109]] }
  0x99   :  { %8443 = vmatprep.subr.bf16.mxu1 %v9034_v56  ;;  %v296_v60 = vcombine.high %v288_v44, %v288_v44  ;;  %v265_v16 = vadd.f32 %v263_v9, %v256_v0  ;;  %v1788_v53 = vadd.f32 %v1786_v34, %v1782_v27  ;;  %v323_v10 = vpack.c.bf16 %v288_v44, %v288_v44  ;;  %v9056_v9 = vld [vmem:[%s13871_s3 + $0x110] sm:$0xff]   ;;  %v10603_v27 = vld [vmem:[%s13868_s0 + $0x60] sm:$0xff]  ;;  %v9058_v44 = vld [vmem:[%s13871_s3 + $0x158] sm:$0xff]   ;;  %s11183_s14 = sld [smem:[#allocation2 + $0x189]] }
  0x9a   :  { %8424 = vmatpush3.bf16.msra.mxu0 %v9033_v54  ;;  %v1781_v54 = vmul.f32 %v10524_v26, %v1779_v11  ;;  %v297_v35 = vcombine.high %v10501_v55, %v10501_v55  ;;  %v1810_v34 = vmul.f32 %v10603_v27, %v1809_v42 }
  0x9b   :  { %8425 = vmatprep.subr.bf16.mxu0 %v9036_v3  ;;  %v324_v56 = vpack.c.bf16 %v296_v60, %v296_v60  ;;  %v274_v12 = vadd.f32 %v272_v47, %v265_v16  ;;  %v9050_v3 = vld [vmem:[%s13871_s3 + $0xf8] sm:$0xff]   ;;  %v1794_v24 = vadd.f32 %v1792_v40, %v1788_v53 }
  0x9c   :  { %8444 = vmatpush3.bf16.msra.mxu1 %v9035_v21  ;;  %v326_v43 = vpack.c.bf16 %v297_v35, %v297_v35  ;;  %v1783_v11 = vadd.f32 %v1781_v54, %v1777_v4  ;;  %v10550_v21 = vld [vmem:[%s13868_s0 + $0x28] sm:$0xff]  ;;  %v10643_v53 = vld [vmem:[%s13868_s0 + $0x58] sm:$0xff]  ;;  %v9060_v4 = vld [vmem:[%s13871_s3 + $0x190] sm:$0xff]  }
  0x9d   :  { %8445 = vmatprep.subr.bf16.mxu1 %v9038_v23  ;;  %1646 = vmatprep.mubr.bf16.mxu0 %v324_v56  ;;  %v278_v7 = vadd.f32 %v276_v61, %v274_v12  ;;  %v1800_v61 = vadd.f32 %v1798_v33, %v1794_v24  ;;  %v1805_v40 = vmul.f32 %v10643_v53, %v1803_v46  ;;  %v9062_v54 = vld [vmem:[%s13871_s3 + $0x120] sm:$0xff]   ;;  %v9064_v35 = vld [vmem:[%s13871_s3 + $0x168] sm:$0xff]   ;;  %v1821_v12 = vstv %s10621_s27  ;;  %v10680_v24 = vld [vmem:[%s13868_s0 + $0x90] sm:$0xff]  ;;  %s11257_s27 = sld [smem:[#allocation2 + $0x191]] }
  0x9e   :  { %8426 = vmatpush3.bf16.msra.mxu0 %v9037_v38  ;;  %v1787_v38 = vmul.f32 %v10550_v21, %v1785_v5  ;;  %1686 = vmatprep.mubr.bf16.mxu1 %v326_v43  ;;  %v325_v5 = vpack.c.bf16 %v10501_v55, %v10501_v55  ;;  %v10628_v55 = vld [vmem:[%s13868_s0 + $0x70] sm:$0xff]  ;;  %v9063_v43 = vld [vmem:[%s13871_s3 + $0x198] sm:$0xff]  }
  0x9f   :  { %8427 = vmatprep.subr.bf16.mxu0 %v9040_v45  ;;  %v298_v23 = vcombine.high %v278_v7, %v278_v7  ;;  %v10554_v1 = vrot.slane %v278_v7, %v10150_v22  ;;  %v9053_v45 = vld [vmem:[%s13871_s3 + $0x108] sm:$0xff]   ;;  %v1806_v47 = vadd.f32 %v1804_v62, %v1800_v61  ;;  %v1816_v16 = vmul.f32 %v10628_v55, %v1815_v49  ;;  %v10674_v7 = vld [vmem:[%s13868_s0 + $0x80] sm:$0xff] }
  0xa0   :  { %8446 = vmatpush3.bf16.msra.mxu1 %v9039_v28  ;;  %v1789_v37 = vadd.f32 %v1787_v38, %v1783_v11  ;;  %v1833_v11 = vstv %s10631_s19  ;;  %v9065_v38 = vld [vmem:[%s13871_s3 + $0x128] sm:$0xff]   ;;  %v1845_v61 = vstv %s10638_s24  ;;  %s10860_s24 = sld [smem:[#allocation2 + $0x117]]  ;;  %s11225_s19 = sld [smem:[#allocation2 + $0x18e]] }
  0xa1   :  { %8447 = vmatprep.subr.bf16.mxu1 %v9042_v14  ;;  %v313_v18 = vcombine.high %v10554_v1, %v10554_v1  ;;  %v10565_v28 = vrot.slane %v298_v23, %v10150_v22  ;;  %v1812_v60 = vadd.f32 %v1810_v34, %v1806_v47  ;;  %v1839_v23 = vstv %s10633_s17  ;;  %v9069_v47 = vld [vmem:[%s13871_s3 + $0x1a8] sm:$0xff]   ;;  %v9070_v34 = vld [vmem:[%s13871_s3 + $0x178] sm:$0xff]   ;;  %s12300_s17 = sld [smem:[#allocation2 + $0x28f]] }
  0xa2   :  { %8428 = vmatpush3.bf16.msra.mxu0 %v9041_v8  ;;  %v9055_v8 = vld [vmem:[%s13871_s3 + $0x150] sm:$0xff]   ;;  %v1795_v0 = vadd.f32 %v1793_v2, %v1789_v37  ;;  %v10706_v37 = vld [vmem:[%s13868_s0 + $0x78] sm:$0xff] }
  0xa3   :  { %8429 = vmatprep.subr.bf16.mxu0 %v9044_v13  ;;  %v328_v14 = vpack.c.bf16 %v313_v18, %v313_v18  ;;  %v314_v41 = vcombine.high %v10565_v28, %v10565_v28  ;;  %v9057_v13 = vld [vmem:[%s13871_s3 + $0x188] sm:$0xff]   ;;  %v1818_v56 = vadd.f32 %v1816_v16, %v1812_v60  ;;  %v1817_v2 = vmul.f32 %v10706_v37, %v1815_v49 }
  0xa4   :  { %8448 = vmatpush3.bf16.msra.mxu1 %v9043_v63  ;;  %v1863_v16 = vstv %s10689_s11  ;;  %s11204_s11 = sld [smem:[#allocation2 + $0x18c]] }
  0xa5   :  { %8449 = vmatprep.subr.bf16.mxu1 %v9046_v39  ;;  %v330_v63 = vpack.c.bf16 %v314_v41, %v314_v41  ;;  %v9059_v39 = vld [vmem:[%s13871_s3 + $0x118] sm:$0xff]  }
  0xa6   :  { %8430 = vmatpush3.bf16.msra.mxu0 %v9045_v30  ;;  %v1799_v30 = vmul.f32 %v10613_v31, %v1797_v15  ;;  %v1827_v15 = vstv %s10623_s21  ;;  %s11322_s21 = sld [smem:[#allocation2 + $0x196]] }
  0xa7   :  { %8459 = vmatprep.subr.bf16.mxu0 %v9048_v20  ;;  %v1828_v33 = vmul.f32 %v10680_v24, %v1827_v15 }
  0xa8   :  { %8450 = vmatpush3.bf16.msra.mxu1 %v9047_v36  ;;  %v9061_v36 = vld [vmem:[%s13871_s3 + $0x160] sm:$0xff]   ;;  %v1801_v20 = vadd.f32 %v1799_v30, %v1795_v0  ;;  %v9071_v0 = vld [vmem:[%s13871_s3 + $0x138] sm:$0xff]  }
  0xa9   :  { %1647 = vmatmul.mubr.bf16.vlgmr.msra.gmra.mrb[8].mxu0 %v323_v10  ;;  %8451 = vmatprep.subr.bf16.mxu1 %v9050_v3  ;;  %v10665_v10 = vld [vmem:[%s13868_s0 + $0x68] sm:$0xff] }
  0xaa   :  { %8460 = vmatpush3.bf16.msra.mxu0 %v9049_v6  ;;  %1726 = vmatprep.mubr.bf16.mxu0 %v328_v14  ;;  %v1807_v6 = vadd.f32 %v1805_v40, %v1801_v20  ;;  %v1811_v3 = vmul.f32 %v10665_v10, %v1809_v42  ;;  %v10715_v14 = vld [vmem:[%s13868_s0 + $0xb0] sm:$0xff]  ;;  %v1851_v42 = vstv %s10650_s8  ;;  %v10768_v40 = vld [vmem:[%s13868_s0 + $0x98] sm:$0xff]  ;;  %s10882_s8 = sld [smem:[#allocation2 + $0x118]] }
  0xab   :  { %8461 = vmatprep.subr.bf16.mxu0 %v9052_v32  ;;  %v1822_v32 = vmul.f32 %v10674_v7, %v1821_v12  ;;  %v1840_v41 = vmul.f32 %v10715_v14, %v1839_v23 }
  0xac   :  { %8452 = vmatpush3.bf16.msra.mxu1 %v9051_v48  ;;  %v10694_v48 = vld [vmem:[%s13868_s0 + $0xa0] sm:$0xff]  ;;  %v1813_v62 = vadd.f32 %v1811_v3, %v1807_v6  ;;  %v1869_v6 = vstv %s10701_s10  ;;  %s10957_s10 = sld [smem:[#allocation5 + $0x2]] }
  0xad   :  { %1734 = vmatprep.subr.bf16.mxu1 %v13945_v51  ;;  %v1824_v46 = vadd.f32 %v1822_v32, %v1818_v56  ;;  %v1834_v18 = vmul.f32 %v10694_v48, %v1833_v11  ;;  %v9073_v56 = vld [vmem:[%s13871_s3 + $0x3c8] sm:$0xff]  }
  0xae   :  { %8462 = vmatpush3.bf16.msra.mxu0 %v9053_v45  ;;  %v9067_v45 = vld [vmem:[%s13871_s3 + $0x170] sm:$0xff]   ;;  %v1819_v49 = vadd.f32 %v1817_v2, %v1813_v62  ;;  %v10814_v2 = vld [vmem:[%s13868_s0 + $0xb8] sm:$0xff] }
  0xaf   :  { %1687 = vmatmul.mubr.bf16.vlgmr.msra.gmra.mrb[8].mxu1 %v325_v5  ;;  %8463 = vmatprep.subr.bf16.mxu0 %v9055_v8  ;;  %v9066_v5 = vld [vmem:[%s13871_s3 + $0x1a0] sm:$0xff]   ;;  %v1830_v8 = vadd.f32 %v1828_v33, %v1824_v46  ;;  %v9074_v33 = vld [vmem:[%s13871_s3 + $0x388] sm:$0xff]   ;;  %v10800_v46 = vld [vmem:[%s13868_s0 + $0xf0] sm:$0xff] }
  0xb0   :  { %1735 = vmatpush1.bf16.msra.mxu1 %v9054_v57  ;;  %7164 = vmatprep.mubr.msk.bf16.mxu1 %vm1101_vm0, %v330_v63  ;;  %v9068_v57 = vld [vmem:[%s13871_s3 + $0x130] sm:$0xff]   ;;  %v10730_v63 = vld [vmem:[%s13868_s0 + $0xc0] sm:$0xff] }
  0xb1   :  { %1736 = vmatprep.subr.bf16.mxu1 %v13945_v51 }
  0xb2   :  { %8464 = vmatpush3.bf16.msra.mxu0 %v9056_v9  ;;  %v1836_v9 = vadd.f32 %v1834_v18, %v1830_v8  ;;  %v1864_v18 = vmul.f32 %v10800_v46, %v1863_v16  ;;  %v9075_v8 = vld [vmem:[%s13871_s3 + $0x1b8] sm:$0xff]  }
  0xb3   :  { %8465 = vmatprep.subr.bf16.mxu0 %v9058_v44  ;;  %v1857_v44 = vstv %s10660_s9  ;;  %s11295_s9 = sld [smem:[#allocation2 + $0x194]] }
  0xb4   :  { %1737 = vmatpush1.bf16.msra.mxu1 %v9057_v13  ;;  %v1846_v13 = vmul.f32 %v10730_v63, %v1845_v61  ;;  %v1842_v30 = vadd.f32 %v1840_v41, %v1836_v9  ;;  %v9078_v9 = vld [vmem:[%s13871_s3 + $0x1c0] ss:$0 sps:$4 sm:$0x33]  }
  0xb5   :  { %1738 = vmatprep.subr.bf16.mxu1 %v13945_v51 }
  0xb6   :  { %8466 = vmatpush3.bf16.msra.mxu0 %v9059_v39  ;;  %v10750_v39 = vld [vmem:[%s13868_s0 + $0xd0] sm:$0xff] }
  0xb7   :  { %8467 = vmatprep.subr.bf16.mxu0 %v9061_v36  ;;  %v1852_v60 = vmul.f32 %v10750_v39, %v1851_v42  ;;  %v10762_v36 = vld [vmem:[%s13868_s0 + $0x88] sm:$0xff] }
  0xb8   :  { %1739 = vmatpush1.bf16.msra.mxu1 %v9060_v4  ;;  %v1823_v20 = vmul.f32 %v10762_v36, %v1821_v12  ;;  %v1829_v4 = vmul.f32 %v10768_v40, %v1827_v15  ;;  %v10780_v12 = vld [vmem:[%s13868_s0 + $0xe0] sm:$0xff] }
  0xb9   :  { %1740 = vmatprep.subr.bf16.mxu1 %v13945_v51  ;;  %v1858_v15 = vmul.f32 %v10780_v12, %v1857_v44 }
  0xba   :  { %8468 = vmatpush3.bf16.msra.mxu0 %v9062_v54  ;;  %v9072_v54 = vld [vmem:[%s13871_s3 + $0x1b0] sm:$0xff]   ;;  %v1825_v3 = vadd.f32 %v1823_v20, %v1819_v49 }
  0xbb   :  { %8469 = vmatprep.subr.bf16.mxu0 %v9064_v35  ;;  %v1848_v35 = vadd.f32 %v1846_v13, %v1842_v30  ;;  %v1881_v13 = vstv %s10742_s25  ;;  %s11178_s25 = sld [smem:[#allocation2 + $0x187]] }
  0xbc   :  { %1741 = vmatpush1.bf16.msra.mxu1 %v9063_v43  ;;  %v10791_v43 = vld [vmem:[%s13868_s0 + $0xa8] sm:$0xff]  ;;  %v1831_v62 = vadd.f32 %v1829_v4, %v1825_v3  ;;  %v10876_v3 = vld [vmem:[%s13868_s0 + $0x120] sm:$0xff] }
  0xbd   :  { %1742 = vmatprep.subr.bf16.mxu1 %v13945_v51  ;;  %v1835_v32 = vmul.f32 %v10791_v43, %v1833_v11  ;;  %v327_v11 = vpack.c.bf16 %v10554_v1, %v10554_v1  ;;  %v9076_v1 = vld [vmem:[%s13871_s3 + $0x3d0] sm:$0xff]  }
  0xbe   :  { %8470 = vmatpush3.bf16.msra.mxu0 %v9065_v38  ;;  %v1854_v38 = vadd.f32 %v1852_v60, %v1848_v35  ;;  %v10853_v60 = vld [vmem:[%s13868_s0 + $0x110] sm:$0xff]  ;;  %v9079_v35 = vld [vmem:[%s13871_s3 + $0x3d8] sm:$0xff]  }
  0xbf   :  { %8471 = vmatprep.subr.bf16.mxu0 %v9067_v45  ;;  %v1875_v45 = vstv %s10722_s12  ;;  %s11269_s12 = sld [smem:[#allocation2 + $0x192]] }
  0xc0   :  { %1743 = vmatpush1.bf16.msra.mxu1 %v9066_v5  ;;  %v1841_v5 = vmul.f32 %v10814_v2, %v1839_v23  ;;  %v1860_v41 = vadd.f32 %v1858_v15, %v1854_v38  ;;  %v1876_v20 = vmul.f32 %v10853_v60, %v1875_v45  ;;  %v13888_v38 = vstv %s10786_s28 }
  0xc1   :  { %1744 = vmatprep.subr.bf16.mxu1 %v13945_v51 }
  0xc2   :  { %8472 = vmatpush3.bf16.msra.mxu0 %v9068_v57  ;;  %v10828_v57 = vld [vmem:[%s13868_s0 + $0x100] sm:$0xff]  ;;  %v1866_v30 = vadd.f32 %v1864_v18, %v1860_v41  ;;  %v13889_v41 = vstv %s10809_s18 }
  0xc3   :  { %8473 = vmatprep.subr.bf16.mxu0 %v9070_v34  ;;  %v1870_v23 = vmul.f32 %v10828_v57, %v1869_v6  ;;  %v10842_v34 = vld [vmem:[%s13868_s0 + $0xc8] sm:$0xff] }
  0xc4   :  { %1745 = vmatpush1.bf16.msra.mxu1 %v9069_v47  ;;  %v1837_v47 = vadd.f32 %v1835_v32, %v1831_v62  ;;  %v1847_v49 = vmul.f32 %v10842_v34, %v1845_v61  ;;  %v13890_v61 = vstv %s10757_s16  ;;  %v1882_v32 = vmul.f32 %v10876_v3, %v1881_v13 }
  0xc5   :  { %1746 = vmatprep.subr.bf16.mxu1 %v13945_v51  ;;  %v1872_v15 = vadd.f32 %v1870_v23, %v1866_v30 }
  0xc6   :  { %8474 = vmatpush3.bf16.msra.mxu0 %v9071_v0  ;;  %v9077_v0 = vld [vmem:[%s13871_s3 + $0x390] sm:$0xff]   ;;  %v1843_v4 = vadd.f32 %v1841_v5, %v1837_v47  ;;  %v10912_v47 = vld [vmem:[%s13868_s0 + $0xf8] sm:$0xff] }
  0xc7   :  { %8481 = vmatprep.subr.bf16.mxu0 %v9073_v56  ;;  %v1878_v62 = vadd.f32 %v1876_v20, %v1872_v15  ;;  %v10898_v5 = vld [vmem:[%s13868_s0 + $0x130] sm:$0xff]  ;;  %v10923_v20 = vld [vmem:[%s13868_s0 + $0x140] sm:$0xff] }
  0xc8   :  { %1747 = vmatpush1.bf16.msra.mxu1 %v9072_v54  ;;  %v10865_v54 = vld [vmem:[%s13868_s0 + $0xd8] sm:$0xff] }
  0xc9   :  { %1727 = vmatmul.mubr.bf16.vlgmr.msra.gmra.mrb[12].mxu0 %v327_v11  ;;  %1748 = vmatprep.subr.bf16.mxu1 %v13945_v51  ;;  %v1853_v56 = vmul.f32 %v10865_v54, %v1851_v42  ;;  %v1849_v42 = vadd.f32 %v1847_v49, %v1843_v4  ;;  %v9080_v11 = vld [vmem:[%s13871_s3 + $0x398] sm:$0xff]   ;;  %v1865_v49 = vmul.f32 %v10912_v47, %v1863_v16 }
  0xca   :  { %8482 = vmatpush3.bf16.msra.mxu0 %v9074_v33  ;;  %v10887_v33 = vld [vmem:[%s13868_s0 + $0xe8] sm:$0xff]  ;;  %v1884_v30 = vadd.f32 %v1882_v32, %v1878_v62  ;;  %v1894_v4 = vmul.f32 %v10923_v20, %v13888_v38  ;;  %v329_v16 = vpack.c.bf16 %v10565_v28, %v10565_v28  ;;  %v9084_v28 = vld [vmem:[%s13871_s3 + $0x3a0] sm:$0xff]   ;;  %v10962_v38 = vld [vmem:[%s13868_s0 + $0x118] sm:$0xff] }
  0xcb   :  { %8483 = vmatprep.subr.bf16.mxu0 %v9076_v1  ;;  %v1859_v18 = vmul.f32 %v10887_v33, %v1857_v44  ;;  %v1888_v1 = vmul.f32 %v10898_v5, %v13890_v61  ;;  %v1612_v44 = vsel %vm1105_vm1, %v9078_v9, 0  ;;  %v1855_v23 = vadd.f32 %v1853_v56, %v1849_v42  ;;  %v9082_v9 = vld [vmem:[%s13871_s3 + $0x408] sm:$0xff]   ;;  %13957 = vst [vmem:[#allocation11_spill] sm:$0xff] %v10962_v38 }
  0xcc   :  { %1749 = vmatpush1.bf16.msra.mxu1 %v9075_v8  ;;  %v9081_v8 = vld [vmem:[%s13871_s3 + $0x448] sm:$0xff]   ;;  %v13891_v56 = vstv %s10837_s30 }
  0xcd   :  { %1750 = vmatprep.subr.bf16.mxu1 %v13945_v51  ;;  %v1861_v15 = vadd.f32 %v1859_v18, %v1855_v23  ;;  %v10937_v32 = vld [vmem:[%s13868_s0 + $0x108] sm:$0xff]  ;;  %v1890_v62 = vadd.f32 %v1888_v1, %v1884_v30  ;;  %v10951_v18 = vld [vmem:[%s13868_s0 + $0x150] sm:$0xff]  ;;  %v1877_v1 = vmul.f32 %v10962_v38, %v1875_v45  ;;  %v9089_v45 = vld [vmem:[%s13871_s3 + $0x458] sm:$0xff]  }
  0xce   :  { %8484 = vmatpush3.bf16.msra.mxu0 %v9077_v0  ;;  %v9083_v0 = vld [vmem:[%s13871_s3 + $0x3e0] sm:$0xff]   ;;  %v1871_v42 = vmul.f32 %v10937_v32, %v1869_v6  ;;  %13956 = vst [vmem:[#allocation15_spill] sm:$0xff] %v10951_v18  ;;  %v1900_v23 = vmul.f32 %v10951_v18, %v13889_v41  ;;  %v13892_v6 = vstv %s10860_s24  ;;  %v9086_v30 = vld [vmem:[%s13871_s3 + $0x410] sm:$0xff]  }
  0xcf   :  { %8485 = vmatprep.subr.bf16.mxu0 %v9079_v35  ;;  %v9085_v35 = vld [vmem:[%s13871_s3 + $0x450] sm:$0xff]   ;;  %v1896_v41 = vadd.f32 %v1894_v4, %v1890_v62  ;;  %v10988_v4 = vld [vmem:[%s13868_s0 + $0x128] sm:$0xff] }
  0xd0   :  { %1751 = vmatpush1.bf16.msra.mxu1 %v1612_v44  ;;  %v1867_v44 = vadd.f32 %v1865_v49, %v1861_v15  ;;  %v10976_v49 = vld [vmem:[%s13868_s0 + $0x160] sm:$0xff]  ;;  %13959 = vst [vmem:[#allocation12_spill] sm:$0xff] %v10988_v4  ;;  %v1883_v62 = vmul.f32 %v10988_v4, %v1881_v13  ;;  %v11009_v13 = vld [vmem:[%s13868_s0 + $0x138] sm:$0xff] }
  0xd1   :  { %8503 = vmatprep.subr.bf16.mxu1 %v9081_v8  ;;  %v9087_v8 = vld [vmem:[%s13871_s3 + $0x3e8] sm:$0xff]   ;;  %13958 = vst [vmem:[#allocation17_spill] sm:$0xff] %v10976_v49  ;;  %v1906_v15 = vmul.f32 %v10976_v49, %v13891_v56  ;;  %v10999_v56 = vld [vmem:[%s13868_s0 + $0x170] sm:$0xff]  ;;  %13961 = vst [vmem:[#allocation13_spill] sm:$0xff] %v11009_v13  ;;  %v2603_v49 = vstv %s11014_s22  ;;  %s12257_s22 = sld [smem:[#allocation2 + $0x28b]] }
  0xd2   :  { %8486 = vmatpush3.bf16.msra.mxu0 %v9080_v11  ;;  %v1917_v11 = vstv %s10882_s8  ;;  %v1873_v61 = vadd.f32 %v1871_v42, %v1867_v44  ;;  %13960 = vst [vmem:[#allocation19_spill] sm:$0xff] %v10999_v56  ;;  %v1912_v42 = vmul.f32 %v10999_v56, %v13892_v6  ;;  %s11004_s8 = sld [smem:[#allocation2 + $0x180]]  ;;  %v11046_v56 = vld [vmem:[%s13868_s0 + $0x158] sm:$0xff] }
  0xd3   :  { %1767 = vmatmul.mubr.bf16.vlgmr.msra.gmra.mrb[12].mxu1 %v329_v16  ;;  %8487 = vmatprep.subr.bf16.mxu0 %v9083_v0  ;;  %v9088_v16 = vld [vmem:[%s13871_s3 + $0x3a8] sm:$0xff]   ;;  %v1902_v0 = vadd.f32 %v1900_v23, %v1896_v41  ;;  %v9090_v23 = vld [vmem:[%s13871_s3 + $0x418] sm:$0xff]   ;;  %13966 = vst [vmem:[#allocation18_spill] sm:$0xff] %v11046_v56 }
  0xd4   :  { %8504 = vmatpush3.bf16.msra.mxu1 %v9082_v9  ;;  %v1879_v44 = vadd.f32 %v1877_v1, %v1873_v61  ;;  %v13962_v9 = vstv %s10757_s16  ;;  %v11022_v61 = vld [vmem:[%s13868_s0 + $0x180] sm:$0xff]  ;;  %v9091_v1 = vld [vmem:[%s13871_s3 + $0x3f0] sm:$0xff]   ;;  %s11195_s16 = sld [smem:[#allocation2 + $0x18b]] }
  0xd5   :  { %8505 = vmatprep.subr.bf16.mxu1 %v9085_v35  ;;  %v1889_v41 = vmul.f32 %v11009_v13, %v13962_v9  ;;  %v1908_v6 = vadd.f32 %v1906_v15, %v1902_v0  ;;  %13963 = vst [vmem:[#allocation14_spill] sm:$0xff] %v11022_v61  ;;  %v1918_v35 = vmul.f32 %v11022_v61, %v1917_v11  ;;  %v13965_v15 = vstv %s10786_s28  ;;  %v9092_v13 = vld [vmem:[%s13871_s3 + $0x3b0] sm:$0xff]   ;;  %s11051_s28 = sld [smem:[#allocation2 + $0x182]] }
  0xd6   :  { %8488 = vmatpush3.bf16.msra.mxu0 %v9084_v28  ;;  %v1885_v9 = vadd.f32 %v1883_v62, %v1879_v44  ;;  %v11031_v28 = vld [vmem:[%s13868_s0 + $0x148] sm:$0xff]  ;;  %v1923_v62 = vstv %s10957_s10  ;;  %s11176_s10 = sld [smem:[#allocation2 + $0x186]] }
  0xd7   :  { %8489 = vmatprep.subr.bf16.mxu0 %v9087_v8  ;;  %13964 = vst [vmem:[#allocation16_spill] sm:$0xff] %v11031_v28  ;;  %v1895_v0 = vmul.f32 %v11031_v28, %v13965_v15  ;;  %v9093_v8 = vld [vmem:[%s13871_s3 + $0x460] sm:$0xff]   ;;  %v1914_v61 = vadd.f32 %v1912_v42, %v1908_v6  ;;  %v13967_v15 = vstv %s10809_s18  ;;  %v9095_v42 = vld [vmem:[%s13871_s3 + $0x3f8] sm:$0xff]   ;;  %s11125_s18 = sld [smem:[#allocation2 + $0x185]] }
  0xd8   :  { %8506 = vmatpush3.bf16.msra.mxu1 %v9086_v30  ;;  %v1891_v44 = vadd.f32 %v1889_v41, %v1885_v9  ;;  %v1901_v30 = vmul.f32 %v11046_v56, %v13967_v15  ;;  %v9094_v6 = vld [vmem:[%s13871_s3 + $0x420] sm:$0xff]   ;;  %v9097_v41 = vld [vmem:[%s13871_s3 + $0x468] sm:$0xff]   ;;  %v13969_v15 = vstv %s10837_s30  ;;  %v2599_v4 = vstv %s11004_s8  ;;  %s11083_s30 = sld [smem:[#allocation2 + $0x183]]  ;;  %s11217_s8 = sld [smem:[#allocation2 + $0x18d]] }
  0xd9   :  { %8507 = vmatprep.subr.bf16.mxu1 %v9089_v45  ;;  %v1920_v45 = vadd.f32 %v1918_v35, %v1914_v61  ;;  %v9096_v61 = vld [vmem:[%s13871_s3 + $0x3b8] sm:$0xff]  }
  0xda   :  { %8490 = vmatpush3.bf16.msra.mxu0 %v9088_v16  ;;  %v1897_v9 = vadd.f32 %v1895_v0, %v1891_v44  ;;  %v11065_v16 = vld [vmem:[%s13868_s0 + $0x168] sm:$0xff]  ;;  %v11076_v0 = vld [vmem:[%s13868_s0 + $0x178] sm:$0xff]  ;;  %v13971_v44 = vstv %s10860_s24  ;;  %s11773_s24 = sld [smem:[#allocation2 + $0x214]] }
  0xdb   :  { %8491 = vmatprep.subr.bf16.mxu0 %v9091_v1  ;;  %13968 = vst [vmem:[#allocation20_spill] sm:$0xff] %v11065_v16  ;;  %v1907_v56 = vmul.f32 %v11065_v16, %v13969_v15  ;;  %v1924_v35 = vadd.f32 %v1923_v62, %v1920_v45  ;;  %13970 = vst [vmem:[#allocation21_spill] sm:$0xff] %v11076_v0  ;;  %v1913_v28 = vmul.f32 %v11076_v0, %v13971_v44  ;;  %v9099_v45 = vld [vmem:[%s13871_s3 + $0x400] sm:$0xff]   ;;  %v11095_v15 = vld [vmem:[%s13868_s0 + $0x188] sm:$0xff] }
  0xdc   :  { %8508 = vmatpush3.bf16.msra.mxu1 %v9090_v23  ;;  %v1903_v1 = vadd.f32 %v1901_v30, %v1897_v9  ;;  %v9098_v23 = vld [vmem:[%s13871_s3 + $0x428] sm:$0xff]   ;;  %13972 = vst [vmem:[#allocation22_spill] sm:$0xff] %v11095_v15  ;;  %v9100_v44 = vld [vmem:[%s13871_s3 + $0x3c0] sm:$0xff]  }
  0xdd   :  { %8509 = vmatprep.subr.bf16.mxu1 %v9093_v8  ;;  %v1935_v8 = vrot.slane %v1924_v35, %v10150_v22  ;;  %v1928_v30 = vcombine.high %v1924_v35, %v1924_v35 }
  0xde   :  { %8492 = vmatpush3.bf16.msra.mxu0 %v9092_v13  ;;  %v1909_v9 = vadd.f32 %v1907_v56, %v1903_v1  ;;  %v1919_v13 = vmul.f32 %v11095_v15, %v1917_v11  ;;  %v2600_v56 = vmul.f32 %v10457_v29, %v2599_v4  ;;  %v2604_v1 = vmul.f32 %v10463_v50, %v2603_v49  ;;  %v9103_v29 = vld [vmem:[%s13871_s3 + $0x4c8] sm:$0xff]  }
  0xdf   :  { %8493 = vmatprep.subr.bf16.mxu0 %v9095_v42  ;;  %v9101_v42 = vld [vmem:[%s13871_s3 + $0x470] sm:$0xff]   ;;  %v1943_v35 = vcombine.high %v1935_v8, %v1935_v8  ;;  %v11105_v0 = vrot.slane %v1928_v30, %v10150_v22  ;;  %v2609_v11 = vstv %s11051_s28  ;;  %v2615_v18 = vstv %s11083_s30  ;;  %s11181_s28 = sld [smem:[#allocation2 + $0x188]]  ;;  %s11448_s30 = sld [smem:[#allocation2 + $0x204]] }
  0xe0   :  { %8510 = vmatpush3.bf16.msra.mxu1 %v9094_v6  ;;  %v1915_v16 = vadd.f32 %v1913_v28, %v1909_v9  ;;  %v9102_v6 = vld [vmem:[%s13871_s3 + $0x430] sm:$0xff]   ;;  %v9105_v28 = vld [vmem:[%s13871_s3 + $0x478] sm:$0xff]   ;;  %v2610_v9 = vmul.f32 %v10487_v17, %v2609_v11 }
  0xe1   :  { %8511 = vmatprep.subr.bf16.mxu1 %v9097_v41  ;;  %v1971_v15 = vpack.c.bf16 %v1943_v35, %v1943_v35  ;;  %v1944_v30 = vcombine.high %v11105_v0, %v11105_v0  ;;  %v1970_v35 = vpack.c.bf16 %v1935_v8, %v1935_v8 }
  0xe2   :  { %8494 = vmatpush3.bf16.msra.mxu0 %v9096_v61  ;;  %v1921_v50 = vadd.f32 %v1919_v13, %v1915_v16  ;;  %v2606_v61 = vadd.f32 %v2604_v1, %v2600_v56  ;;  %v9104_v16 = vld [vmem:[%s13871_s3 + $0x488] sm:$0xff]   ;;  %v2601_v13 = vmul.f32 %v10518_v58, %v2599_v4  ;;  %v2621_v56 = vstv %s11110_s29  ;;  %v9111_v58 = vld [vmem:[%s13871_s3 + $0x4d8] sm:$0xff]   ;;  %s11336_s29 = sld [smem:[#allocation2 + $0x197]] }
  0xe3   :  { %8495 = vmatprep.subr.bf16.mxu0 %v9099_v45  ;;  %2469 = vmatprep.mubr.bf16.mxu0 %v1971_v15  ;;  %v1973_v41 = vpack.c.bf16 %v1944_v30, %v1944_v30  ;;  %v2616_v15 = vmul.f32 %v10512_v19, %v2615_v18  ;;  %v2605_v1 = vmul.f32 %v10524_v26, %v2603_v49  ;;  %v9108_v19 = vld [vmem:[%s13871_s3 + $0x490] sm:$0xff]  }
  0xe4   :  { %8512 = vmatpush3.bf16.msra.mxu1 %v9098_v23  ;;  %v1925_v38 = vadd.f32 %v1923_v62, %v1921_v50  ;;  %v9107_v23 = vld [vmem:[%s13871_s3 + $0x4d0] sm:$0xff]   ;;  %v9106_v62 = vld [vmem:[%s13871_s3 + $0x438] sm:$0xff]   ;;  %v2612_v8 = vadd.f32 %v2610_v9, %v2606_v61  ;;  %v2622_v49 = vmul.f32 %v10544_v59, %v2621_v56  ;;  %v1972_v61 = vpack.c.bf16 %v11105_v0, %v11105_v0  ;;  %v9113_v9 = vld [vmem:[%s13871_s3 + $0x508] sm:$0xff]  }
  0xe5   :  { %8513 = vmatprep.subr.bf16.mxu1 %v9101_v42  ;;  %2509 = vmatprep.mubr.bf16.mxu1 %v1973_v41  ;;  %v2607_v50 = vadd.f32 %v2605_v1, %v2601_v13  ;;  %v9112_v41 = vld [vmem:[%s13871_s3 + $0x498] sm:$0xff]   ;;  %v9114_v59 = vld [vmem:[%s13871_s3 + $0x4e0] sm:$0xff]   ;;  %v9118_v13 = vld [vmem:[%s13871_s3 + $0x4a8] sm:$0xff]   ;;  %v2645_v1 = vstv %s11181_s28  ;;  %s11743_s28 = sld [smem:[#allocation2 + $0x211]] }
  0xe6   :  { %8496 = vmatpush3.bf16.msra.mxu0 %v9100_v44  ;;  %v1945_v45 = vcombine.high %v1925_v38, %v1925_v38  ;;  %v11134_v17 = vrot.slane %v1925_v38, %v10150_v22  ;;  %v9109_v44 = vld [vmem:[%s13871_s3 + $0x480] sm:$0xff]   ;;  %v2618_v26 = vadd.f32 %v2616_v15, %v2612_v8  ;;  %v2623_v15 = vmul.f32 %v10613_v31, %v2621_v56  ;;  %v9119_v31 = vld [vmem:[%s13871_s3 + $0x518] sm:$0xff]  }
  0xe7   :  { %8525 = vmatprep.subr.bf16.mxu0 %v9103_v29  ;;  %v2627_v29 = vstv %s11125_s18  ;;  %s11186_s18 = sld [smem:[#allocation2 + $0x18a]] }
  0xe8   :  { %8514 = vmatpush3.bf16.msra.mxu1 %v9102_v6  ;;  %v1960_v38 = vcombine.high %v11134_v17, %v11134_v17  ;;  %v11147_v42 = vrot.slane %v1945_v45, %v10150_v22  ;;  %v9110_v6 = vld [vmem:[%s13871_s3 + $0x440] sm:$0xff]   ;;  %v9116_v45 = vld [vmem:[%s13871_s3 + $0x510] sm:$0xff]  }
  0xe9   :  { %2470 = vmatmul.mubr.bf16.vlgmr.msra.gmra.mrb[16].mxu0 %v1970_v35  ;;  %8515 = vmatprep.subr.bf16.mxu1 %v9105_v28  ;;  %v2611_v28 = vmul.f32 %v10550_v21, %v2609_v11  ;;  %v2624_v11 = vadd.f32 %v2622_v49, %v2618_v26  ;;  %v2628_v35 = vmul.f32 %v10573_v52, %v2627_v29  ;;  %v9117_v52 = vld [vmem:[%s13871_s3 + $0x4e8] sm:$0xff]  }
  0xea   :  { %8526 = vmatpush3.bf16.msra.mxu0 %v9104_v16  ;;  %v1975_v4 = vpack.c.bf16 %v1960_v38, %v1960_v38  ;;  %v1961_v30 = vcombine.high %v11147_v42, %v11147_v42  ;;  %v2617_v16 = vmul.f32 %v10579_v25, %v2615_v18  ;;  %v2633_v18 = vstv %s11176_s10  ;;  %s11236_s10 = sld [smem:[#allocation2 + $0x18f]] }
  0xeb   :  { %8527 = vmatprep.subr.bf16.mxu0 %v9107_v23  ;;  %v2613_v0 = vadd.f32 %v2611_v28, %v2607_v50  ;;  %v9115_v23 = vld [vmem:[%s13871_s3 + $0x4a0] sm:$0xff]   ;;  %v2630_v25 = vadd.f32 %v2628_v35, %v2624_v11  ;;  %v2663_v50 = vstv %s11195_s16  ;;  %v2675_v11 = vstv %s11217_s8  ;;  %s11354_s8 = sld [smem:[#allocation2 + $0x201]]  ;;  %s12244_s16 = sld [smem:[#allocation2 + $0x28a]] }
  0xec   :  { %8516 = vmatpush3.bf16.msra.mxu1 %v9106_v62  ;;  %2549 = vmatprep.mubr.bf16.mxu0 %v1975_v4  ;;  %v1977_v21 = vpack.c.bf16 %v1961_v30, %v1961_v30  ;;  %v2639_v62 = vstv %s11178_s25  ;;  %v9121_v30 = vld [vmem:[%s13871_s3 + $0x4b0] sm:$0xff]   ;;  %v2635_v35 = vmul.f32 %v10665_v10, %v2633_v18  ;;  %v2647_v10 = vmul.f32 %v10762_v36, %v2645_v1  ;;  %s11401_s25 = sld [smem:[#allocation5 + $0x3]] }
  0xed   :  { %8517 = vmatprep.subr.bf16.mxu1 %v9109_v44  ;;  %v2619_v8 = vadd.f32 %v2617_v16, %v2613_v0  ;;  %v2634_v44 = vmul.f32 %v10603_v27, %v2633_v18  ;;  %v2640_v38 = vmul.f32 %v10628_v55, %v2639_v62  ;;  %v2646_v27 = vmul.f32 %v10674_v7, %v2645_v1  ;;  %v9123_v7 = vld [vmem:[%s13871_s3 + $0x4f8] sm:$0xff]  }
  0xee   :  { %8528 = vmatpush3.bf16.msra.mxu0 %v9108_v19  ;;  %v9120_v19 = vld [vmem:[%s13871_s3 + $0x4f0] sm:$0xff]   ;;  %v2657_v55 = vstv %s11186_s18  ;;  %v2676_v18 = vmul.f32 %v10750_v39, %v2675_v11  ;;  %v1974_v39 = vpack.c.bf16 %v11134_v17, %v11134_v17  ;;  %s11643_s18 = sld [smem:[#allocation2 + $0x20c]] }
  0xef   :  { %8529 = vmatprep.subr.bf16.mxu0 %v9111_v58  ;;  %v2651_v58 = vstv %s11183_s14  ;;  %v2636_v56 = vadd.f32 %v2634_v44, %v2630_v25  ;;  %v2625_v4 = vadd.f32 %v2623_v15, %v2619_v8  ;;  %v2658_v28 = vmul.f32 %v10694_v48, %v2657_v55  ;;  %s11244_s14 = sld [smem:[#allocation2 + $0x190]]  ;;  %v9125_v48 = vld [vmem:[%s13871_s3 + $0x528] sm:$0xff]   ;;  %v9128_v25 = vld [vmem:[%s13871_s3 + $0x530] sm:$0xff]  }
  0xf0   :  { %8518 = vmatpush3.bf16.msra.mxu1 %v9110_v6  ;;  %v2629_v6 = vmul.f32 %v10643_v53, %v2627_v29  ;;  %v2652_v49 = vmul.f32 %v10680_v24, %v2651_v58  ;;  %v9122_v53 = vld [vmem:[%s13871_s3 + $0x520] sm:$0xff]   ;;  %v2669_v24 = vstv %s11204_s11  ;;  %v2653_v36 = vmul.f32 %v10768_v40, %v2651_v58  ;;  %v9130_v15 = vld [vmem:[%s13871_s3 + $0x54c] sm:$0xff]   ;;  %s11339_s11 = sld [smem:[#allocation2 + $0x198]] }
  0xf1   :  { %2557 = vmatprep.subr.bf16.mxu1 %v13945_v51  ;;  %v2642_v26 = vadd.f32 %v2640_v38, %v2636_v56  ;;  %v2670_v16 = vmul.f32 %v10730_v63, %v2669_v24  ;;  %v9129_v63 = vld [vmem:[%s13871_s3 + $0x58c] sm:$0xff]   ;;  %v2659_v1 = vmul.f32 %v10791_v43, %v2657_v55  ;;  %v2665_v56 = vmul.f32 %v10814_v2, %v2663_v50 }
  0xf2   :  { %8530 = vmatpush3.bf16.msra.mxu0 %v9112_v41  ;;  %v2631_v41 = vadd.f32 %v2629_v6, %v2625_v4  ;;  %v2705_v2 = vstv %s11269_s12  ;;  %s11715_s12 = sld [smem:[#allocation2 + $0x210]] }
  0xf3   :  { %2510 = vmatmul.mubr.bf16.vlgmr.msra.gmra.mrb[16].mxu1 %v1972_v61  ;;  %8531 = vmatprep.subr.bf16.mxu0 %v9114_v59  ;;  %v2648_v29 = vadd.f32 %v2646_v27, %v2642_v26  ;;  %v9124_v61 = vld [vmem:[%s13871_s3 + $0x4b8] sm:$0xff]   ;;  %v2664_v59 = vmul.f32 %v10715_v14, %v2663_v50  ;;  %v9127_v14 = vld [vmem:[%s13871_s3 + $0x4c0] sm:$0xff]   ;;  %v9137_v26 = vld [vmem:[%s13871_s3 + $0x548] ss:$0 sps:$4 sm:$0x33]   ;;  %v2711_v50 = vstv %s11282_s2  ;;  %s11553_s2 = sld [smem:[#allocation2 + $0x207]] }
  0xf4   :  { %2558 = vmatpush1.bf16.msra.mxu1 %v9113_v9  ;;  %7361 = vmatprep.mubr.msk.bf16.mxu1 %vm1101_vm0, %v1977_v21  ;;  %v9126_v21 = vld [vmem:[%s13871_s3 + $0x500] sm:$0xff]   ;;  %v9133_v27 = vld [vmem:[%s13871_s3 + $0x554] sm:$0xff]  }
  0xf5   :  { %2559 = vmatprep.subr.bf16.mxu1 %v13945_v51  ;;  %v2654_v9 = vadd.f32 %v2652_v49, %v2648_v29  ;;  %v2693_v38 = vstv %s11244_s14  ;;  %s11625_s14 = sld [smem:[#allocation2 + $0x208]] }
  0xf6   :  { %8532 = vmatpush3.bf16.msra.mxu0 %v9115_v23  ;;  %v2641_v23 = vmul.f32 %v10706_v37, %v2639_v62  ;;  %v2687_v62 = vstv %s11236_s10  ;;  %v2694_v4 = vmul.f32 %v10828_v57, %v2693_v38  ;;  %v9134_v57 = vld [vmem:[%s13871_s3 + $0x540] sm:$0xff]   ;;  %s11384_s10 = sld [smem:[#allocation2 + $0x202]] }
  0xf7   :  { %8533 = vmatprep.subr.bf16.mxu0 %v9117_v52  ;;  %v2660_v0 = vadd.f32 %v2658_v28, %v2654_v9  ;;  %v2681_v52 = vstv %s11225_s19  ;;  %v2688_v17 = vmul.f32 %v10800_v46, %v2687_v62  ;;  %v9135_v46 = vld [vmem:[%s13871_s3 + $0x59c] sm:$0xff]   ;;  %v2706_v28 = vmul.f32 %v10876_v3, %v2705_v2  ;;  %v9138_v9 = vld [vmem:[%s13871_s3 + $0x5a4] sm:$0xff]   ;;  %s11702_s19 = sld [smem:[#allocation2 + $0x20f]] }
  0xf8   :  { %2560 = vmatpush1.bf16.msra.mxu1 %v9116_v45  ;;  %v2637_v45 = vadd.f32 %v2635_v35, %v2631_v41  ;;  %v2682_v44 = vmul.f32 %v10780_v12, %v2681_v52  ;;  %v9132_v12 = vld [vmem:[%s13871_s3 + $0x594] sm:$0xff]   ;;  %v2683_v41 = vmul.f32 %v10887_v33, %v2681_v52  ;;  %v2712_v3 = vmul.f32 %v10898_v5, %v2711_v50  ;;  %v9140_v5 = vld [vmem:[%s13871_s3 + $0x60c] sm:$0xff]  }
  0xf9   :  { %2561 = vmatprep.subr.bf16.mxu1 %v13945_v51  ;;  %v2666_v37 = vadd.f32 %v2664_v59, %v2660_v0  ;;  %v2723_v33 = vstv %s11308_s26  ;;  %s11480_s26 = sld [smem:[#allocation2 + $0x205]] }
  0xfa   :  { %8534 = vmatpush3.bf16.msra.mxu0 %v9118_v13  ;;  %v2643_v8 = vadd.f32 %v2641_v23, %v2637_v45  ;;  %v9141_v23 = vld [vmem:[%s13871_s3 + $0x5cc] sm:$0xff]   ;;  %v13973_v45 = vld [vmem:[#allocation15_spill] sm:$0xff] }
  0xfb   :  { %8535 = vmatprep.subr.bf16.mxu0 %v9120_v19  ;;  %v2672_v13 = vadd.f32 %v2670_v16, %v2666_v37  ;;  %v9131_v19 = vld [vmem:[%s13871_s3 + $0x538] sm:$0xff]   ;;  %v2695_v16 = vmul.f32 %v10937_v32, %v2693_v38  ;;  %v1976_v32 = vpack.c.bf16 %v11147_v42, %v11147_v42 }
  0xfc   :  { %2562 = vmatpush1.bf16.msra.mxu1 %v9119_v31  ;;  %v2649_v40 = vadd.f32 %v2647_v10, %v2643_v8  ;;  %v2699_v31 = vstv %s11257_s27  ;;  %v2724_v10 = vmul.f32 %v13973_v45, %v2723_v33  ;;  %v9143_v8 = vld [vmem:[%s13871_s3 + $0x56c] sm:$0xff]   ;;  %s11745_s27 = sld [smem:[#allocation2 + $0x212]] }
  0xfd   :  { %2563 = vmatprep.subr.bf16.mxu1 %v13945_v51  ;;  %v2678_v58 = vadd.f32 %v2676_v18, %v2672_v13  ;;  %v13974_v18 = vld [vmem:[#allocation11_spill] sm:$0xff]  ;;  %v13975_v42 = vld [vmem:[#allocation17_spill] sm:$0xff]  ;;  %v2741_v13 = vstv %s11339_s11  ;;  %s12205_s11 = sld [smem:[#allocation2 + $0x286]] }
  0xfe   :  { %8536 = vmatpush3.bf16.msra.mxu0 %v9121_v30  ;;  %v2655_v43 = vadd.f32 %v2653_v36, %v2649_v40  ;;  %v2671_v30 = vmul.f32 %v10842_v34, %v2669_v24  ;;  %v3423_v40 = vstv %s11347_s15  ;;  %v11497_v45 = vld [vmem:[%s13868_s0 + $0x30] sm:$0xff]  ;;  %s11667_s15 = sld [smem:[#allocation2 + $0x20e]] }
  0xff   :  { %8537 = vmatprep.subr.bf16.mxu0 %v9123_v7  ;;  %v2684_v55 = vadd.f32 %v2682_v44, %v2678_v58  ;;  %v2700_v7 = vmul.f32 %v10853_v60, %v2699_v31  ;;  %v2717_v60 = vstv %s11295_s9  ;;  %v13977_v58 = vld [vmem:[#allocation19_spill] sm:$0xff]  ;;  %s11519_s9 = sld [smem:[#allocation2 + $0x206]] }
 0x100   :  { %2564 = vmatpush1.bf16.msra.mxu1 %v9122_v53  ;;  %v2661_v6 = vadd.f32 %v2659_v1, %v2655_v43  ;;  %v2677_v53 = vmul.f32 %v10865_v54, %v2675_v11  ;;  %v9136_v54 = vld [vmem:[%s13871_s3 + $0x55c] sm:$0xff]   ;;  %v9139_v11 = vld [vmem:[%s13871_s3 + $0x564] sm:$0xff]   ;;  %v3427_v1 = vstv %s11354_s8  ;;  %s12074_s8 = sld [smem:[#allocation2 + $0x281]] }
 0x101   :  { %2565 = vmatprep.subr.bf16.mxu1 %v13945_v51  ;;  %v2690_v49 = vadd.f32 %v2688_v17, %v2684_v55  ;;  %v9147_v55 = vld [vmem:[%s13871_s3 + $0x574] sm:$0xff]  }
 0x102   :  { %8538 = vmatpush3.bf16.msra.mxu0 %v9124_v61  ;;  %v2667_v34 = vadd.f32 %v2665_v56, %v2661_v6  ;;  %v13978_v56 = vld [vmem:[#allocation13_spill] sm:$0xff]  ;;  %v11439_v6 = vld [vmem:[%s13868_s0] sm:$0xff] }
 0x103   :  { %8539 = vmatprep.subr.bf16.mxu0 %v9126_v21  ;;  %v2696_v29 = vadd.f32 %v2694_v4, %v2690_v49  ;;  %v2435_v21 = vsel %vm1105_vm1, %v9137_v26, 0  ;;  %v9148_v49 = vld [vmem:[%s13871_s3 + $0x61c] sm:$0xff]  }
 0x104   :  { %2566 = vmatpush1.bf16.msra.mxu1 %v9125_v48  ;;  %v2673_v24 = vadd.f32 %v2671_v30, %v2667_v34  ;;  %v2689_v48 = vmul.f32 %v10912_v47, %v2687_v62  ;;  %v2729_v47 = vstv %s11322_s21  ;;  %v2701_v62 = vmul.f32 %v13974_v18, %v2699_v31  ;;  %v9146_v31 = vld [vmem:[%s13871_s3 + $0x5b4] sm:$0xff]   ;;  %v9155_v18 = vld [vmem:[%s13871_s3 + $0x584] sm:$0xff]   ;;  %s12884_s21 = sld [smem:[#allocation2 + $0x312]] }
 0x105   :  { %2567 = vmatprep.subr.bf16.mxu1 %v13945_v51  ;;  %v2702_v61 = vadd.f32 %v2700_v7, %v2696_v29  ;;  %v3424_v30 = vmul.f32 %v11439_v6, %v3423_v40  ;;  %v9149_v29 = vld [vmem:[%s13871_s3 + $0x5dc] sm:$0xff]  }
 0x106   :  { %8540 = vmatpush3.bf16.msra.mxu0 %v9127_v14  ;;  %v2679_v59 = vadd.f32 %v2677_v53, %v2673_v24  ;;  %v2718_v14 = vmul.f32 %v10923_v20, %v2717_v60  ;;  %v9142_v20 = vld [vmem:[%s13871_s3 + $0x5ac] sm:$0xff]   ;;  %v3433_v53 = vstv %s11384_s10  ;;  %v9150_v24 = vld [vmem:[%s13871_s3 + $0x5bc] sm:$0xff]   ;;  %s11641_s10 = sld [smem:[#allocation2 + $0x20b]] }
 0x107   :  { %8547 = vmatprep.subr.bf16.mxu0 %v9129_v63  ;;  %v2708_v35 = vadd.f32 %v2706_v28, %v2702_v61  ;;  %v2735_v63 = vstv %s11336_s29  ;;  %v13981_v61 = vld [vmem:[#allocation18_spill] sm:$0xff]  ;;  %s12203_s29 = sld [smem:[#allocation2 + $0x285]] }
 0x108   :  { %2568 = vmatpush1.bf16.msra.mxu1 %v9128_v25  ;;  %v2685_v0 = vadd.f32 %v2683_v41, %v2679_v59  ;;  %v9144_v25 = vld [vmem:[%s13871_s3 + $0x614] sm:$0xff]   ;;  %v2736_v17 = vmul.f32 %v13977_v58, %v2735_v63  ;;  %v2747_v41 = vstv %s11401_s25  ;;  %s11639_s25 = sld [smem:[#allocation2 + $0x20a]] }
 0x109   :  { %2550 = vmatmul.mubr.bf16.vlgmr.msra.gmra.mrb[20].mxu0 %v1974_v39  ;;  %2569 = vmatprep.subr.bf16.mxu1 %v13945_v51  ;;  %v2714_v52 = vadd.f32 %v2712_v3, %v2708_v35  ;;  %v13976_v39 = vld [vmem:[#allocation12_spill] sm:$0xff] }
 0x10a   :  { %8548 = vmatpush3.bf16.msra.mxu0 %v9130_v15  ;;  %v2691_v37 = vadd.f32 %v2689_v48, %v2685_v0  ;;  %v2730_v15 = vmul.f32 %v13975_v42, %v2729_v47  ;;  %v2707_v38 = vmul.f32 %v13976_v39, %v2705_v2  ;;  %v9152_v3 = vld [vmem:[%s13871_s3 + $0x624] sm:$0xff]   ;;  %v13984_v39 = vld [vmem:[#allocation22_spill] sm:$0xff] }
 0x10b   :  { %8549 = vmatprep.subr.bf16.mxu0 %v9132_v12  ;;  %v2720_v36 = vadd.f32 %v2718_v14, %v2714_v52  ;;  %v11473_v48 = vld [vmem:[%s13868_s0 + $0x20] sm:$0xff] }
 0x10c   :  { %2570 = vmatpush1.bf16.msra.mxu1 %v9131_v19  ;;  %v2697_v44 = vadd.f32 %v2695_v16, %v2691_v37  ;;  %v9145_v19 = vld [vmem:[%s13871_s3 + $0x5d4] sm:$0xff]   ;;  %v9151_v14 = vld [vmem:[%s13871_s3 + $0x57c] sm:$0xff]   ;;  %v9153_v0 = vld [vmem:[%s13871_s3 + $0x5e4] sm:$0xff]  }
 0x10d   :  { %2571 = vmatprep.subr.bf16.mxu1 %v13945_v51  ;;  %v2726_v12 = vadd.f32 %v2724_v10, %v2720_v36 }
 0x10e   :  { %8550 = vmatpush3.bf16.msra.mxu0 %v9133_v27  ;;  %v2703_v43 = vadd.f32 %v2701_v62, %v2697_v44  ;;  %v2713_v27 = vmul.f32 %v13978_v56, %v2711_v50  ;;  %v13980_v50 = vld [vmem:[#allocation16_spill] sm:$0xff] }
 0x10f   :  { %8551 = vmatprep.subr.bf16.mxu0 %v9135_v46  ;;  %v2732_v4 = vadd.f32 %v2730_v15, %v2726_v12  ;;  %v13979_v46 = vld [vmem:[#allocation14_spill] sm:$0xff]  ;;  %v2719_v34 = vmul.f32 %v13980_v50, %v2717_v60  ;;  %v2725_v60 = vmul.f32 %v13981_v61, %v2723_v33  ;;  %v13982_v33 = vld [vmem:[#allocation20_spill] sm:$0xff]  ;;  %v3445_v15 = vstv %s11448_s30  ;;  %s12270_s30 = sld [smem:[#allocation2 + $0x28c]] }
 0x110   :  { %2572 = vmatpush1.bf16.msra.mxu1 %v9134_v57  ;;  %v2742_v2 = vmul.f32 %v13979_v46, %v2741_v13  ;;  %v11445_v57 = vld [vmem:[%s13868_s0 + $0x10] sm:$0xff]  ;;  %v2709_v7 = vadd.f32 %v2707_v38, %v2703_v43  ;;  %v2731_v35 = vmul.f32 %v13982_v33, %v2729_v47  ;;  %v9154_v47 = vld [vmem:[%s13871_s3 + $0x5c4] sm:$0xff]   ;;  %v2743_v38 = vmul.f32 %v13984_v39, %v2741_v13  ;;  %v9166_v33 = vld [vmem:[%s13871_s3 + $0x69c] sm:$0xff]  }
 0x111   :  { %2573 = vmatprep.subr.bf16.mxu1 %v13945_v51  ;;  %v3428_v26 = vmul.f32 %v11445_v57, %v3427_v1  ;;  %v2738_v28 = vadd.f32 %v2736_v17, %v2732_v4  ;;  %v9156_v62 = vld [vmem:[%s13871_s3 + $0x62c] sm:$0xff]   ;;  %v11533_v13 = vld [vmem:[%s13868_s0 + $0x40] sm:$0xff] }
 0x112   :  { %8552 = vmatpush3.bf16.msra.mxu0 %v9136_v54  ;;  %v2715_v54 = vadd.f32 %v2713_v27, %v2709_v7  ;;  %v9158_v12 = vld [vmem:[%s13871_s3 + $0x68c] sm:$0xff]   ;;  %v3446_v17 = vmul.f32 %v11533_v13, %v3445_v15  ;;  %v9161_v7 = vld [vmem:[%s13871_s3 + $0x5f4] sm:$0xff]   ;;  %v9171_v39 = vld [vmem:[%s13871_s3 + $0x664] sm:$0xff]  }
 0x113   :  { %8553 = vmatprep.subr.bf16.mxu0 %v9138_v9  ;;  %v2744_v9 = vadd.f32 %v2742_v2, %v2738_v28  ;;  %v3430_v59 = vadd.f32 %v3428_v26, %v3424_v30  ;;  %v9159_v27 = vld [vmem:[%s13871_s3 + $0x64c] sm:$0xff]  }
 0x114   :  { %2574 = vmatpush1.bf16.msra.mxu1 %v2435_v21  ;;  %v3434_v21 = vmul.f32 %v11473_v48, %v3433_v53 }
 0x115   :  { %8569 = vmatprep.subr.bf16.mxu1 %v9140_v5  ;;  %v2721_v5 = vadd.f32 %v2719_v34, %v2715_v54  ;;  %v2748_v16 = vadd.f32 %v2747_v41, %v2744_v9  ;;  %v9162_v34 = vld [vmem:[%s13871_s3 + $0x694] sm:$0xff]   ;;  %v3457_v9 = vstv %s11519_s9  ;;  %s12069_s9 = sld [smem:[#allocation2 + $0x280]] }
 0x116   :  { %8554 = vmatpush3.bf16.msra.mxu0 %v9139_v11  ;;  %v3439_v11 = vstv %s11413_s13  ;;  %v3436_v42 = vadd.f32 %v3434_v21, %v3430_v59  ;;  %v11582_v59 = vld [vmem:[%s13868_s0 + $0x38] sm:$0xff]  ;;  %s11659_s13 = sld [smem:[#allocation2 + $0x20d]] }
 0x117   :  { %2590 = vmatmul.mubr.bf16.vlgmr.msra.gmra.mrb[20].mxu1 %v1976_v32  ;;  %8555 = vmatprep.subr.bf16.mxu0 %v9142_v20  ;;  %v2727_v52 = vadd.f32 %v2725_v60, %v2721_v5  ;;  %v3440_v10 = vmul.f32 %v11497_v45, %v3439_v11  ;;  %v9471_v32 = vld [vmem:[%s13868_s0 + $0x8] sm:$0xff]  ;;  %v2752_v36 = vcombine.high %v2748_v16, %v2748_v16  ;;  %v9165_v5 = vld [vmem:[%s13871_s3 + $0x5fc] sm:$0xff]  }
 0x118   :  { %8570 = vmatpush3.bf16.msra.mxu1 %v9141_v23  ;;  %v13983_v23 = vld [vmem:[#allocation21_spill] sm:$0xff]  ;;  %v3441_v21 = vmul.f32 %v11582_v59, %v3439_v11 }
 0x119   :  { %8571 = vmatprep.subr.bf16.mxu1 %v9144_v25  ;;  %v2737_v20 = vmul.f32 %v13983_v23, %v2735_v63  ;;  %v3425_v25 = vmul.f32 %v9471_v32, %v3423_v40  ;;  %v9472_v63 = vld [vmem:[%s13868_s0 + $0x18] sm:$0xff]  ;;  %v2733_v44 = vadd.f32 %v2731_v35, %v2727_v52  ;;  %v9157_v40 = vld [vmem:[%s13871_s3 + $0x5ec] sm:$0xff]   ;;  %v3442_v46 = vadd.f32 %v3440_v10, %v3436_v42 }
 0x11a   :  { %8556 = vmatpush3.bf16.msra.mxu0 %v9143_v8  ;;  %v3429_v37 = vmul.f32 %v9472_v63, %v3427_v1  ;;  %v2759_v8 = vrot.slane %v2748_v16, %v10150_v22  ;;  %v11604_v16 = vld [vmem:[%s13868_s0 + $0x60] sm:$0xff]  ;;  %v3463_v52 = vstv %s11553_s2  ;;  %v11614_v32 = vld [vmem:[%s13868_s0 + $0x48] sm:$0xff]  ;;  %s11975_s2 = sld [smem:[#allocation5 + $0x4]] }
 0x11b   :  { %8557 = vmatprep.subr.bf16.mxu0 %v9146_v31  ;;  %v2739_v58 = vadd.f32 %v2737_v20, %v2733_v44  ;;  %v11541_v31 = vld [vmem:[%s13868_s0 + $0x28] sm:$0xff]  ;;  %v3448_v28 = vadd.f32 %v3446_v17, %v3442_v46  ;;  %v3458_v23 = vmul.f32 %v11604_v16, %v3457_v9  ;;  %v3469_v17 = vstv %s11625_s14  ;;  %s12678_s14 = sld [smem:[#allocation2 + $0x309]] }
 0x11c   :  { %8572 = vmatpush3.bf16.msra.mxu1 %v9145_v19  ;;  %v2767_v1 = vcombine.high %v2759_v8, %v2759_v8  ;;  %v11525_v19 = vrot.slane %v2752_v36, %v10150_v22  ;;  %v3435_v43 = vmul.f32 %v11541_v31, %v3433_v53  ;;  %v3431_v2 = vadd.f32 %v3429_v37, %v3425_v25  ;;  %v9168_v20 = vld [vmem:[%s13871_s3 + $0x644] sm:$0xff]  }
 0x11d   :  { %8573 = vmatprep.subr.bf16.mxu1 %v9148_v49  ;;  %v2794_v30 = vpack.c.bf16 %v2759_v8, %v2759_v8  ;;  %v2745_v26 = vadd.f32 %v2743_v38, %v2739_v58  ;;  %v3451_v49 = vstv %s11480_s26  ;;  %v3447_v25 = vmul.f32 %v11614_v32, %v3445_v15  ;;  %v9169_v63 = vld [vmem:[%s13871_s3 + $0x604] sm:$0xff]   ;;  %v11634_v8 = vld [vmem:[%s13868_s0 + $0x70] sm:$0xff]  ;;  %v11648_v15 = vld [vmem:[%s13868_s0 + $0x58] sm:$0xff]  ;;  %s13079_s26 = sld [smem:[#allocation2 + $0x380]] }
 0x11e   :  { %8558 = vmatpush3.bf16.msra.mxu0 %v9147_v55  ;;  %v2795_v56 = vpack.c.bf16 %v2767_v1, %v2767_v1  ;;  %v9160_v55 = vld [vmem:[%s13871_s3 + $0x634] sm:$0xff]   ;;  %v2768_v4 = vcombine.high %v11525_v19, %v11525_v19  ;;  %v3437_v61 = vadd.f32 %v3435_v43, %v3431_v2  ;;  %v9170_v37 = vld [vmem:[%s13871_s3 + $0x6a4] sm:$0xff]   ;;  %v3464_v36 = vmul.f32 %v11634_v8, %v3463_v52  ;;  %v9172_v1 = vld [vmem:[%s13871_s3 + $0x6cc] sm:$0xff]  }
 0x11f   :  { %8559 = vmatprep.subr.bf16.mxu0 %v9150_v24  ;;  %v2749_v53 = vadd.f32 %v2747_v41, %v2745_v26  ;;  %v11569_v24 = vld [vmem:[%s13868_s0 + $0x50] sm:$0xff]  ;;  %v9164_v41 = vld [vmem:[%s13871_s3 + $0x63c] sm:$0xff]   ;;  %v3453_v44 = vmul.f32 %v11648_v15, %v3451_v49  ;;  %v2796_v38 = vpack.c.bf16 %v11525_v19, %v11525_v19  ;;  %v3475_v19 = vstv %s11627_s23  ;;  %s13385_s23 = sld [smem:[#allocation2 + $0x38d]] }
 0x120   :  { %8574 = vmatpush3.bf16.msra.mxu1 %v9149_v29  ;;  %3293 = vmatprep.mubr.bf16.mxu0 %v2795_v56  ;;  %v2797_v50 = vpack.c.bf16 %v2768_v4, %v2768_v4  ;;  %v9163_v29 = vld [vmem:[%s13871_s3 + $0x654] sm:$0xff]   ;;  %v3452_v54 = vmul.f32 %v11569_v24, %v3451_v49  ;;  %v3443_v10 = vadd.f32 %v3441_v21, %v3437_v61  ;;  %v11672_v56 = vld [vmem:[%s13868_s0 + $0x68] sm:$0xff]  ;;  %v11681_v4 = vld [vmem:[%s13868_s0 + $0x80] sm:$0xff]  ;;  %v3481_v26 = vstv %s11639_s25  ;;  %s11833_s25 = sld [smem:[#allocation2 + $0x215]] }
 0x121   :  { %8575 = vmatprep.subr.bf16.mxu1 %v9152_v3  ;;  %v2769_v60 = vcombine.high %v2749_v53, %v2749_v53  ;;  %v11576_v3 = vrot.slane %v2749_v53, %v10150_v22  ;;  %v3470_v46 = vmul.f32 %v11681_v4, %v3469_v17  ;;  %v11689_v2 = vld [vmem:[%s13868_s0 + $0x90] sm:$0xff]  ;;  %v11708_v53 = vld [vmem:[%s13868_s0 + $0xa0] sm:$0xff]  ;;  %v11720_v61 = vld [vmem:[%s13868_s0 + $0x78] sm:$0xff] }
 0x122   :  { %8560 = vmatpush3.bf16.msra.mxu0 %v9151_v14  ;;  %3333 = vmatprep.mubr.bf16.mxu1 %v2797_v50  ;;  %v9167_v14 = vld [vmem:[%s13871_s3 + $0x65c] sm:$0xff]   ;;  %v3449_v42 = vadd.f32 %v3447_v25, %v3443_v10  ;;  %v9175_v49 = vld [vmem:[%s13871_s3 + $0x6d4] sm:$0xff]   ;;  %v3487_v50 = vstv %s11641_s10  ;;  %v9182_v25 = vld [vmem:[%s13871_s3 + $0x6c4] sm:$0xff]   ;;  %s11858_s10 = sld [smem:[#allocation2 + $0x216]] }
 0x123   :  { %8561 = vmatprep.subr.bf16.mxu0 %v9154_v47  ;;  %v2784_v35 = vcombine.high %v11576_v3, %v11576_v3  ;;  %v11599_v11 = vrot.slane %v2769_v60, %v10150_v22  ;;  %v9177_v60 = vld [vmem:[%s13871_s3 + $0x674] sm:$0xff]  }
 0x124   :  { %8576 = vmatpush3.bf16.msra.mxu1 %v9153_v0  ;;  %v3454_v0 = vadd.f32 %v3452_v54, %v3448_v28  ;;  %v3455_v43 = vadd.f32 %v3453_v44, %v3449_v42  ;;  %v3493_v28 = vstv %s11643_s18  ;;  %v11731_v21 = vld [vmem:[%s13868_s0 + $0xb0] sm:$0xff]  ;;  %s11880_s18 = sld [smem:[#allocation2 + $0x217]] }
 0x125   :  { %8577 = vmatprep.subr.bf16.mxu1 %v9156_v62  ;;  %v2799_v47 = vpack.c.bf16 %v2784_v35, %v2784_v35  ;;  %v9179_v35 = vld [vmem:[%s13871_s3 + $0x6bc] sm:$0xff]   ;;  %v11768_v44 = vld [vmem:[%s13868_s0 + $0xd0] sm:$0xff] }
 0x126   :  { %8562 = vmatpush3.bf16.msra.mxu0 %v9155_v18  ;;  %v2785_v18 = vcombine.high %v11599_v11, %v11599_v11  ;;  %v3460_v62 = vadd.f32 %v3458_v23, %v3454_v0  ;;  %v9180_v23 = vld [vmem:[%s13871_s3 + $0x67c] sm:$0xff]  }
 0x127   :  { %8591 = vmatprep.subr.bf16.mxu0 %v9158_v12 }
 0x128   :  { %8578 = vmatpush3.bf16.msra.mxu1 %v9157_v40  ;;  %v9173_v40 = vld [vmem:[%s13871_s3 + $0x6ac] sm:$0xff]   ;;  %v2801_v12 = vpack.c.bf16 %v2785_v18, %v2785_v18  ;;  %v3466_v58 = vadd.f32 %v3464_v36, %v3460_v62 }
 0x129   :  { %3294 = vmatmul.mubr.bf16.vlgmr.msra.gmra.mrb[24].mxu0 %v2794_v30  ;;  %8579 = vmatprep.subr.bf16.mxu1 %v9160_v55  ;;  %v9174_v55 = vld [vmem:[%s13871_s3 + $0x66c] sm:$0xff]   ;;  %v3476_v30 = vmul.f32 %v11689_v2, %v3475_v19 }
 0x12a   :  { %8592 = vmatpush3.bf16.msra.mxu0 %v9159_v27  ;;  %3373 = vmatprep.mubr.bf16.mxu0 %v2799_v47  ;;  %v3459_v27 = vmul.f32 %v11672_v56, %v3457_v9  ;;  %v11753_v47 = vld [vmem:[%s13868_s0 + $0xc0] sm:$0xff] }
 0x12b   :  { %8593 = vmatprep.subr.bf16.mxu0 %v9162_v34  ;;  %v3472_v34 = vadd.f32 %v3470_v46, %v3466_v58 }
 0x12c   :  { %8580 = vmatpush3.bf16.msra.mxu1 %v9161_v7  ;;  %v9176_v7 = vld [vmem:[%s13871_s3 + $0x6b4] sm:$0xff]   ;;  %v3461_v54 = vadd.f32 %v3459_v27, %v3455_v43 }
 0x12d   :  { %8581 = vmatprep.subr.bf16.mxu1 %v9164_v41  ;;  %v3465_v41 = vmul.f32 %v11720_v61, %v3463_v52  ;;  %v3478_v9 = vadd.f32 %v3476_v30, %v3472_v34  ;;  %v3494_v52 = vmul.f32 %v11753_v47, %v3493_v28  ;;  %v11787_v43 = vld [vmem:[%s13868_s0 + $0x98] sm:$0xff]  ;;  %v9181_v30 = vld [vmem:[%s13871_s3 + $0x6e4] sm:$0xff]  }
 0x12e   :  { %8594 = vmatpush3.bf16.msra.mxu0 %v9163_v29  ;;  %v3482_v29 = vmul.f32 %v11708_v53, %v3481_v26  ;;  %v3477_v27 = vmul.f32 %v11787_v43, %v3475_v19  ;;  %v9183_v19 = vld [vmem:[%s13871_s3 + $0x684] sm:$0xff]  }
 0x12f   :  { %8595 = vmatprep.subr.bf16.mxu0 %v9166_v33  ;;  %v9178_v33 = vld [vmem:[%s13871_s3 + $0x6dc] sm:$0xff]  }
 0x130   :  { %8582 = vmatpush3.bf16.msra.mxu1 %v9165_v5  ;;  %v3488_v5 = vmul.f32 %v11731_v21, %v3487_v50 }
 0x131   :  { %8583 = vmatprep.subr.bf16.mxu1 %v9168_v20  ;;  %v3484_v20 = vadd.f32 %v3482_v29, %v3478_v9  ;;  %v3517_v29 = vstv %s11715_s12  ;;  %s12425_s12 = sld [smem:[#allocation2 + $0x297]] }
 0x132   :  { %8596 = vmatpush3.bf16.msra.mxu0 %v9167_v14  ;;  %v3499_v14 = vstv %s11659_s13  ;;  %s11903_s13 = sld [smem:[#allocation2 + $0x218]] }
 0x133   :  { %8597 = vmatprep.subr.bf16.mxu0 %v9170_v37  ;;  %v3467_v37 = vadd.f32 %v3465_v41, %v3461_v54  ;;  %v3490_v42 = vadd.f32 %v3488_v5, %v3484_v20  ;;  %v11811_v41 = vld [vmem:[%s13868_s0 + $0xa8] sm:$0xff] }
 0x134   :  { %8584 = vmatpush3.bf16.msra.mxu1 %v9169_v63  ;;  %v3505_v63 = vstv %s11667_s15  ;;  %v9184_v5 = vld [vmem:[%s13871_s3 + $0x6ec] sm:$0xff]   ;;  %s12142_s15 = sld [smem:[#allocation2 + $0x284]] }
 0x135   :  { %3381 = vmatprep.subr.bf16.mxu1 %v13945_v51 }
 0x136   :  { %8598 = vmatpush3.bf16.msra.mxu0 %v9171_v39  ;;  %v3500_v39 = vmul.f32 %v11768_v44, %v3499_v14 }
 0x137   :  { %3334 = vmatmul.mubr.bf16.vlgmr.msra.gmra.mrb[24].mxu1 %v2796_v38  ;;  %8599 = vmatprep.subr.bf16.mxu0 %v9173_v40 }
 0x138   :  { %3382 = vmatpush1.bf16.msra.mxu1 %v9172_v1  ;;  %7558 = vmatprep.mubr.msk.bf16.mxu1 %vm1101_vm0, %v2801_v12  ;;  %v3511_v1 = vstv %s11702_s19  ;;  %v11779_v12 = vld [vmem:[%s13868_s0 + $0x88] sm:$0xff]  ;;  %s12397_s19 = sld [smem:[#allocation2 + $0x295]] }
 0x139   :  { %3383 = vmatprep.subr.bf16.mxu1 %v13945_v51  ;;  %v3471_v58 = vmul.f32 %v11779_v12, %v3469_v17  ;;  %v11798_v17 = vld [vmem:[%s13868_s0 + $0xe0] sm:$0xff] }
 0x13a   :  { %8600 = vmatpush3.bf16.msra.mxu0 %v9174_v55 }
 0x13b   :  { %8601 = vmatprep.subr.bf16.mxu0 %v9176_v7  ;;  %v3506_v7 = vmul.f32 %v11798_v17, %v3505_v63  ;;  %v3473_v54 = vadd.f32 %v3471_v58, %v3467_v37  ;;  %v9186_v37 = vld [vmem:[%s13871_s3 + $0x710] sm:$0xff]  }
 0x13c   :  { %3384 = vmatpush1.bf16.msra.mxu1 %v9175_v49  ;;  %v8365_v0 = vpop.f32.mrb[0].mxu0  ;;  %v3496_v49 = vadd.f32 %v3494_v52, %v3490_v42  ;;  %v11838_v52 = vld [vmem:[%s13868_s0 + $0xb8] sm:$0xff]  ;;  %v11874_v58 = vld [vmem:[%s13868_s0 + $0x110] sm:$0xff] }
 0x13d   :  { %3385 = vmatprep.subr.bf16.mxu1 %v13945_v51  ;;  %v8366_v10 = vpop.f32.mrb[1].mxu0  ;;  %v3479_v20 = vadd.f32 %v3477_v27, %v3473_v54 }
 0x13e   :  { %8602 = vmatpush3.bf16.msra.mxu0 %v9177_v60  ;;  %v8387_v18 = vpop.f32.mrb[0].mxu1  ;;  %v8367_v62 = vadd.f32 %v8366_v10, %v8365_v0  ;;  %v8368_v36 = vpop.f32.mrb[2].mxu0  ;;  %v3483_v60 = vmul.f32 %v11811_v41, %v3481_v26  ;;  %v11827_v0 = vld [vmem:[%s13868_s0 + $0xf0] sm:$0xff]  ;;  %v3489_v10 = vmul.f32 %v11838_v52, %v3487_v50  ;;  %v2798_v50 = vpack.c.bf16 %v11576_v3, %v11576_v3 }
 0x13f   :  { %v8388_v38 = vpop.f32.mrb[1].mxu1  ;;  %8603 = vmatprep.subr.bf16.mxu0 %v9179_v35  ;;  %v8369_v40 = vpop.f32.mrb[3].mxu0  ;;  %v3502_v35 = vadd.f32 %v3500_v39, %v3496_v49  ;;  %v3512_v26 = vmul.f32 %v11827_v0, %v3511_v1  ;;  %v3529_v36 = vstv %s11745_s27  ;;  %v11863_v39 = vld [vmem:[%s13868_s0 + $0xc8] sm:$0xff]  ;;  %v9187_v49 = vld [vmem:[%s13871_s3 + $0x6f4] sm:$0xff]   ;;  %s12298_s27 = sld [smem:[#allocation2 + $0x28e]] }
 0x140   :  { %v8389_v55 = vadd.f32 %v8388_v38, %v8387_v18  ;;  %3386 = vmatpush1.bf16.msra.mxu1 %v9178_v33  ;;  %v8390_v46 = vpop.f32.mrb[2].mxu1  ;;  %v9185_v33 = vld [vmem:[%s13871_s3 + $0x750] sm:$0xff]   ;;  %v11849_v18 = vld [vmem:[%s13868_s0 + $0x100] sm:$0xff]  ;;  %v3485_v42 = vadd.f32 %v3483_v60, %v3479_v20  ;;  %v3495_v38 = vmul.f32 %v11863_v39, %v3493_v28  ;;  %v9188_v40 = vld [vmem:[%s13871_s3 + $0x758] sm:$0xff]  }
 0x141   :  { %v8391_v34 = vpop.f32.mrb[3].mxu1  ;;  %3387 = vmatprep.subr.bf16.mxu1 %v13945_v51  ;;  %v11885_v46 = vld [vmem:[%s13868_s0 + $0xd8] sm:$0xff]  ;;  %v11908_v60 = vld [vmem:[%s13868_s0 + $0xe8] sm:$0xff] }
 0x142   :  { %v11816_v9 = vadd.f32 %v8389_v55, %v8367_v62  ;;  %8604 = vmatpush3.bf16.msra.mxu0 %v9180_v23  ;;  %v3523_v23 = vstv %s11743_s28  ;;  %v3518_v62 = vmul.f32 %v11849_v18, %v3517_v29  ;;  %v3535_v55 = vstv %s11763_s1  ;;  %v11896_v34 = vld [vmem:[%s13868_s0 + $0x120] sm:$0xff]  ;;  %s12322_s1 = sld [smem:[#allocation2 + $0x291]]  ;;  %s12519_s28 = sld [smem:[#allocation2 + $0x300]] }
 0x143   :  { %8605 = vmatprep.subr.bf16.mxu0 %v9182_v25  ;;  %v3508_v25 = vadd.f32 %v3506_v7, %v3502_v35  ;;  %v3524_v27 = vmul.f32 %v11874_v58, %v3523_v23  ;;  %v3491_v28 = vadd.f32 %v3489_v10, %v3485_v42  ;;  %v13905_v10 = vstv %s11833_s25 }
 0x144   :  { %3388 = vmatpush1.bf16.msra.mxu1 %v9181_v30  ;;  %v3501_v30 = vmul.f32 %v11885_v46, %v3499_v14  ;;  %v3541_v14 = vstv %s11773_s24  ;;  %s12348_s24 = sld [smem:[#allocation2 + $0x293]] }
 0x145   :  { %3389 = vmatprep.subr.bf16.mxu1 %v13945_v51  ;;  %v3514_v3 = vadd.f32 %v3512_v26, %v3508_v25  ;;  %v3497_v54 = vadd.f32 %v3495_v38, %v3491_v28  ;;  %v11919_v26 = vld [vmem:[%s13868_s0 + $0x130] sm:$0xff]  ;;  %v11931_v25 = vld [vmem:[%s13868_s0 + $0xf8] sm:$0xff]  ;;  %v11942_v38 = vld [vmem:[%s13868_s0 + $0x140] sm:$0xff] }
 0x146   :  { %8606 = vmatpush3.bf16.msra.mxu0 %v9183_v19  ;;  %v3530_v19 = vmul.f32 %v11896_v34, %v3529_v36  ;;  %v3536_v20 = vmul.f32 %v11919_v26, %v3535_v55  ;;  %v11955_v28 = vld [vmem:[%s13868_s0 + $0x108] sm:$0xff] }
 0x147   :  { %8613 = vmatprep.subr.bf16.mxu0 %v9185_v33  ;;  %v3520_v7 = vadd.f32 %v3518_v62, %v3514_v3  ;;  %v9189_v33 = vld [vmem:[%s13871_s3 + $0x718] sm:$0xff]   ;;  %v3513_v62 = vmul.f32 %v11931_v25, %v3511_v1  ;;  %v9192_v1 = vld [vmem:[%s13871_s3 + $0x720] sm:$0xff]   ;;  %v13906_v3 = vstv %s11858_s10 }
 0x148   :  { %3390 = vmatpush1.bf16.msra.mxu1 %v9184_v5  ;;  %v3507_v5 = vmul.f32 %v11908_v60, %v3505_v63  ;;  %v9191_v63 = vld [vmem:[%s13871_s3 + $0x760] sm:$0xff]  }
 0x149   :  { %3374 = vmatmul.mubr.bf16.vlgmr.msra.gmra.mrb[28].mxu0 %v2798_v50  ;;  %3391 = vmatprep.subr.bf16.mxu1 %v13945_v51  ;;  %v3526_v35 = vadd.f32 %v3524_v27, %v3520_v7  ;;  %v9190_v50 = vld [vmem:[%s13871_s3 + $0x6fc] sm:$0xff]  }
 0x14a   :  { %8614 = vmatpush3.bf16.msra.mxu0 %v9186_v37  ;;  %v3503_v37 = vadd.f32 %v3501_v30, %v3497_v54  ;;  %v3519_v30 = vmul.f32 %v11955_v28, %v3517_v29  ;;  %v9196_v29 = vld [vmem:[%s13871_s3 + $0x70c] ss:$0 sps:$4 sm:$0x33]  }
 0x14b   :  { %8615 = vmatprep.subr.bf16.mxu0 %v9188_v40  ;;  %v3532_v42 = vadd.f32 %v3530_v19, %v3526_v35  ;;  %v3542_v40 = vmul.f32 %v11942_v38, %v3541_v14  ;;  %v11966_v19 = vld [vmem:[%s13868_s0 + $0x150] sm:$0xff]  ;;  %v11980_v35 = vld [vmem:[%s13868_s0 + $0x118] sm:$0xff] }
 0x14c   :  { %3392 = vmatpush1.bf16.msra.mxu1 %v9187_v49  ;;  %v3509_v27 = vadd.f32 %v3507_v5, %v3503_v37  ;;  %v9194_v49 = vld [vmem:[%s13871_s3 + $0x768] sm:$0xff]   ;;  %v3548_v54 = vmul.f32 %v11966_v19, %v13905_v10  ;;  %v13907_v5 = vstv %s11880_s18 }
 0x14d   :  { %3393 = vmatprep.subr.bf16.mxu1 %v13945_v51  ;;  %v3538_v7 = vadd.f32 %v3536_v20, %v3532_v42  ;;  %v3525_v20 = vmul.f32 %v11980_v35, %v3523_v23  ;;  %v11991_v42 = vld [vmem:[%s13868_s0 + $0x160] sm:$0xff]  ;;  %v12001_v23 = vld [vmem:[%s13868_s0 + $0x128] sm:$0xff] }
 0x14e   :  { %8616 = vmatpush3.bf16.msra.mxu0 %v9189_v33  ;;  %v3515_v33 = vadd.f32 %v3513_v62, %v3509_v27  ;;  %v3554_v62 = vmul.f32 %v11991_v42, %v13906_v3  ;;  %v13908_v27 = vstv %s11903_s13  ;;  %13985 = vst [vmem:[#allocation15_spill] sm:$0xff] %v12001_v23  ;;  %v12012_v3 = vld [vmem:[%s13868_s0 + $0x170] sm:$0xff] }
 0x14f   :  { %8617 = vmatprep.subr.bf16.mxu0 %v9191_v63  ;;  %v9193_v63 = vld [vmem:[%s13871_s3 + $0x704] sm:$0xff]   ;;  %v3544_v37 = vadd.f32 %v3542_v40, %v3538_v7  ;;  %13986 = vst [vmem:[#allocation11_spill] sm:$0xff] %v12012_v3 }
 0x150   :  { %3394 = vmatpush1.bf16.msra.mxu1 %v9190_v50  ;;  %v3521_v10 = vadd.f32 %v3519_v30, %v3515_v33  ;;  %v3531_v50 = vmul.f32 %v12001_v23, %v3529_v36  ;;  %v9195_v40 = vld [vmem:[%s13871_s3 + $0x728] sm:$0xff]   ;;  %v3560_v30 = vmul.f32 %v12012_v3, %v13907_v5  ;;  %v9197_v36 = vld [vmem:[%s13871_s3 + $0x770] sm:$0xff]   ;;  %v12023_v33 = vld [vmem:[%s13868_s0 + $0x138] sm:$0xff] }
 0x151   :  { %3395 = vmatprep.subr.bf16.mxu1 %v13945_v51  ;;  %v3550_v7 = vadd.f32 %v3548_v54, %v3544_v37  ;;  %13987 = vst [vmem:[#allocation17_spill] sm:$0xff] %v12023_v33  ;;  %v3537_v54 = vmul.f32 %v12023_v33, %v3535_v55  ;;  %v9198_v37 = vld [vmem:[%s13871_s3 + $0x730] sm:$0xff]   ;;  %v12034_v5 = vld [vmem:[%s13868_s0 + $0x180] sm:$0xff]  ;;  %v3259_v55 = vsel %vm1105_vm1, %v9196_v29, 0  ;;  %v9201_v29 = vld [vmem:[%s13871_s3 + $0x778] sm:$0xff]  }
 0x152   :  { %8618 = vmatpush3.bf16.msra.mxu0 %v9192_v1  ;;  %v3527_v1 = vadd.f32 %v3525_v20, %v3521_v10  ;;  %13988 = vst [vmem:[#allocation12_spill] sm:$0xff] %v12034_v5  ;;  %v3566_v10 = vmul.f32 %v12034_v5, %v13908_v27  ;;  %v9199_v20 = vld [vmem:[%s13871_s3 + $0x7d0] sm:$0xff]  }
 0x153   :  { %8619 = vmatprep.subr.bf16.mxu0 %v9194_v49  ;;  %v3556_v49 = vadd.f32 %v3554_v62, %v3550_v7  ;;  %v12047_v62 = vld [vmem:[%s13868_s0 + $0x148] sm:$0xff]  ;;  %v9200_v27 = vld [vmem:[%s13871_s3 + $0x790] sm:$0xff]  }
 0x154   :  { %3396 = vmatpush1.bf16.msra.mxu1 %v9193_v63  ;;  %v3533_v63 = vadd.f32 %v3531_v50, %v3527_v1  ;;  %13989 = vst [vmem:[#allocation19_spill] sm:$0xff] %v12047_v62  ;;  %v3543_v7 = vmul.f32 %v12047_v62, %v3541_v14  ;;  %v2800_v50 = vpack.c.bf16 %v11599_v11, %v11599_v11  ;;  %v13912_v1 = vstv %s11975_s2  ;;  %v12064_v14 = vld [vmem:[%s13868_s0 + $0x158] sm:$0xff] }
 0x155   :  { %3397 = vmatprep.subr.bf16.mxu1 %v13945_v51  ;;  %v3562_v33 = vadd.f32 %v3560_v30, %v3556_v49  ;;  %13990 = vst [vmem:[#allocation13_spill] sm:$0xff] %v12064_v14  ;;  %v9202_v30 = vld [vmem:[%s13871_s3 + $0x738] sm:$0xff]   ;;  %v12082_v49 = vld [vmem:[%s13868_s0 + $0x168] sm:$0xff] }
 0x156   :  { %8620 = vmatpush3.bf16.msra.mxu0 %v9195_v40  ;;  %v3539_v5 = vadd.f32 %v3537_v54, %v3533_v63  ;;  %v13991_v40 = vstv %s11833_s25  ;;  %13992 = vst [vmem:[#allocation14_spill] sm:$0xff] %v12082_v49  ;;  %s12308_s25 = sld [smem:[#allocation2 + $0x290]] }
 0x157   :  { %8621 = vmatprep.subr.bf16.mxu0 %v9197_v36  ;;  %v3549_v62 = vmul.f32 %v12064_v14, %v13991_v40  ;;  %v3568_v11 = vadd.f32 %v3566_v10, %v3562_v33  ;;  %v9203_v36 = vld [vmem:[%s13871_s3 + $0x7d8] sm:$0xff]   ;;  %v9205_v10 = vld [vmem:[%s13871_s3 + $0x780] sm:$0xff]  }
 0x158   :  { %3398 = vmatpush1.bf16.msra.mxu1 %v3259_v55  ;;  %v3545_v54 = vadd.f32 %v3543_v7, %v3539_v5  ;;  %v13993_v55 = vstv %s11858_s10  ;;  %v9204_v33 = vld [vmem:[%s13871_s3 + $0x798] sm:$0xff]   ;;  %s12103_s10 = sld [smem:[#allocation2 + $0x282]] }
 0x159   :  { %8635 = vmatprep.subr.bf16.mxu1 %v9199_v20  ;;  %v3555_v63 = vmul.f32 %v12082_v49, %v13993_v55  ;;  %v3572_v20 = vadd.f32 %v13912_v1, %v3568_v11  ;;  %v12098_v7 = vld [vmem:[%s13868_s0 + $0x178] sm:$0xff]  ;;  %v9206_v11 = vld [vmem:[%s13871_s3 + $0x740] sm:$0xff]  }
 0x15a   :  { %8622 = vmatpush3.bf16.msra.mxu0 %v9198_v37  ;;  %v3551_v5 = vadd.f32 %v3549_v62, %v3545_v54  ;;  %13994 = vst [vmem:[#allocation16_spill] sm:$0xff] %v12098_v7  ;;  %v13995_v37 = vstv %s11880_s18  ;;  %v9207_v54 = vld [vmem:[%s13871_s3 + $0x7e0] sm:$0xff]   ;;  %s12226_s18 = sld [smem:[#allocation2 + $0x287]] }
 0x15b   :  { %3414 = vmatmul.mubr.bf16.vlgmr.msra.gmra.mrb[28].mxu1 %v2800_v50  ;;  %8623 = vmatprep.subr.bf16.mxu0 %v9201_v29  ;;  %v3561_v40 = vmul.f32 %v12098_v7, %v13995_v37  ;;  %v3583_v50 = vrot.slane %v3572_v20, %v10150_v22  ;;  %v3576_v29 = vcombine.high %v3572_v20, %v3572_v20  ;;  %v12115_v37 = vld [vmem:[%s13868_s0 + $0x188] sm:$0xff] }
 0x15c   :  { %v8409_v55 = vpop.f32.mrb[4].mxu0  ;;  %8636 = vmatpush3.bf16.msra.mxu1 %v9200_v27  ;;  %v3557_v1 = vadd.f32 %v3555_v63, %v3551_v5  ;;  %13996 = vst [vmem:[#allocation18_spill] sm:$0xff] %v12115_v37  ;;  %v13997_v27 = vstv %s11903_s13  ;;  %v9209_v63 = vld [vmem:[%s13871_s3 + $0x788] sm:$0xff]   ;;  %s12134_s13 = sld [smem:[#allocation2 + $0x283]] }
 0x15d   :  { %v8410_v62 = vpop.f32.mrb[5].mxu0  ;;  %8637 = vmatprep.subr.bf16.mxu1 %v9203_v36  ;;  %v3567_v7 = vmul.f32 %v12115_v37, %v13997_v27  ;;  %v9208_v36 = vld [vmem:[%s13871_s3 + $0x7a0] sm:$0xff]   ;;  %v3591_v20 = vcombine.high %v3583_v50, %v3583_v50  ;;  %v12124_v23 = vrot.slane %v3576_v29, %v10150_v22  ;;  %v4247_v27 = vstv %s12069_s9  ;;  %s12285_s9 = sld [smem:[#allocation2 + $0x28d]] }
 0x15e   :  { %v8411_v49 = vadd.f32 %v8410_v62, %v8409_v55  ;;  %8624 = vmatpush3.bf16.msra.mxu0 %v9202_v30  ;;  %v8412_v14 = vpop.f32.mrb[6].mxu0  ;;  %v3563_v3 = vadd.f32 %v3561_v40, %v3557_v1  ;;  %v4251_v37 = vstv %s12074_s8  ;;  %v9211_v1 = vld [vmem:[%s13871_s3 + $0x7e8] sm:$0xff]   ;;  %s12236_s8 = sld [smem:[#allocation2 + $0x289]] }
 0x15f   :  { %8625 = vmatprep.subr.bf16.mxu0 %v9205_v10  ;;  %v8413_v5 = vpop.f32.mrb[7].mxu0  ;;  %v3619_v55 = vpack.c.bf16 %v3591_v20, %v3591_v20  ;;  %v3592_v62 = vcombine.high %v12124_v23, %v12124_v23  ;;  %v9210_v14 = vld [vmem:[%s13871_s3 + $0x748] sm:$0xff]   ;;  %v4248_v20 = vmul.f32 %v11439_v6, %v4247_v27 }
 0x160   :  { %8638 = vmatpush3.bf16.msra.mxu1 %v9204_v33  ;;  %v1224_v30 = vadd.f32 %v8411_v49, %v11816_v9  ;;  %v3569_v9 = vadd.f32 %v3567_v7, %v3563_v3  ;;  %v9212_v33 = vld [vmem:[%s13871_s3 + $0x7a8] sm:$0xff]   ;;  %v13998_v3 = vstv %s11975_s2  ;;  %s12385_s2 = sld [smem:[#allocation2 + $0x294]] }
 0x161   :  { %8639 = vmatprep.subr.bf16.mxu1 %v9207_v54  ;;  %4117 = vmatprep.mubr.bf16.mxu0 %v3619_v55  ;;  %v3621_v10 = vpack.c.bf16 %v3592_v62, %v3592_v62  ;;  %v9213_v54 = vld [vmem:[%s13871_s3 + $0x850] sm:$0xff]   ;;  %v3618_v62 = vpack.c.bf16 %v3583_v50, %v3583_v50 }
 0x162   :  { %v1263_v49 = vpop.f32.mrb[4].mxu1  ;;  %8626 = vmatpush3.bf16.msra.mxu0 %v9206_v11  ;;  %v3573_v7 = vadd.f32 %v13998_v3, %v3569_v9  ;;  %v4252_v11 = vmul.f32 %v11445_v57, %v4251_v37  ;;  %v9215_v9 = vld [vmem:[%s13871_s3 + $0x7f0] sm:$0xff]   ;;  %v9220_v3 = vld [vmem:[%s13871_s3 + $0x7b8] sm:$0xff]  }
 0x163   :  { %v12147_v40 = vadd.f32 %v1263_v49, %v1224_v30  ;;  %v1265_v29 = vpop.f32.mrb[5].mxu1  ;;  %8627 = vmatprep.subr.bf16.mxu0 %v9209_v63  ;;  %v9214_v30 = vld [vmem:[%s13871_s3 + $0x810] sm:$0xff]   ;;  %4157 = vmatprep.mubr.bf16.mxu1 %v3621_v10  ;;  %v4257_v63 = vstv %s12103_s10  ;;  %v4263_v10 = vstv %s12134_s13  ;;  %s12336_s10 = sld [smem:[#allocation2 + $0x292]]  ;;  %s12480_s13 = sld [smem:[#allocation5 + $0x5]] }
 0x164   :  { %v1266_v5 = vpop.f32.mrb[6].mxu1  ;;  %8640 = vmatpush3.bf16.msra.mxu1 %v9208_v36  ;;  %v12168_v6 = vrot.slane %v3573_v7, %v10150_v22  ;;  %v9216_v57 = vld [vmem:[%s13871_s3 + $0x7b0] sm:$0xff]   ;;  %v9217_v36 = vld [vmem:[%s13871_s3 + $0x858] sm:$0xff]   ;;  %v4258_v49 = vmul.f32 %v11473_v48, %v4257_v63  ;;  %v9221_v48 = vld [vmem:[%s13871_s3 + $0x860] sm:$0xff]  }
 0x165   :  { %v1267_v55 = vpop.f32.mrb[7].mxu1  ;;  %8641 = vmatprep.subr.bf16.mxu1 %v9211_v1  ;;  %v4254_v1 = vadd.f32 %v4252_v11, %v4248_v20  ;;  %v9219_v29 = vld [vmem:[%s13871_s3 + $0x7f8] sm:$0xff]   ;;  %v4264_v20 = vmul.f32 %v11497_v45, %v4263_v10  ;;  %v9222_v11 = vld [vmem:[%s13871_s3 + $0x820] sm:$0xff]   ;;  %v12210_v45 = vld [vmem:[%s13868_s0 + $0x8] sm:$0xff] }
 0x166   :  { %8628 = vmatpush3.bf16.msra.mxu0 %v9210_v14  ;;  %v3608_v50 = vcombine.high %v12168_v6, %v12168_v6  ;;  %v9218_v14 = vld [vmem:[%s13871_s3 + $0x818] sm:$0xff]   ;;  %v9223_v5 = vld [vmem:[%s13871_s3 + $0x800] sm:$0xff]   ;;  %v4269_v55 = vstv %s12142_s15  ;;  %s12438_s15 = sld [smem:[#allocation2 + $0x298]] }
 0x167   :  { %8657 = vmatprep.subr.bf16.mxu0 %v9213_v54 }
 0x168   :  { %8642 = vmatpush3.bf16.msra.mxu1 %v9212_v33  ;;  %v3623_v54 = vpack.c.bf16 %v3608_v50, %v3608_v50  ;;  %v4260_v33 = vadd.f32 %v4258_v49, %v4254_v1  ;;  %v4270_v50 = vmul.f32 %v11533_v13, %v4269_v55  ;;  %v9227_v13 = vld [vmem:[%s13871_s3 + $0x808] sm:$0xff]  }
 0x169   :  { %4118 = vmatmul.mubr.bf16.vlgmr.msra.gmra.mrb[32].mxu0 %v3618_v62  ;;  %8643 = vmatprep.subr.bf16.mxu1 %v9215_v9  ;;  %v9225_v62 = vld [vmem:[%s13871_s3 + $0x868] sm:$0xff]   ;;  %v4249_v9 = vmul.f32 %v12210_v45, %v4247_v27  ;;  %v9224_v27 = vld [vmem:[%s13871_s3 + $0x7c0] sm:$0xff]  }
 0x16a   :  { %8658 = vmatpush3.bf16.msra.mxu0 %v9214_v30  ;;  %4197 = vmatprep.mubr.bf16.mxu0 %v3623_v54  ;;  %v3593_v30 = vcombine.high %v3573_v7, %v3573_v7  ;;  %v12218_v7 = vld [vmem:[%s13868_s0 + $0x18] sm:$0xff] }
 0x16b   :  { %8659 = vmatprep.subr.bf16.mxu0 %v9217_v36  ;;  %v4266_v36 = vadd.f32 %v4264_v20, %v4260_v33  ;;  %v4275_v33 = vstv %s12203_s29  ;;  %v4281_v20 = vstv %s12205_s11  ;;  %s12649_s29 = sld [smem:[#allocation2 + $0x304]]  ;;  %s13341_s11 = sld [smem:[#allocation2 + $0x387]] }
 0x16c   :  { %8644 = vmatpush3.bf16.msra.mxu1 %v9216_v57  ;;  %v4253_v57 = vmul.f32 %v12218_v7, %v4251_v37  ;;  %v12234_v1 = vrot.slane %v3593_v30, %v10150_v22  ;;  %v9226_v37 = vld [vmem:[%s13871_s3 + $0x828] sm:$0xff]   ;;  %v4293_v30 = vstv %s12228_s20  ;;  %s13347_s20 = sld [smem:[#allocation2 + $0x389]] }
 0x16d   :  { %8645 = vmatprep.subr.bf16.mxu1 %v9219_v29  ;;  %v9229_v29 = vld [vmem:[%s13871_s3 + $0x870] sm:$0xff]   ;;  %v4272_v54 = vadd.f32 %v4270_v50, %v4266_v36 }
 0x16e   :  { %8660 = vmatpush3.bf16.msra.mxu0 %v9218_v14  ;;  %v4255_v49 = vadd.f32 %v4253_v57, %v4249_v9  ;;  %v4259_v14 = vmul.f32 %v11541_v31, %v4257_v63  ;;  %v4276_v31 = vmul.f32 %v11569_v24, %v4275_v33  ;;  %v4282_v63 = vmul.f32 %v11604_v16, %v4281_v20  ;;  %v9232_v16 = vld [vmem:[%s13871_s3 + $0x878] sm:$0xff]   ;;  %v9231_v50 = vld [vmem:[%s13871_s3 + $0x890] sm:$0xff]  }
 0x16f   :  { %8661 = vmatprep.subr.bf16.mxu0 %v9221_v48  ;;  %v3609_v48 = vcombine.high %v12234_v1, %v12234_v1  ;;  %v4265_v9 = vmul.f32 %v11582_v59, %v4263_v10  ;;  %v3620_v24 = vpack.c.bf16 %v12124_v23, %v12124_v23  ;;  %v4299_v10 = vstv %s12236_s8  ;;  %s13369_s8 = sld [smem:[#allocation2 + $0x38c]] }
 0x170   :  { %8646 = vmatpush3.bf16.msra.mxu1 %v9220_v3  ;;  %v9228_v3 = vld [vmem:[%s13871_s3 + $0x7c8] sm:$0xff]   ;;  %v4278_v57 = vadd.f32 %v4276_v31, %v4272_v54 }
 0x171   :  { %8647 = vmatprep.subr.bf16.mxu1 %v9223_v5  ;;  %v9230_v5 = vld [vmem:[%s13871_s3 + $0x830] sm:$0xff]   ;;  %v3625_v59 = vpack.c.bf16 %v3609_v48, %v3609_v48  ;;  %v4311_v48 = vstv %s12257_s22  ;;  %s12663_s22 = sld [smem:[#allocation2 + $0x306]] }
 0x172   :  { %8662 = vmatpush3.bf16.msra.mxu0 %v9222_v11  ;;  %v4287_v11 = vstv %s12226_s18  ;;  %v4284_v23 = vadd.f32 %v4282_v63, %v4278_v57  ;;  %s12811_s18 = sld [smem:[#allocation2 + $0x310]] }
 0x173   :  { %8663 = vmatprep.subr.bf16.mxu0 %v9225_v62  ;;  %v4261_v62 = vadd.f32 %v4259_v14, %v4255_v49  ;;  %v4288_v36 = vmul.f32 %v11634_v8, %v4287_v11  ;;  %v9233_v8 = vld [vmem:[%s13871_s3 + $0x838] sm:$0xff]  }
 0x174   :  { %8648 = vmatpush3.bf16.msra.mxu1 %v9224_v27  ;;  %v4294_v27 = vmul.f32 %v11681_v4, %v4293_v30  ;;  %v4271_v4 = vmul.f32 %v11614_v32, %v4269_v55  ;;  %v9236_v32 = vld [vmem:[%s13871_s3 + $0x840] sm:$0xff]  }
 0x175   :  { %8649 = vmatprep.subr.bf16.mxu1 %v9227_v13  ;;  %v9235_v13 = vld [vmem:[%s13871_s3 + $0x880] sm:$0xff]   ;;  %v4267_v49 = vadd.f32 %v4265_v9, %v4261_v62  ;;  %v4290_v14 = vadd.f32 %v4288_v36, %v4284_v23  ;;  %v4317_v9 = vstv %s12270_s30  ;;  %v4312_v36 = vmul.f32 %v11731_v21, %v4311_v48  ;;  %s12670_s30 = sld [smem:[#allocation2 + $0x308]] }
 0x176   :  { %8664 = vmatpush3.bf16.msra.mxu0 %v9226_v37  ;;  %v4305_v37 = vstv %s12244_s16  ;;  %v4277_v23 = vmul.f32 %v11648_v15, %v4275_v33  ;;  %v4318_v21 = vmul.f32 %v11753_v47, %v4317_v9  ;;  %v9239_v15 = vld [vmem:[%s13871_s3 + $0x848] sm:$0xff]   ;;  %v4329_v33 = vstv %s12298_s27  ;;  %v9241_v47 = vld [vmem:[%s13871_s3 + $0x914] sm:$0xff]   ;;  %s12413_s16 = sld [smem:[#allocation2 + $0x296]]  ;;  %s12531_s27 = sld [smem:[#allocation2 + $0x302]] }
 0x177   :  { %8665 = vmatprep.subr.bf16.mxu0 %v9229_v29  ;;  %v4300_v29 = vmul.f32 %v11689_v2, %v4299_v10  ;;  %v4296_v2 = vadd.f32 %v4294_v27, %v4290_v14  ;;  %v4306_v55 = vmul.f32 %v11708_v53, %v4305_v37  ;;  %v4283_v27 = vmul.f32 %v11672_v56, %v4281_v20 }
 0x178   :  { %8650 = vmatpush3.bf16.msra.mxu1 %v9228_v3  ;;  %v9234_v3 = vld [vmem:[%s13871_s3 + $0x898] sm:$0xff]   ;;  %v4289_v56 = vmul.f32 %v11720_v61, %v4287_v11  ;;  %v4335_v61 = vstv %s12300_s17  ;;  %s12764_s17 = sld [smem:[#allocation2 + $0x30d]] }
 0x179   :  { %4205 = vmatprep.subr.bf16.mxu1 %v13945_v51  ;;  %v4302_v57 = vadd.f32 %v4300_v29, %v4296_v2 }
 0x17a   :  { %8666 = vmatpush3.bf16.msra.mxu0 %v9230_v5  ;;  %v9237_v5 = vld [vmem:[%s13871_s3 + $0x8a0] sm:$0xff]  }
 0x17b   :  { %4158 = vmatmul.mubr.bf16.vlgmr.msra.gmra.mrb[32].mxu1 %v3620_v24  ;;  %8667 = vmatprep.subr.bf16.mxu0 %v9232_v16  ;;  %v4273_v24 = vadd.f32 %v4271_v4, %v4267_v49  ;;  %v9238_v16 = vld [vmem:[%s13871_s3 + $0x888] sm:$0xff]  }
 0x17c   :  { %v8431_v54 = vpop.f32.mrb[8].mxu0  ;;  %4206 = vmatpush1.bf16.msra.mxu1 %v9231_v50  ;;  %7755 = vmatprep.mubr.msk.bf16.mxu1 %vm1101_vm0, %v3625_v59  ;;  %v4323_v59 = vstv %s12285_s9  ;;  %s12863_s9 = sld [smem:[#allocation2 + $0x311]] }
 0x17d   :  { %v8432_v31 = vpop.f32.mrb[9].mxu0  ;;  %4207 = vmatprep.subr.bf16.mxu1 %v13945_v51  ;;  %v4324_v4 = vmul.f32 %v11768_v44, %v4323_v59  ;;  %v3622_v44 = vpack.c.bf16 %v12168_v6, %v12168_v6 }
 0x17e   :  { %v8433_v63 = vadd.f32 %v8432_v31, %v8431_v54  ;;  %8668 = vmatpush3.bf16.msra.mxu0 %v9233_v8  ;;  %v8434_v62 = vpop.f32.mrb[10].mxu0  ;;  %v4308_v8 = vadd.f32 %v4306_v55, %v4302_v57  ;;  %v9240_v54 = vld [vmem:[%s13871_s3 + $0x8a8] sm:$0xff]   ;;  %v4330_v55 = vmul.f32 %v11798_v17, %v4329_v33  ;;  %v9244_v17 = vld [vmem:[%s13871_s3 + $0x91c] sm:$0xff]  }
 0x17f   :  { %8669 = vmatprep.subr.bf16.mxu0 %v9235_v13  ;;  %v8435_v53 = vpop.f32.mrb[11].mxu0  ;;  %v4279_v13 = vadd.f32 %v4277_v23, %v4273_v24  ;;  %v4336_v24 = vmul.f32 %v11827_v0, %v4335_v61  ;;  %v9247_v23 = vld [vmem:[%s13871_s3 + $0x924] sm:$0xff]  }
 0x180   :  { %v1649_v50 = vadd.f32 %v8433_v63, %v12147_v40  ;;  %4208 = vmatpush1.bf16.msra.mxu1 %v9234_v3  ;;  %v4314_v49 = vadd.f32 %v4312_v36, %v4308_v8  ;;  %v4295_v3 = vmul.f32 %v11779_v12, %v4293_v30  ;;  %v9243_v12 = vld [vmem:[%s13871_s3 + $0x8b0] sm:$0xff]   ;;  %v4341_v30 = vstv %s12308_s25  ;;  %v9246_v36 = vld [vmem:[%s13871_s3 + $0x8b8] sm:$0xff]   ;;  %s12809_s25 = sld [smem:[#allocation2 + $0x30f]] }
 0x181   :  { %4209 = vmatprep.subr.bf16.mxu1 %v13945_v51  ;;  %v4285_v11 = vadd.f32 %v4283_v27, %v4279_v13  ;;  %v4342_v0 = vmul.f32 %v11849_v18, %v4341_v30  ;;  %v4359_v8 = vstv %s12348_s24  ;;  %s12651_s24 = sld [smem:[#allocation2 + $0x305]] }
 0x182   :  { %v8453_v40 = vpop.f32.mrb[8].mxu1  ;;  %8670 = vmatpush3.bf16.msra.mxu0 %v9236_v32  ;;  %v9242_v32 = vld [vmem:[%s13871_s3 + $0x8d4] sm:$0xff]   ;;  %v4320_v2 = vadd.f32 %v4318_v21, %v4314_v49 }
 0x183   :  { %v8454_v20 = vpop.f32.mrb[9].mxu1  ;;  %8671 = vmatprep.subr.bf16.mxu0 %v9238_v16  ;;  %v4291_v6 = vadd.f32 %v4289_v56, %v4285_v11  ;;  %v4347_v16 = vstv %s12322_s1  ;;  %s12905_s1 = sld [smem:[#allocation2 + $0x314]] }
 0x184   :  { %v8455_v14 = vadd.f32 %v8454_v20, %v8453_v40  ;;  %v8456_v29 = vpop.f32.mrb[10].mxu1  ;;  %4210 = vmatpush1.bf16.msra.mxu1 %v9237_v5  ;;  %v4301_v5 = vmul.f32 %v11787_v43, %v4299_v10  ;;  %v4326_v62 = vadd.f32 %v4324_v4, %v4320_v2  ;;  %v4307_v43 = vmul.f32 %v11811_v41, %v4305_v37  ;;  %v9245_v10 = vld [vmem:[%s13871_s3 + $0x8dc] sm:$0xff]  }
 0x185   :  { %v8457_v31 = vpop.f32.mrb[11].mxu1  ;;  %4211 = vmatprep.subr.bf16.mxu1 %v13945_v51  ;;  %v4297_v53 = vadd.f32 %v4295_v3, %v4291_v6  ;;  %v4313_v37 = vmul.f32 %v11838_v52, %v4311_v48  ;;  %v4348_v27 = vmul.f32 %v11874_v58, %v4347_v16  ;;  %v4319_v40 = vmul.f32 %v11863_v39, %v4317_v9  ;;  %v9248_v52 = vld [vmem:[%s13871_s3 + $0x8e4] sm:$0xff]   ;;  %v9250_v9 = vld [vmem:[%s13871_s3 + $0x92c] sm:$0xff]  }
 0x186   :  { %v12379_v63 = vadd.f32 %v8455_v14, %v1649_v50  ;;  %8672 = vmatpush3.bf16.msra.mxu0 %v9239_v15  ;;  %v4332_v57 = vadd.f32 %v4330_v55, %v4326_v62  ;;  %v4353_v50 = vstv %s12336_s10  ;;  %v4365_v15 = vstv %s12385_s2  ;;  %v9249_v20 = vld [vmem:[%s13871_s3 + $0x8c0] sm:$0xff]   ;;  %v9252_v14 = vld [vmem:[%s13871_s3 + $0x8c8] sm:$0xff]   ;;  %s12527_s10 = sld [smem:[#allocation2 + $0x301]]  ;;  %s12665_s2 = sld [smem:[#allocation2 + $0x307]] }
 0x187   :  { %8679 = vmatprep.subr.bf16.mxu0 %v9241_v47  ;;  %v4303_v41 = vadd.f32 %v4301_v5, %v4297_v53  ;;  %v4354_v58 = vmul.f32 %v11896_v34, %v4353_v50  ;;  %v4325_v39 = vmul.f32 %v11885_v46, %v4323_v59  ;;  %v4360_v34 = vmul.f32 %v11919_v26, %v4359_v8  ;;  %v9251_v59 = vld [vmem:[%s13871_s3 + $0x8ec] sm:$0xff]   ;;  %v13999_v6 = vld [vmem:[#allocation11_spill] sm:$0xff] }
 0x188   :  { %4212 = vmatpush1.bf16.msra.mxu1 %v9240_v54  ;;  %v4338_v18 = vadd.f32 %v4336_v24, %v4332_v57  ;;  %v4371_v47 = vstv %s12397_s19  ;;  %v4331_v46 = vmul.f32 %v11908_v60, %v4329_v33  ;;  %v4366_v26 = vmul.f32 %v11942_v38, %v4365_v15  ;;  %v9255_v60 = vld [vmem:[%s13871_s3 + $0x8d0] ss:$0 sps:$4 sm:$0x33]   ;;  %v9253_v38 = vld [vmem:[%s13871_s3 + $0x934] sm:$0xff]   ;;  %v14000_v24 = vld [vmem:[#allocation15_spill] sm:$0xff]  ;;  %s12723_s19 = sld [smem:[#allocation2 + $0x30b]] }
 0x189   :  { %4198 = vmatmul.mubr.bf16.vlgmr.msra.gmra.mrb[36].mxu0 %v3622_v44  ;;  %4213 = vmatprep.subr.bf16.mxu1 %v13945_v51  ;;  %v4309_v21 = vadd.f32 %v4307_v43, %v4303_v41  ;;  %v4377_v33 = vstv %s12413_s16  ;;  %v4337_v54 = vmul.f32 %v11931_v25, %v4335_v61  ;;  %v4372_v3 = vmul.f32 %v11966_v19, %v4371_v47  ;;  %v9254_v19 = vld [vmem:[%s13871_s3 + $0x8f4] sm:$0xff]   ;;  %v9260_v53 = vld [vmem:[%s13871_s3 + $0x944] sm:$0xff]   ;;  %s12576_s16 = sld [smem:[#allocation2 + $0x303]] }
 0x18a   :  { %8680 = vmatpush3.bf16.msra.mxu0 %v9242_v32  ;;  %v4344_v48 = vadd.f32 %v4342_v0, %v4338_v18  ;;  %v4383_v31 = vstv %s12425_s12  ;;  %v4343_v32 = vmul.f32 %v11955_v28, %v4341_v30  ;;  %v4378_v61 = vmul.f32 %v11991_v42, %v4377_v33  ;;  %v9256_v28 = vld [vmem:[%s13871_s3 + $0x93c] sm:$0xff]   ;;  %v9259_v0 = vld [vmem:[%s13871_s3 + $0x954] sm:$0xff]  }
 0x18b   :  { %8681 = vmatprep.subr.bf16.mxu0 %v9244_v17  ;;  %v4315_v13 = vadd.f32 %v4313_v37, %v4309_v21  ;;  %v4389_v2 = vstv %s12438_s15  ;;  %v4384_v42 = vmul.f32 %v13999_v6, %v4383_v31  ;;  %v4083_v5 = vsel %vm1105_vm1, %v9255_v60, 0  ;;  %v9257_v17 = vld [vmem:[%s13871_s3 + $0x8fc] sm:$0xff]   ;;  %v9266_v60 = vld [vmem:[%s13871_s3 + $0x9a4] sm:$0xff]  }
 0x18c   :  { %4214 = vmatpush1.bf16.msra.mxu1 %v9243_v12  ;;  %v4350_v56 = vadd.f32 %v4348_v27, %v4344_v48  ;;  %v4349_v12 = vmul.f32 %v11980_v35, %v4347_v16  ;;  %v9258_v35 = vld [vmem:[%s13871_s3 + $0x994] sm:$0xff]   ;;  %v4355_v16 = vmul.f32 %v14000_v24, %v4353_v50  ;;  %v3624_v37 = vpack.c.bf16 %v12234_v1, %v12234_v1  ;;  %v9261_v27 = vld [vmem:[%s13871_s3 + $0x904] sm:$0xff]   ;;  %v9262_v1 = vld [vmem:[%s13871_s3 + $0x99c] sm:$0xff]  }
 0x18d   :  { %4215 = vmatprep.subr.bf16.mxu1 %v13945_v51  ;;  %v4321_v49 = vadd.f32 %v4319_v40, %v4315_v13  ;;  %v14002_v50 = vld [vmem:[#allocation17_spill] sm:$0xff]  ;;  %v4395_v21 = vstv %s12480_s13  ;;  %s12791_s13 = sld [smem:[#allocation2 + $0x30e]] }
 0x18e   :  { %8682 = vmatpush3.bf16.msra.mxu0 %v9245_v10  ;;  %v4356_v4 = vadd.f32 %v4354_v58, %v4350_v56  ;;  %v14001_v10 = vld [vmem:[#allocation12_spill] sm:$0xff]  ;;  %v4361_v41 = vmul.f32 %v14002_v50, %v4359_v8  ;;  %v14003_v8 = vld [vmem:[#allocation19_spill] sm:$0xff] }
 0x18f   :  { %8683 = vmatprep.subr.bf16.mxu0 %v9247_v23  ;;  %v4327_v29 = vadd.f32 %v4325_v39, %v4321_v49  ;;  %v4390_v57 = vmul.f32 %v14001_v10, %v4389_v2  ;;  %v9263_v39 = vld [vmem:[%s13871_s3 + $0x95c] sm:$0xff]  }
 0x190   :  { %4216 = vmatpush1.bf16.msra.mxu1 %v9246_v36  ;;  %v4362_v11 = vadd.f32 %v4360_v34, %v4356_v4  ;;  %v14004_v34 = vld [vmem:[#allocation13_spill] sm:$0xff] }
 0x191   :  { %4217 = vmatprep.subr.bf16.mxu1 %v13945_v51  ;;  %v4333_v44 = vadd.f32 %v4331_v46, %v4327_v29  ;;  %v9265_v4 = vld [vmem:[%s13871_s3 + $0x90c] sm:$0xff]  }
 0x192   :  { %8684 = vmatpush3.bf16.msra.mxu0 %v9248_v52  ;;  %v4368_v25 = vadd.f32 %v4366_v26, %v4362_v11  ;;  %v4367_v52 = vmul.f32 %v14003_v8, %v4365_v15  ;;  %v9264_v15 = vld [vmem:[%s13871_s3 + $0x94c] sm:$0xff]   ;;  %v14005_v26 = vld [vmem:[#allocation14_spill] sm:$0xff] }
 0x193   :  { %8685 = vmatprep.subr.bf16.mxu0 %v9250_v9  ;;  %v4339_v55 = vadd.f32 %v4337_v54, %v4333_v44  ;;  %v14006_v11 = vld [vmem:[#allocation16_spill] sm:$0xff] }
 0x194   :  { %4218 = vmatpush1.bf16.msra.mxu1 %v9249_v20  ;;  %v4374_v30 = vadd.f32 %v4372_v3, %v4368_v25  ;;  %v4373_v20 = vmul.f32 %v14004_v34, %v4371_v47  ;;  %v4385_v3 = vmul.f32 %v14006_v11, %v4383_v31  ;;  %v5075_v25 = vstv %s12527_s10  ;;  %v12713_v11 = vld [vmem:[%s13868_s0 + $0x50] sm:$0xff]  ;;  %s12748_s10 = sld [smem:[#allocation2 + $0x30c]] }
 0x195   :  { %4219 = vmatprep.subr.bf16.mxu1 %v13945_v51  ;;  %v4345_v62 = vadd.f32 %v4343_v32, %v4339_v55  ;;  %v5071_v32 = vstv %s12519_s28  ;;  %v14007_v55 = vld [vmem:[#allocation18_spill] sm:$0xff]  ;;  %s12694_s28 = sld [smem:[#allocation2 + $0x30a]] }
 0x196   :  { %8686 = vmatpush3.bf16.msra.mxu0 %v9251_v59  ;;  %v4380_v43 = vadd.f32 %v4378_v61, %v4374_v30  ;;  %v9267_v61 = vld [vmem:[%s13871_s3 + $0x964] sm:$0xff]   ;;  %v4391_v31 = vmul.f32 %v14007_v55, %v4389_v2  ;;  %v9270_v30 = vld [vmem:[%s13871_s3 + $0x9ac] sm:$0xff]  }
 0x197   :  { %8687 = vmatprep.subr.bf16.mxu0 %v9253_v38  ;;  %v4351_v36 = vadd.f32 %v4349_v12, %v4345_v62  ;;  %v12595_v2 = vld [vmem:[%s13868_s0] sm:$0xff]  ;;  %v12603_v62 = vld [vmem:[%s13868_s0 + $0x10] sm:$0xff] }
 0x198   :  { %4220 = vmatpush1.bf16.msra.mxu1 %v9252_v14  ;;  %v4386_v23 = vadd.f32 %v4384_v42, %v4380_v43  ;;  %v4379_v14 = vmul.f32 %v14005_v26, %v4377_v33  ;;  %v5076_v24 = vmul.f32 %v12603_v62, %v5075_v25  ;;  %v9272_v43 = vld [vmem:[%s13871_s3 + $0xa1c] sm:$0xff]   ;;  %v9281_v26 = vld [vmem:[%s13871_s3 + $0x9ec] sm:$0xff]  }
 0x199   :  { %4221 = vmatprep.subr.bf16.mxu1 %v13945_v51  ;;  %v4357_v40 = vadd.f32 %v4355_v16, %v4351_v36  ;;  %v9271_v36 = vld [vmem:[%s13871_s3 + $0x96c] sm:$0xff]  }
 0x19a   :  { %8688 = vmatpush3.bf16.msra.mxu0 %v9254_v19  ;;  %v4392_v58 = vadd.f32 %v4390_v57, %v4386_v23  ;;  %v5081_v57 = vstv %s12531_s27  ;;  %v9273_v23 = vld [vmem:[%s13871_s3 + $0x9dc] sm:$0xff]   ;;  %s13141_s27 = sld [smem:[#allocation2 + $0x382]] }
 0x19b   :  { %8689 = vmatprep.subr.bf16.mxu0 %v9256_v28  ;;  %v4363_v56 = vadd.f32 %v4361_v41, %v4357_v40  ;;  %v12628_v40 = vld [vmem:[%s13868_s0 + $0x20] sm:$0xff] }
 0x19c   :  { %v8475_v18 = vpop.f32.mrb[12].mxu0  ;;  %4222 = vmatpush1.bf16.msra.mxu1 %v4083_v5  ;;  %v4396_v49 = vadd.f32 %v4395_v21, %v4392_v58  ;;  %v9269_v5 = vld [vmem:[%s13871_s3 + $0x9d4] sm:$0xff]   ;;  %v5082_v8 = vmul.f32 %v12628_v40, %v5081_v57  ;;  %v9277_v58 = vld [vmem:[%s13871_s3 + $0x9e4] sm:$0xff]  }
 0x19d   :  { %v8476_v48 = vpop.f32.mrb[13].mxu0  ;;  %8701 = vmatprep.subr.bf16.mxu1 %v9258_v35  ;;  %v4369_v47 = vadd.f32 %v4367_v52, %v4363_v56  ;;  %v5072_v35 = vmul.f32 %v12595_v2, %v5071_v32  ;;  %v9276_v52 = vld [vmem:[%s13871_s3 + $0xa24] sm:$0xff]   ;;  %v12658_v56 = vld [vmem:[%s13868_s0 + $0x30] sm:$0xff] }
 0x19e   :  { %v8477_v13 = vadd.f32 %v8476_v48, %v8475_v18  ;;  %8690 = vmatpush3.bf16.msra.mxu0 %v9257_v17  ;;  %v8478_v9 = vpop.f32.mrb[14].mxu0  ;;  %v4407_v29 = vrot.slane %v4396_v49, %v10150_v22  ;;  %v4400_v54 = vcombine.high %v4396_v49, %v4396_v49  ;;  %v5087_v48 = vstv %s12576_s16  ;;  %s13175_s16 = sld [smem:[#allocation2 + $0x383]] }
 0x19f   :  { %4238 = vmatmul.mubr.bf16.vlgmr.msra.gmra.mrb[36].mxu1 %v3624_v37  ;;  %8691 = vmatprep.subr.bf16.mxu0 %v9260_v53  ;;  %v8479_v46 = vpop.f32.mrb[15].mxu0  ;;  %v4375_v38 = vadd.f32 %v4373_v20, %v4369_v47  ;;  %v9274_v37 = vld [vmem:[%s13871_s3 + $0x9b4] sm:$0xff]   ;;  %v5088_v34 = vmul.f32 %v12658_v56, %v5087_v48  ;;  %v9280_v20 = vld [vmem:[%s13871_s3 + $0xa2c] sm:$0xff]   ;;  %v5077_v47 = vmul.f32 %v12218_v7, %v5075_v25  ;;  %v9283_v7 = vld [vmem:[%s13871_s3 + $0x984] sm:$0xff]   ;;  %v5111_v25 = vstv %s12665_s2  ;;  %s12911_s2 = sld [smem:[#allocation2 + $0x315]] }
 0x1a0   :  { %8702 = vmatpush3.bf16.msra.mxu1 %v9259_v0  ;;  %v1729_v59 = vadd.f32 %v8477_v13, %v12379_v63  ;;  %v9268_v63 = vld [vmem:[%s13871_s3 + $0xa14] sm:$0xff]   ;;  %v4415_v33 = vcombine.high %v4407_v29, %v4407_v29  ;;  %v12572_v44 = vrot.slane %v4400_v54, %v10150_v22  ;;  %v4442_v28 = vpack.c.bf16 %v4407_v29, %v4407_v29  ;;  %v9278_v13 = vld [vmem:[%s13871_s3 + $0x9bc] sm:$0xff]  }
 0x1a1   :  { %8703 = vmatprep.subr.bf16.mxu1 %v9262_v1  ;;  %v4381_v19 = vadd.f32 %v4379_v14, %v4375_v38  ;;  %v5093_v29 = vstv %s12649_s29  ;;  %s13343_s29 = sld [smem:[#allocation2 + $0x388]] }
 0x1a2   :  { %8692 = vmatpush3.bf16.msra.mxu0 %v9261_v27  ;;  %v4443_v12 = vpack.c.bf16 %v4415_v33, %v4415_v33  ;;  %v4416_v6 = vcombine.high %v12572_v44, %v12572_v44  ;;  %v5078_v27 = vadd.f32 %v5076_v24, %v5072_v35  ;;  %v5105_v33 = vstv %s12663_s22  ;;  %v12758_v24 = vld [vmem:[%s13868_s0 + $0x70] sm:$0xff]  ;;  %s12887_s22 = sld [smem:[#allocation2 + $0x313]] }
 0x1a3   :  { %8693 = vmatprep.subr.bf16.mxu0 %v9264_v15  ;;  %v4387_v17 = vadd.f32 %v4385_v3, %v4381_v19  ;;  %v9279_v15 = vld [vmem:[%s13871_s3 + $0x97c] sm:$0xff]   ;;  %v12728_v19 = vld [vmem:[%s13868_s0 + $0x28] sm:$0xff] }
 0x1a4   :  { %8704 = vmatpush3.bf16.msra.mxu1 %v9263_v39  ;;  %4941 = vmatprep.mubr.bf16.mxu0 %v4443_v12  ;;  %v4445_v10 = vpack.c.bf16 %v4416_v6, %v4416_v6  ;;  %v5084_v9 = vadd.f32 %v5082_v8, %v5078_v27  ;;  %v5083_v55 = vmul.f32 %v12728_v19, %v5081_v57  ;;  %v9288_v6 = vld [vmem:[%s13871_s3 + $0xa3c] sm:$0xff]   ;;  %v5129_v27 = vstv %s12694_s28  ;;  %v9290_v8 = vld [vmem:[%s13871_s3 + $0xa54] sm:$0xff]   ;;  %s12986_s28 = sld [smem:[#allocation2 + $0x316]] }
 0x1a5   :  { %8705 = vmatprep.subr.bf16.mxu1 %v9266_v60  ;;  %v4393_v50 = vadd.f32 %v4391_v31, %v4387_v17  ;;  %v9284_v60 = vld [vmem:[%s13871_s3 + $0xa34] sm:$0xff]  }
 0x1a6   :  { %v1768_v42 = vpop.f32.mrb[12].mxu1  ;;  %8694 = vmatpush3.bf16.msra.mxu0 %v9265_v4  ;;  %4981 = vmatprep.mubr.bf16.mxu1 %v4445_v10  ;;  %v5073_v4 = vmul.f32 %v12210_v45, %v5071_v32  ;;  %v5090_v14 = vadd.f32 %v5088_v34, %v5084_v9  ;;  %v5099_v45 = vstv %s12651_s24  ;;  %v9286_v32 = vld [vmem:[%s13871_s3 + $0x9cc] sm:$0xff]   ;;  %v9285_v31 = vld [vmem:[%s13871_s3 + $0x9f4] sm:$0xff]   ;;  %v5135_v9 = vstv %s12723_s19  ;;  %s13009_s19 = sld [smem:[#allocation2 + $0x317]]  ;;  %s13093_s24 = sld [smem:[#allocation2 + $0x381]] }
 0x1a7   :  { %v12608_v16 = vadd.f32 %v1768_v42, %v1729_v59  ;;  %v1770_v53 = vpop.f32.mrb[13].mxu1  ;;  %8723 = vmatprep.subr.bf16.mxu0 %v9268_v63  ;;  %v4397_v18 = vadd.f32 %v4395_v21, %v4393_v50  ;;  %v9275_v21 = vld [vmem:[%s13871_s3 + $0x974] sm:$0xff]   ;;  %v9282_v59 = vld [vmem:[%s13871_s3 + $0x9c4] sm:$0xff]   ;;  %v5100_v3 = vmul.f32 %v12713_v11, %v5099_v45  ;;  %v5117_v42 = vstv %s12670_s30 }
 0x1a8   :  { %v1771_v0 = vpop.f32.mrb[14].mxu1  ;;  %8706 = vmatpush3.bf16.msra.mxu1 %v9267_v61  ;;  %v12705_v63 = vld [vmem:[%s13868_s0 + $0x40] sm:$0xff]  ;;  %v5079_v61 = vadd.f32 %v5077_v47, %v5073_v4  ;;  %v5112_v53 = vmul.f32 %v12758_v24, %v5111_v25  ;;  %v12769_v57 = vld [vmem:[%s13868_s0 + $0x38] sm:$0xff]  ;;  %v9294_v47 = vld [vmem:[%s13871_s3 + $0xa4c] sm:$0xff]  }
 0x1a9   :  { %v1772_v41 = vpop.f32.mrb[15].mxu1  ;;  %4942 = vmatmul.mubr.bf16.vlgmr.msra.gmra.mrb[40].mxu0 %v4442_v28  ;;  %8707 = vmatprep.subr.bf16.mxu1 %v9270_v30  ;;  %v12641_v1 = vrot.slane %v4397_v18, %v10150_v22  ;;  %v4417_v49 = vcombine.high %v4397_v18, %v4397_v18  ;;  %v5094_v38 = vmul.f32 %v12705_v63, %v5093_v29  ;;  %v12739_v28 = vld [vmem:[%s13868_s0 + $0x60] sm:$0xff] }
 0x1aa   :  { %8724 = vmatpush3.bf16.msra.mxu0 %v9269_v5  ;;  %v5106_v30 = vmul.f32 %v12739_v28, %v5105_v33  ;;  %v9287_v5 = vld [vmem:[%s13871_s3 + $0x98c] sm:$0xff]   ;;  %v5085_v10 = vadd.f32 %v5083_v55, %v5079_v61  ;;  %v5089_v0 = vmul.f32 %v12769_v57, %v5087_v48  ;;  %v12780_v41 = vld [vmem:[%s13868_s0 + $0x80] sm:$0xff] }
 0x1ab   :  { %8725 = vmatprep.subr.bf16.mxu0 %v9272_v43  ;;  %v4432_v39 = vcombine.high %v12641_v1, %v12641_v1  ;;  %v12700_v54 = vrot.slane %v4417_v49, %v10150_v22  ;;  %v5096_v12 = vadd.f32 %v5094_v38, %v5090_v14  ;;  %v5123_v43 = vstv %s12678_s14  ;;  %v9291_v18 = vld [vmem:[%s13871_s3 + $0xa44] sm:$0xff]   ;;  %v9295_v38 = vld [vmem:[%s13871_s3 + $0xa0c] sm:$0xff]  }
 0x1ac   :  { %8708 = vmatpush3.bf16.msra.mxu1 %v9271_v36  ;;  %v9289_v36 = vld [vmem:[%s13871_s3 + $0x9fc] sm:$0xff]   ;;  %v5091_v34 = vadd.f32 %v5089_v0, %v5085_v10  ;;  %v5141_v14 = vstv %s12748_s10  ;;  %s13034_s10 = sld [smem:[#allocation2 + $0x318]] }
 0x1ad   :  { %8709 = vmatprep.subr.bf16.mxu1 %v9274_v37  ;;  %v4447_v46 = vpack.c.bf16 %v4432_v39, %v4432_v39  ;;  %v4433_v17 = vcombine.high %v12700_v54, %v12700_v54  ;;  %v5102_v35 = vadd.f32 %v5100_v3, %v5096_v12  ;;  %v5118_v37 = vmul.f32 %v12780_v41, %v5117_v42  ;;  %v12892_v0 = vld [vmem:[%s13868_s0 + $0x78] sm:$0xff] }
 0x1ae   :  { %8726 = vmatpush3.bf16.msra.mxu0 %v9273_v23  ;;  %v4444_v23 = vpack.c.bf16 %v12572_v44, %v12572_v44  ;;  %v12799_v44 = vld [vmem:[%s13868_s0 + $0x90] sm:$0xff]  ;;  %v5147_v12 = vstv %s12764_s17 }
 0x1af   :  { %8727 = vmatprep.subr.bf16.mxu0 %v9276_v52  ;;  %5021 = vmatprep.mubr.bf16.mxu0 %v4447_v46  ;;  %v5108_v50 = vadd.f32 %v5106_v30, %v5102_v35  ;;  %v4449_v48 = vpack.c.bf16 %v4433_v17, %v4433_v17  ;;  %v12879_v35 = vld [vmem:[%s13868_s0 + $0xc0] sm:$0xff] }
 0x1b0   :  { %8710 = vmatpush3.bf16.msra.mxu1 %v9275_v21 }
 0x1b1   :  { %8711 = vmatprep.subr.bf16.mxu1 %v9278_v13  ;;  %v5114_v21 = vadd.f32 %v5112_v53, %v5108_v50  ;;  %v9292_v13 = vld [vmem:[%s13871_s3 + $0xa04] sm:$0xff]   ;;  %v5142_v53 = vmul.f32 %v12879_v35, %v5141_v14 }
 0x1b2   :  { %8728 = vmatpush3.bf16.msra.mxu0 %v9277_v58  ;;  %v5124_v58 = vmul.f32 %v12799_v44, %v5123_v43 }
 0x1b3   :  { %8729 = vmatprep.subr.bf16.mxu0 %v9280_v20  ;;  %v9293_v20 = vld [vmem:[%s13871_s3 + $0xa5c] sm:$0xff]   ;;  %v5120_v46 = vadd.f32 %v5118_v37, %v5114_v21  ;;  %v12900_v37 = vld [vmem:[%s13868_s0 + $0xd0] sm:$0xff] }
 0x1b4   :  { %8712 = vmatpush3.bf16.msra.mxu1 %v9279_v15 }
 0x1b5   :  { %8713 = vmatprep.subr.bf16.mxu1 %v9282_v59  ;;  %v12821_v59 = vld [vmem:[%s13868_s0 + $0xa0] sm:$0xff]  ;;  %v5126_v3 = vadd.f32 %v5124_v58, %v5120_v46  ;;  %v9298_v58 = vld [vmem:[%s13871_s3 + $0xa98] sm:$0xff]  }
 0x1b6   :  { %8730 = vmatpush3.bf16.msra.mxu0 %v9281_v26  ;;  %v5130_v4 = vmul.f32 %v12821_v59, %v5129_v27  ;;  %v12939_v46 = vld [vmem:[%s13868_s0 + $0x98] sm:$0xff] }
 0x1b7   :  { %8731 = vmatprep.subr.bf16.mxu0 %v9284_v60  ;;  %v12833_v60 = vld [vmem:[%s13868_s0 + $0x48] sm:$0xff] }
 0x1b8   :  { %8714 = vmatpush3.bf16.msra.mxu1 %v9283_v7  ;;  %v5095_v7 = vmul.f32 %v12833_v60, %v5093_v29  ;;  %v12853_v29 = vld [vmem:[%s13868_s0 + $0x58] sm:$0xff]  ;;  %v5132_v17 = vadd.f32 %v5130_v4, %v5126_v3  ;;  %v5125_v4 = vmul.f32 %v12939_v46, %v5123_v43  ;;  %v12950_v3 = vld [vmem:[%s13868_s0 + $0xf0] sm:$0xff]  ;;  %v9301_v43 = vld [vmem:[%s13871_s3 + $0xaa0] sm:$0xff]  }
 0x1b9   :  { %8715 = vmatprep.subr.bf16.mxu1 %v9286_v32  ;;  %v12845_v32 = vld [vmem:[%s13868_s0 + $0xb0] sm:$0xff]  ;;  %v5101_v55 = vmul.f32 %v12853_v29, %v5099_v45  ;;  %v9296_v45 = vld [vmem:[%s13871_s3 + $0xa64] sm:$0xff]  }
 0x1ba   :  { %8732 = vmatpush3.bf16.msra.mxu0 %v9285_v31  ;;  %v5136_v61 = vmul.f32 %v12845_v32, %v5135_v9  ;;  %v9297_v31 = vld [vmem:[%s13871_s3 + $0xad8] sm:$0xff]   ;;  %v5097_v30 = vadd.f32 %v5095_v7, %v5091_v34  ;;  %v9299_v7 = vld [vmem:[%s13871_s3 + $0xa6c] sm:$0xff]  }
 0x1bb   :  { %8733 = vmatprep.subr.bf16.mxu0 %v9288_v6  ;;  %v12868_v6 = vld [vmem:[%s13868_s0 + $0x68] sm:$0xff] }
 0x1bc   :  { %8716 = vmatpush3.bf16.msra.mxu1 %v9287_v5  ;;  %v8497_v52 = vpop.f32.mrb[16].mxu0  ;;  %v5107_v5 = vmul.f32 %v12868_v6, %v5105_v33  ;;  %v5153_v33 = vstv %s12791_s13  ;;  %v5103_v10 = vadd.f32 %v5101_v55, %v5097_v30  ;;  %v5138_v50 = vadd.f32 %v5136_v61, %v5132_v17  ;;  %s13349_s13 = sld [smem:[#allocation2 + $0x38a]] }
 0x1bd   :  { %5029 = vmatprep.subr.bf16.mxu1 %v13945_v51  ;;  %v8498_v39 = vpop.f32.mrb[17].mxu0 }
 0x1be   :  { %8734 = vmatpush3.bf16.msra.mxu0 %v9289_v36  ;;  %v12816_v15 = vadd.f32 %v8498_v39, %v8497_v52  ;;  %v8500_v49 = vpop.f32.mrb[18].mxu0  ;;  %v5113_v36 = vmul.f32 %v12892_v0, %v5111_v25  ;;  %v5159_v25 = vstv %s12809_s25  ;;  %v12916_v52 = vld [vmem:[%s13868_s0 + $0x88] sm:$0xff]  ;;  %s13108_s25 = sld [smem:[#allocation5 + $0x6]] }
 0x1bf   :  { %4982 = vmatmul.mubr.bf16.vlgmr.msra.gmra.mrb[40].mxu1 %v4444_v23  ;;  %8735 = vmatprep.subr.bf16.mxu0 %v9291_v18  ;;  %v8501_v26 = vpop.f32.mrb[19].mxu0  ;;  %v5148_v23 = vmul.f32 %v12900_v37, %v5147_v12  ;;  %v4446_v18 = vpack.c.bf16 %v12641_v1, %v12641_v1  ;;  %v5144_v1 = vadd.f32 %v5142_v53, %v5138_v50  ;;  %v9302_v53 = vld [vmem:[%s13871_s3 + $0xa74] sm:$0xff]   ;;  %v12980_v50 = vld [vmem:[%s13868_s0 + $0x100] sm:$0xff] }
 0x1c0   :  { %5030 = vmatpush1.bf16.msra.mxu1 %v9290_v8  ;;  %7952 = vmatprep.mubr.msk.bf16.mxu1 %vm1101_vm0, %v4449_v48  ;;  %v5109_v8 = vadd.f32 %v5107_v5, %v5103_v10  ;;  %v5119_v48 = vmul.f32 %v12916_v52, %v5117_v42  ;;  %v9300_v42 = vld [vmem:[%s13871_s3 + $0xae0] sm:$0xff]   ;;  %v5160_v61 = vmul.f32 %v12950_v3, %v5159_v25  ;;  %v12963_v5 = vld [vmem:[%s13868_s0 + $0xa8] sm:$0xff] }
 0x1c1   :  { %5031 = vmatprep.subr.bf16.mxu1 %v13945_v51  ;;  %v9303_v10 = vld [vmem:[%s13871_s3 + $0xae8] sm:$0xff]  }
 0x1c2   :  { %8736 = vmatpush3.bf16.msra.mxu0 %v9292_v13  ;;  %v12927_v13 = vld [vmem:[%s13868_s0 + $0xe0] sm:$0xff]  ;;  %v5115_v49 = vadd.f32 %v5113_v36, %v5109_v8 }
 0x1c3   :  { %8737 = vmatprep.subr.bf16.mxu0 %v9294_v47  ;;  %v5154_v39 = vmul.f32 %v12927_v13, %v5153_v33 }
 0x1c4   :  { %5032 = vmatpush1.bf16.msra.mxu1 %v9293_v20  ;;  %v5165_v20 = vstv %s12811_s18  ;;  %v5121_v30 = vadd.f32 %v5119_v48, %v5115_v49  ;;  %v9304_v48 = vld [vmem:[%s13871_s3 + $0xaa8] sm:$0xff]   ;;  %v9305_v49 = vld [vmem:[%s13871_s3 + $0xa7c] sm:$0xff]  }
 0x1c5   :  { %5033 = vmatprep.subr.bf16.mxu1 %v13945_v51 }
 0x1c6   :  { %v8519_v21 = vpop.f32.mrb[16].mxu1  ;;  %8738 = vmatpush3.bf16.msra.mxu0 %v9295_v38  ;;  %v5150_v38 = vadd.f32 %v5148_v23, %v5144_v1  ;;  %v5127_v23 = vadd.f32 %v5125_v4, %v5121_v30  ;;  %v9306_v4 = vld [vmem:[%s13871_s3 + $0xaf0] sm:$0xff]  }
 0x1c7   :  { %v8520_v34 = vpop.f32.mrb[17].mxu1  ;;  %8745 = vmatprep.subr.bf16.mxu0 %v9297_v31  ;;  %v5171_v31 = vstv %s12863_s9 }
 0x1c8   :  { %v8521_v47 = vadd.f32 %v8520_v34, %v8519_v21  ;;  %v8522_v26 = vpop.f32.mrb[18].mxu1  ;;  %5034 = vmatpush1.bf16.msra.mxu1 %v9296_v45  ;;  %v5131_v45 = vmul.f32 %v12963_v5, %v5129_v27  ;;  %v5156_v36 = vadd.f32 %v5154_v39, %v5150_v38  ;;  %v5166_v27 = vmul.f32 %v12980_v50, %v5165_v20  ;;  %v13014_v34 = vld [vmem:[%s13868_s0 + $0xc8] sm:$0xff] }
 0x1c9   :  { %v8523_v55 = vpop.f32.mrb[19].mxu1  ;;  %5022 = vmatmul.mubr.bf16.vlgmr.msra.gmra.mrb[44].mxu0 %v4446_v18  ;;  %5035 = vmatprep.subr.bf16.mxu1 %v13945_v51  ;;  %v12991_v18 = vld [vmem:[%s13868_s0 + $0xb8] sm:$0xff]  ;;  %v13921_v39 = vstv %s12887_s22  ;;  %v13028_v26 = vld [vmem:[%s13868_s0 + $0x120] sm:$0xff] }
 0x1ca   :  { %v12969_v17 = vadd.f32 %v8521_v47, %v12816_v15  ;;  %8746 = vmatpush3.bf16.msra.mxu0 %v9298_v58  ;;  %v5177_v15 = vstv %s12884_s21  ;;  %v5137_v8 = vmul.f32 %v12991_v18, %v5135_v9  ;;  %v5162_v21 = vadd.f32 %v5160_v61, %v5156_v36  ;;  %v13002_v58 = vld [vmem:[%s13868_s0 + $0x110] sm:$0xff]  ;;  %v13039_v61 = vld [vmem:[%s13868_s0 + $0xd8] sm:$0xff]  ;;  %s13187_s21 = sld [smem:[#allocation2 + $0x384]] }
 0x1cb   :  { %8747 = vmatprep.subr.bf16.mxu0 %v9300_v42  ;;  %v5172_v1 = vmul.f32 %v13002_v58, %v5171_v31  ;;  %v5133_v9 = vadd.f32 %v5131_v45, %v5127_v23  ;;  %v5143_v42 = vmul.f32 %v13014_v34, %v5141_v14  ;;  %v5178_v14 = vmul.f32 %v13028_v26, %v5177_v15  ;;  %v13050_v45 = vld [vmem:[%s13868_s0 + $0x130] sm:$0xff] }
 0x1cc   :  { %5036 = vmatpush1.bf16.msra.mxu1 %v9299_v7  ;;  %v5168_v47 = vadd.f32 %v5166_v27, %v5162_v21  ;;  %v13920_v7 = vstv %s12905_s1  ;;  %v5149_v55 = vmul.f32 %v13039_v61, %v5147_v12  ;;  %v9309_v12 = vld [vmem:[%s13871_s3 + $0xaf8] sm:$0xff]   ;;  %v13063_v27 = vld [vmem:[%s13868_s0 + $0xe8] sm:$0xff] }
 0x1cd   :  { %5037 = vmatprep.subr.bf16.mxu1 %v13945_v51  ;;  %v5139_v38 = vadd.f32 %v5137_v8, %v5133_v9  ;;  %v5155_v23 = vmul.f32 %v13063_v27, %v5153_v33  ;;  %v9308_v8 = vld [vmem:[%s13871_s3 + $0xa84] sm:$0xff]   ;;  %v9314_v33 = vld [vmem:[%s13871_s3 + $0xa94] ss:$0 sps:$4 sm:$0x33]  }
 0x1ce   :  { %8748 = vmatpush3.bf16.msra.mxu0 %v9301_v43  ;;  %v9307_v43 = vld [vmem:[%s13871_s3 + $0xab0] sm:$0xff]   ;;  %v5174_v30 = vadd.f32 %v5172_v1, %v5168_v47  ;;  %v13074_v1 = vld [vmem:[%s13868_s0 + $0x140] sm:$0xff]  ;;  %v13088_v47 = vld [vmem:[%s13868_s0 + $0xf8] sm:$0xff] }
 0x1cf   :  { %8749 = vmatprep.subr.bf16.mxu0 %v9303_v10  ;;  %v5184_v10 = vmul.f32 %v13050_v45, %v13921_v39  ;;  %v5145_v36 = vadd.f32 %v5143_v42, %v5139_v38  ;;  %v5190_v9 = vmul.f32 %v13074_v1, %v13920_v7  ;;  %v13136_v39 = vld [vmem:[%s13868_s0 + $0x118] sm:$0xff] }
 0x1d0   :  { %5038 = vmatpush1.bf16.msra.mxu1 %v9302_v53  ;;  %v13919_v53 = vstv %s12911_s2  ;;  %v5180_v21 = vadd.f32 %v5178_v14, %v5174_v30  ;;  %v5161_v14 = vmul.f32 %v13088_v47, %v5159_v25  ;;  %v13923_v25 = vstv %s13009_s19  ;;  %14010 = vst [vmem:[#allocation22_spill] sm:$0xff] %v13136_v39 }
 0x1d1   :  { %5039 = vmatprep.subr.bf16.mxu1 %v13945_v51  ;;  %v5151_v42 = vadd.f32 %v5149_v55, %v5145_v36  ;;  %v13101_v55 = vld [vmem:[%s13868_s0 + $0x150] sm:$0xff] }
 0x1d2   :  { %8750 = vmatpush3.bf16.msra.mxu0 %v9304_v48  ;;  %v13922_v48 = vstv %s12986_s28  ;;  %v5186_v38 = vadd.f32 %v5184_v10, %v5180_v21  ;;  %14008 = vst [vmem:[#allocation20_spill] sm:$0xff] %v13101_v55  ;;  %v5196_v30 = vmul.f32 %v13101_v55, %v13919_v53  ;;  %v13113_v10 = vld [vmem:[%s13868_s0 + $0x108] sm:$0xff]  ;;  %v9312_v53 = vld [vmem:[%s13871_s3 + $0xb00] sm:$0xff]   ;;  %v4448_v55 = vpack.c.bf16 %v12700_v54, %v12700_v54  ;;  %v9320_v54 = vld [vmem:[%s13871_s3 + $0xad0] sm:$0xff]  }
 0x1d3   :  { %8751 = vmatprep.subr.bf16.mxu0 %v9306_v4  ;;  %v9310_v4 = vld [vmem:[%s13871_s3 + $0xab8] sm:$0xff]   ;;  %v5167_v36 = vmul.f32 %v13113_v10, %v5165_v20  ;;  %v9311_v21 = vld [vmem:[%s13871_s3 + $0xa8c] sm:$0xff]   ;;  %v13170_v20 = vld [vmem:[%s13868_s0 + $0x180] sm:$0xff] }
 0x1d4   :  { %5040 = vmatpush1.bf16.msra.mxu1 %v9305_v49  ;;  %v5157_v49 = vadd.f32 %v5155_v23, %v5151_v42  ;;  %v5192_v7 = vadd.f32 %v5190_v9, %v5186_v38  ;;  %v13127_v23 = vld [vmem:[%s13868_s0 + $0x160] sm:$0xff]  ;;  %v5173_v9 = vmul.f32 %v13136_v39, %v5171_v31  ;;  %v4907_v31 = vsel %vm1105_vm1, %v9314_v33, 0  ;;  %14013 = vst [vmem:[#allocation12_spill] sm:$0xff] %v13170_v20 }
 0x1d5   :  { %5041 = vmatprep.subr.bf16.mxu1 %v13945_v51  ;;  %14009 = vst [vmem:[#allocation21_spill] sm:$0xff] %v13127_v23  ;;  %v5202_v42 = vmul.f32 %v13127_v23, %v13922_v48  ;;  %v9313_v38 = vld [vmem:[%s13871_s3 + $0xac0] sm:$0xff]   ;;  %v14014_v33 = vstv %s13034_s10 }
 0x1d6   :  { %8752 = vmatpush3.bf16.msra.mxu0 %v9307_v43  ;;  %v5163_v43 = vadd.f32 %v5161_v14, %v5157_v49  ;;  %v13149_v14 = vld [vmem:[%s13868_s0 + $0x170] sm:$0xff] }
 0x1d7   :  { %8753 = vmatprep.subr.bf16.mxu0 %v9309_v12  ;;  %v5198_v12 = vadd.f32 %v5196_v30, %v5192_v7  ;;  %14011 = vst [vmem:[#allocation11_spill] sm:$0xff] %v13149_v14  ;;  %v5208_v49 = vmul.f32 %v13149_v14, %v13923_v25  ;;  %v13162_v30 = vld [vmem:[%s13868_s0 + $0x128] sm:$0xff]  ;;  %v5214_v14 = vmul.f32 %v13170_v20, %v14014_v33  ;;  %v9317_v33 = vld [vmem:[%s13871_s3 + $0xb58] sm:$0xff]  }
 0x1d8   :  { %5042 = vmatpush1.bf16.msra.mxu1 %v9308_v8  ;;  %v9315_v8 = vld [vmem:[%s13871_s3 + $0xb08] sm:$0xff]   ;;  %v5169_v7 = vadd.f32 %v5167_v36, %v5163_v43  ;;  %14012 = vst [vmem:[#allocation15_spill] sm:$0xff] %v13162_v30  ;;  %v5179_v48 = vmul.f32 %v13162_v30, %v5177_v15  ;;  %v13180_v15 = vld [vmem:[%s13868_s0 + $0x138] sm:$0xff]  ;;  %v5895_v43 = vstv %s13079_s26  ;;  %s13440_s26 = sld [smem:[#allocation2 + $0x392]] }
 0x1d9   :  { %5043 = vmatprep.subr.bf16.mxu1 %v13945_v51  ;;  %v5204_v25 = vadd.f32 %v5202_v42, %v5198_v12  ;;  %14015 = vst [vmem:[#allocation17_spill] sm:$0xff] %v13180_v15  ;;  %v14017_v12 = vstv %s12905_s1  ;;  %s13520_s1 = sld [smem:[#allocation2 + $0x397]] }
 0x1da   :  { %8754 = vmatpush3.bf16.msra.mxu0 %v9310_v4  ;;  %v5175_v36 = vadd.f32 %v5173_v9, %v5169_v7  ;;  %v14016_v4 = vstv %s12887_s22  ;;  %s13259_s22 = sld [smem:[#allocation2 + $0x385]] }
 0x1db   :  { %8755 = vmatprep.subr.bf16.mxu0 %v9312_v53  ;;  %v5185_v42 = vmul.f32 %v13180_v15, %v14016_v4  ;;  %v9316_v53 = vld [vmem:[%s13871_s3 + $0xac8] sm:$0xff]   ;;  %v5210_v9 = vadd.f32 %v5208_v49, %v5204_v25  ;;  %v9318_v49 = vld [vmem:[%s13871_s3 + $0xb18] sm:$0xff]  }
 0x1dc   :  { %v8541_v30 = vpop.f32.mrb[20].mxu0  ;;  %5044 = vmatpush1.bf16.msra.mxu1 %v9311_v21  ;;  %v5181_v20 = vadd.f32 %v5179_v48, %v5175_v36  ;;  %v13200_v21 = vld [vmem:[%s13868_s0 + $0x148] sm:$0xff]  ;;  %v5896_v48 = vmul.f32 %v12595_v2, %v5895_v43  ;;  %v14018_v36 = vstv %s13093_s24  ;;  %v14019_v2 = vstv %s12911_s2 }
 0x1dd   :  { %v8542_v7 = vpop.f32.mrb[21].mxu0  ;;  %5045 = vmatprep.subr.bf16.mxu1 %v13945_v51  ;;  %v5191_v15 = vmul.f32 %v13200_v21, %v14017_v12  ;;  %v5216_v23 = vadd.f32 %v5214_v14, %v5210_v9  ;;  %v5900_v39 = vmul.f32 %v12603_v62, %v14018_v36  ;;  %v13220_v14 = vld [vmem:[%s13868_s0 + $0x158] sm:$0xff]  ;;  %v13931_v62 = vstv %s13141_s27 }
 0x1de   :  { %v8543_v25 = vadd.f32 %v8542_v7, %v8541_v30  ;;  %8756 = vmatpush3.bf16.msra.mxu0 %v9313_v38  ;;  %v8544_v4 = vpop.f32.mrb[22].mxu0  ;;  %v9319_v38 = vld [vmem:[%s13871_s3 + $0xb10] sm:$0xff]   ;;  %v5187_v12 = vadd.f32 %v5185_v42, %v5181_v20  ;;  %v5197_v9 = vmul.f32 %v13220_v14, %v14019_v2  ;;  %v9321_v20 = vld [vmem:[%s13871_s3 + $0xb60] sm:$0xff]   ;;  %v14022_v36 = vstv %s12986_s28  ;;  %v13253_v2 = vld [vmem:[%s13868_s0 + $0x178] sm:$0xff]  ;;  %s13438_s28 = sld [smem:[#allocation2 + $0x391]] }
 0x1df   :  { %8757 = vmatprep.subr.bf16.mxu0 %v9315_v8  ;;  %v8545_v30 = vpop.f32.mrb[23].mxu0  ;;  %v14020_v8 = vstv %s13108_s25  ;;  %14023 = vst [vmem:[#allocation13_spill] sm:$0xff] %v13253_v2 }
 0x1e0   :  { %5046 = vmatpush1.bf16.msra.mxu1 %v4907_v31  ;;  %v5220_v7 = vadd.f32 %v14020_v8, %v5216_v23  ;;  %v2552_v4 = vadd.f32 %v8543_v25, %v12969_v17  ;;  %v5193_v42 = vadd.f32 %v5191_v15, %v5187_v12  ;;  %v13238_v31 = vld [vmem:[%s13868_s0 + $0x168] sm:$0xff]  ;;  %v9323_v17 = vld [vmem:[%s13871_s3 + $0xbd8] sm:$0xff]   ;;  %v5902_v25 = vadd.f32 %v5900_v39, %v5896_v48 }
 0x1e1   :  { %8767 = vmatprep.subr.bf16.mxu1 %v9317_v33  ;;  %14021 = vst [vmem:[#allocation19_spill] sm:$0xff] %v13238_v31  ;;  %v5203_v30 = vmul.f32 %v13238_v31, %v14022_v36  ;;  %v5906_v15 = vmul.f32 %v12628_v40, %v13931_v62  ;;  %v9322_v40 = vld [vmem:[%s13871_s3 + $0xb20] sm:$0xff]   ;;  %v13270_v48 = vld [vmem:[%s13868_s0 + $0x188] sm:$0xff]  ;;  %v9568_v62 = vld [vmem:[%s13868_s0 + $0x18] sm:$0xff]  ;;  %v14027_v36 = vstv %s13093_s24 }
 0x1e2   :  { %8758 = vmatpush3.bf16.msra.mxu0 %v9316_v53  ;;  %v5231_v23 = vrot.slane %v5220_v7, %v10150_v22  ;;  %v5224_v33 = vcombine.high %v5220_v7, %v5220_v7  ;;  %v5199_v12 = vadd.f32 %v5197_v9, %v5193_v42  ;;  %v14024_v53 = vstv %s13009_s19  ;;  %14025 = vst [vmem:[#allocation14_spill] sm:$0xff] %v13270_v48  ;;  %s13524_s19 = sld [smem:[#allocation2 + $0x398]] }
 0x1e3   :  { %5062 = vmatmul.mubr.bf16.vlgmr.msra.gmra.mrb[44].mxu1 %v4448_v55  ;;  %8759 = vmatprep.subr.bf16.mxu0 %v9319_v38  ;;  %v5209_v8 = vmul.f32 %v13253_v2, %v14024_v53  ;;  %v14026_v38 = vstv %s13034_s10  ;;  %v5901_v2 = vmul.f32 %v9568_v62, %v14027_v36  ;;  %v5917_v62 = vstv %s13187_s21  ;;  %s13411_s10 = sld [smem:[#allocation2 + $0x38f]] }
 0x1e4   :  { %8768 = vmatpush3.bf16.msra.mxu1 %v9318_v49  ;;  %v5239_v39 = vcombine.high %v5231_v23, %v5231_v23  ;;  %v13265_v55 = vrot.slane %v5224_v33, %v10150_v22  ;;  %v5215_v9 = vmul.f32 %v13270_v48, %v14026_v38  ;;  %v5266_v7 = vpack.c.bf16 %v5231_v23, %v5231_v23  ;;  %v9325_v49 = vld [vmem:[%s13871_s3 + $0xb68] sm:$0xff]   ;;  %v9324_v23 = vld [vmem:[%s13871_s3 + $0xb98] sm:$0xff]  }
 0x1e5   :  { %8769 = vmatprep.subr.bf16.mxu1 %v9321_v20  ;;  %v5205_v42 = vadd.f32 %v5203_v30, %v5199_v12  ;;  %v9567_v33 = vld [vmem:[%s13868_s0 + $0x8] sm:$0xff]  ;;  %v5908_v12 = vadd.f32 %v5906_v15, %v5902_v25  ;;  %v14028_v38 = vstv %s13175_s16  ;;  %s13360_s0 = sld [smem:[#allocation2 + $0x38b]] }
 0x1e6   :  { %v5897_v53 = vmul.f32 %v9567_v33, %v5895_v43  ;;  %8760 = vmatpush3.bf16.msra.mxu0 %v9320_v54  ;;  %v5267_v20 = vpack.c.bf16 %v5239_v39, %v5239_v39  ;;  %v5240_v30 = vcombine.high %v13265_v55, %v13265_v55  ;;  %v5912_v48 = vmul.f32 %v12658_v56, %v14028_v38  ;;  %v9327_v43 = vld [vmem:[%s13871_s3 + $0xbe0] sm:$0xff]   ;;  %v9326_v54 = vld [vmem:[%s13871_s3 + $0xb28] sm:$0xff]  }
 0x1e7   :  { %8789 = vmatprep.subr.bf16.mxu0 %v9323_v17  ;;  %v5211_v33 = vadd.f32 %v5209_v8, %v5205_v42  ;;  %v9328_v56 = vld [vmem:[%s13871_s3 + $0xba0] sm:$0xff]   ;;  %v9329_v17 = vld [vmem:[%s13871_s3 + $0xb70] sm:$0xff]   ;;  %v5918_v39 = vmul.f32 %v12705_v63, %v5917_v62  ;;  %v14030_v38 = vstv %s13141_s27  ;;  %v9332_v63 = vld [vmem:[%s13871_s3 + $0xba8] sm:$0xff]  }
 0x1e8   :  { %8770 = vmatpush3.bf16.msra.mxu1 %v9322_v40  ;;  %5765 = vmatprep.mubr.bf16.mxu0 %v5267_v20  ;;  %v5269_v36 = vpack.c.bf16 %v5240_v30, %v5240_v30  ;;  %v9330_v8 = vld [vmem:[%s13871_s3 + $0xb30] sm:$0xff]   ;;  %v5914_v40 = vadd.f32 %v5912_v48, %v5908_v12  ;;  %v9331_v20 = vld [vmem:[%s13871_s3 + $0xbe8] sm:$0xff]   ;;  %v14029_v30 = vstv %s13108_s25  ;;  %s13395_s25 = sld [smem:[#allocation2 + $0x38e]] }
 0x1e9   :  { %5766 = vmatmul.mubr.bf16.vlgmr.msra.gmra.mrb[48].mxu0 %v5266_v7  ;;  %8771 = vmatprep.subr.bf16.mxu1 %v9325_v49  ;;  %v5217_v25 = vadd.f32 %v5215_v9, %v5211_v33  ;;  %v5903_v7 = vadd.f32 %v5901_v2, %v5897_v53  ;;  %v5907_v33 = vmul.f32 %v12728_v19, %v14030_v38  ;;  %v9335_v19 = vld [vmem:[%s13871_s3 + $0xbf0] sm:$0xff]   ;;  %v9341_v38 = vld [vmem:[%s13871_s3 + $0xb88] sm:$0xff]  }
 0x1ea   :  { %v2591_v15 = vpop.f32.mrb[20].mxu1  ;;  %8790 = vmatpush3.bf16.msra.mxu0 %v9324_v23  ;;  %5805 = vmatprep.mubr.bf16.mxu1 %v5269_v36  ;;  %v5923_v23 = vstv %s13259_s22  ;;  %s13338_s22 = sld [smem:[#allocation2 + $0x386]]  ;;  %v5920_v53 = vadd.f32 %v5918_v39, %v5914_v40  ;;  %v5919_v39 = vmul.f32 %v12833_v60, %v5917_v62  ;;  %v5947_v62 = vstv %s13347_s20  ;;  %s13481_s20 = sld [smem:[#allocation2 + $0x394]] }
 0x1eb   :  { %v2592_v49 = vadd.f32 %v2591_v15, %v2552_v4  ;;  %v2593_v42 = vpop.f32.mrb[21].mxu1  ;;  %8791 = vmatprep.subr.bf16.mxu0 %v9327_v43  ;;  %v13316_v9 = vadd.f32 %v14029_v30, %v5217_v25  ;;  %v9333_v4 = vld [vmem:[%s13871_s3 + $0xb78] sm:$0xff]   ;;  %v5924_v12 = vmul.f32 %v12713_v11, %v5923_v23  ;;  %v5909_v43 = vadd.f32 %v5907_v33, %v5903_v7  ;;  %v9338_v7 = vld [vmem:[%s13871_s3 + $0xb40] sm:$0xff]  }
 0x1ec   :  { %v2594_v31 = vpop.f32.mrb[22].mxu1  ;;  %8772 = vmatpush3.bf16.msra.mxu1 %v9326_v54  ;;  %v14031_v54 = vstv %s13175_s16  ;;  %v9334_v11 = vld [vmem:[%s13871_s3 + $0xb38] sm:$0xff]   ;;  %v5941_v30 = vstv %s13343_s29  ;;  %s13423_s16 = sld [smem:[#allocation2 + $0x390]] }
 0x1ed   :  { %v13329_v2 = vadd.f32 %v2592_v49, %v12608_v16  ;;  %v2595_v48 = vpop.f32.mrb[23].mxu1  ;;  %8773 = vmatprep.subr.bf16.mxu1 %v9329_v17  ;;  %v13336_v31 = vrot.slane %v13316_v9, %v10150_v22  ;;  %v5913_v36 = vmul.f32 %v12769_v57, %v14031_v54  ;;  %v9336_v57 = vld [vmem:[%s13871_s3 + $0xbb0] sm:$0xff]   ;;  %v5926_v25 = vadd.f32 %v5924_v12, %v5920_v53  ;;  %v9339_v15 = vld [vmem:[%s13871_s3 + $0xbf8] sm:$0xff]  }
 0x1ee   :  { %8792 = vmatpush3.bf16.msra.mxu0 %v9328_v56  ;;  %v9337_v56 = vld [vmem:[%s13871_s3 + $0xb80] sm:$0xff]   ;;  %v5241_v49 = vcombine.high %v13316_v9, %v13316_v9  ;;  %v9340_v9 = vld [vmem:[%s13871_s3 + $0xbb8] sm:$0xff]   ;;  %v5942_v33 = vmul.f32 %v12780_v41, %v5941_v30  ;;  %v5925_v48 = vmul.f32 %v12853_v29, %v5923_v23  ;;  %v5948_v12 = vmul.f32 %v12799_v44, %v5947_v62  ;;  %v9347_v44 = vld [vmem:[%s13871_s3 + $0xc08] sm:$0xff]  }
 0x1ef   :  { %8793 = vmatprep.subr.bf16.mxu0 %v9331_v20  ;;  %v5256_v16 = vcombine.high %v13336_v31, %v13336_v31  ;;  %v5915_v40 = vadd.f32 %v5913_v36, %v5909_v43  ;;  %v5935_v20 = vstv %s13341_s11  ;;  %v5959_v43 = vstv %s13360_s0  ;;  %v9344_v29 = vld [vmem:[%s13871_s3 + $0xbc0] sm:$0xff]   ;;  %s13466_s11 = sld [smem:[#allocation2 + $0x393]]  ;;  %s13512_s0 = sld [smem:[#allocation2 + $0x396]] }
 0x1f0   :  { %8774 = vmatpush3.bf16.msra.mxu1 %v9330_v8  ;;  %v5929_v8 = vstv %s13338_s22  ;;  %v5936_v60 = vmul.f32 %v12758_v24, %v5935_v20  ;;  %v13402_v41 = vrot.slane %v5241_v49, %v10150_v22  ;;  %v5965_v36 = vstv %s13369_s8 }
 0x1f1   :  { %8775 = vmatprep.subr.bf16.mxu1 %v9333_v4  ;;  %v5271_v17 = vpack.c.bf16 %v5256_v16, %v5256_v16  ;;  %v5930_v42 = vmul.f32 %v12739_v28, %v5929_v8  ;;  %v5953_v4 = vstv %s13349_s13  ;;  %v5921_v24 = vadd.f32 %v5919_v39, %v5915_v40  ;;  %v9345_v16 = vld [vmem:[%s13871_s3 + $0xb90] sm:$0xff]   ;;  %s13497_s13 = sld [smem:[#allocation2 + $0x395]] }
 0x1f2   :  { %8794 = vmatpush3.bf16.msra.mxu0 %v9332_v63  ;;  %v9343_v63 = vld [vmem:[%s13871_s3 + $0xc00] sm:$0xff]   ;;  %v5954_v54 = vmul.f32 %v12821_v59, %v5953_v4  ;;  %v5257_v59 = vcombine.high %v13402_v41, %v13402_v41  ;;  %v5971_v40 = vstv %s13385_s23  ;;  %v5268_v39 = vpack.c.bf16 %v13265_v55, %v13265_v55 }
 0x1f3   :  { %8795 = vmatprep.subr.bf16.mxu0 %v9335_v19  ;;  %5845 = vmatprep.mubr.bf16.mxu0 %v5271_v17  ;;  %v5932_v28 = vadd.f32 %v5930_v42, %v5926_v25  ;;  %v9342_v19 = vld [vmem:[%s13871_s3 + $0xb48] sm:$0xff]   ;;  %v9346_v17 = vld [vmem:[%s13871_s3 + $0xb50] sm:$0xff]  }
 0x1f4   :  { %8776 = vmatpush3.bf16.msra.mxu1 %v9334_v11  ;;  %v5927_v11 = vadd.f32 %v5925_v48, %v5921_v24  ;;  %v9351_v24 = vld [vmem:[%s13871_s3 + $0xbd0] sm:$0xff]  }
 0x1f5   :  { %8777 = vmatprep.subr.bf16.mxu1 %v9337_v56  ;;  %v5938_v53 = vadd.f32 %v5936_v60, %v5932_v28  ;;  %v5931_v56 = vmul.f32 %v12868_v6, %v5929_v8  ;;  %v9348_v6 = vld [vmem:[%s13871_s3 + $0xbc8] sm:$0xff]   ;;  %v9350_v60 = vld [vmem:[%s13871_s3 + $0xc10] sm:$0xff]  }
 0x1f6   :  { %8796 = vmatpush3.bf16.msra.mxu0 %v9336_v57 }
 0x1f7   :  { %8797 = vmatprep.subr.bf16.mxu0 %v9339_v15  ;;  %v5944_v23 = vadd.f32 %v5942_v33, %v5938_v53  ;;  %v5960_v15 = vmul.f32 %v12845_v32, %v5959_v43  ;;  %v9349_v32 = vld [vmem:[%s13871_s3 + $0xc18] sm:$0xff]   ;;  %v5933_v28 = vadd.f32 %v5931_v56, %v5927_v11  ;;  %v5937_v33 = vmul.f32 %v12892_v0, %v5935_v20  ;;  %v9352_v20 = vld [vmem:[%s13871_s3 + $0xc20] sm:$0xff]  }
 0x1f8   :  { %8778 = vmatpush3.bf16.msra.mxu1 %v9338_v7  ;;  %v5983_v53 = vstv %s13411_s10  ;;  %v9356_v11 = vld [vmem:[%s13871_s3 + $0xca4] sm:$0xff]  }
 0x1f9   :  { %8779 = vmatprep.subr.bf16.mxu1 %v9341_v38  ;;  %v5950_v25 = vadd.f32 %v5948_v12, %v5944_v23  ;;  %v5966_v38 = vmul.f32 %v12879_v35, %v5965_v36  ;;  %v5273_v35 = vpack.c.bf16 %v5257_v59, %v5257_v59  ;;  %v5939_v0 = vadd.f32 %v5937_v33, %v5933_v28 }
 0x1fa   :  { %8798 = vmatpush3.bf16.msra.mxu0 %v9340_v9  ;;  %v5977_v9 = vstv %s13395_s25  ;;  %v5984_v23 = vmul.f32 %v12950_v3, %v5983_v53  ;;  %v9355_v3 = vld [vmem:[%s13871_s3 + $0xc28] sm:$0xff]   ;;  %v6019_v28 = vstv %s13497_s13 }
 0x1fb   :  { %8799 = vmatprep.subr.bf16.mxu0 %v9343_v63  ;;  %v5956_v42 = vadd.f32 %v5954_v54, %v5950_v25  ;;  %v5943_v63 = vmul.f32 %v12916_v52, %v5941_v30  ;;  %v5949_v52 = vmul.f32 %v12939_v46, %v5947_v62  ;;  %v5978_v12 = vmul.f32 %v12927_v13, %v5977_v9 }
 0x1fc   :  { %8780 = vmatpush3.bf16.msra.mxu1 %v9342_v19  ;;  %v8563_v57 = vpop.f32.mrb[24].mxu0  ;;  %v5972_v19 = vmul.f32 %v12900_v37, %v5971_v40  ;;  %v9353_v37 = vld [vmem:[%s13871_s3 + $0xc9c] sm:$0xff]   ;;  %v5955_v62 = vmul.f32 %v12963_v5, %v5953_v4  ;;  %v5270_v54 = vpack.c.bf16 %v13336_v31, %v13336_v31  ;;  %v5995_v5 = vstv %s13438_s28 }
 0x1fd   :  { %8781 = vmatprep.subr.bf16.mxu1 %v9345_v16  ;;  %v8564_v8 = vpop.f32.mrb[25].mxu0  ;;  %v5962_v48 = vadd.f32 %v5960_v15, %v5956_v42  ;;  %v5989_v16 = vstv %s13423_s16  ;;  %v5945_v46 = vadd.f32 %v5943_v63, %v5939_v0  ;;  %v5996_v59 = vmul.f32 %v13002_v58, %v5995_v5  ;;  %v9357_v58 = vld [vmem:[%s13871_s3 + $0xc64] sm:$0xff]   ;;  %v9360_v63 = vld [vmem:[%s13871_s3 + $0xc6c] sm:$0xff]  }
 0x1fe   :  { %8800 = vmatpush3.bf16.msra.mxu0 %v9344_v29  ;;  %v13447_v7 = vadd.f32 %v8564_v8, %v8563_v57  ;;  %v8566_v49 = vpop.f32.mrb[26].mxu0  ;;  %v9354_v29 = vld [vmem:[%s13871_s3 + $0xc5c] sm:$0xff]   ;;  %v5990_v31 = vmul.f32 %v12980_v50, %v5989_v16  ;;  %v6007_v50 = vstv %s13466_s11  ;;  %v5973_v15 = vmul.f32 %v13039_v61, %v5971_v40  ;;  %v14032_v0 = vld [vmem:[#allocation20_spill] sm:$0xff] }
 0x1ff   :  { %8801 = vmatprep.subr.bf16.mxu0 %v9347_v44  ;;  %v8567_v55 = vpop.f32.mrb[27].mxu0  ;;  %v5968_v30 = vadd.f32 %v5966_v38, %v5962_v48  ;;  %v5951_v4 = vadd.f32 %v5949_v52, %v5945_v46  ;;  %v5961_v44 = vmul.f32 %v12991_v18, %v5959_v43  ;;  %v5967_v43 = vmul.f32 %v13014_v34, %v5965_v36 }
 0x200   :  { %8782 = vmatpush3.bf16.msra.mxu1 %v9346_v17  ;;  %v6001_v17 = vstv %s13440_s26  ;;  %v5979_v40 = vmul.f32 %v13063_v27, %v5977_v9  ;;  %v5985_v27 = vmul.f32 %v13088_v47, %v5983_v53  ;;  %v6025_v48 = vstv %s13512_s0 }
 0x201   :  { %5853 = vmatprep.subr.bf16.mxu1 %v13945_v51  ;;  %v5974_v13 = vadd.f32 %v5972_v19, %v5968_v30  ;;  %v5957_v18 = vadd.f32 %v5955_v62, %v5951_v4  ;;  %v9361_v19 = vld [vmem:[%s13871_s3 + $0xc38] sm:$0xff]   ;;  %v6031_v52 = vstv %s13520_s1  ;;  %s9628_s1 = smov [#allocation7]  }
 0x202   :  { %8802 = vmatpush3.bf16.msra.mxu0 %v9348_v6  ;;  %v6002_v6 = vmul.f32 %v13028_v26, %v6001_v17  ;;  %v9358_v26 = vld [vmem:[%s13871_s3 + $0xc30] sm:$0xff]   ;;  %v9365_v62 = vld [vmem:[%s13871_s3 + $0xcbc] sm:$0xff]  }
 0x203   :  { %5806 = vmatmul.mubr.bf16.vlgmr.msra.gmra.mrb[48].mxu1 %v5268_v39  ;;  %8803 = vmatprep.subr.bf16.mxu0 %v9350_v60  ;;  %v5980_v56 = vadd.f32 %v5978_v12, %v5974_v13  ;;  %v5963_v25 = vadd.f32 %v5961_v44, %v5957_v18  ;;  %v9359_v39 = vld [vmem:[%s13871_s3 + $0xcac] sm:$0xff]   ;;  %v6008_v60 = vmul.f32 %v13050_v45, %v6007_v50  ;;  %v14036_v44 = vld [vmem:[#allocation11_spill] sm:$0xff] }
 0x204   :  { %5854 = vmatpush1.bf16.msra.mxu1 %v9349_v32  ;;  %8149 = vmatprep.mubr.msk.bf16.mxu1 %vm1101_vm0, %v5273_v35  ;;  %v6013_v32 = vstv %s13481_s20  ;;  %v9362_v35 = vld [vmem:[%s13871_s3 + $0xcb4] sm:$0xff]   ;;  %s13571_s20 = sld [smem:[#allocation5 + $0x7]]  ;;  %v9366_v18 = vld [vmem:[%s13871_s3 + $0xc7c] sm:$0xff]  }
 0x205   :  { %5855 = vmatprep.subr.bf16.mxu1 %v13945_v51  ;;  %v5986_v57 = vadd.f32 %v5984_v23, %v5980_v56  ;;  %v5969_v61 = vadd.f32 %v5967_v43, %v5963_v25  ;;  %v6014_v45 = vmul.f32 %v13074_v1, %v6013_v32  ;;  %v6020_v1 = vmul.f32 %v14032_v0, %v6019_v28  ;;  %v14035_v23 = vld [vmem:[#allocation15_spill] sm:$0xff]  ;;  %v14037_v56 = vld [vmem:[#allocation17_spill] sm:$0xff]  ;;  %v14038_v43 = vld [vmem:[#allocation12_spill] sm:$0xff] }
 0x206   :  { %8804 = vmatpush3.bf16.msra.mxu0 %v9351_v24 }
 0x207   :  { %8811 = vmatprep.subr.bf16.mxu0 %v9353_v37  ;;  %v5992_v36 = vadd.f32 %v5990_v31, %v5986_v57  ;;  %v5975_v33 = vadd.f32 %v5973_v15, %v5969_v61  ;;  %v14033_v37 = vld [vmem:[#allocation22_spill] sm:$0xff]  ;;  %v6009_v31 = vmul.f32 %v14037_v56, %v6007_v50  ;;  %v6015_v15 = vmul.f32 %v13200_v21, %v6013_v32  ;;  %v9367_v50 = vld [vmem:[%s13871_s3 + $0xc48] sm:$0xff]  }
 0x208   :  { %5856 = vmatpush1.bf16.msra.mxu1 %v9352_v20  ;;  %v5997_v30 = vmul.f32 %v14033_v37, %v5995_v5  ;;  %v9364_v5 = vld [vmem:[%s13871_s3 + $0xc40] sm:$0xff]   ;;  %v9371_v21 = vld [vmem:[%s13871_s3 + $0xccc] sm:$0xff]  }
 0x209   :  { %5846 = vmatmul.mubr.bf16.vlgmr.msra.gmra.mrb[52].mxu0 %v5270_v54  ;;  %5857 = vmatprep.subr.bf16.mxu1 %v13945_v51  ;;  %v5998_v38 = vadd.f32 %v5996_v59, %v5992_v36  ;;  %v5981_v47 = vadd.f32 %v5979_v40, %v5975_v33  ;;  %v6003_v54 = vmul.f32 %v14035_v23, %v6001_v17  ;;  %v9368_v59 = vld [vmem:[%s13871_s3 + $0xcc4] sm:$0xff]  }
 0x20a   :  { %v8585_v34 = vpop.f32.mrb[24].mxu1  ;;  %8812 = vmatpush3.bf16.msra.mxu0 %v9354_v29  ;;  %v6037_v29 = vstv %s13524_s19  ;;  %v14039_v61 = vld [vmem:[#allocation19_spill] sm:$0xff]  ;;  %s6828_s19 = sshll.u32 %s9628_s1, 4  ;;  %s6829_s19 = int_to_ptr.vmem [resolvable:$true] %s6828_s19 }
 0x20b   :  { %v8586_v8 = vpop.f32.mrb[25].mxu1  ;;  %8813 = vmatprep.subr.bf16.mxu0 %v9356_v11  ;;  %v6004_v24 = vadd.f32 %v6002_v6, %v5998_v38  ;;  %v5987_v20 = vadd.f32 %v5985_v27, %v5981_v47  ;;  %v6038_v57 = vmul.f32 %v14038_v43, %v6037_v29  ;;  %v6021_v6 = vmul.f32 %v13220_v14, %v6019_v28  ;;  %v9370_v14 = vld [vmem:[%s13871_s3 + $0xc50] sm:$0xff]   ;;  %v9373_v38 = vld [vmem:[%s13871_s3 + $0xc58] ss:$0 sps:$4 sm:$0x33]   ;;  %v9380_v23 = vld [vmem:[%s13871_s3 + $0xd24] sm:$0xff]   ;;  %p9598_p11 = scmp.lt.s32.totalorder %s6829_s19, %s6829_s19 }
 0x20c   :  { %v8587_v49 = vadd.f32 %v8586_v8, %v8585_v34  ;;  %v8588_v42 = vpop.f32.mrb[26].mxu1  ;;  %5858 = vmatpush1.bf16.msra.mxu1 %v9355_v3  ;;  %v6032_v3 = vmul.f32 %v14036_v44, %v6031_v52  ;;  %v9369_v8 = vld [vmem:[%s13871_s3 + $0xc84] sm:$0xff]   ;;  %v6027_v40 = vmul.f32 %v14039_v61, %v6025_v48  ;;  %v9372_v27 = vld [vmem:[%s13871_s3 + $0xc8c] sm:$0xff]   ;;  %v9388_v43 = vld [vmem:[%s13871_s3 + $0xd34] sm:$0xff]   ;;  %s9593_s8 = scalar_lea.vmem %s6829_s19, 32 }
 0x20d   :  { %v8589_v55 = vpop.f32.mrb[27].mxu1  ;;  %5859 = vmatprep.subr.bf16.mxu1 %v13945_v51  ;;  %v6010_v53 = vadd.f32 %v6008_v60, %v6004_v24  ;;  %v9381_v44 = vld [vmem:[%s13871_s3 + $0xce4] sm:$0xff]   ;;  %v9395_v61 = vld [vmem:[%s13871_s3 + $0xd7c] sm:$0xff]   ;;  %p9594_p10 = scmp.ne.s32.totalorder %s6829_s19, %s9593_s8  ;;  %p9599_p12 = scmp.lt.s32.totalorder %s9593_s8, %s9593_s8 }
 0x20e   :  { %v13552_v9 = vadd.f32 %v8587_v49, %v13447_v7  ;;  %8814 = vmatpush3.bf16.msra.mxu0 %v9357_v58  ;;  %v5991_v7 = vmul.f32 %v13113_v10, %v5989_v16  ;;  %v9363_v10 = vld [vmem:[%s13871_s3 + $0xc74] sm:$0xff]   ;;  %v6043_v58 = vstv %s13571_s20  ;;  %v9383_v56 = vld [vmem:[%s13871_s3 + $0xd64] sm:$0xff]  }
 0x20f   :  { %8815 = vmatprep.subr.bf16.mxu0 %v9359_v39  ;;  %v6016_v12 = vadd.f32 %v6014_v45, %v6010_v53  ;;  %v14034_v16 = vld [vmem:[#allocation21_spill] sm:$0xff]  ;;  %p9600_p13 = por %p9599_p12, %p9598_p11 }
 0x210   :  { %5860 = vmatpush1.bf16.msra.mxu1 %v9358_v26  ;;  %v6026_v46 = vmul.f32 %v14034_v16, %v6025_v48  ;;  %v5993_v13 = vadd.f32 %v5991_v7, %v5987_v20  ;;  %v14040_v55 = vld [vmem:[#allocation13_spill] sm:$0xff]  ;;  %v14041_v7 = vld [vmem:[#allocation14_spill] sm:$0xff] }
 0x211   :  { %5861 = vmatprep.subr.bf16.mxu1 %v13945_v51  ;;  %v6022_v4 = vadd.f32 %v6020_v1, %v6016_v12  ;;  %v6033_v28 = vmul.f32 %v14040_v55, %v6031_v52  ;;  %v5731_v52 = vsel %vm1105_vm1, %v9373_v38, 0  ;;  %v9376_v20 = vld [vmem:[%s13871_s3 + $0xd1c] sm:$0xff]   ;;  %v5272_v12 = vpack.c.bf16 %v13402_v41, %v13402_v41  ;;  %v9402_v38 = vld [vmem:[%s13871_s3 + $0xdcc] sm:$0xff]   ;;  %p9601_p0 = pnand %p9600_p13, %p9594_p10 }
 0x212   :  { %8816 = vmatpush3.bf16.msra.mxu0 %v9360_v63  ;;  %v5999_v11 = vadd.f32 %v5997_v30, %v5993_v13  ;;  %v9375_v30 = vld [vmem:[%s13871_s3 + $0xc94] sm:$0xff]   ;;  %v9378_v16 = vld [vmem:[%s13871_s3 + $0xd9c] sm:$0xff]  }
 0x213   :  { %8817 = vmatprep.subr.bf16.mxu0 %v9362_v35  ;;  %v6028_v17 = vadd.f32 %v6026_v46, %v6022_v4  ;;  %v9374_v35 = vld [vmem:[%s13871_s3 + $0xcd4] sm:$0xff]   ;;  %v9379_v41 = vld [vmem:[%s13871_s3 + $0xd5c] sm:$0xff]  }
 0x214   :  { %5862 = vmatpush1.bf16.msra.mxu1 %v9361_v19  ;;  %v6005_v25 = vadd.f32 %v6003_v54, %v5999_v11  ;;  %v6039_v19 = vmul.f32 %v14041_v7, %v6037_v29  ;;  %v9407_v7 = vld [vmem:[%s13871_s3 + $0xd94] sm:$0xff]  }
 0x215   :  { %5863 = vmatprep.subr.bf16.mxu1 %v13945_v51  ;;  %v6034_v34 = vadd.f32 %v6032_v3, %v6028_v17  ;;  %v9384_v3 = vld [vmem:[%s13871_s3 + $0xd2c] sm:$0xff]  }
 0x216   :  { %8818 = vmatpush3.bf16.msra.mxu0 %v9363_v10  ;;  %v6011_v36 = vadd.f32 %v6009_v31, %v6005_v25  ;;  %v9386_v31 = vld [vmem:[%s13871_s3 + $0xdac] sm:$0xff]  }
 0x217   :  { %8819 = vmatprep.subr.bf16.mxu0 %v9365_v62  ;;  %v6040_v39 = vadd.f32 %v6038_v57, %v6034_v34  ;;  %v9377_v62 = vld [vmem:[%s13871_s3 + $0xcdc] sm:$0xff]   ;;  %v9385_v17 = vld [vmem:[%s13871_s3 + $0xcec] sm:$0xff]  }
 0x218   :  { %5864 = vmatpush1.bf16.msra.mxu1 %v9364_v5  ;;  %v6017_v32 = vadd.f32 %v6015_v15, %v6011_v36  ;;  %v9382_v5 = vld [vmem:[%s13871_s3 + $0xda4] sm:$0xff]  }
 0x219   :  { %5865 = vmatprep.subr.bf16.mxu1 %v13945_v51  ;;  %v6044_v42 = vadd.f32 %v6043_v58, %v6040_v39  ;;  %v9391_v39 = vld [vmem:[%s13871_s3 + $0xd74] sm:$0xff]  }
 0x21a   :  { %8820 = vmatpush3.bf16.msra.mxu0 %v9366_v18  ;;  %v6023_v60 = vadd.f32 %v6021_v6, %v6017_v32  ;;  %v9396_v32 = vld [vmem:[%s13871_s3 + $0xd44] sm:$0xff]  }
 0x21b   :  { %8821 = vmatprep.subr.bf16.mxu0 %v9368_v59  ;;  %v6055_v63 = vrot.slane %v6044_v42, %v10150_v22  ;;  %v6048_v45 = vcombine.high %v6044_v42, %v6044_v42  ;;  %v9387_v59 = vld [vmem:[%s13871_s3 + $0xd6c] sm:$0xff]  }
 0x21c   :  { %v8607_v49 = vpop.f32.mrb[28].mxu0  ;;  %5866 = vmatpush1.bf16.msra.mxu1 %v9367_v50  ;;  %v6029_v47 = vadd.f32 %v6027_v40, %v6023_v60  ;;  %v9390_v50 = vld [vmem:[%s13871_s3 + $0xdb4] sm:$0xff]   ;;  %v9398_v40 = vld [vmem:[%s13871_s3 + $0xdc4] sm:$0xff]   ;;  %v9400_v42 = vld [vmem:[%s13871_s3 + $0xd4c] sm:$0xff]  }
 0x21d   :  { %v8608_v26 = vpop.f32.mrb[29].mxu0  ;;  %5867 = vmatprep.subr.bf16.mxu1 %v13945_v51  ;;  %v6063_v53 = vcombine.high %v6055_v63, %v6055_v63  ;;  %v13632_v1 = vrot.slane %v6048_v45, %v10150_v22  ;;  %v6090_v13 = vpack.c.bf16 %v6055_v63, %v6055_v63  ;;  %v9401_v60 = vld [vmem:[%s13871_s3 + $0xd0c] sm:$0xff]  }
 0x21e   :  { %v8609_v33 = vadd.f32 %v8608_v26, %v8607_v49  ;;  %8822 = vmatpush3.bf16.msra.mxu0 %v9369_v8  ;;  %v8610_v24 = vpop.f32.mrb[30].mxu0  ;;  %v6035_v37 = vadd.f32 %v6033_v28, %v6029_v47  ;;  %v9392_v8 = vld [vmem:[%s13871_s3 + $0xd3c] sm:$0xff]   ;;  %v9397_v49 = vld [vmem:[%s13871_s3 + $0xd04] sm:$0xff]   ;;  %v9403_v63 = vld [vmem:[%s13871_s3 + $0xd8c] sm:$0xff]  }
 0x21f   :  { %8823 = vmatprep.subr.bf16.mxu0 %v9371_v21  ;;  %v8611_v48 = vpop.f32.mrb[31].mxu0  ;;  %v6091_v10 = vpack.c.bf16 %v6063_v53, %v6063_v53  ;;  %v9394_v21 = vld [vmem:[%s13871_s3 + $0xdbc] sm:$0xff]   ;;  %v9399_v26 = vld [vmem:[%s13871_s3 + $0xd84] sm:$0xff]  }
 0x220   :  { %5868 = vmatpush1.bf16.msra.mxu1 %v9370_v14  ;;  %v3376_v0 = vadd.f32 %v8609_v33, %v13552_v9  ;;  %v6064_v9 = vcombine.high %v13632_v1, %v13632_v1  ;;  %v6041_v46 = vadd.f32 %v6039_v19, %v6035_v37  ;;  %v9404_v33 = vld [vmem:[%s13871_s3 + $0xd54] sm:$0xff]   ;;  %v6092_v19 = vpack.c.bf16 %v13632_v1, %v13632_v1  ;;  %v9408_v53 = vld [vmem:[%s13871_s3 + $0xddc] sm:$0xff]   ;;  %v9410_v1 = vld [vmem:[%s13871_s3 + $0xdec] sm:$0xff]  }
 0x221   :  { %5869 = vmatprep.subr.bf16.mxu1 %v13945_v51  ;;  %6589 = vmatprep.mubr.bf16.mxu0 %v6091_v10  ;;  %v9405_v48 = vld [vmem:[%s13871_s3 + $0xd14] sm:$0xff]  }
 0x222   :  { %8824 = vmatpush3.bf16.msra.mxu0 %v9372_v27  ;;  %v6093_v29 = vpack.c.bf16 %v6064_v9, %v6064_v9  ;;  %v13655_v54 = vadd.f32 %v6043_v58, %v6041_v46  ;;  %v9389_v58 = vld [vmem:[%s13871_s3 + $0xcf4] sm:$0xff]  }
 0x223   :  { %8825 = vmatprep.subr.bf16.mxu0 %v9374_v35  ;;  %v9406_v35 = vld [vmem:[%s13871_s3 + $0xdd4] sm:$0xff]  }
 0x224   :  { %5870 = vmatpush1.bf16.msra.mxu1 %v5731_v52  ;;  %v13665_v4 = vrot.slane %v13655_v54, %v10150_v22  ;;  %v6065_v14 = vcombine.high %v13655_v54, %v13655_v54 }
 0x225   :  { %8833 = vmatprep.subr.bf16.mxu1 %v9376_v20  ;;  %v9409_v20 = vld [vmem:[%s13871_s3 + $0xde4] sm:$0xff]  }
 0x226   :  { %8826 = vmatpush3.bf16.msra.mxu0 %v9375_v30  ;;  %v6080_v11 = vcombine.high %v13665_v4, %v13665_v4  ;;  %v13738_v28 = vrot.slane %v6065_v14, %v10150_v22  ;;  %v6094_v52 = vpack.c.bf16 %v13665_v4, %v13665_v4 }
 0x227   :  { %5886 = vmatmul.mubr.bf16.vlgmr.msra.gmra.mrb[52].mxu1 %v5272_v12  ;;  %8855 = vmatprep.subr.bf16.mxu0 %v9378_v16  ;;  %v9411_v12 = vld [vmem:[%s13871_s3 + $0xdf4] sm:$0xff]  }
 0x228   :  { %8834 = vmatpush3.bf16.msra.mxu1 %v9377_v62  ;;  %6629 = vmatprep.mubr.bf16.mxu1 %v6093_v29  ;;  %v6095_v18 = vpack.c.bf16 %v6080_v11, %v6080_v11  ;;  %v6081_v47 = vcombine.high %v13738_v28, %v13738_v28  ;;  %v9412_v62 = vld [vmem:[%s13871_s3 + $0xdfc] sm:$0xff]   ;;  %v9413_v29 = vld [vmem:[%s13871_s3 + $0xe04] sm:$0xff]  }
 0x229   :  { %6590 = vmatmul.mubr.bf16.vlgmr.msra.gmra.mrb[56].mxu0 %v6090_v13  ;;  %8835 = vmatprep.subr.bf16.mxu1 %v9380_v23  ;;  %v9414_v23 = vld [vmem:[%s13871_s3 + $0xe0c] sm:$0xff]   ;;  %v9416_v11 = vld [vmem:[%s13871_s3 + $0xe1c] ss:$0 sps:$4 sm:$0x33]  }
 0x22a   :  { %8856 = vmatpush3.bf16.msra.mxu0 %v9379_v41  ;;  %6669 = vmatprep.mubr.bf16.mxu0 %v6095_v18 }
 0x22b   :  { %8857 = vmatprep.subr.bf16.mxu0 %v9382_v5 }
 0x22c   :  { %8836 = vmatpush3.bf16.msra.mxu1 %v9381_v44  ;;  %v9415_v44 = vld [vmem:[%s13871_s3 + $0xe14] sm:$0xff]  }
 0x22d   :  { %8837 = vmatprep.subr.bf16.mxu1 %v9384_v3 }
 0x22e   :  { %v3415_v57 = vpop.f32.mrb[28].mxu1  ;;  %8858 = vmatpush3.bf16.msra.mxu0 %v9383_v56  ;;  %v6555_v56 = vsel %vm1105_vm1, %v9416_v11, 0 }
 0x22f   :  { %v3416_v25 = vadd.f32 %v3415_v57, %v3376_v0  ;;  %v3417_v15 = vpop.f32.mrb[29].mxu1  ;;  %8859 = vmatprep.subr.bf16.mxu0 %v9386_v31  ;;  %v6097_v0 = vpack.c.bf16 %v6081_v47, %v6081_v47  ;;  %v6096_v31 = vpack.c.bf16 %v13738_v28, %v13738_v28  ;;  %v6730_v28 = vld [vmem:[%s13873_s5 + $0x18] sm:$0xff]  ;;  %v6735_v47 = vld [vmem:[%s13873_s5 + $0x40] sm:$0xff] }
 0x230   :  { %v3418_v34 = vpop.f32.mrb[30].mxu1  ;;  %8838 = vmatpush3.bf16.msra.mxu1 %v9385_v17 }
 0x231   :  { %v13697_v36 = vadd.f32 %v3416_v25, %v13329_v2  ;;  %v3419_v6 = vpop.f32.mrb[31].mxu1  ;;  %8839 = vmatprep.subr.bf16.mxu1 %v9388_v43  ;;  %v9393_v2 = vld [vmem:[%s13871_s3 + $0xcfc] sm:$0xff]  }
 0x232   :  { %8860 = vmatpush3.bf16.msra.mxu0 %v9387_v59 }
 0x233   :  { %8861 = vmatprep.subr.bf16.mxu0 %v9390_v50 }
 0x234   :  { %8840 = vmatpush3.bf16.msra.mxu1 %v9389_v58 }
 0x235   :  { %8841 = vmatprep.subr.bf16.mxu1 %v9392_v8 }
 0x236   :  { %8862 = vmatpush3.bf16.msra.mxu0 %v9391_v39 }
 0x237   :  { %8863 = vmatprep.subr.bf16.mxu0 %v9394_v21 }
 0x238   :  { %8842 = vmatpush3.bf16.msra.mxu1 %v9393_v2 }
 0x239   :  { %8843 = vmatprep.subr.bf16.mxu1 %v9396_v32 }
 0x23a   :  { %8864 = vmatpush3.bf16.msra.mxu0 %v9395_v61 }
 0x23b   :  { %8865 = vmatprep.subr.bf16.mxu0 %v9398_v40 }
 0x23c   :  { %8844 = vmatpush3.bf16.msra.mxu1 %v9397_v49  ;;  %v8629_v55 = vpop.f32.mrb[32].mxu0 }
 0x23d   :  { %8845 = vmatprep.subr.bf16.mxu1 %v9400_v42  ;;  %v8630_v27 = vpop.f32.mrb[33].mxu0  ;;  %v6728_v42 = vld [vmem:[%s13873_s5 + $0x8] sm:$0xff] }
 0x23e   :  { %8866 = vmatpush3.bf16.msra.mxu0 %v9399_v26  ;;  %v8631_v24 = vadd.f32 %v8630_v27, %v8629_v55  ;;  %v8632_v45 = vpop.f32.mrb[34].mxu0  ;;  %v6729_v26 = vld [vmem:[%s13873_s5 + $0x10] sm:$0xff] }
 0x23f   :  { %8867 = vmatprep.subr.bf16.mxu0 %v9402_v38  ;;  %v8633_v22 = vpop.f32.mrb[35].mxu0  ;;  %v8933_v27 = vpack.c.bf16 %v6730_v28, %v6729_v26 }
 0x240   :  { %8846 = vmatpush3.bf16.msra.mxu1 %v9401_v60  ;;  %v9625_v60 = vmov 0.0|0.0   ;;  %v6734_v22 = vld [vmem:[%s13873_s5 + $0x38] sm:$0xff] }
 0x241   :  { %8847 = vmatprep.subr.bf16.mxu1 %v9404_v33 }
 0x242   :  { %8868 = vmatpush3.bf16.msra.mxu0 %v9403_v63  ;;  %v6731_v63 = vld [vmem:[%s13873_s5 + $0x20] sm:$0xff] }
 0x243   :  { %8869 = vmatprep.subr.bf16.mxu0 %v9406_v35  ;;  %v6733_v35 = vld [vmem:[%s13873_s5 + $0x30] sm:$0xff] }
 0x244   :  { %8848 = vmatpush3.bf16.msra.mxu1 %v9405_v48  ;;  %v8939_v48 = vpack.c.bf16 %v6734_v22, %v6733_v35  ;;  %v8347_v22 = vld [vmem:[%s13872_s4] ss:$0 sm:$0xff] }
 0x245   :  { %6677 = vmatprep.subr.bf16.mxu1 %v13945_v51 }
 0x246   :  { %8870 = vmatpush3.bf16.msra.mxu0 %v9407_v7  ;;  %v6736_v7 = vld [vmem:[%s13873_s5 + $0x48] sm:$0xff] }
 0x247   :  { %6630 = vmatmul.mubr.bf16.vlgmr.msra.gmra.mrb[56].mxu1 %v6092_v19  ;;  %8929 = vmatprep.subr.bf16.mxu0 %v9625_v60  ;;  %v8942_v19 = vpack.c.bf16 %v6736_v7, %v6735_v47 }
 0x248   :  { %6678 = vmatpush1.bf16.msra.mxu1 %v9408_v53  ;;  %8346 = vmatprep.mubr.msk.bf16.mxu1 %vm1101_vm0, %v6097_v0  ;;  %v6737_v53 = vld [vmem:[%s13873_s5 + $0x50] sm:$0xff]  ;;  %v6738_v0 = vld [vmem:[%s13873_s5 + $0x58] sm:$0xff] }
 0x249   :  { %6670 = vmatmul.mubr.bf16.vlgmr.msra.gmra.mrb[60].mxu0 %v6094_v52  ;;  %6679 = vmatprep.subr.bf16.mxu1 %v13945_v51  ;;  %v8945_v52 = vpack.c.bf16 %v6738_v0, %v6737_v53  ;;  %v8348_v0 = vld [vmem:[%s13874_s6] ss:$0 sm:$0xff] }
 0x24c   :  { %6680 = vmatpush1.bf16.msra.mxu1 %v9409_v20 }
 0x24d   :  { %6681 = vmatprep.subr.bf16.mxu1 %v13945_v51 }
 0x24e   :  { %v8651_v37 = vpop.f32.mrb[32].mxu1 }
 0x24f   :  { %v8652_v30 = vpop.f32.mrb[33].mxu1 }
 0x250   :  { %v8653_v10 = vadd.f32 %v8652_v30, %v8651_v37  ;;  %v8654_v9 = vpop.f32.mrb[34].mxu1  ;;  %6682 = vmatpush1.bf16.msra.mxu1 %v9410_v1 }
 0x251   :  { %v8655_v16 = vpop.f32.mrb[35].mxu1  ;;  %6683 = vmatprep.subr.bf16.mxu1 %v13945_v51 }
 0x252   :  { %v4160_v46 = vadd.f32 %v8653_v10, %v8631_v24  ;;  %v6732_v24 = vld [vmem:[%s13873_s5 + $0x28] sm:$0xff] }
 0x253   :  { %v8936_v45 = vpack.c.bf16 %v6732_v24, %v6731_v63 }
 0x254   :  { %6684 = vmatpush1.bf16.msra.mxu1 %v9411_v12 }
 0x255   :  { %6685 = vmatprep.subr.bf16.mxu1 %v13945_v51 }
 0x258   :  { %6686 = vmatpush1.bf16.msra.mxu1 %v9412_v62  ;;  %v6740_v62 = vld [vmem:[%s13873_s5 + $0x68] sm:$0xff] }
 0x259   :  { %6687 = vmatprep.subr.bf16.mxu1 %v13945_v51 }
 0x25c   :  { %v8673_v13 = vpop.f32.mrb[36].mxu0  ;;  %6688 = vmatpush1.bf16.msra.mxu1 %v9413_v29 }
 0x25d   :  { %v8674_v54 = vpop.f32.mrb[37].mxu0  ;;  %6689 = vmatprep.subr.bf16.mxu1 %v13945_v51 }
 0x25e   :  { %v8675_v41 = vadd.f32 %v8674_v54, %v8673_v13  ;;  %v8676_v5 = vpop.f32.mrb[38].mxu0 }
 0x25f   :  { %v8677_v4 = vpop.f32.mrb[39].mxu0  ;;  %v6742_v5 = vld [vmem:[%s13873_s5 + $0x78] sm:$0xff] }
 0x260   :  { %6690 = vmatpush1.bf16.msra.mxu1 %v9414_v23  ;;  %v4200_v3 = vadd.f32 %v8675_v41, %v4160_v46  ;;  %v6739_v46 = vld [vmem:[%s13873_s5 + $0x60] sm:$0xff]  ;;  %v6741_v41 = vld [vmem:[%s13873_s5 + $0x70] sm:$0xff] }
 0x261   :  { %6691 = vmatprep.subr.bf16.mxu1 %v13945_v51  ;;  %v8948_v23 = vpack.c.bf16 %v6740_v62, %v6739_v46  ;;  %v8951_v4 = vpack.c.bf16 %v6742_v5, %v6741_v41 }
 0x264   :  { %6692 = vmatpush1.bf16.msra.mxu1 %v9415_v44  ;;  %v9627_v44 = vmov 0.0  }
 0x265   :  { %6693 = vmatprep.subr.bf16.mxu1 %v13945_v51  ;;  %8926 = vmatprep.mubr.msk.f32.mxu0 %vm9626_vm2, %v9627_v44 }
 0x268   :  { %6694 = vmatpush1.bf16.msra.mxu1 %v6555_v56 }
 0x26b   :  { %6710 = vmatmul.mubr.bf16.vlgmr.msra.gmra.mrb[60].mxu1 %v6096_v31 }
 0x272   :  { %v4239_v18 = vpop.f32.mrb[36].mxu1 }
 0x273   :  { %v4240_v17 = vadd.f32 %v4239_v18, %v4200_v3  ;;  %v4241_v43 = vpop.f32.mrb[37].mxu1 }
 0x274   :  { %v4242_v57 = vpop.f32.mrb[38].mxu1 }
 0x275   :  { %v4245_v59 = vadd.f32 %v4240_v17, %v13697_v36  ;;  %v4243_v25 = vpop.f32.mrb[39].mxu1  ;;  %v6727_v36 = vld [vmem:[%s13873_s5] sm:$0xff] }
 0x276   :  { %v8930_v55 = vpack.c.bf16 %v6728_v42, %v6727_v36 }
 0x278   :  { %8931 = vmatpush3.bf16.msra.mxu0 %v8930_v55 }
 0x279   :  { %8932 = vmatprep.subr.bf16.mxu0 %v9625_v60 }
 0x27c   :  { %v8695_v15 = vpop.f32.mrb[40].mxu0  ;;  %8934 = vmatpush3.bf16.msra.mxu0 %v8933_v27 }
 0x27d   :  { %v8696_v50 = vpop.f32.mrb[41].mxu0  ;;  %8935 = vmatprep.subr.bf16.mxu0 %v9625_v60 }
 0x27e   :  { %v8697_v34 = vadd.f32 %v8696_v50, %v8695_v15  ;;  %v8698_v58 = vpop.f32.mrb[42].mxu0 }
 0x27f   :  { %v8699_v6 = vpop.f32.mrb[43].mxu0 }
 0x280   :  { %8937 = vmatpush3.bf16.msra.mxu0 %v8936_v45 }
 0x281   :  { %8938 = vmatprep.subr.bf16.mxu0 %v9625_v60 }
 0x284   :  { %8940 = vmatpush3.bf16.msra.mxu0 %v8939_v48 }
 0x285   :  { %8941 = vmatprep.subr.bf16.mxu0 %v9625_v60 }
 0x288   :  { %8943 = vmatpush3.bf16.msra.mxu0 %v8942_v19 }
 0x289   :  { %8944 = vmatprep.subr.bf16.mxu0 %v9625_v60 }
 0x28c   :  { %8946 = vmatpush3.bf16.msra.mxu0 %v8945_v52 }
 0x28d   :  { %8947 = vmatprep.subr.bf16.mxu0 %v9625_v60 }
 0x290   :  { %8949 = vmatpush3.bf16.msra.mxu0 %v8948_v23 }
 0x291   :  { %8950 = vmatprep.subr.bf16.mxu0 %v9625_v60 }
 0x292   :  { %v8717_v51 = vpop.f32.mrb[40].mxu1 }
 0x293   :  { %v8718_v8 = vpop.f32.mrb[41].mxu1 }
 0x294   :  { %v8719_v39 = vadd.f32 %v8718_v8, %v8717_v51  ;;  %v8720_v21 = vpop.f32.mrb[42].mxu1  ;;  %8952 = vmatpush3.bf16.msra.mxu0 %v8951_v4 }
 0x295   :  { %v8721_v2 = vpop.f32.mrb[43].mxu1 }
 0x296   :  { %v4984_v32 = vadd.f32 %v8719_v39, %v8697_v34 }
 0x29c   :  { %v8739_v61 = vpop.f32.mrb[44].mxu0 }
 0x29d   :  { %v8740_v40 = vpop.f32.mrb[45].mxu0 }
 0x29e   :  { %v8741_v49 = vadd.f32 %v8740_v40, %v8739_v61  ;;  %v8742_v14 = vpop.f32.mrb[46].mxu0 }
 0x29f   :  { %v8743_v38 = vpop.f32.mrb[47].mxu0 }
 0x2a0   :  { %v5024_v33 = vadd.f32 %v8741_v49, %v4984_v32 }
 0x2b6   :  { %v5063_v20 = vpop.f32.mrb[44].mxu1 }
 0x2b7   :  { %v5064_v1 = vadd.f32 %v5063_v20, %v5024_v33  ;;  %v5065_v37 = vpop.f32.mrb[45].mxu1 }
 0x2b8   :  { %v5066_v30 = vpop.f32.mrb[46].mxu1 }
 0x2b9   :  { %v5069_v10 = vadd.f32 %v5064_v1, %v4245_v59  ;;  %v5067_v9 = vpop.f32.mrb[47].mxu1 }
 0x2bc   :  { %v8761_v12 = vpop.f32.mrb[48].mxu0 }
 0x2bd   :  { %v8762_v16 = vpop.f32.mrb[49].mxu0 }
 0x2be   :  { %v8763_v29 = vadd.f32 %v8762_v16, %v8761_v12  ;;  %v8764_v13 = vpop.f32.mrb[50].mxu0 }
 0x2bf   :  { %v8765_v54 = vpop.f32.mrb[51].mxu0 }
 0x2d6   :  { %v8783_v3 = vpop.f32.mrb[48].mxu1 }
 0x2d7   :  { %v8784_v11 = vpop.f32.mrb[49].mxu1 }
 0x2d8   :  { %v8785_v56 = vadd.f32 %v8784_v11, %v8783_v3  ;;  %v8786_v31 = vpop.f32.mrb[50].mxu1 }
 0x2d9   :  { %v8787_v18 = vpop.f32.mrb[51].mxu1 }
 0x2da   :  { %v5808_v17 = vadd.f32 %v8785_v56, %v8763_v29 }
 0x2dc   :  { %v8805_v43 = vpop.f32.mrb[52].mxu0 }
 0x2dd   :  { %v8806_v57 = vpop.f32.mrb[53].mxu0 }
 0x2de   :  { %v8807_v59 = vadd.f32 %v8806_v57, %v8805_v43  ;;  %v8808_v25 = vpop.f32.mrb[54].mxu0 }
 0x2df   :  { %v8809_v15 = vpop.f32.mrb[55].mxu0 }
 0x2e0   :  { %v5848_v50 = vadd.f32 %v8807_v59, %v5808_v17 }
 0x2fa   :  { %v5887_v34 = vpop.f32.mrb[52].mxu1 }
 0x2fb   :  { %v5888_v58 = vadd.f32 %v5887_v34, %v5848_v50  ;;  %v5889_v6 = vpop.f32.mrb[53].mxu1 }
 0x2fc   :  { %v5890_v51 = vpop.f32.mrb[54].mxu1  ;;  %v8827_v8 = vpop.f32.mrb[56].mxu0 }
 0x2fd   :  { %v5893_v39 = vadd.f32 %v5888_v58, %v5069_v10  ;;  %v5891_v21 = vpop.f32.mrb[55].mxu1  ;;  %v8828_v2 = vpop.f32.mrb[57].mxu0 }
 0x2fe   :  { %v8829_v32 = vadd.f32 %v8828_v2, %v8827_v8  ;;  %v8830_v61 = vpop.f32.mrb[58].mxu0 }
 0x2ff   :  { %v8831_v40 = vpop.f32.mrb[59].mxu0 }
 0x31a   :  { %v8849_v49 = vpop.f32.mrb[56].mxu1 }
 0x31b   :  { %v8850_v14 = vpop.f32.mrb[57].mxu1 }
 0x31c   :  { %v8851_v36 = vadd.f32 %v8850_v14, %v8849_v49  ;;  %v8852_v42 = vpop.f32.mrb[58].mxu1  ;;  %v8871_v26 = vpop.f32.mrb[60].mxu0 }
 0x31d   :  { %v8853_v38 = vpop.f32.mrb[59].mxu1  ;;  %v8872_v60 = vpop.f32.mrb[61].mxu0 }
 0x31e   :  { %v6632_v55 = vadd.f32 %v8851_v36, %v8829_v32  ;;  %v8873_v28 = vadd.f32 %v8872_v60, %v8871_v26  ;;  %v8874_v33 = vpop.f32.mrb[62].mxu0 }
 0x31f   :  { %v8875_v27 = vpop.f32.mrb[63].mxu0 }
 0x320   :  { %v6672_v63 = vadd.f32 %v8873_v28, %v6632_v55 }
 0x33e   :  { %v6711_v24 = vpop.f32.mrb[60].mxu1 }
 0x33f   :  { %v6712_v45 = vadd.f32 %v6711_v24, %v6672_v63  ;;  %v6713_v35 = vpop.f32.mrb[61].mxu1 }
 0x340   :  { %v6714_v48 = vpop.f32.mrb[62].mxu1 }
 0x341   :  { %v6717_v47 = vadd.f32 %v6712_v45, %v5893_v39  ;;  %v6715_v7 = vpop.f32.mrb[63].mxu1 }
 0x343   :  { %v6725_v19 = vadd.f32 %v8347_v22, %v6717_v47 }
 0x345   :  { %v6726_v53 = vmax.f32 %v6725_v19, 0.0 }
 0x347   :  { %8927 = vmatmul.mubr.f32.vlgmr.msra.gmra.mrb[64].mxu0 %v6726_v53 }
 0x41a   :  { %v6816_v52 = vpop.f32.mrb[64].mxu0 }
 0x41b   :  { %v6817_v20 = vadd.f32 %v8348_v0, %v6816_v52  ;;  %v8928_v1 = vpop.f32.mrb[65].mxu0 }
 0x41d   :  { %6821 = vst.msk [vmem:[#allocation7] sm:$0x3] %vm6820_vm3, %v6817_v20 }
 0x41e   :  { %9604 = shalt.err (!%p9601_p0)
}
 0x41f   :  { %s9605_s27 = scalar_lea.hbm %s13875_s7, 32 }
 0x420   :  { %p9606_p1 = scmp.ne.s32.totalorder %s13875_s7, %s9605_s27  ;;  %p9609_p2 = scmp.lt.u32.totalorder %s9605_s27, %s13875_s7 }
 0x422   :  { %p9611_p3 = pnand %p9609_p2, %p9606_p1 }
 0x424   :  { %9614 = shalt.err (!%p9611_p3)
}
 0x425   :  { %6831 = dma.vmem_to_hbm [thread:$0]  %s6829_s19, 32, %s13875_s7, [#allocation3]  }
 0x426   :  { %9619 = dma.done.wait [#allocation3], 32  }
 0x427   :  { %9620 = vsyncadd [#allocation3], 4294967264 }
 0x428   :  { %6835 = vsyncpa [#allocation3], 1 }
 0x429   :  { %6836 = vsyncpa [#allocation4], 1 }
 0x42a   :  { %6837 = vsyncpa [#allocation6], 1 }

</bundles_post_ra>
